<compile_context>
chip_gen: v7x
topology: tpu7x:2x2x1
jax: 0.10.0
libtpu: 0.0.40
codegen_flags: <defaults>
</compile_context>

<pallas_src>
import numpy as np
import jax
import jax.numpy as jnp
from jax.experimental import pallas as pl
from jax.experimental.pallas import tpu as pltpu

_EPS = 1e-7            # matches _eps in the PyTorch module
_R = 8.314             # gas constant
N_OMEGA = 4            # number of interaction coefficients in params_list
N_PARAMS = N_OMEGA + 1  # + G0 (pure-phase offset)

LANE = 128             # TPU lane width
ROWS = 8               # sublane rows per grid block (one full vreg)
N_OUTER = 4            # fori_loop trip count
INNER = 16             # trace-unrolled Newton steps per fori iteration
TOTAL_ITERS = N_OUTER * INNER
TOL = 1e-6             # per-problem freeze tolerance (module f_thres = 1e-6)
STEP_CLIP = 0.05       # per-iteration trust-region step clip (widened per review)


def _make_kernel(RT: float, lo: float, hi: float):
    """Build the batched common-tangent Newton kernel with constants baked in."""
    RT = float(RT)
    lo = float(lo)
    hi = float(hi)

    def kernel(x_ref, p_ref, o_ref):
        # Lane-dense per-problem parameters: loaded ONCE, loop-invariant.
        # (No per-iteration scalar->vector broadcasts inside the unrolled body.)
        w0 = p_ref[0]
        w1 = p_ref[1]
        w2 = p_ref[2]
        w3 = p_ref[3]
        g0 = p_ref[4]
        w2_2 = 2.0 * w2        # hoisted derived RK coefficients
        w3_3 = 3.0 * w3
        w3_6 = 6.0 * w3

        def eval_all(x):
            """Clipped x, G(x), mu = G', mup = G'' -- fully elementwise."""
            x = jnp.clip(x, _EPS, 1.0 - _EPS)
            onem = 1.0 - x
            t = 1.0 - 2.0 * x
            # Horner evaluation of the RK sums and their t-derivatives
            S0 = w0 + t * (w1 + t * (w2 + t * w3))
            S1 = w1 + t * (w2_2 + t * w3_3)
            S2 = w2_2 + w3_6 * t
            logx = jnp.log(x)
            log1m = jnp.log(onem)
            x_onem = x * onem
            inv_xonem = pl.reciprocal(x_onem, approx=True)   # = 1/x + 1/(1-x)
            G = x * g0 + RT * (x * logx + onem * log1m) + x_onem * S0
            mu = g0 + RT * (logx - log1m) + t * S0 - 2.0 * x_onem * S1
            mup = RT * inv_xonem - 2.0 * S0 - 4.0 * t * S1 + 4.0 * x_onem * S2
            return x, G, mu, mup

        def newton_step(xa, xb):
            """One exact 2x2 Newton step on F = [Fa, Fb]; no cross-lane traffic."""
            xa, Ga, mua, mupa = eval_all(xa)
            xb, Gb, mub, mupb = eval_all(xb)
            d = xb - xa
            dG = Gb - Ga
            dmu = mub - mua
            Fa = dG - mua * d                        # tangent at a hits (xb, Gb)
            Fb = mub * d - dG                        # tangent at b hits (xa, Ga)
            det = dmu * dmu - mupa * mupb * d * d    # Newton Jacobian determinant
            det = jnp.where(jnp.abs(det) < 1e-12,
                            jnp.where(det >= 0.0, 1e-12, -1e-12), det)
            inv_det = pl.reciprocal(det, approx=True)
            sa = jnp.clip((dmu * Fb - mupb * d * Fa) * inv_det,
                          -STEP_CLIP, STEP_CLIP)
            sb = jnp.clip((mupa * d * Fb - dmu * Fa) * inv_det,
                          -STEP_CLIP, STEP_CLIP)
            na = jnp.clip(xa + sa, lo, hi)           # is_clamp=True: clamp in [lo, hi]
            nb = jnp.clip(xb + sb, lo, hi)
            mag = jnp.maximum(jnp.abs(na - xa), jnp.abs(nb - xb))
            return na, nb, mag

        def step(carry):
            xa, xb, act = carry                      # act: 1.0 while still iterating
            na, nb, mag = newton_step(xa, xb)
            # Predicated (frozen once converged) update: pure vector select,
            # no vector->scalar sync / pipeline break anywhere in the solve.
            xa = xa + act * (na - xa)
            xb = xb + act * (nb - xb)
            act = jnp.where(mag < TOL, 0.0, act)
            return xa, xb, act

        def outer(_, carry):
            for _ in range(INNER):                   # trace-time unrolled chunk
                carry = step(carry)
            return carry

        xa0 = jnp.clip(x_ref[0], lo, hi)
        xb0 = jnp.clip(x_ref[1], lo, hi)
        act0 = jnp.ones((ROWS, LANE), jnp.float32)
        xa, xb, _ = jax.lax.fori_loop(0, N_OUTER, outer, (xa0, xb0, act0))
        o_ref[0, :, :] = xa
        o_ref[1, :, :] = xb

    return kernel


def common_tangent_batched(x0, params, T=300.0, end_points=(0.0, 1.0)):
    """Solve B interior common-tangent problems in one Pallas call.

    x0:     (B, 2)  hull seeds [x_alpha, x_beta]
    params: (N_PARAMS,) shared or (B, N_PARAMS) per-problem RK coefficients + G0
    Returns (B, 2) refined phase-boundary pairs (float32).

    Layout: problem p -> lane p % 128, row p // 128; the two phases live on two
    leading-dim planes, so 1024 problems fit one (2,8,128) block and the Newton
    update is fully elementwise.
    """
    x0 = jnp.asarray(x0, jnp.float32)
    params = jnp.asarray(params, jnp.float32)
    B = int(x0.shape[0])
    rows = max(1, -(-B // LANE))
    rows_pad = -(-rows // ROWS) * ROWS
    total = rows_pad * LANE

    # Pad unused lanes with benign interior values (they converge harmlessly).
    xa = jnp.full((total,), 0.25, jnp.float32).at[:B].set(x0[:, 0])
    xb = jnp.full((total,), 0.75, jnp.float32).at[:B].set(x0[:, 1])
    xab = jnp.stack([xa, xb], axis=0).reshape(2, rows_pad, LANE)

    if params.ndim == 1:
        p_flat = jnp.broadcast_to(params[:, None], (N_PARAMS, total))
    else:
        p_pad = jnp.broadcast_to(params[0:1], (total, N_PARAMS)).at[:B].set(params)
        p_flat = p_pad.T
    pab = p_flat.reshape(N_PARAMS, rows_pad, LANE)

    kernel = _make_kernel(_R * float(T),
                          float(end_points[0]) + _EPS,
                          float(end_points[1]) - _EPS)

    n_elem = 2 * total
    out = pl.pallas_call(
        kernel,
        out_shape=jax.ShapeDtypeStruct((2, rows_pad, LANE), jnp.float32),
        grid=(rows_pad // ROWS,),
        in_specs=[
            pl.BlockSpec((2, ROWS, LANE), lambda i: (0, i, 0)),
            pl.BlockSpec((N_PARAMS, ROWS, LANE), lambda i: (0, i, 0)),
        ],
        out_specs=pl.BlockSpec((2, ROWS, LANE), lambda i: (0, i, 0)),
        compiler_params=pltpu.CompilerParams(
            dimension_semantics=("parallel",)),   # shards blocks across TCs on v7x
        cost_estimate=pl.CostEstimate(
            flops=int(70 * n_elem * TOTAL_ITERS),
            transcendentals=int(2 * n_elem * TOTAL_ITERS),
            bytes_accessed=int((2 + N_PARAMS + 2) * total * 4)),
    )(xab, pab)
    return out.reshape(2, total)[:, :B].T


def common_tangent_pallas(x, params, T=300.0, end_points=(0.0, 1.0)):
    """Interior branch of CommonTangent.forward for a single seed (shape (2,))."""
    x = jnp.asarray(x, jnp.float32).reshape(1, 2)
    return common_tangent_batched(x, params, T=T, end_points=end_points)[0]


def common_tangent_forward(x, params, T=300.0, end_points=(0.0, 1.0)):
    """CommonTangent.forward branch selection, done on-device (no host sync)."""
    x = jnp.asarray(x, jnp.float32)
    params = jnp.asarray(params, jnp.float32)
    ep0, ep1 = float(end_points[0]), float(end_points[1])
    interior = jnp.logical_and(x[0] - ep0 >= _EPS * 2.0,
                               ep1 - x[1] >= _EPS * 2.0)
    concave = jnp.logical_and(x[0] - ep0 < _EPS * 2.0,
                              ep1 - x[1] < _EPS * 2.0)
    idx = jnp.where(interior, 0, jnp.where(concave, 1, 2))
    branches = [
        # normal case: solve common tangent with Newton (Pallas kernel)
        lambda xx: common_tangent_pallas(xx, params, T, end_points),
        # TODO(synk): FixedPointOperation1D.forward_0D path (whole-region
        #             concave warning); returns the end points like the module.
        lambda xx: jnp.asarray(end_points, jnp.float32),
        # TODO(synk): 1D solver branch (solver_1D + FixedPointOperation1D).
        lambda xx: xx,
    ]
    return jax.lax.switch(idx, branches, x)


def _reference_newton(x0, params, T=300.0, end_points=(0.0, 1.0),
                      n_iter=TOTAL_ITERS):
    """Pure-numpy (f64) reference running the identical clipped Newton."""
    RT = _R * float(T)
    lo = float(end_points[0]) + _EPS
    hi = float(end_points[1]) - _EPS
    p = np.asarray(params, np.float64)
    w, g0 = p[:N_OMEGA], p[N_OMEGA]

    def eval_all(xv):
        x = np.clip(xv, _EPS, 1.0 - _EPS)
        onem = 1.0 - x
        t = 1.0 - 2.0 * x
        S0 = w[0] + t * (w[1] + t * (w[2] + t * w[3]))
        S1 = w[1] + t * (2.0 * w[2] + t * (3.0 * w[3]))
        S2 = 2.0 * w[2] + 6.0 * w[3] * t
        G = x * g0 + RT * (x * np.log(x) + onem * np.log(onem)) + x * onem * S0
        mu = g0 + RT * (np.log(x) - np.log(onem)) + t * S0 - 2.0 * x * onem * S1
        mup = RT / (x * onem) - 2.0 * S0 - 4.0 * t * S1 + 4.0 * x * onem * S2
        return x, G, mu, mup

    xa, xb = float(x0[0]), float(x0[1])
    for _ in range(n_iter):
        xa_c, Ga, mua, mupa = eval_all(xa)
        xb_c, Gb, mub, mupb = eval_all(xb)
        d = xb_c - xa_c
        dG = Gb - Ga
        dmu = mub - mua
        Fa = dG - mua * d
        Fb = mub * d - dG
        det = dmu * dmu - mupa * mupb * d * d
        if abs(det) < 1e-12:
            det = 1e-12 if det >= 0.0 else -1e-12
        sa = float(np.clip((dmu * Fb - mupb * d * Fa) / det, -STEP_CLIP, STEP_CLIP))
        sb = float(np.clip((mupa * d * Fb - dmu * Fa) / det, -STEP_CLIP, STEP_CLIP))
        xa = float(np.clip(xa_c + sa, lo, hi))
        xb = float(np.clip(xb_c + sb, lo, hi))
    return np.array([xa, xb], np.float64)


if __name__ == "__main__":
    T = 300.0
    RT = _R * T
    # deterministic base parameters (4 RK coefficients + G0 offset) -> strong
    # miscibility gap so the interior common-tangent branch is exercised.
    base = np.array([3.2 * RT, 0.2 * RT, 0.05 * RT, 0.0, -0.3 * RT], np.float32)

    key = jax.random.PRNGKey(0)
    k1, k2 = jax.random.split(key, 2)
    B = 8
    # batched hull seeds, jittered deterministically
    jitter = jax.random.uniform(k1, (B, 2), minval=-0.01, maxval=0.01,
                                dtype=jnp.float32)
    x0_batch = jnp.array([0.10, 0.90], dtype=jnp.float32)[None, :] + jitter
    # per-problem RK coefficient perturbation (exercises the lane-dense params path)
    w0_jit = jax.random.uniform(k2, (B,), minval=-0.1 * RT, maxval=0.1 * RT,
                                dtype=jnp.float32)
    params_batch = jnp.broadcast_to(jnp.asarray(base), (B, N_PARAMS)).at[:, 0].add(w0_jit)

    # batched throughput path (one problem per lane; blocks shard across TCs on v7x)
    solve_b = jax.jit(lambda xx, pp: common_tangent_batched(xx, pp, T=T))
    out_b = jax.block_until_ready(solve_b(x0_batch, params_batch))

    # module-equivalent single-solve forward with on-device branch selection
    params_single = jnp.asarray(base)
    x0_single = x0_batch[0]
    fwd = jax.jit(lambda xx: common_tangent_forward(xx, params_single, T=T,
                                                    end_points=(0.0, 1.0)))
    out_s = jax.block_until_ready(fwd(x0_single))

    # verify against the f64 reference
    out_b_np = np.asarray(out_b, np.float64)
    assert out_b_np.shape == (B, 2)
    assert np.all(np.isfinite(out_b_np))
    for b in range(B):
        ref = _reference_newton(np.asarray(x0_batch[b], np.float64),
                                np.asarray(params_batch[b], np.float64), T=T)
        assert np.max(np.abs(out_b_np[b] - ref)) < 1e-3, (b, out_b_np[b], ref)

    out_s_np = np.asarray(out_s, np.float64)
    ref0 = _reference_newton(np.asarray(x0_single, np.float64),
                             np.asarray(base, np.float64), T=T)
    assert out_s_np.shape == (2,)
    assert np.all(np.isfinite(out_s_np))
    assert np.max(np.abs(out_s_np - ref0)) < 1e-3, (out_s_np, ref0)

    print("KERNEL_OK")
</pallas_src>

<mosaic_0001>
module attributes {stable_mosaic.version = 11 : i64} {
  func.func @kernel(%arg0: i32, %arg1: memref<2x8x128xf32, #tpu.memory_space<vmem>>, %arg2: memref<5x8x128xf32, #tpu.memory_space<vmem>>, %arg3: memref<2x8x128xf32, #tpu.memory_space<vmem>>) attributes {dimension_semantics = [#tpu.dimension_semantics<parallel>], iteration_bounds = array<i64: 1>, scalar_prefetch = 0 : i64, scratch_operands = 0 : i64, tpu.core_type = #tpu.core_type<tc>, window_params = [{transform_indices = @transform_0, window_bounds = array<i64: 2, 8, 128>}, {transform_indices = @transform_1, window_bounds = array<i64: 5, 8, 128>}, {transform_indices = @transform_2, window_bounds = array<i64: 2, 8, 128>}]} {
    %c0 = arith.constant 0 : index
    %c0_0 = arith.constant 0 : index
    %c0_1 = arith.constant 0 : index
    %0 = vector.load %arg2[%c0, %c0_0, %c0_1] : memref<5x8x128xf32, #tpu.memory_space<vmem>>, vector<1x8x128xf32>
    %1 = vector.shape_cast %0 : vector<1x8x128xf32> to vector<8x128xf32>
    %c1 = arith.constant 1 : index
    %c0_2 = arith.constant 0 : index
    %c0_3 = arith.constant 0 : index
    %2 = vector.load %arg2[%c1, %c0_2, %c0_3] : memref<5x8x128xf32, #tpu.memory_space<vmem>>, vector<1x8x128xf32>
    %3 = vector.shape_cast %2 : vector<1x8x128xf32> to vector<8x128xf32>
    %c2 = arith.constant 2 : index
    %c0_4 = arith.constant 0 : index
    %c0_5 = arith.constant 0 : index
    %4 = vector.load %arg2[%c2, %c0_4, %c0_5] : memref<5x8x128xf32, #tpu.memory_space<vmem>>, vector<1x8x128xf32>
    %5 = vector.shape_cast %4 : vector<1x8x128xf32> to vector<8x128xf32>
    %c3 = arith.constant 3 : index
    %c0_6 = arith.constant 0 : index
    %c0_7 = arith.constant 0 : index
    %6 = vector.load %arg2[%c3, %c0_6, %c0_7] : memref<5x8x128xf32, #tpu.memory_space<vmem>>, vector<1x8x128xf32>
    %7 = vector.shape_cast %6 : vector<1x8x128xf32> to vector<8x128xf32>
    %c4 = arith.constant 4 : index
    %c0_8 = arith.constant 0 : index
    %c0_9 = arith.constant 0 : index
    %8 = vector.load %arg2[%c4, %c0_8, %c0_9] : memref<5x8x128xf32, #tpu.memory_space<vmem>>, vector<1x8x128xf32>
    %9 = vector.shape_cast %8 : vector<1x8x128xf32> to vector<8x128xf32>
    %cst = arith.constant 2.000000e+00 : f32
    %10 = vector.broadcast %cst : f32 to vector<8x128xf32>
    %11 = arith.mulf %10, %5 : vector<8x128xf32>
    %cst_10 = arith.constant 3.000000e+00 : f32
    %12 = vector.broadcast %cst_10 : f32 to vector<8x128xf32>
    %13 = arith.mulf %12, %7 : vector<8x128xf32>
    %cst_11 = arith.constant 6.000000e+00 : f32
    %14 = vector.broadcast %cst_11 : f32 to vector<8x128xf32>
    %15 = arith.mulf %14, %7 : vector<8x128xf32>
    %c0_12 = arith.constant 0 : index
    %c0_13 = arith.constant 0 : index
    %c0_14 = arith.constant 0 : index
    %16 = vector.load %arg1[%c0_12, %c0_13, %c0_14] : memref<2x8x128xf32, #tpu.memory_space<vmem>>, vector<1x8x128xf32>
    %17 = vector.shape_cast %16 : vector<1x8x128xf32> to vector<8x128xf32>
    %cst_15 = arith.constant 1.000000e-07 : f32
    %cst_16 = arith.constant 0.99999988 : f32
    %18 = vector.broadcast %cst_15 : f32 to vector<8x128xf32>
    %19 = arith.maximumf %18, %17 : vector<8x128xf32>
    %20 = vector.broadcast %cst_16 : f32 to vector<8x128xf32>
    %21 = arith.minimumf %20, %19 : vector<8x128xf32>
    %c1_17 = arith.constant 1 : index
    %c0_18 = arith.constant 0 : index
    %c0_19 = arith.constant 0 : index
    %22 = vector.load %arg1[%c1_17, %c0_18, %c0_19] : memref<2x8x128xf32, #tpu.memory_space<vmem>>, vector<1x8x128xf32>
    %23 = vector.shape_cast %22 : vector<1x8x128xf32> to vector<8x128xf32>
    %cst_20 = arith.constant 1.000000e-07 : f32
    %cst_21 = arith.constant 0.99999988 : f32
    %24 = vector.broadcast %cst_20 : f32 to vector<8x128xf32>
    %25 = arith.maximumf %24, %23 : vector<8x128xf32>
    %26 = vector.broadcast %cst_21 : f32 to vector<8x128xf32>
    %27 = arith.minimumf %26, %25 : vector<8x128xf32>
    %cst_22 = arith.constant 1.000000e+00 : f32
    %28 = vector.broadcast %cst_22 : f32 to vector<8x128xf32>
    %c0_i32 = arith.constant 0 : i32
    %c4_i32 = arith.constant 4 : i32
    %29 = arith.addi %c0_i32, %c4_i32 : i32
    %c1_i32 = arith.constant 1 : i32
    %30:3 = scf.for %arg4 = %c0_i32 to %29 step %c1_i32 iter_args(%arg5 = %21, %arg6 = %27, %arg7 = %28) -> (vector<8x128xf32>, vector<8x128xf32>, vector<8x128xf32>)  : i32 {
      %cst_29 = arith.constant 1.000000e-07 : f32
      %cst_30 = arith.constant 0.99999988 : f32
      %37 = vector.broadcast %cst_29 : f32 to vector<8x128xf32>
      %38 = arith.maximumf %37, %arg5 : vector<8x128xf32>
      %39 = vector.broadcast %cst_30 : f32 to vector<8x128xf32>
      %40 = arith.minimumf %39, %38 : vector<8x128xf32>
      %cst_31 = arith.constant 1.000000e+00 : f32
      %41 = vector.broadcast %cst_31 : f32 to vector<8x128xf32>
      %42 = arith.subf %41, %40 : vector<8x128xf32>
      %cst_32 = arith.constant 2.000000e+00 : f32
      %43 = vector.broadcast %cst_32 : f32 to vector<8x128xf32>
      %44 = arith.mulf %43, %40 : vector<8x128xf32>
      %cst_33 = arith.constant 1.000000e+00 : f32
      %45 = vector.broadcast %cst_33 : f32 to vector<8x128xf32>
      %46 = arith.subf %45, %44 : vector<8x128xf32>
      %47 = arith.mulf %46, %7 : vector<8x128xf32>
      %48 = arith.addf %5, %47 : vector<8x128xf32>
      %49 = arith.mulf %46, %48 : vector<8x128xf32>
      %50 = arith.addf %3, %49 : vector<8x128xf32>
      %51 = arith.mulf %46, %50 : vector<8x128xf32>
      %52 = arith.addf %1, %51 : vector<8x128xf32>
      %53 = arith.mulf %46, %13 : vector<8x128xf32>
      %54 = arith.addf %11, %53 : vector<8x128xf32>
      %55 = arith.mulf %46, %54 : vector<8x128xf32>
      %56 = arith.addf %3, %55 : vector<8x128xf32>
      %57 = arith.mulf %15, %46 : vector<8x128xf32>
      %58 = arith.addf %11, %57 : vector<8x128xf32>
      %59 = math.log %40 : vector<8x128xf32>
      %60 = math.log %42 : vector<8x128xf32>
      %61 = arith.mulf %40, %42 : vector<8x128xf32>
      %62 = tpu.reciprocal %61 {approx = true} : vector<8x128xf32> -> vector<8x128xf32>
      %63 = arith.mulf %40, %9 : vector<8x128xf32>
      %64 = arith.mulf %40, %59 : vector<8x128xf32>
      %65 = arith.mulf %42, %60 : vector<8x128xf32>
      %66 = arith.addf %64, %65 : vector<8x128xf32>
      %cst_34 = arith.constant 2.494200e+03 : f32
      %67 = vector.broadcast %cst_34 : f32 to vector<8x128xf32>
      %68 = arith.mulf %67, %66 : vector<8x128xf32>
      %69 = arith.addf %63, %68 : vector<8x128xf32>
      %70 = arith.mulf %61, %52 : vector<8x128xf32>
      %71 = arith.addf %69, %70 : vector<8x128xf32>
      %72 = arith.subf %59, %60 : vector<8x128xf32>
      %cst_35 = arith.constant 2.494200e+03 : f32
      %73 = vector.broadcast %cst_35 : f32 to vector<8x128xf32>
      %74 = arith.mulf %73, %72 : vector<8x128xf32>
      %75 = arith.addf %9, %74 : vector<8x128xf32>
      %76 = arith.mulf %46, %52 : vector<8x128xf32>
      %77 = arith.addf %75, %76 : vector<8x128xf32>
      %cst_36 = arith.constant 2.000000e+00 : f32
      %78 = vector.broadcast %cst_36 : f32 to vector<8x128xf32>
      %79 = arith.mulf %78, %61 : vector<8x128xf32>
      %80 = arith.mulf %79, %56 : vector<8x128xf32>
      %81 = arith.subf %77, %80 : vector<8x128xf32>
      %cst_37 = arith.constant 2.494200e+03 : f32
      %82 = vector.broadcast %cst_37 : f32 to vector<8x128xf32>
      %83 = arith.mulf %82, %62 : vector<8x128xf32>
      %cst_38 = arith.constant 2.000000e+00 : f32
      %84 = vector.broadcast %cst_38 : f32 to vector<8x128xf32>
      %85 = arith.mulf %84, %52 : vector<8x128xf32>
      %86 = arith.subf %83, %85 : vector<8x128xf32>
      %cst_39 = arith.constant 4.000000e+00 : f32
      %87 = vector.broadcast %cst_39 : f32 to vector<8x128xf32>
      %88 = arith.mulf %87, %46 : vector<8x128xf32>
      %89 = arith.mulf %88, %56 : vector<8x128xf32>
      %90 = arith.subf %86, %89 : vector<8x128xf32>
      %cst_40 = arith.constant 4.000000e+00 : f32
      %91 = vector.broadcast %cst_40 : f32 to vector<8x128xf32>
      %92 = arith.mulf %91, %61 : vector<8x128xf32>
      %93 = arith.mulf %92, %58 : vector<8x128xf32>
      %94 = arith.addf %90, %93 : vector<8x128xf32>
      %cst_41 = arith.constant 1.000000e-07 : f32
      %cst_42 = arith.constant 0.99999988 : f32
      %95 = vector.broadcast %cst_41 : f32 to vector<8x128xf32>
      %96 = arith.maximumf %95, %arg6 : vector<8x128xf32>
      %97 = vector.broadcast %cst_42 : f32 to vector<8x128xf32>
      %98 = arith.minimumf %97, %96 : vector<8x128xf32>
      %cst_43 = arith.constant 1.000000e+00 : f32
      %99 = vector.broadcast %cst_43 : f32 to vector<8x128xf32>
      %100 = arith.subf %99, %98 : vector<8x128xf32>
      %cst_44 = arith.constant 2.000000e+00 : f32
      %101 = vector.broadcast %cst_44 : f32 to vector<8x128xf32>
      %102 = arith.mulf %101, %98 : vector<8x128xf32>
      %cst_45 = arith.constant 1.000000e+00 : f32
      %103 = vector.broadcast %cst_45 : f32 to vector<8x128xf32>
      %104 = arith.subf %103, %102 : vector<8x128xf32>
      %105 = arith.mulf %104, %7 : vector<8x128xf32>
      %106 = arith.addf %5, %105 : vector<8x128xf32>
      %107 = arith.mulf %104, %106 : vector<8x128xf32>
      %108 = arith.addf %3, %107 : vector<8x128xf32>
      %109 = arith.mulf %104, %108 : vector<8x128xf32>
      %110 = arith.addf %1, %109 : vector<8x128xf32>
      %111 = arith.mulf %104, %13 : vector<8x128xf32>
      %112 = arith.addf %11, %111 : vector<8x128xf32>
      %113 = arith.mulf %104, %112 : vector<8x128xf32>
      %114 = arith.addf %3, %113 : vector<8x128xf32>
      %115 = arith.mulf %15, %104 : vector<8x128xf32>
      %116 = arith.addf %11, %115 : vector<8x128xf32>
      %117 = math.log %98 : vector<8x128xf32>
      %118 = math.log %100 : vector<8x128xf32>
      %119 = arith.mulf %98, %100 : vector<8x128xf32>
      %120 = tpu.reciprocal %119 {approx = true} : vector<8x128xf32> -> vector<8x128xf32>
      %121 = arith.mulf %98, %9 : vector<8x128xf32>
      %122 = arith.mulf %98, %117 : vector<8x128xf32>
      %123 = arith.mulf %100, %118 : vector<8x128xf32>
      %124 = arith.addf %122, %123 : vector<8x128xf32>
      %cst_46 = arith.constant 2.494200e+03 : f32
      %125 = vector.broadcast %cst_46 : f32 to vector<8x128xf32>
      %126 = arith.mulf %125, %124 : vector<8x128xf32>
      %127 = arith.addf %121, %126 : vector<8x128xf32>
      %128 = arith.mulf %119, %110 : vector<8x128xf32>
      %129 = arith.addf %127, %128 : vector<8x128xf32>
      %130 = arith.subf %117, %118 : vector<8x128xf32>
      %cst_47 = arith.constant 2.494200e+03 : f32
      %131 = vector.broadcast %cst_47 : f32 to vector<8x128xf32>
      %132 = arith.mulf %131, %130 : vector<8x128xf32>
      %133 = arith.addf %9, %132 : vector<8x128xf32>
      %134 = arith.mulf %104, %110 : vector<8x128xf32>
      %135 = arith.addf %133, %134 : vector<8x128xf32>
      %cst_48 = arith.constant 2.000000e+00 : f32
      %136 = vector.broadcast %cst_48 : f32 to vector<8x128xf32>
      %137 = arith.mulf %136, %119 : vector<8x128xf32>
      %138 = arith.mulf %137, %114 : vector<8x128xf32>
      %139 = arith.subf %135, %138 : vector<8x128xf32>
      %cst_49 = arith.constant 2.494200e+03 : f32
      %140 = vector.broadcast %cst_49 : f32 to vector<8x128xf32>
      %141 = arith.mulf %140, %120 : vector<8x128xf32>
      %cst_50 = arith.constant 2.000000e+00 : f32
      %142 = vector.broadcast %cst_50 : f32 to vector<8x128xf32>
      %143 = arith.mulf %142, %110 : vector<8x128xf32>
      %144 = arith.subf %141, %143 : vector<8x128xf32>
      %cst_51 = arith.constant 4.000000e+00 : f32
      %145 = vector.broadcast %cst_51 : f32 to vector<8x128xf32>
      %146 = arith.mulf %145, %104 : vector<8x128xf32>
      %147 = arith.mulf %146, %114 : vector<8x128xf32>
      %148 = arith.subf %144, %147 : vector<8x128xf32>
      %cst_52 = arith.constant 4.000000e+00 : f32
      %149 = vector.broadcast %cst_52 : f32 to vector<8x128xf32>
      %150 = arith.mulf %149, %119 : vector<8x128xf32>
      %151 = arith.mulf %150, %116 : vector<8x128xf32>
      %152 = arith.addf %148, %151 : vector<8x128xf32>
      %153 = arith.subf %98, %40 : vector<8x128xf32>
      %154 = arith.subf %129, %71 : vector<8x128xf32>
      %155 = arith.subf %139, %81 : vector<8x128xf32>
      %156 = arith.mulf %81, %153 : vector<8x128xf32>
      %157 = arith.subf %154, %156 : vector<8x128xf32>
      %158 = arith.mulf %139, %153 : vector<8x128xf32>
      %159 = arith.subf %158, %154 : vector<8x128xf32>
      %160 = arith.mulf %155, %155 : vector<8x128xf32>
      %161 = arith.mulf %94, %152 : vector<8x128xf32>
      %162 = arith.mulf %161, %153 : vector<8x128xf32>
      %163 = arith.mulf %162, %153 : vector<8x128xf32>
      %164 = arith.subf %160, %163 : vector<8x128xf32>
      %165 = math.absf %164 : vector<8x128xf32>
      %cst_53 = arith.constant 9.99999996E-13 : f32
      %166 = vector.broadcast %cst_53 : f32 to vector<8x128xf32>
      %167 = arith.cmpf olt, %165, %166 : vector<8x128xf32>
      %cst_54 = arith.constant 0.000000e+00 : f32
      %168 = vector.broadcast %cst_54 : f32 to vector<8x128xf32>
      %169 = arith.cmpf oge, %164, %168 : vector<8x128xf32>
      %cst_55 = arith.constant 9.99999996E-13 : f32
      %cst_56 = arith.constant -9.99999996E-13 : f32
      %170 = vector.broadcast %cst_55 : f32 to vector<8x128xf32>
      %171 = vector.broadcast %cst_56 : f32 to vector<8x128xf32>
      %172 = arith.select %169, %170, %171 : vector<8x128xi1>, vector<8x128xf32>
      %173 = arith.select %167, %172, %164 : vector<8x128xi1>, vector<8x128xf32>
      %174 = tpu.reciprocal %173 {approx = true} : vector<8x128xf32> -> vector<8x128xf32>
      %175 = arith.mulf %155, %159 : vector<8x128xf32>
      %176 = arith.mulf %152, %153 : vector<8x128xf32>
      %177 = arith.mulf %176, %157 : vector<8x128xf32>
      %178 = arith.subf %175, %177 : vector<8x128xf32>
      %179 = arith.mulf %178, %174 : vector<8x128xf32>
      %cst_57 = arith.constant -5.000000e-02 : f32
      %cst_58 = arith.constant 5.000000e-02 : f32
      %180 = vector.broadcast %cst_57 : f32 to vector<8x128xf32>
      %181 = arith.maximumf %180, %179 : vector<8x128xf32>
      %182 = vector.broadcast %cst_58 : f32 to vector<8x128xf32>
      %183 = arith.minimumf %182, %181 : vector<8x128xf32>
      %184 = arith.mulf %94, %153 : vector<8x128xf32>
      %185 = arith.mulf %184, %159 : vector<8x128xf32>
      %186 = arith.mulf %155, %157 : vector<8x128xf32>
      %187 = arith.subf %185, %186 : vector<8x128xf32>
      %188 = arith.mulf %187, %174 : vector<8x128xf32>
      %cst_59 = arith.constant -5.000000e-02 : f32
      %cst_60 = arith.constant 5.000000e-02 : f32
      %189 = vector.broadcast %cst_59 : f32 to vector<8x128xf32>
      %190 = arith.maximumf %189, %188 : vector<8x128xf32>
      %191 = vector.broadcast %cst_60 : f32 to vector<8x128xf32>
      %192 = arith.minimumf %191, %190 : vector<8x128xf32>
      %193 = arith.addf %40, %183 : vector<8x128xf32>
      %cst_61 = arith.constant 1.000000e-07 : f32
      %cst_62 = arith.constant 0.99999988 : f32
      %194 = vector.broadcast %cst_61 : f32 to vector<8x128xf32>
      %195 = arith.maximumf %194, %193 : vector<8x128xf32>
      %196 = vector.broadcast %cst_62 : f32 to vector<8x128xf32>
      %197 = arith.minimumf %196, %195 : vector<8x128xf32>
      %198 = arith.addf %98, %192 : vector<8x128xf32>
      %cst_63 = arith.constant 1.000000e-07 : f32
      %cst_64 = arith.constant 0.99999988 : f32
      %199 = vector.broadcast %cst_63 : f32 to vector<8x128xf32>
      %200 = arith.maximumf %199, %198 : vector<8x128xf32>
      %201 = vector.broadcast %cst_64 : f32 to vector<8x128xf32>
      %202 = arith.minimumf %201, %200 : vector<8x128xf32>
      %203 = arith.subf %197, %40 : vector<8x128xf32>
      %204 = math.absf %203 : vector<8x128xf32>
      %205 = arith.subf %202, %98 : vector<8x128xf32>
      %206 = math.absf %205 : vector<8x128xf32>
      %207 = arith.maximumf %204, %206 : vector<8x128xf32>
      %208 = arith.subf %197, %arg5 : vector<8x128xf32>
      %209 = arith.mulf %arg7, %208 : vector<8x128xf32>
      %210 = arith.addf %arg5, %209 : vector<8x128xf32>
      %211 = arith.subf %202, %arg6 : vector<8x128xf32>
      %212 = arith.mulf %arg7, %211 : vector<8x128xf32>
      %213 = arith.addf %arg6, %212 : vector<8x128xf32>
      %cst_65 = arith.constant 9.99999997E-7 : f32
      %214 = vector.broadcast %cst_65 : f32 to vector<8x128xf32>
      %215 = arith.cmpf olt, %207, %214 : vector<8x128xf32>
      %cst_66 = arith.constant 0.000000e+00 : f32
      %216 = vector.broadcast %cst_66 : f32 to vector<8x128xf32>
      %217 = arith.select %215, %216, %arg7 : vector<8x128xi1>, vector<8x128xf32>
      %cst_67 = arith.constant 1.000000e-07 : f32
      %cst_68 = arith.constant 0.99999988 : f32
      %218 = vector.broadcast %cst_67 : f32 to vector<8x128xf32>
      %219 = arith.maximumf %218, %210 : vector<8x128xf32>
      %220 = vector.broadcast %cst_68 : f32 to vector<8x128xf32>
      %221 = arith.minimumf %220, %219 : vector<8x128xf32>
      %cst_69 = arith.constant 1.000000e+00 : f32
      %222 = vector.broadcast %cst_69 : f32 to vector<8x128xf32>
      %223 = arith.subf %222, %221 : vector<8x128xf32>
      %cst_70 = arith.constant 2.000000e+00 : f32
      %224 = vector.broadcast %cst_70 : f32 to vector<8x128xf32>
      %225 = arith.mulf %224, %221 : vector<8x128xf32>
      %cst_71 = arith.constant 1.000000e+00 : f32
      %226 = vector.broadcast %cst_71 : f32 to vector<8x128xf32>
      %227 = arith.subf %226, %225 : vector<8x128xf32>
      %228 = arith.mulf %227, %7 : vector<8x128xf32>
      %229 = arith.addf %5, %228 : vector<8x128xf32>
      %230 = arith.mulf %227, %229 : vector<8x128xf32>
      %231 = arith.addf %3, %230 : vector<8x128xf32>
      %232 = arith.mulf %227, %231 : vector<8x128xf32>
      %233 = arith.addf %1, %232 : vector<8x128xf32>
      %234 = arith.mulf %227, %13 : vector<8x128xf32>
      %235 = arith.addf %11, %234 : vector<8x128xf32>
      %236 = arith.mulf %227, %235 : vector<8x128xf32>
      %237 = arith.addf %3, %236 : vector<8x128xf32>
      %238 = arith.mulf %15, %227 : vector<8x128xf32>
      %239 = arith.addf %11, %238 : vector<8x128xf32>
      %240 = math.log %221 : vector<8x128xf32>
      %241 = math.log %223 : vector<8x128xf32>
      %242 = arith.mulf %221, %223 : vector<8x128xf32>
      %243 = tpu.reciprocal %242 {approx = true} : vector<8x128xf32> -> vector<8x128xf32>
      %244 = arith.mulf %221, %9 : vector<8x128xf32>
      %245 = arith.mulf %221, %240 : vector<8x128xf32>
      %246 = arith.mulf %223, %241 : vector<8x128xf32>
      %247 = arith.addf %245, %246 : vector<8x128xf32>
      %cst_72 = arith.constant 2.494200e+03 : f32
      %248 = vector.broadcast %cst_72 : f32 to vector<8x128xf32>
      %249 = arith.mulf %248, %247 : vector<8x128xf32>
      %250 = arith.addf %244, %249 : vector<8x128xf32>
      %251 = arith.mulf %242, %233 : vector<8x128xf32>
      %252 = arith.addf %250, %251 : vector<8x128xf32>
      %253 = arith.subf %240, %241 : vector<8x128xf32>
      %cst_73 = arith.constant 2.494200e+03 : f32
      %254 = vector.broadcast %cst_73 : f32 to vector<8x128xf32>
      %255 = arith.mulf %254, %253 : vector<8x128xf32>
      %256 = arith.addf %9, %255 : vector<8x128xf32>
      %257 = arith.mulf %227, %233 : vector<8x128xf32>
      %258 = arith.addf %256, %257 : vector<8x128xf32>
      %cst_74 = arith.constant 2.000000e+00 : f32
      %259 = vector.broadcast %cst_74 : f32 to vector<8x128xf32>
      %260 = arith.mulf %259, %242 : vector<8x128xf32>
      %261 = arith.mulf %260, %237 : vector<8x128xf32>
      %262 = arith.subf %258, %261 : vector<8x128xf32>
      %cst_75 = arith.constant 2.494200e+03 : f32
      %263 = vector.broadcast %cst_75 : f32 to vector<8x128xf32>
      %264 = arith.mulf %263, %243 : vector<8x128xf32>
      %cst_76 = arith.constant 2.000000e+00 : f32
      %265 = vector.broadcast %cst_76 : f32 to vector<8x128xf32>
      %266 = arith.mulf %265, %233 : vector<8x128xf32>
      %267 = arith.subf %264, %266 : vector<8x128xf32>
      %cst_77 = arith.constant 4.000000e+00 : f32
      %268 = vector.broadcast %cst_77 : f32 to vector<8x128xf32>
      %269 = arith.mulf %268, %227 : vector<8x128xf32>
      %270 = arith.mulf %269, %237 : vector<8x128xf32>
      %271 = arith.subf %267, %270 : vector<8x128xf32>
      %cst_78 = arith.constant 4.000000e+00 : f32
      %272 = vector.broadcast %cst_78 : f32 to vector<8x128xf32>
      %273 = arith.mulf %272, %242 : vector<8x128xf32>
      %274 = arith.mulf %273, %239 : vector<8x128xf32>
      %275 = arith.addf %271, %274 : vector<8x128xf32>
      %cst_79 = arith.constant 1.000000e-07 : f32
      %cst_80 = arith.constant 0.99999988 : f32
      %276 = vector.broadcast %cst_79 : f32 to vector<8x128xf32>
      %277 = arith.maximumf %276, %213 : vector<8x128xf32>
      %278 = vector.broadcast %cst_80 : f32 to vector<8x128xf32>
      %279 = arith.minimumf %278, %277 : vector<8x128xf32>
      %cst_81 = arith.constant 1.000000e+00 : f32
      %280 = vector.broadcast %cst_81 : f32 to vector<8x128xf32>
      %281 = arith.subf %280, %279 : vector<8x128xf32>
      %cst_82 = arith.constant 2.000000e+00 : f32
      %282 = vector.broadcast %cst_82 : f32 to vector<8x128xf32>
      %283 = arith.mulf %282, %279 : vector<8x128xf32>
      %cst_83 = arith.constant 1.000000e+00 : f32
      %284 = vector.broadcast %cst_83 : f32 to vector<8x128xf32>
      %285 = arith.subf %284, %283 : vector<8x128xf32>
      %286 = arith.mulf %285, %7 : vector<8x128xf32>
      %287 = arith.addf %5, %286 : vector<8x128xf32>
      %288 = arith.mulf %285, %287 : vector<8x128xf32>
      %289 = arith.addf %3, %288 : vector<8x128xf32>
      %290 = arith.mulf %285, %289 : vector<8x128xf32>
      %291 = arith.addf %1, %290 : vector<8x128xf32>
      %292 = arith.mulf %285, %13 : vector<8x128xf32>
      %293 = arith.addf %11, %292 : vector<8x128xf32>
      %294 = arith.mulf %285, %293 : vector<8x128xf32>
      %295 = arith.addf %3, %294 : vector<8x128xf32>
      %296 = arith.mulf %15, %285 : vector<8x128xf32>
      %297 = arith.addf %11, %296 : vector<8x128xf32>
      %298 = math.log %279 : vector<8x128xf32>
      %299 = math.log %281 : vector<8x128xf32>
      %300 = arith.mulf %279, %281 : vector<8x128xf32>
      %301 = tpu.reciprocal %300 {approx = true} : vector<8x128xf32> -> vector<8x128xf32>
      %302 = arith.mulf %279, %9 : vector<8x128xf32>
      %303 = arith.mulf %279, %298 : vector<8x128xf32>
      %304 = arith.mulf %281, %299 : vector<8x128xf32>
      %305 = arith.addf %303, %304 : vector<8x128xf32>
      %cst_84 = arith.constant 2.494200e+03 : f32
      %306 = vector.broadcast %cst_84 : f32 to vector<8x128xf32>
      %307 = arith.mulf %306, %305 : vector<8x128xf32>
      %308 = arith.addf %302, %307 : vector<8x128xf32>
      %309 = arith.mulf %300, %291 : vector<8x128xf32>
      %310 = arith.addf %308, %309 : vector<8x128xf32>
      %311 = arith.subf %298, %299 : vector<8x128xf32>
      %cst_85 = arith.constant 2.494200e+03 : f32
      %312 = vector.broadcast %cst_85 : f32 to vector<8x128xf32>
      %313 = arith.mulf %312, %311 : vector<8x128xf32>
      %314 = arith.addf %9, %313 : vector<8x128xf32>
      %315 = arith.mulf %285, %291 : vector<8x128xf32>
      %316 = arith.addf %314, %315 : vector<8x128xf32>
      %cst_86 = arith.constant 2.000000e+00 : f32
      %317 = vector.broadcast %cst_86 : f32 to vector<8x128xf32>
      %318 = arith.mulf %317, %300 : vector<8x128xf32>
      %319 = arith.mulf %318, %295 : vector<8x128xf32>
      %320 = arith.subf %316, %319 : vector<8x128xf32>
      %cst_87 = arith.constant 2.494200e+03 : f32
      %321 = vector.broadcast %cst_87 : f32 to vector<8x128xf32>
      %322 = arith.mulf %321, %301 : vector<8x128xf32>
      %cst_88 = arith.constant 2.000000e+00 : f32
      %323 = vector.broadcast %cst_88 : f32 to vector<8x128xf32>
      %324 = arith.mulf %323, %291 : vector<8x128xf32>
      %325 = arith.subf %322, %324 : vector<8x128xf32>
      %cst_89 = arith.constant 4.000000e+00 : f32
      %326 = vector.broadcast %cst_89 : f32 to vector<8x128xf32>
      %327 = arith.mulf %326, %285 : vector<8x128xf32>
      %328 = arith.mulf %327, %295 : vector<8x128xf32>
      %329 = arith.subf %325, %328 : vector<8x128xf32>
      %cst_90 = arith.constant 4.000000e+00 : f32
      %330 = vector.broadcast %cst_90 : f32 to vector<8x128xf32>
      %331 = arith.mulf %330, %300 : vector<8x128xf32>
      %332 = arith.mulf %331, %297 : vector<8x128xf32>
      %333 = arith.addf %329, %332 : vector<8x128xf32>
      %334 = arith.subf %279, %221 : vector<8x128xf32>
      %335 = arith.subf %310, %252 : vector<8x128xf32>
      %336 = arith.subf %320, %262 : vector<8x128xf32>
      %337 = arith.mulf %262, %334 : vector<8x128xf32>
      %338 = arith.subf %335, %337 : vector<8x128xf32>
      %339 = arith.mulf %320, %334 : vector<8x128xf32>
      %340 = arith.subf %339, %335 : vector<8x128xf32>
      %341 = arith.mulf %336, %336 : vector<8x128xf32>
      %342 = arith.mulf %275, %333 : vector<8x128xf32>
      %343 = arith.mulf %342, %334 : vector<8x128xf32>
      %344 = arith.mulf %343, %334 : vector<8x128xf32>
      %345 = arith.subf %341, %344 : vector<8x128xf32>
      %346 = math.absf %345 : vector<8x128xf32>
      %cst_91 = arith.constant 9.99999996E-13 : f32
      %347 = vector.broadcast %cst_91 : f32 to vector<8x128xf32>
      %348 = arith.cmpf olt, %346, %347 : vector<8x128xf32>
      %cst_92 = arith.constant 0.000000e+00 : f32
      %349 = vector.broadcast %cst_92 : f32 to vector<8x128xf32>
      %350 = arith.cmpf oge, %345, %349 : vector<8x128xf32>
      %cst_93 = arith.constant 9.99999996E-13 : f32
      %cst_94 = arith.constant -9.99999996E-13 : f32
      %351 = vector.broadcast %cst_93 : f32 to vector<8x128xf32>
      %352 = vector.broadcast %cst_94 : f32 to vector<8x128xf32>
      %353 = arith.select %350, %351, %352 : vector<8x128xi1>, vector<8x128xf32>
      %354 = arith.select %348, %353, %345 : vector<8x128xi1>, vector<8x128xf32>
      %355 = tpu.reciprocal %354 {approx = true} : vector<8x128xf32> -> vector<8x128xf32>
      %356 = arith.mulf %336, %340 : vector<8x128xf32>
      %357 = arith.mulf %333, %334 : vector<8x128xf32>
      %358 = arith.mulf %357, %338 : vector<8x128xf32>
      %359 = arith.subf %356, %358 : vector<8x128xf32>
      %360 = arith.mulf %359, %355 : vector<8x128xf32>
      %cst_95 = arith.constant -5.000000e-02 : f32
      %cst_96 = arith.constant 5.000000e-02 : f32
      %361 = vector.broadcast %cst_95 : f32 to vector<8x128xf32>
      %362 = arith.maximumf %361, %360 : vector<8x128xf32>
      %363 = vector.broadcast %cst_96 : f32 to vector<8x128xf32>
      %364 = arith.minimumf %363, %362 : vector<8x128xf32>
      %365 = arith.mulf %275, %334 : vector<8x128xf32>
      %366 = arith.mulf %365, %340 : vector<8x128xf32>
      %367 = arith.mulf %336, %338 : vector<8x128xf32>
      %368 = arith.subf %366, %367 : vector<8x128xf32>
      %369 = arith.mulf %368, %355 : vector<8x128xf32>
      %cst_97 = arith.constant -5.000000e-02 : f32
      %cst_98 = arith.constant 5.000000e-02 : f32
      %370 = vector.broadcast %cst_97 : f32 to vector<8x128xf32>
      %371 = arith.maximumf %370, %369 : vector<8x128xf32>
      %372 = vector.broadcast %cst_98 : f32 to vector<8x128xf32>
      %373 = arith.minimumf %372, %371 : vector<8x128xf32>
      %374 = arith.addf %221, %364 : vector<8x128xf32>
      %cst_99 = arith.constant 1.000000e-07 : f32
      %cst_100 = arith.constant 0.99999988 : f32
      %375 = vector.broadcast %cst_99 : f32 to vector<8x128xf32>
      %376 = arith.maximumf %375, %374 : vector<8x128xf32>
      %377 = vector.broadcast %cst_100 : f32 to vector<8x128xf32>
      %378 = arith.minimumf %377, %376 : vector<8x128xf32>
      %379 = arith.addf %279, %373 : vector<8x128xf32>
      %cst_101 = arith.constant 1.000000e-07 : f32
      %cst_102 = arith.constant 0.99999988 : f32
      %380 = vector.broadcast %cst_101 : f32 to vector<8x128xf32>
      %381 = arith.maximumf %380, %379 : vector<8x128xf32>
      %382 = vector.broadcast %cst_102 : f32 to vector<8x128xf32>
      %383 = arith.minimumf %382, %381 : vector<8x128xf32>
      %384 = arith.subf %378, %221 : vector<8x128xf32>
      %385 = math.absf %384 : vector<8x128xf32>
      %386 = arith.subf %383, %279 : vector<8x128xf32>
      %387 = math.absf %386 : vector<8x128xf32>
      %388 = arith.maximumf %385, %387 : vector<8x128xf32>
      %389 = arith.subf %378, %210 : vector<8x128xf32>
      %390 = arith.mulf %217, %389 : vector<8x128xf32>
      %391 = arith.addf %210, %390 : vector<8x128xf32>
      %392 = arith.subf %383, %213 : vector<8x128xf32>
      %393 = arith.mulf %217, %392 : vector<8x128xf32>
      %394 = arith.addf %213, %393 : vector<8x128xf32>
      %cst_103 = arith.constant 9.99999997E-7 : f32
      %395 = vector.broadcast %cst_103 : f32 to vector<8x128xf32>
      %396 = arith.cmpf olt, %388, %395 : vector<8x128xf32>
      %cst_104 = arith.constant 0.000000e+00 : f32
      %397 = vector.broadcast %cst_104 : f32 to vector<8x128xf32>
      %398 = arith.select %396, %397, %217 : vector<8x128xi1>, vector<8x128xf32>
      %cst_105 = arith.constant 1.000000e-07 : f32
      %cst_106 = arith.constant 0.99999988 : f32
      %399 = vector.broadcast %cst_105 : f32 to vector<8x128xf32>
      %400 = arith.maximumf %399, %391 : vector<8x128xf32>
      %401 = vector.broadcast %cst_106 : f32 to vector<8x128xf32>
      %402 = arith.minimumf %401, %400 : vector<8x128xf32>
      %cst_107 = arith.constant 1.000000e+00 : f32
      %403 = vector.broadcast %cst_107 : f32 to vector<8x128xf32>
      %404 = arith.subf %403, %402 : vector<8x128xf32>
      %cst_108 = arith.constant 2.000000e+00 : f32
      %405 = vector.broadcast %cst_108 : f32 to vector<8x128xf32>
      %406 = arith.mulf %405, %402 : vector<8x128xf32>
      %cst_109 = arith.constant 1.000000e+00 : f32
      %407 = vector.broadcast %cst_109 : f32 to vector<8x128xf32>
      %408 = arith.subf %407, %406 : vector<8x128xf32>
      %409 = arith.mulf %408, %7 : vector<8x128xf32>
      %410 = arith.addf %5, %409 : vector<8x128xf32>
      %411 = arith.mulf %408, %410 : vector<8x128xf32>
      %412 = arith.addf %3, %411 : vector<8x128xf32>
      %413 = arith.mulf %408, %412 : vector<8x128xf32>
      %414 = arith.addf %1, %413 : vector<8x128xf32>
      %415 = arith.mulf %408, %13 : vector<8x128xf32>
      %416 = arith.addf %11, %415 : vector<8x128xf32>
      %417 = arith.mulf %408, %416 : vector<8x128xf32>
      %418 = arith.addf %3, %417 : vector<8x128xf32>
      %419 = arith.mulf %15, %408 : vector<8x128xf32>
      %420 = arith.addf %11, %419 : vector<8x128xf32>
      %421 = math.log %402 : vector<8x128xf32>
      %422 = math.log %404 : vector<8x128xf32>
      %423 = arith.mulf %402, %404 : vector<8x128xf32>
      %424 = tpu.reciprocal %423 {approx = true} : vector<8x128xf32> -> vector<8x128xf32>
      %425 = arith.mulf %402, %9 : vector<8x128xf32>
      %426 = arith.mulf %402, %421 : vector<8x128xf32>
      %427 = arith.mulf %404, %422 : vector<8x128xf32>
      %428 = arith.addf %426, %427 : vector<8x128xf32>
      %cst_110 = arith.constant 2.494200e+03 : f32
      %429 = vector.broadcast %cst_110 : f32 to vector<8x128xf32>
      %430 = arith.mulf %429, %428 : vector<8x128xf32>
      %431 = arith.addf %425, %430 : vector<8x128xf32>
      %432 = arith.mulf %423, %414 : vector<8x128xf32>
      %433 = arith.addf %431, %432 : vector<8x128xf32>
      %434 = arith.subf %421, %422 : vector<8x128xf32>
      %cst_111 = arith.constant 2.494200e+03 : f32
      %435 = vector.broadcast %cst_111 : f32 to vector<8x128xf32>
      %436 = arith.mulf %435, %434 : vector<8x128xf32>
      %437 = arith.addf %9, %436 : vector<8x128xf32>
      %438 = arith.mulf %408, %414 : vector<8x128xf32>
      %439 = arith.addf %437, %438 : vector<8x128xf32>
      %cst_112 = arith.constant 2.000000e+00 : f32
      %440 = vector.broadcast %cst_112 : f32 to vector<8x128xf32>
      %441 = arith.mulf %440, %423 : vector<8x128xf32>
      %442 = arith.mulf %441, %418 : vector<8x128xf32>
      %443 = arith.subf %439, %442 : vector<8x128xf32>
      %cst_113 = arith.constant 2.494200e+03 : f32
      %444 = vector.broadcast %cst_113 : f32 to vector<8x128xf32>
      %445 = arith.mulf %444, %424 : vector<8x128xf32>
      %cst_114 = arith.constant 2.000000e+00 : f32
      %446 = vector.broadcast %cst_114 : f32 to vector<8x128xf32>
      %447 = arith.mulf %446, %414 : vector<8x128xf32>
      %448 = arith.subf %445, %447 : vector<8x128xf32>
      %cst_115 = arith.constant 4.000000e+00 : f32
      %449 = vector.broadcast %cst_115 : f32 to vector<8x128xf32>
      %450 = arith.mulf %449, %408 : vector<8x128xf32>
      %451 = arith.mulf %450, %418 : vector<8x128xf32>
      %452 = arith.subf %448, %451 : vector<8x128xf32>
      %cst_116 = arith.constant 4.000000e+00 : f32
      %453 = vector.broadcast %cst_116 : f32 to vector<8x128xf32>
      %454 = arith.mulf %453, %423 : vector<8x128xf32>
      %455 = arith.mulf %454, %420 : vector<8x128xf32>
      %456 = arith.addf %452, %455 : vector<8x128xf32>
      %cst_117 = arith.constant 1.000000e-07 : f32
      %cst_118 = arith.constant 0.99999988 : f32
      %457 = vector.broadcast %cst_117 : f32 to vector<8x128xf32>
      %458 = arith.maximumf %457, %394 : vector<8x128xf32>
      %459 = vector.broadcast %cst_118 : f32 to vector<8x128xf32>
      %460 = arith.minimumf %459, %458 : vector<8x128xf32>
      %cst_119 = arith.constant 1.000000e+00 : f32
      %461 = vector.broadcast %cst_119 : f32 to vector<8x128xf32>
      %462 = arith.subf %461, %460 : vector<8x128xf32>
      %cst_120 = arith.constant 2.000000e+00 : f32
      %463 = vector.broadcast %cst_120 : f32 to vector<8x128xf32>
      %464 = arith.mulf %463, %460 : vector<8x128xf32>
      %cst_121 = arith.constant 1.000000e+00 : f32
      %465 = vector.broadcast %cst_121 : f32 to vector<8x128xf32>
      %466 = arith.subf %465, %464 : vector<8x128xf32>
      %467 = arith.mulf %466, %7 : vector<8x128xf32>
      %468 = arith.addf %5, %467 : vector<8x128xf32>
      %469 = arith.mulf %466, %468 : vector<8x128xf32>
      %470 = arith.addf %3, %469 : vector<8x128xf32>
      %471 = arith.mulf %466, %470 : vector<8x128xf32>
      %472 = arith.addf %1, %471 : vector<8x128xf32>
      %473 = arith.mulf %466, %13 : vector<8x128xf32>
      %474 = arith.addf %11, %473 : vector<8x128xf32>
      %475 = arith.mulf %466, %474 : vector<8x128xf32>
      %476 = arith.addf %3, %475 : vector<8x128xf32>
      %477 = arith.mulf %15, %466 : vector<8x128xf32>
      %478 = arith.addf %11, %477 : vector<8x128xf32>
      %479 = math.log %460 : vector<8x128xf32>
      %480 = math.log %462 : vector<8x128xf32>
      %481 = arith.mulf %460, %462 : vector<8x128xf32>
      %482 = tpu.reciprocal %481 {approx = true} : vector<8x128xf32> -> vector<8x128xf32>
      %483 = arith.mulf %460, %9 : vector<8x128xf32>
      %484 = arith.mulf %460, %479 : vector<8x128xf32>
      %485 = arith.mulf %462, %480 : vector<8x128xf32>
      %486 = arith.addf %484, %485 : vector<8x128xf32>
      %cst_122 = arith.constant 2.494200e+03 : f32
      %487 = vector.broadcast %cst_122 : f32 to vector<8x128xf32>
      %488 = arith.mulf %487, %486 : vector<8x128xf32>
      %489 = arith.addf %483, %488 : vector<8x128xf32>
      %490 = arith.mulf %481, %472 : vector<8x128xf32>
      %491 = arith.addf %489, %490 : vector<8x128xf32>
      %492 = arith.subf %479, %480 : vector<8x128xf32>
      %cst_123 = arith.constant 2.494200e+03 : f32
      %493 = vector.broadcast %cst_123 : f32 to vector<8x128xf32>
      %494 = arith.mulf %493, %492 : vector<8x128xf32>
      %495 = arith.addf %9, %494 : vector<8x128xf32>
      %496 = arith.mulf %466, %472 : vector<8x128xf32>
      %497 = arith.addf %495, %496 : vector<8x128xf32>
      %cst_124 = arith.constant 2.000000e+00 : f32
      %498 = vector.broadcast %cst_124 : f32 to vector<8x128xf32>
      %499 = arith.mulf %498, %481 : vector<8x128xf32>
      %500 = arith.mulf %499, %476 : vector<8x128xf32>
      %501 = arith.subf %497, %500 : vector<8x128xf32>
      %cst_125 = arith.constant 2.494200e+03 : f32
      %502 = vector.broadcast %cst_125 : f32 to vector<8x128xf32>
      %503 = arith.mulf %502, %482 : vector<8x128xf32>
      %cst_126 = arith.constant 2.000000e+00 : f32
      %504 = vector.broadcast %cst_126 : f32 to vector<8x128xf32>
      %505 = arith.mulf %504, %472 : vector<8x128xf32>
      %506 = arith.subf %503, %505 : vector<8x128xf32>
      %cst_127 = arith.constant 4.000000e+00 : f32
      %507 = vector.broadcast %cst_127 : f32 to vector<8x128xf32>
      %508 = arith.mulf %507, %466 : vector<8x128xf32>
      %509 = arith.mulf %508, %476 : vector<8x128xf32>
      %510 = arith.subf %506, %509 : vector<8x128xf32>
      %cst_128 = arith.constant 4.000000e+00 : f32
      %511 = vector.broadcast %cst_128 : f32 to vector<8x128xf32>
      %512 = arith.mulf %511, %481 : vector<8x128xf32>
      %513 = arith.mulf %512, %478 : vector<8x128xf32>
      %514 = arith.addf %510, %513 : vector<8x128xf32>
      %515 = arith.subf %460, %402 : vector<8x128xf32>
      %516 = arith.subf %491, %433 : vector<8x128xf32>
      %517 = arith.subf %501, %443 : vector<8x128xf32>
      %518 = arith.mulf %443, %515 : vector<8x128xf32>
      %519 = arith.subf %516, %518 : vector<8x128xf32>
      %520 = arith.mulf %501, %515 : vector<8x128xf32>
      %521 = arith.subf %520, %516 : vector<8x128xf32>
      %522 = arith.mulf %517, %517 : vector<8x128xf32>
      %523 = arith.mulf %456, %514 : vector<8x128xf32>
      %524 = arith.mulf %523, %515 : vector<8x128xf32>
      %525 = arith.mulf %524, %515 : vector<8x128xf32>
      %526 = arith.subf %522, %525 : vector<8x128xf32>
      %527 = math.absf %526 : vector<8x128xf32>
      %cst_129 = arith.constant 9.99999996E-13 : f32
      %528 = vector.broadcast %cst_129 : f32 to vector<8x128xf32>
      %529 = arith.cmpf olt, %527, %528 : vector<8x128xf32>
      %cst_130 = arith.constant 0.000000e+00 : f32
      %530 = vector.broadcast %cst_130 : f32 to vector<8x128xf32>
      %531 = arith.cmpf oge, %526, %530 : vector<8x128xf32>
      %cst_131 = arith.constant 9.99999996E-13 : f32
      %cst_132 = arith.constant -9.99999996E-13 : f32
      %532 = vector.broadcast %cst_131 : f32 to vector<8x128xf32>
      %533 = vector.broadcast %cst_132 : f32 to vector<8x128xf32>
      %534 = arith.select %531, %532, %533 : vector<8x128xi1>, vector<8x128xf32>
      %535 = arith.select %529, %534, %526 : vector<8x128xi1>, vector<8x128xf32>
      %536 = tpu.reciprocal %535 {approx = true} : vector<8x128xf32> -> vector<8x128xf32>
      %537 = arith.mulf %517, %521 : vector<8x128xf32>
      %538 = arith.mulf %514, %515 : vector<8x128xf32>
      %539 = arith.mulf %538, %519 : vector<8x128xf32>
      %540 = arith.subf %537, %539 : vector<8x128xf32>
      %541 = arith.mulf %540, %536 : vector<8x128xf32>
      %cst_133 = arith.constant -5.000000e-02 : f32
      %cst_134 = arith.constant 5.000000e-02 : f32
      %542 = vector.broadcast %cst_133 : f32 to vector<8x128xf32>
      %543 = arith.maximumf %542, %541 : vector<8x128xf32>
      %544 = vector.broadcast %cst_134 : f32 to vector<8x128xf32>
      %545 = arith.minimumf %544, %543 : vector<8x128xf32>
      %546 = arith.mulf %456, %515 : vector<8x128xf32>
      %547 = arith.mulf %546, %521 : vector<8x128xf32>
      %548 = arith.mulf %517, %519 : vector<8x128xf32>
      %549 = arith.subf %547, %548 : vector<8x128xf32>
      %550 = arith.mulf %549, %536 : vector<8x128xf32>
      %cst_135 = arith.constant -5.000000e-02 : f32
      %cst_136 = arith.constant 5.000000e-02 : f32
      %551 = vector.broadcast %cst_135 : f32 to vector<8x128xf32>
      %552 = arith.maximumf %551, %550 : vector<8x128xf32>
      %553 = vector.broadcast %cst_136 : f32 to vector<8x128xf32>
      %554 = arith.minimumf %553, %552 : vector<8x128xf32>
      %555 = arith.addf %402, %545 : vector<8x128xf32>
      %cst_137 = arith.constant 1.000000e-07 : f32
      %cst_138 = arith.constant 0.99999988 : f32
      %556 = vector.broadcast %cst_137 : f32 to vector<8x128xf32>
      %557 = arith.maximumf %556, %555 : vector<8x128xf32>
      %558 = vector.broadcast %cst_138 : f32 to vector<8x128xf32>
      %559 = arith.minimumf %558, %557 : vector<8x128xf32>
      %560 = arith.addf %460, %554 : vector<8x128xf32>
      %cst_139 = arith.constant 1.000000e-07 : f32
      %cst_140 = arith.constant 0.99999988 : f32
      %561 = vector.broadcast %cst_139 : f32 to vector<8x128xf32>
      %562 = arith.maximumf %561, %560 : vector<8x128xf32>
      %563 = vector.broadcast %cst_140 : f32 to vector<8x128xf32>
      %564 = arith.minimumf %563, %562 : vector<8x128xf32>
      %565 = arith.subf %559, %402 : vector<8x128xf32>
      %566 = math.absf %565 : vector<8x128xf32>
      %567 = arith.subf %564, %460 : vector<8x128xf32>
      %568 = math.absf %567 : vector<8x128xf32>
      %569 = arith.maximumf %566, %568 : vector<8x128xf32>
      %570 = arith.subf %559, %391 : vector<8x128xf32>
      %571 = arith.mulf %398, %570 : vector<8x128xf32>
      %572 = arith.addf %391, %571 : vector<8x128xf32>
      %573 = arith.subf %564, %394 : vector<8x128xf32>
      %574 = arith.mulf %398, %573 : vector<8x128xf32>
      %575 = arith.addf %394, %574 : vector<8x128xf32>
      %cst_141 = arith.constant 9.99999997E-7 : f32
      %576 = vector.broadcast %cst_141 : f32 to vector<8x128xf32>
      %577 = arith.cmpf olt, %569, %576 : vector<8x128xf32>
      %cst_142 = arith.constant 0.000000e+00 : f32
      %578 = vector.broadcast %cst_142 : f32 to vector<8x128xf32>
      %579 = arith.select %577, %578, %398 : vector<8x128xi1>, vector<8x128xf32>
      %cst_143 = arith.constant 1.000000e-07 : f32
      %cst_144 = arith.constant 0.99999988 : f32
      %580 = vector.broadcast %cst_143 : f32 to vector<8x128xf32>
      %581 = arith.maximumf %580, %572 : vector<8x128xf32>
      %582 = vector.broadcast %cst_144 : f32 to vector<8x128xf32>
      %583 = arith.minimumf %582, %581 : vector<8x128xf32>
      %cst_145 = arith.constant 1.000000e+00 : f32
      %584 = vector.broadcast %cst_145 : f32 to vector<8x128xf32>
      %585 = arith.subf %584, %583 : vector<8x128xf32>
      %cst_146 = arith.constant 2.000000e+00 : f32
      %586 = vector.broadcast %cst_146 : f32 to vector<8x128xf32>
      %587 = arith.mulf %586, %583 : vector<8x128xf32>
      %cst_147 = arith.constant 1.000000e+00 : f32
      %588 = vector.broadcast %cst_147 : f32 to vector<8x128xf32>
      %589 = arith.subf %588, %587 : vector<8x128xf32>
      %590 = arith.mulf %589, %7 : vector<8x128xf32>
      %591 = arith.addf %5, %590 : vector<8x128xf32>
      %592 = arith.mulf %589, %591 : vector<8x128xf32>
      %593 = arith.addf %3, %592 : vector<8x128xf32>
      %594 = arith.mulf %589, %593 : vector<8x128xf32>
      %595 = arith.addf %1, %594 : vector<8x128xf32>
      %596 = arith.mulf %589, %13 : vector<8x128xf32>
      %597 = arith.addf %11, %596 : vector<8x128xf32>
      %598 = arith.mulf %589, %597 : vector<8x128xf32>
      %599 = arith.addf %3, %598 : vector<8x128xf32>
      %600 = arith.mulf %15, %589 : vector<8x128xf32>
      %601 = arith.addf %11, %600 : vector<8x128xf32>
      %602 = math.log %583 : vector<8x128xf32>
      %603 = math.log %585 : vector<8x128xf32>
      %604 = arith.mulf %583, %585 : vector<8x128xf32>
      %605 = tpu.reciprocal %604 {approx = true} : vector<8x128xf32> -> vector<8x128xf32>
      %606 = arith.mulf %583, %9 : vector<8x128xf32>
      %607 = arith.mulf %583, %602 : vector<8x128xf32>
      %608 = arith.mulf %585, %603 : vector<8x128xf32>
      %609 = arith.addf %607, %608 : vector<8x128xf32>
      %cst_148 = arith.constant 2.494200e+03 : f32
      %610 = vector.broadcast %cst_148 : f32 to vector<8x128xf32>
      %611 = arith.mulf %610, %609 : vector<8x128xf32>
      %612 = arith.addf %606, %611 : vector<8x128xf32>
      %613 = arith.mulf %604, %595 : vector<8x128xf32>
      %614 = arith.addf %612, %613 : vector<8x128xf32>
      %615 = arith.subf %602, %603 : vector<8x128xf32>
      %cst_149 = arith.constant 2.494200e+03 : f32
      %616 = vector.broadcast %cst_149 : f32 to vector<8x128xf32>
      %617 = arith.mulf %616, %615 : vector<8x128xf32>
      %618 = arith.addf %9, %617 : vector<8x128xf32>
      %619 = arith.mulf %589, %595 : vector<8x128xf32>
      %620 = arith.addf %618, %619 : vector<8x128xf32>
      %cst_150 = arith.constant 2.000000e+00 : f32
      %621 = vector.broadcast %cst_150 : f32 to vector<8x128xf32>
      %622 = arith.mulf %621, %604 : vector<8x128xf32>
      %623 = arith.mulf %622, %599 : vector<8x128xf32>
      %624 = arith.subf %620, %623 : vector<8x128xf32>
      %cst_151 = arith.constant 2.494200e+03 : f32
      %625 = vector.broadcast %cst_151 : f32 to vector<8x128xf32>
      %626 = arith.mulf %625, %605 : vector<8x128xf32>
      %cst_152 = arith.constant 2.000000e+00 : f32
      %627 = vector.broadcast %cst_152 : f32 to vector<8x128xf32>
      %628 = arith.mulf %627, %595 : vector<8x128xf32>
      %629 = arith.subf %626, %628 : vector<8x128xf32>
      %cst_153 = arith.constant 4.000000e+00 : f32
      %630 = vector.broadcast %cst_153 : f32 to vector<8x128xf32>
      %631 = arith.mulf %630, %589 : vector<8x128xf32>
      %632 = arith.mulf %631, %599 : vector<8x128xf32>
      %633 = arith.subf %629, %632 : vector<8x128xf32>
      %cst_154 = arith.constant 4.000000e+00 : f32
      %634 = vector.broadcast %cst_154 : f32 to vector<8x128xf32>
      %635 = arith.mulf %634, %604 : vector<8x128xf32>
      %636 = arith.mulf %635, %601 : vector<8x128xf32>
      %637 = arith.addf %633, %636 : vector<8x128xf32>
      %cst_155 = arith.constant 1.000000e-07 : f32
      %cst_156 = arith.constant 0.99999988 : f32
      %638 = vector.broadcast %cst_155 : f32 to vector<8x128xf32>
      %639 = arith.maximumf %638, %575 : vector<8x128xf32>
      %640 = vector.broadcast %cst_156 : f32 to vector<8x128xf32>
      %641 = arith.minimumf %640, %639 : vector<8x128xf32>
      %cst_157 = arith.constant 1.000000e+00 : f32
      %642 = vector.broadcast %cst_157 : f32 to vector<8x128xf32>
      %643 = arith.subf %642, %641 : vector<8x128xf32>
      %cst_158 = arith.constant 2.000000e+00 : f32
      %644 = vector.broadcast %cst_158 : f32 to vector<8x128xf32>
      %645 = arith.mulf %644, %641 : vector<8x128xf32>
      %cst_159 = arith.constant 1.000000e+00 : f32
      %646 = vector.broadcast %cst_159 : f32 to vector<8x128xf32>
      %647 = arith.subf %646, %645 : vector<8x128xf32>
      %648 = arith.mulf %647, %7 : vector<8x128xf32>
      %649 = arith.addf %5, %648 : vector<8x128xf32>
      %650 = arith.mulf %647, %649 : vector<8x128xf32>
      %651 = arith.addf %3, %650 : vector<8x128xf32>
      %652 = arith.mulf %647, %651 : vector<8x128xf32>
      %653 = arith.addf %1, %652 : vector<8x128xf32>
      %654 = arith.mulf %647, %13 : vector<8x128xf32>
      %655 = arith.addf %11, %654 : vector<8x128xf32>
      %656 = arith.mulf %647, %655 : vector<8x128xf32>
      %657 = arith.addf %3, %656 : vector<8x128xf32>
      %658 = arith.mulf %15, %647 : vector<8x128xf32>
      %659 = arith.addf %11, %658 : vector<8x128xf32>
      %660 = math.log %641 : vector<8x128xf32>
      %661 = math.log %643 : vector<8x128xf32>
      %662 = arith.mulf %641, %643 : vector<8x128xf32>
      %663 = tpu.reciprocal %662 {approx = true} : vector<8x128xf32> -> vector<8x128xf32>
      %664 = arith.mulf %641, %9 : vector<8x128xf32>
      %665 = arith.mulf %641, %660 : vector<8x128xf32>
      %666 = arith.mulf %643, %661 : vector<8x128xf32>
      %667 = arith.addf %665, %666 : vector<8x128xf32>
      %cst_160 = arith.constant 2.494200e+03 : f32
      %668 = vector.broadcast %cst_160 : f32 to vector<8x128xf32>
      %669 = arith.mulf %668, %667 : vector<8x128xf32>
      %670 = arith.addf %664, %669 : vector<8x128xf32>
      %671 = arith.mulf %662, %653 : vector<8x128xf32>
      %672 = arith.addf %670, %671 : vector<8x128xf32>
      %673 = arith.subf %660, %661 : vector<8x128xf32>
      %cst_161 = arith.constant 2.494200e+03 : f32
      %674 = vector.broadcast %cst_161 : f32 to vector<8x128xf32>
      %675 = arith.mulf %674, %673 : vector<8x128xf32>
      %676 = arith.addf %9, %675 : vector<8x128xf32>
      %677 = arith.mulf %647, %653 : vector<8x128xf32>
      %678 = arith.addf %676, %677 : vector<8x128xf32>
      %cst_162 = arith.constant 2.000000e+00 : f32
      %679 = vector.broadcast %cst_162 : f32 to vector<8x128xf32>
      %680 = arith.mulf %679, %662 : vector<8x128xf32>
      %681 = arith.mulf %680, %657 : vector<8x128xf32>
      %682 = arith.subf %678, %681 : vector<8x128xf32>
      %cst_163 = arith.constant 2.494200e+03 : f32
      %683 = vector.broadcast %cst_163 : f32 to vector<8x128xf32>
      %684 = arith.mulf %683, %663 : vector<8x128xf32>
      %cst_164 = arith.constant 2.000000e+00 : f32
      %685 = vector.broadcast %cst_164 : f32 to vector<8x128xf32>
      %686 = arith.mulf %685, %653 : vector<8x128xf32>
      %687 = arith.subf %684, %686 : vector<8x128xf32>
      %cst_165 = arith.constant 4.000000e+00 : f32
      %688 = vector.broadcast %cst_165 : f32 to vector<8x128xf32>
      %689 = arith.mulf %688, %647 : vector<8x128xf32>
      %690 = arith.mulf %689, %657 : vector<8x128xf32>
      %691 = arith.subf %687, %690 : vector<8x128xf32>
      %cst_166 = arith.constant 4.000000e+00 : f32
      %692 = vector.broadcast %cst_166 : f32 to vector<8x128xf32>
      %693 = arith.mulf %692, %662 : vector<8x128xf32>
      %694 = arith.mulf %693, %659 : vector<8x128xf32>
      %695 = arith.addf %691, %694 : vector<8x128xf32>
      %696 = arith.subf %641, %583 : vector<8x128xf32>
      %697 = arith.subf %672, %614 : vector<8x128xf32>
      %698 = arith.subf %682, %624 : vector<8x128xf32>
      %699 = arith.mulf %624, %696 : vector<8x128xf32>
      %700 = arith.subf %697, %699 : vector<8x128xf32>
      %701 = arith.mulf %682, %696 : vector<8x128xf32>
      %702 = arith.subf %701, %697 : vector<8x128xf32>
      %703 = arith.mulf %698, %698 : vector<8x128xf32>
      %704 = arith.mulf %637, %695 : vector<8x128xf32>
      %705 = arith.mulf %704, %696 : vector<8x128xf32>
      %706 = arith.mulf %705, %696 : vector<8x128xf32>
      %707 = arith.subf %703, %706 : vector<8x128xf32>
      %708 = math.absf %707 : vector<8x128xf32>
      %cst_167 = arith.constant 9.99999996E-13 : f32
      %709 = vector.broadcast %cst_167 : f32 to vector<8x128xf32>
      %710 = arith.cmpf olt, %708, %709 : vector<8x128xf32>
      %cst_168 = arith.constant 0.000000e+00 : f32
      %711 = vector.broadcast %cst_168 : f32 to vector<8x128xf32>
      %712 = arith.cmpf oge, %707, %711 : vector<8x128xf32>
      %cst_169 = arith.constant 9.99999996E-13 : f32
      %cst_170 = arith.constant -9.99999996E-13 : f32
      %713 = vector.broadcast %cst_169 : f32 to vector<8x128xf32>
      %714 = vector.broadcast %cst_170 : f32 to vector<8x128xf32>
      %715 = arith.select %712, %713, %714 : vector<8x128xi1>, vector<8x128xf32>
      %716 = arith.select %710, %715, %707 : vector<8x128xi1>, vector<8x128xf32>
      %717 = tpu.reciprocal %716 {approx = true} : vector<8x128xf32> -> vector<8x128xf32>
      %718 = arith.mulf %698, %702 : vector<8x128xf32>
      %719 = arith.mulf %695, %696 : vector<8x128xf32>
      %720 = arith.mulf %719, %700 : vector<8x128xf32>
      %721 = arith.subf %718, %720 : vector<8x128xf32>
      %722 = arith.mulf %721, %717 : vector<8x128xf32>
      %cst_171 = arith.constant -5.000000e-02 : f32
      %cst_172 = arith.constant 5.000000e-02 : f32
      %723 = vector.broadcast %cst_171 : f32 to vector<8x128xf32>
      %724 = arith.maximumf %723, %722 : vector<8x128xf32>
      %725 = vector.broadcast %cst_172 : f32 to vector<8x128xf32>
      %726 = arith.minimumf %725, %724 : vector<8x128xf32>
      %727 = arith.mulf %637, %696 : vector<8x128xf32>
      %728 = arith.mulf %727, %702 : vector<8x128xf32>
      %729 = arith.mulf %698, %700 : vector<8x128xf32>
      %730 = arith.subf %728, %729 : vector<8x128xf32>
      %731 = arith.mulf %730, %717 : vector<8x128xf32>
      %cst_173 = arith.constant -5.000000e-02 : f32
      %cst_174 = arith.constant 5.000000e-02 : f32
      %732 = vector.broadcast %cst_173 : f32 to vector<8x128xf32>
      %733 = arith.maximumf %732, %731 : vector<8x128xf32>
      %734 = vector.broadcast %cst_174 : f32 to vector<8x128xf32>
      %735 = arith.minimumf %734, %733 : vector<8x128xf32>
      %736 = arith.addf %583, %726 : vector<8x128xf32>
      %cst_175 = arith.constant 1.000000e-07 : f32
      %cst_176 = arith.constant 0.99999988 : f32
      %737 = vector.broadcast %cst_175 : f32 to vector<8x128xf32>
      %738 = arith.maximumf %737, %736 : vector<8x128xf32>
      %739 = vector.broadcast %cst_176 : f32 to vector<8x128xf32>
      %740 = arith.minimumf %739, %738 : vector<8x128xf32>
      %741 = arith.addf %641, %735 : vector<8x128xf32>
      %cst_177 = arith.constant 1.000000e-07 : f32
      %cst_178 = arith.constant 0.99999988 : f32
      %742 = vector.broadcast %cst_177 : f32 to vector<8x128xf32>
      %743 = arith.maximumf %742, %741 : vector<8x128xf32>
      %744 = vector.broadcast %cst_178 : f32 to vector<8x128xf32>
      %745 = arith.minimumf %744, %743 : vector<8x128xf32>
      %746 = arith.subf %740, %583 : vector<8x128xf32>
      %747 = math.absf %746 : vector<8x128xf32>
      %748 = arith.subf %745, %641 : vector<8x128xf32>
      %749 = math.absf %748 : vector<8x128xf32>
      %750 = arith.maximumf %747, %749 : vector<8x128xf32>
      %751 = arith.subf %740, %572 : vector<8x128xf32>
      %752 = arith.mulf %579, %751 : vector<8x128xf32>
      %753 = arith.addf %572, %752 : vector<8x128xf32>
      %754 = arith.subf %745, %575 : vector<8x128xf32>
      %755 = arith.mulf %579, %754 : vector<8x128xf32>
      %756 = arith.addf %575, %755 : vector<8x128xf32>
      %cst_179 = arith.constant 9.99999997E-7 : f32
      %757 = vector.broadcast %cst_179 : f32 to vector<8x128xf32>
      %758 = arith.cmpf olt, %750, %757 : vector<8x128xf32>
      %cst_180 = arith.constant 0.000000e+00 : f32
      %759 = vector.broadcast %cst_180 : f32 to vector<8x128xf32>
      %760 = arith.select %758, %759, %579 : vector<8x128xi1>, vector<8x128xf32>
      %cst_181 = arith.constant 1.000000e-07 : f32
      %cst_182 = arith.constant 0.99999988 : f32
      %761 = vector.broadcast %cst_181 : f32 to vector<8x128xf32>
      %762 = arith.maximumf %761, %753 : vector<8x128xf32>
      %763 = vector.broadcast %cst_182 : f32 to vector<8x128xf32>
      %764 = arith.minimumf %763, %762 : vector<8x128xf32>
      %cst_183 = arith.constant 1.000000e+00 : f32
      %765 = vector.broadcast %cst_183 : f32 to vector<8x128xf32>
      %766 = arith.subf %765, %764 : vector<8x128xf32>
      %cst_184 = arith.constant 2.000000e+00 : f32
      %767 = vector.broadcast %cst_184 : f32 to vector<8x128xf32>
      %768 = arith.mulf %767, %764 : vector<8x128xf32>
      %cst_185 = arith.constant 1.000000e+00 : f32
      %769 = vector.broadcast %cst_185 : f32 to vector<8x128xf32>
      %770 = arith.subf %769, %768 : vector<8x128xf32>
      %771 = arith.mulf %770, %7 : vector<8x128xf32>
      %772 = arith.addf %5, %771 : vector<8x128xf32>
      %773 = arith.mulf %770, %772 : vector<8x128xf32>
      %774 = arith.addf %3, %773 : vector<8x128xf32>
      %775 = arith.mulf %770, %774 : vector<8x128xf32>
      %776 = arith.addf %1, %775 : vector<8x128xf32>
      %777 = arith.mulf %770, %13 : vector<8x128xf32>
      %778 = arith.addf %11, %777 : vector<8x128xf32>
      %779 = arith.mulf %770, %778 : vector<8x128xf32>
      %780 = arith.addf %3, %779 : vector<8x128xf32>
      %781 = arith.mulf %15, %770 : vector<8x128xf32>
      %782 = arith.addf %11, %781 : vector<8x128xf32>
      %783 = math.log %764 : vector<8x128xf32>
      %784 = math.log %766 : vector<8x128xf32>
      %785 = arith.mulf %764, %766 : vector<8x128xf32>
      %786 = tpu.reciprocal %785 {approx = true} : vector<8x128xf32> -> vector<8x128xf32>
      %787 = arith.mulf %764, %9 : vector<8x128xf32>
      %788 = arith.mulf %764, %783 : vector<8x128xf32>
      %789 = arith.mulf %766, %784 : vector<8x128xf32>
      %790 = arith.addf %788, %789 : vector<8x128xf32>
      %cst_186 = arith.constant 2.494200e+03 : f32
      %791 = vector.broadcast %cst_186 : f32 to vector<8x128xf32>
      %792 = arith.mulf %791, %790 : vector<8x128xf32>
      %793 = arith.addf %787, %792 : vector<8x128xf32>
      %794 = arith.mulf %785, %776 : vector<8x128xf32>
      %795 = arith.addf %793, %794 : vector<8x128xf32>
      %796 = arith.subf %783, %784 : vector<8x128xf32>
      %cst_187 = arith.constant 2.494200e+03 : f32
      %797 = vector.broadcast %cst_187 : f32 to vector<8x128xf32>
      %798 = arith.mulf %797, %796 : vector<8x128xf32>
      %799 = arith.addf %9, %798 : vector<8x128xf32>
      %800 = arith.mulf %770, %776 : vector<8x128xf32>
      %801 = arith.addf %799, %800 : vector<8x128xf32>
      %cst_188 = arith.constant 2.000000e+00 : f32
      %802 = vector.broadcast %cst_188 : f32 to vector<8x128xf32>
      %803 = arith.mulf %802, %785 : vector<8x128xf32>
      %804 = arith.mulf %803, %780 : vector<8x128xf32>
      %805 = arith.subf %801, %804 : vector<8x128xf32>
      %cst_189 = arith.constant 2.494200e+03 : f32
      %806 = vector.broadcast %cst_189 : f32 to vector<8x128xf32>
      %807 = arith.mulf %806, %786 : vector<8x128xf32>
      %cst_190 = arith.constant 2.000000e+00 : f32
      %808 = vector.broadcast %cst_190 : f32 to vector<8x128xf32>
      %809 = arith.mulf %808, %776 : vector<8x128xf32>
      %810 = arith.subf %807, %809 : vector<8x128xf32>
      %cst_191 = arith.constant 4.000000e+00 : f32
      %811 = vector.broadcast %cst_191 : f32 to vector<8x128xf32>
      %812 = arith.mulf %811, %770 : vector<8x128xf32>
      %813 = arith.mulf %812, %780 : vector<8x128xf32>
      %814 = arith.subf %810, %813 : vector<8x128xf32>
      %cst_192 = arith.constant 4.000000e+00 : f32
      %815 = vector.broadcast %cst_192 : f32 to vector<8x128xf32>
      %816 = arith.mulf %815, %785 : vector<8x128xf32>
      %817 = arith.mulf %816, %782 : vector<8x128xf32>
      %818 = arith.addf %814, %817 : vector<8x128xf32>
      %cst_193 = arith.constant 1.000000e-07 : f32
      %cst_194 = arith.constant 0.99999988 : f32
      %819 = vector.broadcast %cst_193 : f32 to vector<8x128xf32>
      %820 = arith.maximumf %819, %756 : vector<8x128xf32>
      %821 = vector.broadcast %cst_194 : f32 to vector<8x128xf32>
      %822 = arith.minimumf %821, %820 : vector<8x128xf32>
      %cst_195 = arith.constant 1.000000e+00 : f32
      %823 = vector.broadcast %cst_195 : f32 to vector<8x128xf32>
      %824 = arith.subf %823, %822 : vector<8x128xf32>
      %cst_196 = arith.constant 2.000000e+00 : f32
      %825 = vector.broadcast %cst_196 : f32 to vector<8x128xf32>
      %826 = arith.mulf %825, %822 : vector<8x128xf32>
      %cst_197 = arith.constant 1.000000e+00 : f32
      %827 = vector.broadcast %cst_197 : f32 to vector<8x128xf32>
      %828 = arith.subf %827, %826 : vector<8x128xf32>
      %829 = arith.mulf %828, %7 : vector<8x128xf32>
      %830 = arith.addf %5, %829 : vector<8x128xf32>
      %831 = arith.mulf %828, %830 : vector<8x128xf32>
      %832 = arith.addf %3, %831 : vector<8x128xf32>
      %833 = arith.mulf %828, %832 : vector<8x128xf32>
      %834 = arith.addf %1, %833 : vector<8x128xf32>
      %835 = arith.mulf %828, %13 : vector<8x128xf32>
      %836 = arith.addf %11, %835 : vector<8x128xf32>
      %837 = arith.mulf %828, %836 : vector<8x128xf32>
      %838 = arith.addf %3, %837 : vector<8x128xf32>
      %839 = arith.mulf %15, %828 : vector<8x128xf32>
      %840 = arith.addf %11, %839 : vector<8x128xf32>
      %841 = math.log %822 : vector<8x128xf32>
      %842 = math.log %824 : vector<8x128xf32>
      %843 = arith.mulf %822, %824 : vector<8x128xf32>
      %844 = tpu.reciprocal %843 {approx = true} : vector<8x128xf32> -> vector<8x128xf32>
      %845 = arith.mulf %822, %9 : vector<8x128xf32>
      %846 = arith.mulf %822, %841 : vector<8x128xf32>
      %847 = arith.mulf %824, %842 : vector<8x128xf32>
      %848 = arith.addf %846, %847 : vector<8x128xf32>
      %cst_198 = arith.constant 2.494200e+03 : f32
      %849 = vector.broadcast %cst_198 : f32 to vector<8x128xf32>
      %850 = arith.mulf %849, %848 : vector<8x128xf32>
      %851 = arith.addf %845, %850 : vector<8x128xf32>
      %852 = arith.mulf %843, %834 : vector<8x128xf32>
      %853 = arith.addf %851, %852 : vector<8x128xf32>
      %854 = arith.subf %841, %842 : vector<8x128xf32>
      %cst_199 = arith.constant 2.494200e+03 : f32
      %855 = vector.broadcast %cst_199 : f32 to vector<8x128xf32>
      %856 = arith.mulf %855, %854 : vector<8x128xf32>
      %857 = arith.addf %9, %856 : vector<8x128xf32>
      %858 = arith.mulf %828, %834 : vector<8x128xf32>
      %859 = arith.addf %857, %858 : vector<8x128xf32>
      %cst_200 = arith.constant 2.000000e+00 : f32
      %860 = vector.broadcast %cst_200 : f32 to vector<8x128xf32>
      %861 = arith.mulf %860, %843 : vector<8x128xf32>
      %862 = arith.mulf %861, %838 : vector<8x128xf32>
      %863 = arith.subf %859, %862 : vector<8x128xf32>
      %cst_201 = arith.constant 2.494200e+03 : f32
      %864 = vector.broadcast %cst_201 : f32 to vector<8x128xf32>
      %865 = arith.mulf %864, %844 : vector<8x128xf32>
      %cst_202 = arith.constant 2.000000e+00 : f32
      %866 = vector.broadcast %cst_202 : f32 to vector<8x128xf32>
      %867 = arith.mulf %866, %834 : vector<8x128xf32>
      %868 = arith.subf %865, %867 : vector<8x128xf32>
      %cst_203 = arith.constant 4.000000e+00 : f32
      %869 = vector.broadcast %cst_203 : f32 to vector<8x128xf32>
      %870 = arith.mulf %869, %828 : vector<8x128xf32>
      %871 = arith.mulf %870, %838 : vector<8x128xf32>
      %872 = arith.subf %868, %871 : vector<8x128xf32>
      %cst_204 = arith.constant 4.000000e+00 : f32
      %873 = vector.broadcast %cst_204 : f32 to vector<8x128xf32>
      %874 = arith.mulf %873, %843 : vector<8x128xf32>
      %875 = arith.mulf %874, %840 : vector<8x128xf32>
      %876 = arith.addf %872, %875 : vector<8x128xf32>
      %877 = arith.subf %822, %764 : vector<8x128xf32>
      %878 = arith.subf %853, %795 : vector<8x128xf32>
      %879 = arith.subf %863, %805 : vector<8x128xf32>
      %880 = arith.mulf %805, %877 : vector<8x128xf32>
      %881 = arith.subf %878, %880 : vector<8x128xf32>
      %882 = arith.mulf %863, %877 : vector<8x128xf32>
      %883 = arith.subf %882, %878 : vector<8x128xf32>
      %884 = arith.mulf %879, %879 : vector<8x128xf32>
      %885 = arith.mulf %818, %876 : vector<8x128xf32>
      %886 = arith.mulf %885, %877 : vector<8x128xf32>
      %887 = arith.mulf %886, %877 : vector<8x128xf32>
      %888 = arith.subf %884, %887 : vector<8x128xf32>
      %889 = math.absf %888 : vector<8x128xf32>
      %cst_205 = arith.constant 9.99999996E-13 : f32
      %890 = vector.broadcast %cst_205 : f32 to vector<8x128xf32>
      %891 = arith.cmpf olt, %889, %890 : vector<8x128xf32>
      %cst_206 = arith.constant 0.000000e+00 : f32
      %892 = vector.broadcast %cst_206 : f32 to vector<8x128xf32>
      %893 = arith.cmpf oge, %888, %892 : vector<8x128xf32>
      %cst_207 = arith.constant 9.99999996E-13 : f32
      %cst_208 = arith.constant -9.99999996E-13 : f32
      %894 = vector.broadcast %cst_207 : f32 to vector<8x128xf32>
      %895 = vector.broadcast %cst_208 : f32 to vector<8x128xf32>
      %896 = arith.select %893, %894, %895 : vector<8x128xi1>, vector<8x128xf32>
      %897 = arith.select %891, %896, %888 : vector<8x128xi1>, vector<8x128xf32>
      %898 = tpu.reciprocal %897 {approx = true} : vector<8x128xf32> -> vector<8x128xf32>
      %899 = arith.mulf %879, %883 : vector<8x128xf32>
      %900 = arith.mulf %876, %877 : vector<8x128xf32>
      %901 = arith.mulf %900, %881 : vector<8x128xf32>
      %902 = arith.subf %899, %901 : vector<8x128xf32>
      %903 = arith.mulf %902, %898 : vector<8x128xf32>
      %cst_209 = arith.constant -5.000000e-02 : f32
      %cst_210 = arith.constant 5.000000e-02 : f32
      %904 = vector.broadcast %cst_209 : f32 to vector<8x128xf32>
      %905 = arith.maximumf %904, %903 : vector<8x128xf32>
      %906 = vector.broadcast %cst_210 : f32 to vector<8x128xf32>
      %907 = arith.minimumf %906, %905 : vector<8x128xf32>
      %908 = arith.mulf %818, %877 : vector<8x128xf32>
      %909 = arith.mulf %908, %883 : vector<8x128xf32>
      %910 = arith.mulf %879, %881 : vector<8x128xf32>
      %911 = arith.subf %909, %910 : vector<8x128xf32>
      %912 = arith.mulf %911, %898 : vector<8x128xf32>
      %cst_211 = arith.constant -5.000000e-02 : f32
      %cst_212 = arith.constant 5.000000e-02 : f32
      %913 = vector.broadcast %cst_211 : f32 to vector<8x128xf32>
      %914 = arith.maximumf %913, %912 : vector<8x128xf32>
      %915 = vector.broadcast %cst_212 : f32 to vector<8x128xf32>
      %916 = arith.minimumf %915, %914 : vector<8x128xf32>
      %917 = arith.addf %764, %907 : vector<8x128xf32>
      %cst_213 = arith.constant 1.000000e-07 : f32
      %cst_214 = arith.constant 0.99999988 : f32
      %918 = vector.broadcast %cst_213 : f32 to vector<8x128xf32>
      %919 = arith.maximumf %918, %917 : vector<8x128xf32>
      %920 = vector.broadcast %cst_214 : f32 to vector<8x128xf32>
      %921 = arith.minimumf %920, %919 : vector<8x128xf32>
      %922 = arith.addf %822, %916 : vector<8x128xf32>
      %cst_215 = arith.constant 1.000000e-07 : f32
      %cst_216 = arith.constant 0.99999988 : f32
      %923 = vector.broadcast %cst_215 : f32 to vector<8x128xf32>
      %924 = arith.maximumf %923, %922 : vector<8x128xf32>
      %925 = vector.broadcast %cst_216 : f32 to vector<8x128xf32>
      %926 = arith.minimumf %925, %924 : vector<8x128xf32>
      %927 = arith.subf %921, %764 : vector<8x128xf32>
      %928 = math.absf %927 : vector<8x128xf32>
      %929 = arith.subf %926, %822 : vector<8x128xf32>
      %930 = math.absf %929 : vector<8x128xf32>
      %931 = arith.maximumf %928, %930 : vector<8x128xf32>
      %932 = arith.subf %921, %753 : vector<8x128xf32>
      %933 = arith.mulf %760, %932 : vector<8x128xf32>
      %934 = arith.addf %753, %933 : vector<8x128xf32>
      %935 = arith.subf %926, %756 : vector<8x128xf32>
      %936 = arith.mulf %760, %935 : vector<8x128xf32>
      %937 = arith.addf %756, %936 : vector<8x128xf32>
      %cst_217 = arith.constant 9.99999997E-7 : f32
      %938 = vector.broadcast %cst_217 : f32 to vector<8x128xf32>
      %939 = arith.cmpf olt, %931, %938 : vector<8x128xf32>
      %cst_218 = arith.constant 0.000000e+00 : f32
      %940 = vector.broadcast %cst_218 : f32 to vector<8x128xf32>
      %941 = arith.select %939, %940, %760 : vector<8x128xi1>, vector<8x128xf32>
      %cst_219 = arith.constant 1.000000e-07 : f32
      %cst_220 = arith.constant 0.99999988 : f32
      %942 = vector.broadcast %cst_219 : f32 to vector<8x128xf32>
      %943 = arith.maximumf %942, %934 : vector<8x128xf32>
      %944 = vector.broadcast %cst_220 : f32 to vector<8x128xf32>
      %945 = arith.minimumf %944, %943 : vector<8x128xf32>
      %cst_221 = arith.constant 1.000000e+00 : f32
      %946 = vector.broadcast %cst_221 : f32 to vector<8x128xf32>
      %947 = arith.subf %946, %945 : vector<8x128xf32>
      %cst_222 = arith.constant 2.000000e+00 : f32
      %948 = vector.broadcast %cst_222 : f32 to vector<8x128xf32>
      %949 = arith.mulf %948, %945 : vector<8x128xf32>
      %cst_223 = arith.constant 1.000000e+00 : f32
      %950 = vector.broadcast %cst_223 : f32 to vector<8x128xf32>
      %951 = arith.subf %950, %949 : vector<8x128xf32>
      %952 = arith.mulf %951, %7 : vector<8x128xf32>
      %953 = arith.addf %5, %952 : vector<8x128xf32>
      %954 = arith.mulf %951, %953 : vector<8x128xf32>
      %955 = arith.addf %3, %954 : vector<8x128xf32>
      %956 = arith.mulf %951, %955 : vector<8x128xf32>
      %957 = arith.addf %1, %956 : vector<8x128xf32>
      %958 = arith.mulf %951, %13 : vector<8x128xf32>
      %959 = arith.addf %11, %958 : vector<8x128xf32>
      %960 = arith.mulf %951, %959 : vector<8x128xf32>
      %961 = arith.addf %3, %960 : vector<8x128xf32>
      %962 = arith.mulf %15, %951 : vector<8x128xf32>
      %963 = arith.addf %11, %962 : vector<8x128xf32>
      %964 = math.log %945 : vector<8x128xf32>
      %965 = math.log %947 : vector<8x128xf32>
      %966 = arith.mulf %945, %947 : vector<8x128xf32>
      %967 = tpu.reciprocal %966 {approx = true} : vector<8x128xf32> -> vector<8x128xf32>
      %968 = arith.mulf %945, %9 : vector<8x128xf32>
      %969 = arith.mulf %945, %964 : vector<8x128xf32>
      %970 = arith.mulf %947, %965 : vector<8x128xf32>
      %971 = arith.addf %969, %970 : vector<8x128xf32>
      %cst_224 = arith.constant 2.494200e+03 : f32
      %972 = vector.broadcast %cst_224 : f32 to vector<8x128xf32>
      %973 = arith.mulf %972, %971 : vector<8x128xf32>
      %974 = arith.addf %968, %973 : vector<8x128xf32>
      %975 = arith.mulf %966, %957 : vector<8x128xf32>
      %976 = arith.addf %974, %975 : vector<8x128xf32>
      %977 = arith.subf %964, %965 : vector<8x128xf32>
      %cst_225 = arith.constant 2.494200e+03 : f32
      %978 = vector.broadcast %cst_225 : f32 to vector<8x128xf32>
      %979 = arith.mulf %978, %977 : vector<8x128xf32>
      %980 = arith.addf %9, %979 : vector<8x128xf32>
      %981 = arith.mulf %951, %957 : vector<8x128xf32>
      %982 = arith.addf %980, %981 : vector<8x128xf32>
      %cst_226 = arith.constant 2.000000e+00 : f32
      %983 = vector.broadcast %cst_226 : f32 to vector<8x128xf32>
      %984 = arith.mulf %983, %966 : vector<8x128xf32>
      %985 = arith.mulf %984, %961 : vector<8x128xf32>
      %986 = arith.subf %982, %985 : vector<8x128xf32>
      %cst_227 = arith.constant 2.494200e+03 : f32
      %987 = vector.broadcast %cst_227 : f32 to vector<8x128xf32>
      %988 = arith.mulf %987, %967 : vector<8x128xf32>
      %cst_228 = arith.constant 2.000000e+00 : f32
      %989 = vector.broadcast %cst_228 : f32 to vector<8x128xf32>
      %990 = arith.mulf %989, %957 : vector<8x128xf32>
      %991 = arith.subf %988, %990 : vector<8x128xf32>
      %cst_229 = arith.constant 4.000000e+00 : f32
      %992 = vector.broadcast %cst_229 : f32 to vector<8x128xf32>
      %993 = arith.mulf %992, %951 : vector<8x128xf32>
      %994 = arith.mulf %993, %961 : vector<8x128xf32>
      %995 = arith.subf %991, %994 : vector<8x128xf32>
      %cst_230 = arith.constant 4.000000e+00 : f32
      %996 = vector.broadcast %cst_230 : f32 to vector<8x128xf32>
      %997 = arith.mulf %996, %966 : vector<8x128xf32>
      %998 = arith.mulf %997, %963 : vector<8x128xf32>
      %999 = arith.addf %995, %998 : vector<8x128xf32>
      %cst_231 = arith.constant 1.000000e-07 : f32
      %cst_232 = arith.constant 0.99999988 : f32
      %1000 = vector.broadcast %cst_231 : f32 to vector<8x128xf32>
      %1001 = arith.maximumf %1000, %937 : vector<8x128xf32>
      %1002 = vector.broadcast %cst_232 : f32 to vector<8x128xf32>
      %1003 = arith.minimumf %1002, %1001 : vector<8x128xf32>
      %cst_233 = arith.constant 1.000000e+00 : f32
      %1004 = vector.broadcast %cst_233 : f32 to vector<8x128xf32>
      %1005 = arith.subf %1004, %1003 : vector<8x128xf32>
      %cst_234 = arith.constant 2.000000e+00 : f32
      %1006 = vector.broadcast %cst_234 : f32 to vector<8x128xf32>
      %1007 = arith.mulf %1006, %1003 : vector<8x128xf32>
      %cst_235 = arith.constant 1.000000e+00 : f32
      %1008 = vector.broadcast %cst_235 : f32 to vector<8x128xf32>
      %1009 = arith.subf %1008, %1007 : vector<8x128xf32>
      %1010 = arith.mulf %1009, %7 : vector<8x128xf32>
      %1011 = arith.addf %5, %1010 : vector<8x128xf32>
      %1012 = arith.mulf %1009, %1011 : vector<8x128xf32>
      %1013 = arith.addf %3, %1012 : vector<8x128xf32>
      %1014 = arith.mulf %1009, %1013 : vector<8x128xf32>
      %1015 = arith.addf %1, %1014 : vector<8x128xf32>
      %1016 = arith.mulf %1009, %13 : vector<8x128xf32>
      %1017 = arith.addf %11, %1016 : vector<8x128xf32>
      %1018 = arith.mulf %1009, %1017 : vector<8x128xf32>
      %1019 = arith.addf %3, %1018 : vector<8x128xf32>
      %1020 = arith.mulf %15, %1009 : vector<8x128xf32>
      %1021 = arith.addf %11, %1020 : vector<8x128xf32>
      %1022 = math.log %1003 : vector<8x128xf32>
      %1023 = math.log %1005 : vector<8x128xf32>
      %1024 = arith.mulf %1003, %1005 : vector<8x128xf32>
      %1025 = tpu.reciprocal %1024 {approx = true} : vector<8x128xf32> -> vector<8x128xf32>
      %1026 = arith.mulf %1003, %9 : vector<8x128xf32>
      %1027 = arith.mulf %1003, %1022 : vector<8x128xf32>
      %1028 = arith.mulf %1005, %1023 : vector<8x128xf32>
      %1029 = arith.addf %1027, %1028 : vector<8x128xf32>
      %cst_236 = arith.constant 2.494200e+03 : f32
      %1030 = vector.broadcast %cst_236 : f32 to vector<8x128xf32>
      %1031 = arith.mulf %1030, %1029 : vector<8x128xf32>
      %1032 = arith.addf %1026, %1031 : vector<8x128xf32>
      %1033 = arith.mulf %1024, %1015 : vector<8x128xf32>
      %1034 = arith.addf %1032, %1033 : vector<8x128xf32>
      %1035 = arith.subf %1022, %1023 : vector<8x128xf32>
      %cst_237 = arith.constant 2.494200e+03 : f32
      %1036 = vector.broadcast %cst_237 : f32 to vector<8x128xf32>
      %1037 = arith.mulf %1036, %1035 : vector<8x128xf32>
      %1038 = arith.addf %9, %1037 : vector<8x128xf32>
      %1039 = arith.mulf %1009, %1015 : vector<8x128xf32>
      %1040 = arith.addf %1038, %1039 : vector<8x128xf32>
      %cst_238 = arith.constant 2.000000e+00 : f32
      %1041 = vector.broadcast %cst_238 : f32 to vector<8x128xf32>
      %1042 = arith.mulf %1041, %1024 : vector<8x128xf32>
      %1043 = arith.mulf %1042, %1019 : vector<8x128xf32>
      %1044 = arith.subf %1040, %1043 : vector<8x128xf32>
      %cst_239 = arith.constant 2.494200e+03 : f32
      %1045 = vector.broadcast %cst_239 : f32 to vector<8x128xf32>
      %1046 = arith.mulf %1045, %1025 : vector<8x128xf32>
      %cst_240 = arith.constant 2.000000e+00 : f32
      %1047 = vector.broadcast %cst_240 : f32 to vector<8x128xf32>
      %1048 = arith.mulf %1047, %1015 : vector<8x128xf32>
      %1049 = arith.subf %1046, %1048 : vector<8x128xf32>
      %cst_241 = arith.constant 4.000000e+00 : f32
      %1050 = vector.broadcast %cst_241 : f32 to vector<8x128xf32>
      %1051 = arith.mulf %1050, %1009 : vector<8x128xf32>
      %1052 = arith.mulf %1051, %1019 : vector<8x128xf32>
      %1053 = arith.subf %1049, %1052 : vector<8x128xf32>
      %cst_242 = arith.constant 4.000000e+00 : f32
      %1054 = vector.broadcast %cst_242 : f32 to vector<8x128xf32>
      %1055 = arith.mulf %1054, %1024 : vector<8x128xf32>
      %1056 = arith.mulf %1055, %1021 : vector<8x128xf32>
      %1057 = arith.addf %1053, %1056 : vector<8x128xf32>
      %1058 = arith.subf %1003, %945 : vector<8x128xf32>
      %1059 = arith.subf %1034, %976 : vector<8x128xf32>
      %1060 = arith.subf %1044, %986 : vector<8x128xf32>
      %1061 = arith.mulf %986, %1058 : vector<8x128xf32>
      %1062 = arith.subf %1059, %1061 : vector<8x128xf32>
      %1063 = arith.mulf %1044, %1058 : vector<8x128xf32>
      %1064 = arith.subf %1063, %1059 : vector<8x128xf32>
      %1065 = arith.mulf %1060, %1060 : vector<8x128xf32>
      %1066 = arith.mulf %999, %1057 : vector<8x128xf32>
      %1067 = arith.mulf %1066, %1058 : vector<8x128xf32>
      %1068 = arith.mulf %1067, %1058 : vector<8x128xf32>
      %1069 = arith.subf %1065, %1068 : vector<8x128xf32>
      %1070 = math.absf %1069 : vector<8x128xf32>
      %cst_243 = arith.constant 9.99999996E-13 : f32
      %1071 = vector.broadcast %cst_243 : f32 to vector<8x128xf32>
      %1072 = arith.cmpf olt, %1070, %1071 : vector<8x128xf32>
      %cst_244 = arith.constant 0.000000e+00 : f32
      %1073 = vector.broadcast %cst_244 : f32 to vector<8x128xf32>
      %1074 = arith.cmpf oge, %1069, %1073 : vector<8x128xf32>
      %cst_245 = arith.constant 9.99999996E-13 : f32
      %cst_246 = arith.constant -9.99999996E-13 : f32
      %1075 = vector.broadcast %cst_245 : f32 to vector<8x128xf32>
      %1076 = vector.broadcast %cst_246 : f32 to vector<8x128xf32>
      %1077 = arith.select %1074, %1075, %1076 : vector<8x128xi1>, vector<8x128xf32>
      %1078 = arith.select %1072, %1077, %1069 : vector<8x128xi1>, vector<8x128xf32>
      %1079 = tpu.reciprocal %1078 {approx = true} : vector<8x128xf32> -> vector<8x128xf32>
      %1080 = arith.mulf %1060, %1064 : vector<8x128xf32>
      %1081 = arith.mulf %1057, %1058 : vector<8x128xf32>
      %1082 = arith.mulf %1081, %1062 : vector<8x128xf32>
      %1083 = arith.subf %1080, %1082 : vector<8x128xf32>
      %1084 = arith.mulf %1083, %1079 : vector<8x128xf32>
      %cst_247 = arith.constant -5.000000e-02 : f32
      %cst_248 = arith.constant 5.000000e-02 : f32
      %1085 = vector.broadcast %cst_247 : f32 to vector<8x128xf32>
      %1086 = arith.maximumf %1085, %1084 : vector<8x128xf32>
      %1087 = vector.broadcast %cst_248 : f32 to vector<8x128xf32>
      %1088 = arith.minimumf %1087, %1086 : vector<8x128xf32>
      %1089 = arith.mulf %999, %1058 : vector<8x128xf32>
      %1090 = arith.mulf %1089, %1064 : vector<8x128xf32>
      %1091 = arith.mulf %1060, %1062 : vector<8x128xf32>
      %1092 = arith.subf %1090, %1091 : vector<8x128xf32>
      %1093 = arith.mulf %1092, %1079 : vector<8x128xf32>
      %cst_249 = arith.constant -5.000000e-02 : f32
      %cst_250 = arith.constant 5.000000e-02 : f32
      %1094 = vector.broadcast %cst_249 : f32 to vector<8x128xf32>
      %1095 = arith.maximumf %1094, %1093 : vector<8x128xf32>
      %1096 = vector.broadcast %cst_250 : f32 to vector<8x128xf32>
      %1097 = arith.minimumf %1096, %1095 : vector<8x128xf32>
      %1098 = arith.addf %945, %1088 : vector<8x128xf32>
      %cst_251 = arith.constant 1.000000e-07 : f32
      %cst_252 = arith.constant 0.99999988 : f32
      %1099 = vector.broadcast %cst_251 : f32 to vector<8x128xf32>
      %1100 = arith.maximumf %1099, %1098 : vector<8x128xf32>
      %1101 = vector.broadcast %cst_252 : f32 to vector<8x128xf32>
      %1102 = arith.minimumf %1101, %1100 : vector<8x128xf32>
      %1103 = arith.addf %1003, %1097 : vector<8x128xf32>
      %cst_253 = arith.constant 1.000000e-07 : f32
      %cst_254 = arith.constant 0.99999988 : f32
      %1104 = vector.broadcast %cst_253 : f32 to vector<8x128xf32>
      %1105 = arith.maximumf %1104, %1103 : vector<8x128xf32>
      %1106 = vector.broadcast %cst_254 : f32 to vector<8x128xf32>
      %1107 = arith.minimumf %1106, %1105 : vector<8x128xf32>
      %1108 = arith.subf %1102, %945 : vector<8x128xf32>
      %1109 = math.absf %1108 : vector<8x128xf32>
      %1110 = arith.subf %1107, %1003 : vector<8x128xf32>
      %1111 = math.absf %1110 : vector<8x128xf32>
      %1112 = arith.maximumf %1109, %1111 : vector<8x128xf32>
      %1113 = arith.subf %1102, %934 : vector<8x128xf32>
      %1114 = arith.mulf %941, %1113 : vector<8x128xf32>
      %1115 = arith.addf %934, %1114 : vector<8x128xf32>
      %1116 = arith.subf %1107, %937 : vector<8x128xf32>
      %1117 = arith.mulf %941, %1116 : vector<8x128xf32>
      %1118 = arith.addf %937, %1117 : vector<8x128xf32>
      %cst_255 = arith.constant 9.99999997E-7 : f32
      %1119 = vector.broadcast %cst_255 : f32 to vector<8x128xf32>
      %1120 = arith.cmpf olt, %1112, %1119 : vector<8x128xf32>
      %cst_256 = arith.constant 0.000000e+00 : f32
      %1121 = vector.broadcast %cst_256 : f32 to vector<8x128xf32>
      %1122 = arith.select %1120, %1121, %941 : vector<8x128xi1>, vector<8x128xf32>
      %cst_257 = arith.constant 1.000000e-07 : f32
      %cst_258 = arith.constant 0.99999988 : f32
      %1123 = vector.broadcast %cst_257 : f32 to vector<8x128xf32>
      %1124 = arith.maximumf %1123, %1115 : vector<8x128xf32>
      %1125 = vector.broadcast %cst_258 : f32 to vector<8x128xf32>
      %1126 = arith.minimumf %1125, %1124 : vector<8x128xf32>
      %cst_259 = arith.constant 1.000000e+00 : f32
      %1127 = vector.broadcast %cst_259 : f32 to vector<8x128xf32>
      %1128 = arith.subf %1127, %1126 : vector<8x128xf32>
      %cst_260 = arith.constant 2.000000e+00 : f32
      %1129 = vector.broadcast %cst_260 : f32 to vector<8x128xf32>
      %1130 = arith.mulf %1129, %1126 : vector<8x128xf32>
      %cst_261 = arith.constant 1.000000e+00 : f32
      %1131 = vector.broadcast %cst_261 : f32 to vector<8x128xf32>
      %1132 = arith.subf %1131, %1130 : vector<8x128xf32>
      %1133 = arith.mulf %1132, %7 : vector<8x128xf32>
      %1134 = arith.addf %5, %1133 : vector<8x128xf32>
      %1135 = arith.mulf %1132, %1134 : vector<8x128xf32>
      %1136 = arith.addf %3, %1135 : vector<8x128xf32>
      %1137 = arith.mulf %1132, %1136 : vector<8x128xf32>
      %1138 = arith.addf %1, %1137 : vector<8x128xf32>
      %1139 = arith.mulf %1132, %13 : vector<8x128xf32>
      %1140 = arith.addf %11, %1139 : vector<8x128xf32>
      %1141 = arith.mulf %1132, %1140 : vector<8x128xf32>
      %1142 = arith.addf %3, %1141 : vector<8x128xf32>
      %1143 = arith.mulf %15, %1132 : vector<8x128xf32>
      %1144 = arith.addf %11, %1143 : vector<8x128xf32>
      %1145 = math.log %1126 : vector<8x128xf32>
      %1146 = math.log %1128 : vector<8x128xf32>
      %1147 = arith.mulf %1126, %1128 : vector<8x128xf32>
      %1148 = tpu.reciprocal %1147 {approx = true} : vector<8x128xf32> -> vector<8x128xf32>
      %1149 = arith.mulf %1126, %9 : vector<8x128xf32>
      %1150 = arith.mulf %1126, %1145 : vector<8x128xf32>
      %1151 = arith.mulf %1128, %1146 : vector<8x128xf32>
      %1152 = arith.addf %1150, %1151 : vector<8x128xf32>
      %cst_262 = arith.constant 2.494200e+03 : f32
      %1153 = vector.broadcast %cst_262 : f32 to vector<8x128xf32>
      %1154 = arith.mulf %1153, %1152 : vector<8x128xf32>
      %1155 = arith.addf %1149, %1154 : vector<8x128xf32>
      %1156 = arith.mulf %1147, %1138 : vector<8x128xf32>
      %1157 = arith.addf %1155, %1156 : vector<8x128xf32>
      %1158 = arith.subf %1145, %1146 : vector<8x128xf32>
      %cst_263 = arith.constant 2.494200e+03 : f32
      %1159 = vector.broadcast %cst_263 : f32 to vector<8x128xf32>
      %1160 = arith.mulf %1159, %1158 : vector<8x128xf32>
      %1161 = arith.addf %9, %1160 : vector<8x128xf32>
      %1162 = arith.mulf %1132, %1138 : vector<8x128xf32>
      %1163 = arith.addf %1161, %1162 : vector<8x128xf32>
      %cst_264 = arith.constant 2.000000e+00 : f32
      %1164 = vector.broadcast %cst_264 : f32 to vector<8x128xf32>
      %1165 = arith.mulf %1164, %1147 : vector<8x128xf32>
      %1166 = arith.mulf %1165, %1142 : vector<8x128xf32>
      %1167 = arith.subf %1163, %1166 : vector<8x128xf32>
      %cst_265 = arith.constant 2.494200e+03 : f32
      %1168 = vector.broadcast %cst_265 : f32 to vector<8x128xf32>
      %1169 = arith.mulf %1168, %1148 : vector<8x128xf32>
      %cst_266 = arith.constant 2.000000e+00 : f32
      %1170 = vector.broadcast %cst_266 : f32 to vector<8x128xf32>
      %1171 = arith.mulf %1170, %1138 : vector<8x128xf32>
      %1172 = arith.subf %1169, %1171 : vector<8x128xf32>
      %cst_267 = arith.constant 4.000000e+00 : f32
      %1173 = vector.broadcast %cst_267 : f32 to vector<8x128xf32>
      %1174 = arith.mulf %1173, %1132 : vector<8x128xf32>
      %1175 = arith.mulf %1174, %1142 : vector<8x128xf32>
      %1176 = arith.subf %1172, %1175 : vector<8x128xf32>
      %cst_268 = arith.constant 4.000000e+00 : f32
      %1177 = vector.broadcast %cst_268 : f32 to vector<8x128xf32>
      %1178 = arith.mulf %1177, %1147 : vector<8x128xf32>
      %1179 = arith.mulf %1178, %1144 : vector<8x128xf32>
      %1180 = arith.addf %1176, %1179 : vector<8x128xf32>
      %cst_269 = arith.constant 1.000000e-07 : f32
      %cst_270 = arith.constant 0.99999988 : f32
      %1181 = vector.broadcast %cst_269 : f32 to vector<8x128xf32>
      %1182 = arith.maximumf %1181, %1118 : vector<8x128xf32>
      %1183 = vector.broadcast %cst_270 : f32 to vector<8x128xf32>
      %1184 = arith.minimumf %1183, %1182 : vector<8x128xf32>
      %cst_271 = arith.constant 1.000000e+00 : f32
      %1185 = vector.broadcast %cst_271 : f32 to vector<8x128xf32>
      %1186 = arith.subf %1185, %1184 : vector<8x128xf32>
      %cst_272 = arith.constant 2.000000e+00 : f32
      %1187 = vector.broadcast %cst_272 : f32 to vector<8x128xf32>
      %1188 = arith.mulf %1187, %1184 : vector<8x128xf32>
      %cst_273 = arith.constant 1.000000e+00 : f32
      %1189 = vector.broadcast %cst_273 : f32 to vector<8x128xf32>
      %1190 = arith.subf %1189, %1188 : vector<8x128xf32>
      %1191 = arith.mulf %1190, %7 : vector<8x128xf32>
      %1192 = arith.addf %5, %1191 : vector<8x128xf32>
      %1193 = arith.mulf %1190, %1192 : vector<8x128xf32>
      %1194 = arith.addf %3, %1193 : vector<8x128xf32>
      %1195 = arith.mulf %1190, %1194 : vector<8x128xf32>
      %1196 = arith.addf %1, %1195 : vector<8x128xf32>
      %1197 = arith.mulf %1190, %13 : vector<8x128xf32>
      %1198 = arith.addf %11, %1197 : vector<8x128xf32>
      %1199 = arith.mulf %1190, %1198 : vector<8x128xf32>
      %1200 = arith.addf %3, %1199 : vector<8x128xf32>
      %1201 = arith.mulf %15, %1190 : vector<8x128xf32>
      %1202 = arith.addf %11, %1201 : vector<8x128xf32>
      %1203 = math.log %1184 : vector<8x128xf32>
      %1204 = math.log %1186 : vector<8x128xf32>
      %1205 = arith.mulf %1184, %1186 : vector<8x128xf32>
      %1206 = tpu.reciprocal %1205 {approx = true} : vector<8x128xf32> -> vector<8x128xf32>
      %1207 = arith.mulf %1184, %9 : vector<8x128xf32>
      %1208 = arith.mulf %1184, %1203 : vector<8x128xf32>
      %1209 = arith.mulf %1186, %1204 : vector<8x128xf32>
      %1210 = arith.addf %1208, %1209 : vector<8x128xf32>
      %cst_274 = arith.constant 2.494200e+03 : f32
      %1211 = vector.broadcast %cst_274 : f32 to vector<8x128xf32>
      %1212 = arith.mulf %1211, %1210 : vector<8x128xf32>
      %1213 = arith.addf %1207, %1212 : vector<8x128xf32>
      %1214 = arith.mulf %1205, %1196 : vector<8x128xf32>
      %1215 = arith.addf %1213, %1214 : vector<8x128xf32>
      %1216 = arith.subf %1203, %1204 : vector<8x128xf32>
      %cst_275 = arith.constant 2.494200e+03 : f32
      %1217 = vector.broadcast %cst_275 : f32 to vector<8x128xf32>
      %1218 = arith.mulf %1217, %1216 : vector<8x128xf32>
      %1219 = arith.addf %9, %1218 : vector<8x128xf32>
      %1220 = arith.mulf %1190, %1196 : vector<8x128xf32>
      %1221 = arith.addf %1219, %1220 : vector<8x128xf32>
      %cst_276 = arith.constant 2.000000e+00 : f32
      %1222 = vector.broadcast %cst_276 : f32 to vector<8x128xf32>
      %1223 = arith.mulf %1222, %1205 : vector<8x128xf32>
      %1224 = arith.mulf %1223, %1200 : vector<8x128xf32>
      %1225 = arith.subf %1221, %1224 : vector<8x128xf32>
      %cst_277 = arith.constant 2.494200e+03 : f32
      %1226 = vector.broadcast %cst_277 : f32 to vector<8x128xf32>
      %1227 = arith.mulf %1226, %1206 : vector<8x128xf32>
      %cst_278 = arith.constant 2.000000e+00 : f32
      %1228 = vector.broadcast %cst_278 : f32 to vector<8x128xf32>
      %1229 = arith.mulf %1228, %1196 : vector<8x128xf32>
      %1230 = arith.subf %1227, %1229 : vector<8x128xf32>
      %cst_279 = arith.constant 4.000000e+00 : f32
      %1231 = vector.broadcast %cst_279 : f32 to vector<8x128xf32>
      %1232 = arith.mulf %1231, %1190 : vector<8x128xf32>
      %1233 = arith.mulf %1232, %1200 : vector<8x128xf32>
      %1234 = arith.subf %1230, %1233 : vector<8x128xf32>
      %cst_280 = arith.constant 4.000000e+00 : f32
      %1235 = vector.broadcast %cst_280 : f32 to vector<8x128xf32>
      %1236 = arith.mulf %1235, %1205 : vector<8x128xf32>
      %1237 = arith.mulf %1236, %1202 : vector<8x128xf32>
      %1238 = arith.addf %1234, %1237 : vector<8x128xf32>
      %1239 = arith.subf %1184, %1126 : vector<8x128xf32>
      %1240 = arith.subf %1215, %1157 : vector<8x128xf32>
      %1241 = arith.subf %1225, %1167 : vector<8x128xf32>
      %1242 = arith.mulf %1167, %1239 : vector<8x128xf32>
      %1243 = arith.subf %1240, %1242 : vector<8x128xf32>
      %1244 = arith.mulf %1225, %1239 : vector<8x128xf32>
      %1245 = arith.subf %1244, %1240 : vector<8x128xf32>
      %1246 = arith.mulf %1241, %1241 : vector<8x128xf32>
      %1247 = arith.mulf %1180, %1238 : vector<8x128xf32>
      %1248 = arith.mulf %1247, %1239 : vector<8x128xf32>
      %1249 = arith.mulf %1248, %1239 : vector<8x128xf32>
      %1250 = arith.subf %1246, %1249 : vector<8x128xf32>
      %1251 = math.absf %1250 : vector<8x128xf32>
      %cst_281 = arith.constant 9.99999996E-13 : f32
      %1252 = vector.broadcast %cst_281 : f32 to vector<8x128xf32>
      %1253 = arith.cmpf olt, %1251, %1252 : vector<8x128xf32>
      %cst_282 = arith.constant 0.000000e+00 : f32
      %1254 = vector.broadcast %cst_282 : f32 to vector<8x128xf32>
      %1255 = arith.cmpf oge, %1250, %1254 : vector<8x128xf32>
      %cst_283 = arith.constant 9.99999996E-13 : f32
      %cst_284 = arith.constant -9.99999996E-13 : f32
      %1256 = vector.broadcast %cst_283 : f32 to vector<8x128xf32>
      %1257 = vector.broadcast %cst_284 : f32 to vector<8x128xf32>
      %1258 = arith.select %1255, %1256, %1257 : vector<8x128xi1>, vector<8x128xf32>
      %1259 = arith.select %1253, %1258, %1250 : vector<8x128xi1>, vector<8x128xf32>
      %1260 = tpu.reciprocal %1259 {approx = true} : vector<8x128xf32> -> vector<8x128xf32>
      %1261 = arith.mulf %1241, %1245 : vector<8x128xf32>
      %1262 = arith.mulf %1238, %1239 : vector<8x128xf32>
      %1263 = arith.mulf %1262, %1243 : vector<8x128xf32>
      %1264 = arith.subf %1261, %1263 : vector<8x128xf32>
      %1265 = arith.mulf %1264, %1260 : vector<8x128xf32>
      %cst_285 = arith.constant -5.000000e-02 : f32
      %cst_286 = arith.constant 5.000000e-02 : f32
      %1266 = vector.broadcast %cst_285 : f32 to vector<8x128xf32>
      %1267 = arith.maximumf %1266, %1265 : vector<8x128xf32>
      %1268 = vector.broadcast %cst_286 : f32 to vector<8x128xf32>
      %1269 = arith.minimumf %1268, %1267 : vector<8x128xf32>
      %1270 = arith.mulf %1180, %1239 : vector<8x128xf32>
      %1271 = arith.mulf %1270, %1245 : vector<8x128xf32>
      %1272 = arith.mulf %1241, %1243 : vector<8x128xf32>
      %1273 = arith.subf %1271, %1272 : vector<8x128xf32>
      %1274 = arith.mulf %1273, %1260 : vector<8x128xf32>
      %cst_287 = arith.constant -5.000000e-02 : f32
      %cst_288 = arith.constant 5.000000e-02 : f32
      %1275 = vector.broadcast %cst_287 : f32 to vector<8x128xf32>
      %1276 = arith.maximumf %1275, %1274 : vector<8x128xf32>
      %1277 = vector.broadcast %cst_288 : f32 to vector<8x128xf32>
      %1278 = arith.minimumf %1277, %1276 : vector<8x128xf32>
      %1279 = arith.addf %1126, %1269 : vector<8x128xf32>
      %cst_289 = arith.constant 1.000000e-07 : f32
      %cst_290 = arith.constant 0.99999988 : f32
      %1280 = vector.broadcast %cst_289 : f32 to vector<8x128xf32>
      %1281 = arith.maximumf %1280, %1279 : vector<8x128xf32>
      %1282 = vector.broadcast %cst_290 : f32 to vector<8x128xf32>
      %1283 = arith.minimumf %1282, %1281 : vector<8x128xf32>
      %1284 = arith.addf %1184, %1278 : vector<8x128xf32>
      %cst_291 = arith.constant 1.000000e-07 : f32
      %cst_292 = arith.constant 0.99999988 : f32
      %1285 = vector.broadcast %cst_291 : f32 to vector<8x128xf32>
      %1286 = arith.maximumf %1285, %1284 : vector<8x128xf32>
      %1287 = vector.broadcast %cst_292 : f32 to vector<8x128xf32>
      %1288 = arith.minimumf %1287, %1286 : vector<8x128xf32>
      %1289 = arith.subf %1283, %1126 : vector<8x128xf32>
      %1290 = math.absf %1289 : vector<8x128xf32>
      %1291 = arith.subf %1288, %1184 : vector<8x128xf32>
      %1292 = math.absf %1291 : vector<8x128xf32>
      %1293 = arith.maximumf %1290, %1292 : vector<8x128xf32>
      %1294 = arith.subf %1283, %1115 : vector<8x128xf32>
      %1295 = arith.mulf %1122, %1294 : vector<8x128xf32>
      %1296 = arith.addf %1115, %1295 : vector<8x128xf32>
      %1297 = arith.subf %1288, %1118 : vector<8x128xf32>
      %1298 = arith.mulf %1122, %1297 : vector<8x128xf32>
      %1299 = arith.addf %1118, %1298 : vector<8x128xf32>
      %cst_293 = arith.constant 9.99999997E-7 : f32
      %1300 = vector.broadcast %cst_293 : f32 to vector<8x128xf32>
      %1301 = arith.cmpf olt, %1293, %1300 : vector<8x128xf32>
      %cst_294 = arith.constant 0.000000e+00 : f32
      %1302 = vector.broadcast %cst_294 : f32 to vector<8x128xf32>
      %1303 = arith.select %1301, %1302, %1122 : vector<8x128xi1>, vector<8x128xf32>
      %cst_295 = arith.constant 1.000000e-07 : f32
      %cst_296 = arith.constant 0.99999988 : f32
      %1304 = vector.broadcast %cst_295 : f32 to vector<8x128xf32>
      %1305 = arith.maximumf %1304, %1296 : vector<8x128xf32>
      %1306 = vector.broadcast %cst_296 : f32 to vector<8x128xf32>
      %1307 = arith.minimumf %1306, %1305 : vector<8x128xf32>
      %cst_297 = arith.constant 1.000000e+00 : f32
      %1308 = vector.broadcast %cst_297 : f32 to vector<8x128xf32>
      %1309 = arith.subf %1308, %1307 : vector<8x128xf32>
      %cst_298 = arith.constant 2.000000e+00 : f32
      %1310 = vector.broadcast %cst_298 : f32 to vector<8x128xf32>
      %1311 = arith.mulf %1310, %1307 : vector<8x128xf32>
      %cst_299 = arith.constant 1.000000e+00 : f32
      %1312 = vector.broadcast %cst_299 : f32 to vector<8x128xf32>
      %1313 = arith.subf %1312, %1311 : vector<8x128xf32>
      %1314 = arith.mulf %1313, %7 : vector<8x128xf32>
      %1315 = arith.addf %5, %1314 : vector<8x128xf32>
      %1316 = arith.mulf %1313, %1315 : vector<8x128xf32>
      %1317 = arith.addf %3, %1316 : vector<8x128xf32>
      %1318 = arith.mulf %1313, %1317 : vector<8x128xf32>
      %1319 = arith.addf %1, %1318 : vector<8x128xf32>
      %1320 = arith.mulf %1313, %13 : vector<8x128xf32>
      %1321 = arith.addf %11, %1320 : vector<8x128xf32>
      %1322 = arith.mulf %1313, %1321 : vector<8x128xf32>
      %1323 = arith.addf %3, %1322 : vector<8x128xf32>
      %1324 = arith.mulf %15, %1313 : vector<8x128xf32>
      %1325 = arith.addf %11, %1324 : vector<8x128xf32>
      %1326 = math.log %1307 : vector<8x128xf32>
      %1327 = math.log %1309 : vector<8x128xf32>
      %1328 = arith.mulf %1307, %1309 : vector<8x128xf32>
      %1329 = tpu.reciprocal %1328 {approx = true} : vector<8x128xf32> -> vector<8x128xf32>
      %1330 = arith.mulf %1307, %9 : vector<8x128xf32>
      %1331 = arith.mulf %1307, %1326 : vector<8x128xf32>
      %1332 = arith.mulf %1309, %1327 : vector<8x128xf32>
      %1333 = arith.addf %1331, %1332 : vector<8x128xf32>
      %cst_300 = arith.constant 2.494200e+03 : f32
      %1334 = vector.broadcast %cst_300 : f32 to vector<8x128xf32>
      %1335 = arith.mulf %1334, %1333 : vector<8x128xf32>
      %1336 = arith.addf %1330, %1335 : vector<8x128xf32>
      %1337 = arith.mulf %1328, %1319 : vector<8x128xf32>
      %1338 = arith.addf %1336, %1337 : vector<8x128xf32>
      %1339 = arith.subf %1326, %1327 : vector<8x128xf32>
      %cst_301 = arith.constant 2.494200e+03 : f32
      %1340 = vector.broadcast %cst_301 : f32 to vector<8x128xf32>
      %1341 = arith.mulf %1340, %1339 : vector<8x128xf32>
      %1342 = arith.addf %9, %1341 : vector<8x128xf32>
      %1343 = arith.mulf %1313, %1319 : vector<8x128xf32>
      %1344 = arith.addf %1342, %1343 : vector<8x128xf32>
      %cst_302 = arith.constant 2.000000e+00 : f32
      %1345 = vector.broadcast %cst_302 : f32 to vector<8x128xf32>
      %1346 = arith.mulf %1345, %1328 : vector<8x128xf32>
      %1347 = arith.mulf %1346, %1323 : vector<8x128xf32>
      %1348 = arith.subf %1344, %1347 : vector<8x128xf32>
      %cst_303 = arith.constant 2.494200e+03 : f32
      %1349 = vector.broadcast %cst_303 : f32 to vector<8x128xf32>
      %1350 = arith.mulf %1349, %1329 : vector<8x128xf32>
      %cst_304 = arith.constant 2.000000e+00 : f32
      %1351 = vector.broadcast %cst_304 : f32 to vector<8x128xf32>
      %1352 = arith.mulf %1351, %1319 : vector<8x128xf32>
      %1353 = arith.subf %1350, %1352 : vector<8x128xf32>
      %cst_305 = arith.constant 4.000000e+00 : f32
      %1354 = vector.broadcast %cst_305 : f32 to vector<8x128xf32>
      %1355 = arith.mulf %1354, %1313 : vector<8x128xf32>
      %1356 = arith.mulf %1355, %1323 : vector<8x128xf32>
      %1357 = arith.subf %1353, %1356 : vector<8x128xf32>
      %cst_306 = arith.constant 4.000000e+00 : f32
      %1358 = vector.broadcast %cst_306 : f32 to vector<8x128xf32>
      %1359 = arith.mulf %1358, %1328 : vector<8x128xf32>
      %1360 = arith.mulf %1359, %1325 : vector<8x128xf32>
      %1361 = arith.addf %1357, %1360 : vector<8x128xf32>
      %cst_307 = arith.constant 1.000000e-07 : f32
      %cst_308 = arith.constant 0.99999988 : f32
      %1362 = vector.broadcast %cst_307 : f32 to vector<8x128xf32>
      %1363 = arith.maximumf %1362, %1299 : vector<8x128xf32>
      %1364 = vector.broadcast %cst_308 : f32 to vector<8x128xf32>
      %1365 = arith.minimumf %1364, %1363 : vector<8x128xf32>
      %cst_309 = arith.constant 1.000000e+00 : f32
      %1366 = vector.broadcast %cst_309 : f32 to vector<8x128xf32>
      %1367 = arith.subf %1366, %1365 : vector<8x128xf32>
      %cst_310 = arith.constant 2.000000e+00 : f32
      %1368 = vector.broadcast %cst_310 : f32 to vector<8x128xf32>
      %1369 = arith.mulf %1368, %1365 : vector<8x128xf32>
      %cst_311 = arith.constant 1.000000e+00 : f32
      %1370 = vector.broadcast %cst_311 : f32 to vector<8x128xf32>
      %1371 = arith.subf %1370, %1369 : vector<8x128xf32>
      %1372 = arith.mulf %1371, %7 : vector<8x128xf32>
      %1373 = arith.addf %5, %1372 : vector<8x128xf32>
      %1374 = arith.mulf %1371, %1373 : vector<8x128xf32>
      %1375 = arith.addf %3, %1374 : vector<8x128xf32>
      %1376 = arith.mulf %1371, %1375 : vector<8x128xf32>
      %1377 = arith.addf %1, %1376 : vector<8x128xf32>
      %1378 = arith.mulf %1371, %13 : vector<8x128xf32>
      %1379 = arith.addf %11, %1378 : vector<8x128xf32>
      %1380 = arith.mulf %1371, %1379 : vector<8x128xf32>
      %1381 = arith.addf %3, %1380 : vector<8x128xf32>
      %1382 = arith.mulf %15, %1371 : vector<8x128xf32>
      %1383 = arith.addf %11, %1382 : vector<8x128xf32>
      %1384 = math.log %1365 : vector<8x128xf32>
      %1385 = math.log %1367 : vector<8x128xf32>
      %1386 = arith.mulf %1365, %1367 : vector<8x128xf32>
      %1387 = tpu.reciprocal %1386 {approx = true} : vector<8x128xf32> -> vector<8x128xf32>
      %1388 = arith.mulf %1365, %9 : vector<8x128xf32>
      %1389 = arith.mulf %1365, %1384 : vector<8x128xf32>
      %1390 = arith.mulf %1367, %1385 : vector<8x128xf32>
      %1391 = arith.addf %1389, %1390 : vector<8x128xf32>
      %cst_312 = arith.constant 2.494200e+03 : f32
      %1392 = vector.broadcast %cst_312 : f32 to vector<8x128xf32>
      %1393 = arith.mulf %1392, %1391 : vector<8x128xf32>
      %1394 = arith.addf %1388, %1393 : vector<8x128xf32>
      %1395 = arith.mulf %1386, %1377 : vector<8x128xf32>
      %1396 = arith.addf %1394, %1395 : vector<8x128xf32>
      %1397 = arith.subf %1384, %1385 : vector<8x128xf32>
      %cst_313 = arith.constant 2.494200e+03 : f32
      %1398 = vector.broadcast %cst_313 : f32 to vector<8x128xf32>
      %1399 = arith.mulf %1398, %1397 : vector<8x128xf32>
      %1400 = arith.addf %9, %1399 : vector<8x128xf32>
      %1401 = arith.mulf %1371, %1377 : vector<8x128xf32>
      %1402 = arith.addf %1400, %1401 : vector<8x128xf32>
      %cst_314 = arith.constant 2.000000e+00 : f32
      %1403 = vector.broadcast %cst_314 : f32 to vector<8x128xf32>
      %1404 = arith.mulf %1403, %1386 : vector<8x128xf32>
      %1405 = arith.mulf %1404, %1381 : vector<8x128xf32>
      %1406 = arith.subf %1402, %1405 : vector<8x128xf32>
      %cst_315 = arith.constant 2.494200e+03 : f32
      %1407 = vector.broadcast %cst_315 : f32 to vector<8x128xf32>
      %1408 = arith.mulf %1407, %1387 : vector<8x128xf32>
      %cst_316 = arith.constant 2.000000e+00 : f32
      %1409 = vector.broadcast %cst_316 : f32 to vector<8x128xf32>
      %1410 = arith.mulf %1409, %1377 : vector<8x128xf32>
      %1411 = arith.subf %1408, %1410 : vector<8x128xf32>
      %cst_317 = arith.constant 4.000000e+00 : f32
      %1412 = vector.broadcast %cst_317 : f32 to vector<8x128xf32>
      %1413 = arith.mulf %1412, %1371 : vector<8x128xf32>
      %1414 = arith.mulf %1413, %1381 : vector<8x128xf32>
      %1415 = arith.subf %1411, %1414 : vector<8x128xf32>
      %cst_318 = arith.constant 4.000000e+00 : f32
      %1416 = vector.broadcast %cst_318 : f32 to vector<8x128xf32>
      %1417 = arith.mulf %1416, %1386 : vector<8x128xf32>
      %1418 = arith.mulf %1417, %1383 : vector<8x128xf32>
      %1419 = arith.addf %1415, %1418 : vector<8x128xf32>
      %1420 = arith.subf %1365, %1307 : vector<8x128xf32>
      %1421 = arith.subf %1396, %1338 : vector<8x128xf32>
      %1422 = arith.subf %1406, %1348 : vector<8x128xf32>
      %1423 = arith.mulf %1348, %1420 : vector<8x128xf32>
      %1424 = arith.subf %1421, %1423 : vector<8x128xf32>
      %1425 = arith.mulf %1406, %1420 : vector<8x128xf32>
      %1426 = arith.subf %1425, %1421 : vector<8x128xf32>
      %1427 = arith.mulf %1422, %1422 : vector<8x128xf32>
      %1428 = arith.mulf %1361, %1419 : vector<8x128xf32>
      %1429 = arith.mulf %1428, %1420 : vector<8x128xf32>
      %1430 = arith.mulf %1429, %1420 : vector<8x128xf32>
      %1431 = arith.subf %1427, %1430 : vector<8x128xf32>
      %1432 = math.absf %1431 : vector<8x128xf32>
      %cst_319 = arith.constant 9.99999996E-13 : f32
      %1433 = vector.broadcast %cst_319 : f32 to vector<8x128xf32>
      %1434 = arith.cmpf olt, %1432, %1433 : vector<8x128xf32>
      %cst_320 = arith.constant 0.000000e+00 : f32
      %1435 = vector.broadcast %cst_320 : f32 to vector<8x128xf32>
      %1436 = arith.cmpf oge, %1431, %1435 : vector<8x128xf32>
      %cst_321 = arith.constant 9.99999996E-13 : f32
      %cst_322 = arith.constant -9.99999996E-13 : f32
      %1437 = vector.broadcast %cst_321 : f32 to vector<8x128xf32>
      %1438 = vector.broadcast %cst_322 : f32 to vector<8x128xf32>
      %1439 = arith.select %1436, %1437, %1438 : vector<8x128xi1>, vector<8x128xf32>
      %1440 = arith.select %1434, %1439, %1431 : vector<8x128xi1>, vector<8x128xf32>
      %1441 = tpu.reciprocal %1440 {approx = true} : vector<8x128xf32> -> vector<8x128xf32>
      %1442 = arith.mulf %1422, %1426 : vector<8x128xf32>
      %1443 = arith.mulf %1419, %1420 : vector<8x128xf32>
      %1444 = arith.mulf %1443, %1424 : vector<8x128xf32>
      %1445 = arith.subf %1442, %1444 : vector<8x128xf32>
      %1446 = arith.mulf %1445, %1441 : vector<8x128xf32>
      %cst_323 = arith.constant -5.000000e-02 : f32
      %cst_324 = arith.constant 5.000000e-02 : f32
      %1447 = vector.broadcast %cst_323 : f32 to vector<8x128xf32>
      %1448 = arith.maximumf %1447, %1446 : vector<8x128xf32>
      %1449 = vector.broadcast %cst_324 : f32 to vector<8x128xf32>
      %1450 = arith.minimumf %1449, %1448 : vector<8x128xf32>
      %1451 = arith.mulf %1361, %1420 : vector<8x128xf32>
      %1452 = arith.mulf %1451, %1426 : vector<8x128xf32>
      %1453 = arith.mulf %1422, %1424 : vector<8x128xf32>
      %1454 = arith.subf %1452, %1453 : vector<8x128xf32>
      %1455 = arith.mulf %1454, %1441 : vector<8x128xf32>
      %cst_325 = arith.constant -5.000000e-02 : f32
      %cst_326 = arith.constant 5.000000e-02 : f32
      %1456 = vector.broadcast %cst_325 : f32 to vector<8x128xf32>
      %1457 = arith.maximumf %1456, %1455 : vector<8x128xf32>
      %1458 = vector.broadcast %cst_326 : f32 to vector<8x128xf32>
      %1459 = arith.minimumf %1458, %1457 : vector<8x128xf32>
      %1460 = arith.addf %1307, %1450 : vector<8x128xf32>
      %cst_327 = arith.constant 1.000000e-07 : f32
      %cst_328 = arith.constant 0.99999988 : f32
      %1461 = vector.broadcast %cst_327 : f32 to vector<8x128xf32>
      %1462 = arith.maximumf %1461, %1460 : vector<8x128xf32>
      %1463 = vector.broadcast %cst_328 : f32 to vector<8x128xf32>
      %1464 = arith.minimumf %1463, %1462 : vector<8x128xf32>
      %1465 = arith.addf %1365, %1459 : vector<8x128xf32>
      %cst_329 = arith.constant 1.000000e-07 : f32
      %cst_330 = arith.constant 0.99999988 : f32
      %1466 = vector.broadcast %cst_329 : f32 to vector<8x128xf32>
      %1467 = arith.maximumf %1466, %1465 : vector<8x128xf32>
      %1468 = vector.broadcast %cst_330 : f32 to vector<8x128xf32>
      %1469 = arith.minimumf %1468, %1467 : vector<8x128xf32>
      %1470 = arith.subf %1464, %1307 : vector<8x128xf32>
      %1471 = math.absf %1470 : vector<8x128xf32>
      %1472 = arith.subf %1469, %1365 : vector<8x128xf32>
      %1473 = math.absf %1472 : vector<8x128xf32>
      %1474 = arith.maximumf %1471, %1473 : vector<8x128xf32>
      %1475 = arith.subf %1464, %1296 : vector<8x128xf32>
      %1476 = arith.mulf %1303, %1475 : vector<8x128xf32>
      %1477 = arith.addf %1296, %1476 : vector<8x128xf32>
      %1478 = arith.subf %1469, %1299 : vector<8x128xf32>
      %1479 = arith.mulf %1303, %1478 : vector<8x128xf32>
      %1480 = arith.addf %1299, %1479 : vector<8x128xf32>
      %cst_331 = arith.constant 9.99999997E-7 : f32
      %1481 = vector.broadcast %cst_331 : f32 to vector<8x128xf32>
      %1482 = arith.cmpf olt, %1474, %1481 : vector<8x128xf32>
      %cst_332 = arith.constant 0.000000e+00 : f32
      %1483 = vector.broadcast %cst_332 : f32 to vector<8x128xf32>
      %1484 = arith.select %1482, %1483, %1303 : vector<8x128xi1>, vector<8x128xf32>
      %cst_333 = arith.constant 1.000000e-07 : f32
      %cst_334 = arith.constant 0.99999988 : f32
      %1485 = vector.broadcast %cst_333 : f32 to vector<8x128xf32>
      %1486 = arith.maximumf %1485, %1477 : vector<8x128xf32>
      %1487 = vector.broadcast %cst_334 : f32 to vector<8x128xf32>
      %1488 = arith.minimumf %1487, %1486 : vector<8x128xf32>
      %cst_335 = arith.constant 1.000000e+00 : f32
      %1489 = vector.broadcast %cst_335 : f32 to vector<8x128xf32>
      %1490 = arith.subf %1489, %1488 : vector<8x128xf32>
      %cst_336 = arith.constant 2.000000e+00 : f32
      %1491 = vector.broadcast %cst_336 : f32 to vector<8x128xf32>
      %1492 = arith.mulf %1491, %1488 : vector<8x128xf32>
      %cst_337 = arith.constant 1.000000e+00 : f32
      %1493 = vector.broadcast %cst_337 : f32 to vector<8x128xf32>
      %1494 = arith.subf %1493, %1492 : vector<8x128xf32>
      %1495 = arith.mulf %1494, %7 : vector<8x128xf32>
      %1496 = arith.addf %5, %1495 : vector<8x128xf32>
      %1497 = arith.mulf %1494, %1496 : vector<8x128xf32>
      %1498 = arith.addf %3, %1497 : vector<8x128xf32>
      %1499 = arith.mulf %1494, %1498 : vector<8x128xf32>
      %1500 = arith.addf %1, %1499 : vector<8x128xf32>
      %1501 = arith.mulf %1494, %13 : vector<8x128xf32>
      %1502 = arith.addf %11, %1501 : vector<8x128xf32>
      %1503 = arith.mulf %1494, %1502 : vector<8x128xf32>
      %1504 = arith.addf %3, %1503 : vector<8x128xf32>
      %1505 = arith.mulf %15, %1494 : vector<8x128xf32>
      %1506 = arith.addf %11, %1505 : vector<8x128xf32>
      %1507 = math.log %1488 : vector<8x128xf32>
      %1508 = math.log %1490 : vector<8x128xf32>
      %1509 = arith.mulf %1488, %1490 : vector<8x128xf32>
      %1510 = tpu.reciprocal %1509 {approx = true} : vector<8x128xf32> -> vector<8x128xf32>
      %1511 = arith.mulf %1488, %9 : vector<8x128xf32>
      %1512 = arith.mulf %1488, %1507 : vector<8x128xf32>
      %1513 = arith.mulf %1490, %1508 : vector<8x128xf32>
      %1514 = arith.addf %1512, %1513 : vector<8x128xf32>
      %cst_338 = arith.constant 2.494200e+03 : f32
      %1515 = vector.broadcast %cst_338 : f32 to vector<8x128xf32>
      %1516 = arith.mulf %1515, %1514 : vector<8x128xf32>
      %1517 = arith.addf %1511, %1516 : vector<8x128xf32>
      %1518 = arith.mulf %1509, %1500 : vector<8x128xf32>
      %1519 = arith.addf %1517, %1518 : vector<8x128xf32>
      %1520 = arith.subf %1507, %1508 : vector<8x128xf32>
      %cst_339 = arith.constant 2.494200e+03 : f32
      %1521 = vector.broadcast %cst_339 : f32 to vector<8x128xf32>
      %1522 = arith.mulf %1521, %1520 : vector<8x128xf32>
      %1523 = arith.addf %9, %1522 : vector<8x128xf32>
      %1524 = arith.mulf %1494, %1500 : vector<8x128xf32>
      %1525 = arith.addf %1523, %1524 : vector<8x128xf32>
      %cst_340 = arith.constant 2.000000e+00 : f32
      %1526 = vector.broadcast %cst_340 : f32 to vector<8x128xf32>
      %1527 = arith.mulf %1526, %1509 : vector<8x128xf32>
      %1528 = arith.mulf %1527, %1504 : vector<8x128xf32>
      %1529 = arith.subf %1525, %1528 : vector<8x128xf32>
      %cst_341 = arith.constant 2.494200e+03 : f32
      %1530 = vector.broadcast %cst_341 : f32 to vector<8x128xf32>
      %1531 = arith.mulf %1530, %1510 : vector<8x128xf32>
      %cst_342 = arith.constant 2.000000e+00 : f32
      %1532 = vector.broadcast %cst_342 : f32 to vector<8x128xf32>
      %1533 = arith.mulf %1532, %1500 : vector<8x128xf32>
      %1534 = arith.subf %1531, %1533 : vector<8x128xf32>
      %cst_343 = arith.constant 4.000000e+00 : f32
      %1535 = vector.broadcast %cst_343 : f32 to vector<8x128xf32>
      %1536 = arith.mulf %1535, %1494 : vector<8x128xf32>
      %1537 = arith.mulf %1536, %1504 : vector<8x128xf32>
      %1538 = arith.subf %1534, %1537 : vector<8x128xf32>
      %cst_344 = arith.constant 4.000000e+00 : f32
      %1539 = vector.broadcast %cst_344 : f32 to vector<8x128xf32>
      %1540 = arith.mulf %1539, %1509 : vector<8x128xf32>
      %1541 = arith.mulf %1540, %1506 : vector<8x128xf32>
      %1542 = arith.addf %1538, %1541 : vector<8x128xf32>
      %cst_345 = arith.constant 1.000000e-07 : f32
      %cst_346 = arith.constant 0.99999988 : f32
      %1543 = vector.broadcast %cst_345 : f32 to vector<8x128xf32>
      %1544 = arith.maximumf %1543, %1480 : vector<8x128xf32>
      %1545 = vector.broadcast %cst_346 : f32 to vector<8x128xf32>
      %1546 = arith.minimumf %1545, %1544 : vector<8x128xf32>
      %cst_347 = arith.constant 1.000000e+00 : f32
      %1547 = vector.broadcast %cst_347 : f32 to vector<8x128xf32>
      %1548 = arith.subf %1547, %1546 : vector<8x128xf32>
      %cst_348 = arith.constant 2.000000e+00 : f32
      %1549 = vector.broadcast %cst_348 : f32 to vector<8x128xf32>
      %1550 = arith.mulf %1549, %1546 : vector<8x128xf32>
      %cst_349 = arith.constant 1.000000e+00 : f32
      %1551 = vector.broadcast %cst_349 : f32 to vector<8x128xf32>
      %1552 = arith.subf %1551, %1550 : vector<8x128xf32>
      %1553 = arith.mulf %1552, %7 : vector<8x128xf32>
      %1554 = arith.addf %5, %1553 : vector<8x128xf32>
      %1555 = arith.mulf %1552, %1554 : vector<8x128xf32>
      %1556 = arith.addf %3, %1555 : vector<8x128xf32>
      %1557 = arith.mulf %1552, %1556 : vector<8x128xf32>
      %1558 = arith.addf %1, %1557 : vector<8x128xf32>
      %1559 = arith.mulf %1552, %13 : vector<8x128xf32>
      %1560 = arith.addf %11, %1559 : vector<8x128xf32>
      %1561 = arith.mulf %1552, %1560 : vector<8x128xf32>
      %1562 = arith.addf %3, %1561 : vector<8x128xf32>
      %1563 = arith.mulf %15, %1552 : vector<8x128xf32>
      %1564 = arith.addf %11, %1563 : vector<8x128xf32>
      %1565 = math.log %1546 : vector<8x128xf32>
      %1566 = math.log %1548 : vector<8x128xf32>
      %1567 = arith.mulf %1546, %1548 : vector<8x128xf32>
      %1568 = tpu.reciprocal %1567 {approx = true} : vector<8x128xf32> -> vector<8x128xf32>
      %1569 = arith.mulf %1546, %9 : vector<8x128xf32>
      %1570 = arith.mulf %1546, %1565 : vector<8x128xf32>
      %1571 = arith.mulf %1548, %1566 : vector<8x128xf32>
      %1572 = arith.addf %1570, %1571 : vector<8x128xf32>
      %cst_350 = arith.constant 2.494200e+03 : f32
      %1573 = vector.broadcast %cst_350 : f32 to vector<8x128xf32>
      %1574 = arith.mulf %1573, %1572 : vector<8x128xf32>
      %1575 = arith.addf %1569, %1574 : vector<8x128xf32>
      %1576 = arith.mulf %1567, %1558 : vector<8x128xf32>
      %1577 = arith.addf %1575, %1576 : vector<8x128xf32>
      %1578 = arith.subf %1565, %1566 : vector<8x128xf32>
      %cst_351 = arith.constant 2.494200e+03 : f32
      %1579 = vector.broadcast %cst_351 : f32 to vector<8x128xf32>
      %1580 = arith.mulf %1579, %1578 : vector<8x128xf32>
      %1581 = arith.addf %9, %1580 : vector<8x128xf32>
      %1582 = arith.mulf %1552, %1558 : vector<8x128xf32>
      %1583 = arith.addf %1581, %1582 : vector<8x128xf32>
      %cst_352 = arith.constant 2.000000e+00 : f32
      %1584 = vector.broadcast %cst_352 : f32 to vector<8x128xf32>
      %1585 = arith.mulf %1584, %1567 : vector<8x128xf32>
      %1586 = arith.mulf %1585, %1562 : vector<8x128xf32>
      %1587 = arith.subf %1583, %1586 : vector<8x128xf32>
      %cst_353 = arith.constant 2.494200e+03 : f32
      %1588 = vector.broadcast %cst_353 : f32 to vector<8x128xf32>
      %1589 = arith.mulf %1588, %1568 : vector<8x128xf32>
      %cst_354 = arith.constant 2.000000e+00 : f32
      %1590 = vector.broadcast %cst_354 : f32 to vector<8x128xf32>
      %1591 = arith.mulf %1590, %1558 : vector<8x128xf32>
      %1592 = arith.subf %1589, %1591 : vector<8x128xf32>
      %cst_355 = arith.constant 4.000000e+00 : f32
      %1593 = vector.broadcast %cst_355 : f32 to vector<8x128xf32>
      %1594 = arith.mulf %1593, %1552 : vector<8x128xf32>
      %1595 = arith.mulf %1594, %1562 : vector<8x128xf32>
      %1596 = arith.subf %1592, %1595 : vector<8x128xf32>
      %cst_356 = arith.constant 4.000000e+00 : f32
      %1597 = vector.broadcast %cst_356 : f32 to vector<8x128xf32>
      %1598 = arith.mulf %1597, %1567 : vector<8x128xf32>
      %1599 = arith.mulf %1598, %1564 : vector<8x128xf32>
      %1600 = arith.addf %1596, %1599 : vector<8x128xf32>
      %1601 = arith.subf %1546, %1488 : vector<8x128xf32>
      %1602 = arith.subf %1577, %1519 : vector<8x128xf32>
      %1603 = arith.subf %1587, %1529 : vector<8x128xf32>
      %1604 = arith.mulf %1529, %1601 : vector<8x128xf32>
      %1605 = arith.subf %1602, %1604 : vector<8x128xf32>
      %1606 = arith.mulf %1587, %1601 : vector<8x128xf32>
      %1607 = arith.subf %1606, %1602 : vector<8x128xf32>
      %1608 = arith.mulf %1603, %1603 : vector<8x128xf32>
      %1609 = arith.mulf %1542, %1600 : vector<8x128xf32>
      %1610 = arith.mulf %1609, %1601 : vector<8x128xf32>
      %1611 = arith.mulf %1610, %1601 : vector<8x128xf32>
      %1612 = arith.subf %1608, %1611 : vector<8x128xf32>
      %1613 = math.absf %1612 : vector<8x128xf32>
      %cst_357 = arith.constant 9.99999996E-13 : f32
      %1614 = vector.broadcast %cst_357 : f32 to vector<8x128xf32>
      %1615 = arith.cmpf olt, %1613, %1614 : vector<8x128xf32>
      %cst_358 = arith.constant 0.000000e+00 : f32
      %1616 = vector.broadcast %cst_358 : f32 to vector<8x128xf32>
      %1617 = arith.cmpf oge, %1612, %1616 : vector<8x128xf32>
      %cst_359 = arith.constant 9.99999996E-13 : f32
      %cst_360 = arith.constant -9.99999996E-13 : f32
      %1618 = vector.broadcast %cst_359 : f32 to vector<8x128xf32>
      %1619 = vector.broadcast %cst_360 : f32 to vector<8x128xf32>
      %1620 = arith.select %1617, %1618, %1619 : vector<8x128xi1>, vector<8x128xf32>
      %1621 = arith.select %1615, %1620, %1612 : vector<8x128xi1>, vector<8x128xf32>
      %1622 = tpu.reciprocal %1621 {approx = true} : vector<8x128xf32> -> vector<8x128xf32>
      %1623 = arith.mulf %1603, %1607 : vector<8x128xf32>
      %1624 = arith.mulf %1600, %1601 : vector<8x128xf32>
      %1625 = arith.mulf %1624, %1605 : vector<8x128xf32>
      %1626 = arith.subf %1623, %1625 : vector<8x128xf32>
      %1627 = arith.mulf %1626, %1622 : vector<8x128xf32>
      %cst_361 = arith.constant -5.000000e-02 : f32
      %cst_362 = arith.constant 5.000000e-02 : f32
      %1628 = vector.broadcast %cst_361 : f32 to vector<8x128xf32>
      %1629 = arith.maximumf %1628, %1627 : vector<8x128xf32>
      %1630 = vector.broadcast %cst_362 : f32 to vector<8x128xf32>
      %1631 = arith.minimumf %1630, %1629 : vector<8x128xf32>
      %1632 = arith.mulf %1542, %1601 : vector<8x128xf32>
      %1633 = arith.mulf %1632, %1607 : vector<8x128xf32>
      %1634 = arith.mulf %1603, %1605 : vector<8x128xf32>
      %1635 = arith.subf %1633, %1634 : vector<8x128xf32>
      %1636 = arith.mulf %1635, %1622 : vector<8x128xf32>
      %cst_363 = arith.constant -5.000000e-02 : f32
      %cst_364 = arith.constant 5.000000e-02 : f32
      %1637 = vector.broadcast %cst_363 : f32 to vector<8x128xf32>
      %1638 = arith.maximumf %1637, %1636 : vector<8x128xf32>
      %1639 = vector.broadcast %cst_364 : f32 to vector<8x128xf32>
      %1640 = arith.minimumf %1639, %1638 : vector<8x128xf32>
      %1641 = arith.addf %1488, %1631 : vector<8x128xf32>
      %cst_365 = arith.constant 1.000000e-07 : f32
      %cst_366 = arith.constant 0.99999988 : f32
      %1642 = vector.broadcast %cst_365 : f32 to vector<8x128xf32>
      %1643 = arith.maximumf %1642, %1641 : vector<8x128xf32>
      %1644 = vector.broadcast %cst_366 : f32 to vector<8x128xf32>
      %1645 = arith.minimumf %1644, %1643 : vector<8x128xf32>
      %1646 = arith.addf %1546, %1640 : vector<8x128xf32>
      %cst_367 = arith.constant 1.000000e-07 : f32
      %cst_368 = arith.constant 0.99999988 : f32
      %1647 = vector.broadcast %cst_367 : f32 to vector<8x128xf32>
      %1648 = arith.maximumf %1647, %1646 : vector<8x128xf32>
      %1649 = vector.broadcast %cst_368 : f32 to vector<8x128xf32>
      %1650 = arith.minimumf %1649, %1648 : vector<8x128xf32>
      %1651 = arith.subf %1645, %1488 : vector<8x128xf32>
      %1652 = math.absf %1651 : vector<8x128xf32>
      %1653 = arith.subf %1650, %1546 : vector<8x128xf32>
      %1654 = math.absf %1653 : vector<8x128xf32>
      %1655 = arith.maximumf %1652, %1654 : vector<8x128xf32>
      %1656 = arith.subf %1645, %1477 : vector<8x128xf32>
      %1657 = arith.mulf %1484, %1656 : vector<8x128xf32>
      %1658 = arith.addf %1477, %1657 : vector<8x128xf32>
      %1659 = arith.subf %1650, %1480 : vector<8x128xf32>
      %1660 = arith.mulf %1484, %1659 : vector<8x128xf32>
      %1661 = arith.addf %1480, %1660 : vector<8x128xf32>
      %cst_369 = arith.constant 9.99999997E-7 : f32
      %1662 = vector.broadcast %cst_369 : f32 to vector<8x128xf32>
      %1663 = arith.cmpf olt, %1655, %1662 : vector<8x128xf32>
      %cst_370 = arith.constant 0.000000e+00 : f32
      %1664 = vector.broadcast %cst_370 : f32 to vector<8x128xf32>
      %1665 = arith.select %1663, %1664, %1484 : vector<8x128xi1>, vector<8x128xf32>
      %cst_371 = arith.constant 1.000000e-07 : f32
      %cst_372 = arith.constant 0.99999988 : f32
      %1666 = vector.broadcast %cst_371 : f32 to vector<8x128xf32>
      %1667 = arith.maximumf %1666, %1658 : vector<8x128xf32>
      %1668 = vector.broadcast %cst_372 : f32 to vector<8x128xf32>
      %1669 = arith.minimumf %1668, %1667 : vector<8x128xf32>
      %cst_373 = arith.constant 1.000000e+00 : f32
      %1670 = vector.broadcast %cst_373 : f32 to vector<8x128xf32>
      %1671 = arith.subf %1670, %1669 : vector<8x128xf32>
      %cst_374 = arith.constant 2.000000e+00 : f32
      %1672 = vector.broadcast %cst_374 : f32 to vector<8x128xf32>
      %1673 = arith.mulf %1672, %1669 : vector<8x128xf32>
      %cst_375 = arith.constant 1.000000e+00 : f32
      %1674 = vector.broadcast %cst_375 : f32 to vector<8x128xf32>
      %1675 = arith.subf %1674, %1673 : vector<8x128xf32>
      %1676 = arith.mulf %1675, %7 : vector<8x128xf32>
      %1677 = arith.addf %5, %1676 : vector<8x128xf32>
      %1678 = arith.mulf %1675, %1677 : vector<8x128xf32>
      %1679 = arith.addf %3, %1678 : vector<8x128xf32>
      %1680 = arith.mulf %1675, %1679 : vector<8x128xf32>
      %1681 = arith.addf %1, %1680 : vector<8x128xf32>
      %1682 = arith.mulf %1675, %13 : vector<8x128xf32>
      %1683 = arith.addf %11, %1682 : vector<8x128xf32>
      %1684 = arith.mulf %1675, %1683 : vector<8x128xf32>
      %1685 = arith.addf %3, %1684 : vector<8x128xf32>
      %1686 = arith.mulf %15, %1675 : vector<8x128xf32>
      %1687 = arith.addf %11, %1686 : vector<8x128xf32>
      %1688 = math.log %1669 : vector<8x128xf32>
      %1689 = math.log %1671 : vector<8x128xf32>
      %1690 = arith.mulf %1669, %1671 : vector<8x128xf32>
      %1691 = tpu.reciprocal %1690 {approx = true} : vector<8x128xf32> -> vector<8x128xf32>
      %1692 = arith.mulf %1669, %9 : vector<8x128xf32>
      %1693 = arith.mulf %1669, %1688 : vector<8x128xf32>
      %1694 = arith.mulf %1671, %1689 : vector<8x128xf32>
      %1695 = arith.addf %1693, %1694 : vector<8x128xf32>
      %cst_376 = arith.constant 2.494200e+03 : f32
      %1696 = vector.broadcast %cst_376 : f32 to vector<8x128xf32>
      %1697 = arith.mulf %1696, %1695 : vector<8x128xf32>
      %1698 = arith.addf %1692, %1697 : vector<8x128xf32>
      %1699 = arith.mulf %1690, %1681 : vector<8x128xf32>
      %1700 = arith.addf %1698, %1699 : vector<8x128xf32>
      %1701 = arith.subf %1688, %1689 : vector<8x128xf32>
      %cst_377 = arith.constant 2.494200e+03 : f32
      %1702 = vector.broadcast %cst_377 : f32 to vector<8x128xf32>
      %1703 = arith.mulf %1702, %1701 : vector<8x128xf32>
      %1704 = arith.addf %9, %1703 : vector<8x128xf32>
      %1705 = arith.mulf %1675, %1681 : vector<8x128xf32>
      %1706 = arith.addf %1704, %1705 : vector<8x128xf32>
      %cst_378 = arith.constant 2.000000e+00 : f32
      %1707 = vector.broadcast %cst_378 : f32 to vector<8x128xf32>
      %1708 = arith.mulf %1707, %1690 : vector<8x128xf32>
      %1709 = arith.mulf %1708, %1685 : vector<8x128xf32>
      %1710 = arith.subf %1706, %1709 : vector<8x128xf32>
      %cst_379 = arith.constant 2.494200e+03 : f32
      %1711 = vector.broadcast %cst_379 : f32 to vector<8x128xf32>
      %1712 = arith.mulf %1711, %1691 : vector<8x128xf32>
      %cst_380 = arith.constant 2.000000e+00 : f32
      %1713 = vector.broadcast %cst_380 : f32 to vector<8x128xf32>
      %1714 = arith.mulf %1713, %1681 : vector<8x128xf32>
      %1715 = arith.subf %1712, %1714 : vector<8x128xf32>
      %cst_381 = arith.constant 4.000000e+00 : f32
      %1716 = vector.broadcast %cst_381 : f32 to vector<8x128xf32>
      %1717 = arith.mulf %1716, %1675 : vector<8x128xf32>
      %1718 = arith.mulf %1717, %1685 : vector<8x128xf32>
      %1719 = arith.subf %1715, %1718 : vector<8x128xf32>
      %cst_382 = arith.constant 4.000000e+00 : f32
      %1720 = vector.broadcast %cst_382 : f32 to vector<8x128xf32>
      %1721 = arith.mulf %1720, %1690 : vector<8x128xf32>
      %1722 = arith.mulf %1721, %1687 : vector<8x128xf32>
      %1723 = arith.addf %1719, %1722 : vector<8x128xf32>
      %cst_383 = arith.constant 1.000000e-07 : f32
      %cst_384 = arith.constant 0.99999988 : f32
      %1724 = vector.broadcast %cst_383 : f32 to vector<8x128xf32>
      %1725 = arith.maximumf %1724, %1661 : vector<8x128xf32>
      %1726 = vector.broadcast %cst_384 : f32 to vector<8x128xf32>
      %1727 = arith.minimumf %1726, %1725 : vector<8x128xf32>
      %cst_385 = arith.constant 1.000000e+00 : f32
      %1728 = vector.broadcast %cst_385 : f32 to vector<8x128xf32>
      %1729 = arith.subf %1728, %1727 : vector<8x128xf32>
      %cst_386 = arith.constant 2.000000e+00 : f32
      %1730 = vector.broadcast %cst_386 : f32 to vector<8x128xf32>
      %1731 = arith.mulf %1730, %1727 : vector<8x128xf32>
      %cst_387 = arith.constant 1.000000e+00 : f32
      %1732 = vector.broadcast %cst_387 : f32 to vector<8x128xf32>
      %1733 = arith.subf %1732, %1731 : vector<8x128xf32>
      %1734 = arith.mulf %1733, %7 : vector<8x128xf32>
      %1735 = arith.addf %5, %1734 : vector<8x128xf32>
      %1736 = arith.mulf %1733, %1735 : vector<8x128xf32>
      %1737 = arith.addf %3, %1736 : vector<8x128xf32>
      %1738 = arith.mulf %1733, %1737 : vector<8x128xf32>
      %1739 = arith.addf %1, %1738 : vector<8x128xf32>
      %1740 = arith.mulf %1733, %13 : vector<8x128xf32>
      %1741 = arith.addf %11, %1740 : vector<8x128xf32>
      %1742 = arith.mulf %1733, %1741 : vector<8x128xf32>
      %1743 = arith.addf %3, %1742 : vector<8x128xf32>
      %1744 = arith.mulf %15, %1733 : vector<8x128xf32>
      %1745 = arith.addf %11, %1744 : vector<8x128xf32>
      %1746 = math.log %1727 : vector<8x128xf32>
      %1747 = math.log %1729 : vector<8x128xf32>
      %1748 = arith.mulf %1727, %1729 : vector<8x128xf32>
      %1749 = tpu.reciprocal %1748 {approx = true} : vector<8x128xf32> -> vector<8x128xf32>
      %1750 = arith.mulf %1727, %9 : vector<8x128xf32>
      %1751 = arith.mulf %1727, %1746 : vector<8x128xf32>
      %1752 = arith.mulf %1729, %1747 : vector<8x128xf32>
      %1753 = arith.addf %1751, %1752 : vector<8x128xf32>
      %cst_388 = arith.constant 2.494200e+03 : f32
      %1754 = vector.broadcast %cst_388 : f32 to vector<8x128xf32>
      %1755 = arith.mulf %1754, %1753 : vector<8x128xf32>
      %1756 = arith.addf %1750, %1755 : vector<8x128xf32>
      %1757 = arith.mulf %1748, %1739 : vector<8x128xf32>
      %1758 = arith.addf %1756, %1757 : vector<8x128xf32>
      %1759 = arith.subf %1746, %1747 : vector<8x128xf32>
      %cst_389 = arith.constant 2.494200e+03 : f32
      %1760 = vector.broadcast %cst_389 : f32 to vector<8x128xf32>
      %1761 = arith.mulf %1760, %1759 : vector<8x128xf32>
      %1762 = arith.addf %9, %1761 : vector<8x128xf32>
      %1763 = arith.mulf %1733, %1739 : vector<8x128xf32>
      %1764 = arith.addf %1762, %1763 : vector<8x128xf32>
      %cst_390 = arith.constant 2.000000e+00 : f32
      %1765 = vector.broadcast %cst_390 : f32 to vector<8x128xf32>
      %1766 = arith.mulf %1765, %1748 : vector<8x128xf32>
      %1767 = arith.mulf %1766, %1743 : vector<8x128xf32>
      %1768 = arith.subf %1764, %1767 : vector<8x128xf32>
      %cst_391 = arith.constant 2.494200e+03 : f32
      %1769 = vector.broadcast %cst_391 : f32 to vector<8x128xf32>
      %1770 = arith.mulf %1769, %1749 : vector<8x128xf32>
      %cst_392 = arith.constant 2.000000e+00 : f32
      %1771 = vector.broadcast %cst_392 : f32 to vector<8x128xf32>
      %1772 = arith.mulf %1771, %1739 : vector<8x128xf32>
      %1773 = arith.subf %1770, %1772 : vector<8x128xf32>
      %cst_393 = arith.constant 4.000000e+00 : f32
      %1774 = vector.broadcast %cst_393 : f32 to vector<8x128xf32>
      %1775 = arith.mulf %1774, %1733 : vector<8x128xf32>
      %1776 = arith.mulf %1775, %1743 : vector<8x128xf32>
      %1777 = arith.subf %1773, %1776 : vector<8x128xf32>
      %cst_394 = arith.constant 4.000000e+00 : f32
      %1778 = vector.broadcast %cst_394 : f32 to vector<8x128xf32>
      %1779 = arith.mulf %1778, %1748 : vector<8x128xf32>
      %1780 = arith.mulf %1779, %1745 : vector<8x128xf32>
      %1781 = arith.addf %1777, %1780 : vector<8x128xf32>
      %1782 = arith.subf %1727, %1669 : vector<8x128xf32>
      %1783 = arith.subf %1758, %1700 : vector<8x128xf32>
      %1784 = arith.subf %1768, %1710 : vector<8x128xf32>
      %1785 = arith.mulf %1710, %1782 : vector<8x128xf32>
      %1786 = arith.subf %1783, %1785 : vector<8x128xf32>
      %1787 = arith.mulf %1768, %1782 : vector<8x128xf32>
      %1788 = arith.subf %1787, %1783 : vector<8x128xf32>
      %1789 = arith.mulf %1784, %1784 : vector<8x128xf32>
      %1790 = arith.mulf %1723, %1781 : vector<8x128xf32>
      %1791 = arith.mulf %1790, %1782 : vector<8x128xf32>
      %1792 = arith.mulf %1791, %1782 : vector<8x128xf32>
      %1793 = arith.subf %1789, %1792 : vector<8x128xf32>
      %1794 = math.absf %1793 : vector<8x128xf32>
      %cst_395 = arith.constant 9.99999996E-13 : f32
      %1795 = vector.broadcast %cst_395 : f32 to vector<8x128xf32>
      %1796 = arith.cmpf olt, %1794, %1795 : vector<8x128xf32>
      %cst_396 = arith.constant 0.000000e+00 : f32
      %1797 = vector.broadcast %cst_396 : f32 to vector<8x128xf32>
      %1798 = arith.cmpf oge, %1793, %1797 : vector<8x128xf32>
      %cst_397 = arith.constant 9.99999996E-13 : f32
      %cst_398 = arith.constant -9.99999996E-13 : f32
      %1799 = vector.broadcast %cst_397 : f32 to vector<8x128xf32>
      %1800 = vector.broadcast %cst_398 : f32 to vector<8x128xf32>
      %1801 = arith.select %1798, %1799, %1800 : vector<8x128xi1>, vector<8x128xf32>
      %1802 = arith.select %1796, %1801, %1793 : vector<8x128xi1>, vector<8x128xf32>
      %1803 = tpu.reciprocal %1802 {approx = true} : vector<8x128xf32> -> vector<8x128xf32>
      %1804 = arith.mulf %1784, %1788 : vector<8x128xf32>
      %1805 = arith.mulf %1781, %1782 : vector<8x128xf32>
      %1806 = arith.mulf %1805, %1786 : vector<8x128xf32>
      %1807 = arith.subf %1804, %1806 : vector<8x128xf32>
      %1808 = arith.mulf %1807, %1803 : vector<8x128xf32>
      %cst_399 = arith.constant -5.000000e-02 : f32
      %cst_400 = arith.constant 5.000000e-02 : f32
      %1809 = vector.broadcast %cst_399 : f32 to vector<8x128xf32>
      %1810 = arith.maximumf %1809, %1808 : vector<8x128xf32>
      %1811 = vector.broadcast %cst_400 : f32 to vector<8x128xf32>
      %1812 = arith.minimumf %1811, %1810 : vector<8x128xf32>
      %1813 = arith.mulf %1723, %1782 : vector<8x128xf32>
      %1814 = arith.mulf %1813, %1788 : vector<8x128xf32>
      %1815 = arith.mulf %1784, %1786 : vector<8x128xf32>
      %1816 = arith.subf %1814, %1815 : vector<8x128xf32>
      %1817 = arith.mulf %1816, %1803 : vector<8x128xf32>
      %cst_401 = arith.constant -5.000000e-02 : f32
      %cst_402 = arith.constant 5.000000e-02 : f32
      %1818 = vector.broadcast %cst_401 : f32 to vector<8x128xf32>
      %1819 = arith.maximumf %1818, %1817 : vector<8x128xf32>
      %1820 = vector.broadcast %cst_402 : f32 to vector<8x128xf32>
      %1821 = arith.minimumf %1820, %1819 : vector<8x128xf32>
      %1822 = arith.addf %1669, %1812 : vector<8x128xf32>
      %cst_403 = arith.constant 1.000000e-07 : f32
      %cst_404 = arith.constant 0.99999988 : f32
      %1823 = vector.broadcast %cst_403 : f32 to vector<8x128xf32>
      %1824 = arith.maximumf %1823, %1822 : vector<8x128xf32>
      %1825 = vector.broadcast %cst_404 : f32 to vector<8x128xf32>
      %1826 = arith.minimumf %1825, %1824 : vector<8x128xf32>
      %1827 = arith.addf %1727, %1821 : vector<8x128xf32>
      %cst_405 = arith.constant 1.000000e-07 : f32
      %cst_406 = arith.constant 0.99999988 : f32
      %1828 = vector.broadcast %cst_405 : f32 to vector<8x128xf32>
      %1829 = arith.maximumf %1828, %1827 : vector<8x128xf32>
      %1830 = vector.broadcast %cst_406 : f32 to vector<8x128xf32>
      %1831 = arith.minimumf %1830, %1829 : vector<8x128xf32>
      %1832 = arith.subf %1826, %1669 : vector<8x128xf32>
      %1833 = math.absf %1832 : vector<8x128xf32>
      %1834 = arith.subf %1831, %1727 : vector<8x128xf32>
      %1835 = math.absf %1834 : vector<8x128xf32>
      %1836 = arith.maximumf %1833, %1835 : vector<8x128xf32>
      %1837 = arith.subf %1826, %1658 : vector<8x128xf32>
      %1838 = arith.mulf %1665, %1837 : vector<8x128xf32>
      %1839 = arith.addf %1658, %1838 : vector<8x128xf32>
      %1840 = arith.subf %1831, %1661 : vector<8x128xf32>
      %1841 = arith.mulf %1665, %1840 : vector<8x128xf32>
      %1842 = arith.addf %1661, %1841 : vector<8x128xf32>
      %cst_407 = arith.constant 9.99999997E-7 : f32
      %1843 = vector.broadcast %cst_407 : f32 to vector<8x128xf32>
      %1844 = arith.cmpf olt, %1836, %1843 : vector<8x128xf32>
      %cst_408 = arith.constant 0.000000e+00 : f32
      %1845 = vector.broadcast %cst_408 : f32 to vector<8x128xf32>
      %1846 = arith.select %1844, %1845, %1665 : vector<8x128xi1>, vector<8x128xf32>
      %cst_409 = arith.constant 1.000000e-07 : f32
      %cst_410 = arith.constant 0.99999988 : f32
      %1847 = vector.broadcast %cst_409 : f32 to vector<8x128xf32>
      %1848 = arith.maximumf %1847, %1839 : vector<8x128xf32>
      %1849 = vector.broadcast %cst_410 : f32 to vector<8x128xf32>
      %1850 = arith.minimumf %1849, %1848 : vector<8x128xf32>
      %cst_411 = arith.constant 1.000000e+00 : f32
      %1851 = vector.broadcast %cst_411 : f32 to vector<8x128xf32>
      %1852 = arith.subf %1851, %1850 : vector<8x128xf32>
      %cst_412 = arith.constant 2.000000e+00 : f32
      %1853 = vector.broadcast %cst_412 : f32 to vector<8x128xf32>
      %1854 = arith.mulf %1853, %1850 : vector<8x128xf32>
      %cst_413 = arith.constant 1.000000e+00 : f32
      %1855 = vector.broadcast %cst_413 : f32 to vector<8x128xf32>
      %1856 = arith.subf %1855, %1854 : vector<8x128xf32>
      %1857 = arith.mulf %1856, %7 : vector<8x128xf32>
      %1858 = arith.addf %5, %1857 : vector<8x128xf32>
      %1859 = arith.mulf %1856, %1858 : vector<8x128xf32>
      %1860 = arith.addf %3, %1859 : vector<8x128xf32>
      %1861 = arith.mulf %1856, %1860 : vector<8x128xf32>
      %1862 = arith.addf %1, %1861 : vector<8x128xf32>
      %1863 = arith.mulf %1856, %13 : vector<8x128xf32>
      %1864 = arith.addf %11, %1863 : vector<8x128xf32>
      %1865 = arith.mulf %1856, %1864 : vector<8x128xf32>
      %1866 = arith.addf %3, %1865 : vector<8x128xf32>
      %1867 = arith.mulf %15, %1856 : vector<8x128xf32>
      %1868 = arith.addf %11, %1867 : vector<8x128xf32>
      %1869 = math.log %1850 : vector<8x128xf32>
      %1870 = math.log %1852 : vector<8x128xf32>
      %1871 = arith.mulf %1850, %1852 : vector<8x128xf32>
      %1872 = tpu.reciprocal %1871 {approx = true} : vector<8x128xf32> -> vector<8x128xf32>
      %1873 = arith.mulf %1850, %9 : vector<8x128xf32>
      %1874 = arith.mulf %1850, %1869 : vector<8x128xf32>
      %1875 = arith.mulf %1852, %1870 : vector<8x128xf32>
      %1876 = arith.addf %1874, %1875 : vector<8x128xf32>
      %cst_414 = arith.constant 2.494200e+03 : f32
      %1877 = vector.broadcast %cst_414 : f32 to vector<8x128xf32>
      %1878 = arith.mulf %1877, %1876 : vector<8x128xf32>
      %1879 = arith.addf %1873, %1878 : vector<8x128xf32>
      %1880 = arith.mulf %1871, %1862 : vector<8x128xf32>
      %1881 = arith.addf %1879, %1880 : vector<8x128xf32>
      %1882 = arith.subf %1869, %1870 : vector<8x128xf32>
      %cst_415 = arith.constant 2.494200e+03 : f32
      %1883 = vector.broadcast %cst_415 : f32 to vector<8x128xf32>
      %1884 = arith.mulf %1883, %1882 : vector<8x128xf32>
      %1885 = arith.addf %9, %1884 : vector<8x128xf32>
      %1886 = arith.mulf %1856, %1862 : vector<8x128xf32>
      %1887 = arith.addf %1885, %1886 : vector<8x128xf32>
      %cst_416 = arith.constant 2.000000e+00 : f32
      %1888 = vector.broadcast %cst_416 : f32 to vector<8x128xf32>
      %1889 = arith.mulf %1888, %1871 : vector<8x128xf32>
      %1890 = arith.mulf %1889, %1866 : vector<8x128xf32>
      %1891 = arith.subf %1887, %1890 : vector<8x128xf32>
      %cst_417 = arith.constant 2.494200e+03 : f32
      %1892 = vector.broadcast %cst_417 : f32 to vector<8x128xf32>
      %1893 = arith.mulf %1892, %1872 : vector<8x128xf32>
      %cst_418 = arith.constant 2.000000e+00 : f32
      %1894 = vector.broadcast %cst_418 : f32 to vector<8x128xf32>
      %1895 = arith.mulf %1894, %1862 : vector<8x128xf32>
      %1896 = arith.subf %1893, %1895 : vector<8x128xf32>
      %cst_419 = arith.constant 4.000000e+00 : f32
      %1897 = vector.broadcast %cst_419 : f32 to vector<8x128xf32>
      %1898 = arith.mulf %1897, %1856 : vector<8x128xf32>
      %1899 = arith.mulf %1898, %1866 : vector<8x128xf32>
      %1900 = arith.subf %1896, %1899 : vector<8x128xf32>
      %cst_420 = arith.constant 4.000000e+00 : f32
      %1901 = vector.broadcast %cst_420 : f32 to vector<8x128xf32>
      %1902 = arith.mulf %1901, %1871 : vector<8x128xf32>
      %1903 = arith.mulf %1902, %1868 : vector<8x128xf32>
      %1904 = arith.addf %1900, %1903 : vector<8x128xf32>
      %cst_421 = arith.constant 1.000000e-07 : f32
      %cst_422 = arith.constant 0.99999988 : f32
      %1905 = vector.broadcast %cst_421 : f32 to vector<8x128xf32>
      %1906 = arith.maximumf %1905, %1842 : vector<8x128xf32>
      %1907 = vector.broadcast %cst_422 : f32 to vector<8x128xf32>
      %1908 = arith.minimumf %1907, %1906 : vector<8x128xf32>
      %cst_423 = arith.constant 1.000000e+00 : f32
      %1909 = vector.broadcast %cst_423 : f32 to vector<8x128xf32>
      %1910 = arith.subf %1909, %1908 : vector<8x128xf32>
      %cst_424 = arith.constant 2.000000e+00 : f32
      %1911 = vector.broadcast %cst_424 : f32 to vector<8x128xf32>
      %1912 = arith.mulf %1911, %1908 : vector<8x128xf32>
      %cst_425 = arith.constant 1.000000e+00 : f32
      %1913 = vector.broadcast %cst_425 : f32 to vector<8x128xf32>
      %1914 = arith.subf %1913, %1912 : vector<8x128xf32>
      %1915 = arith.mulf %1914, %7 : vector<8x128xf32>
      %1916 = arith.addf %5, %1915 : vector<8x128xf32>
      %1917 = arith.mulf %1914, %1916 : vector<8x128xf32>
      %1918 = arith.addf %3, %1917 : vector<8x128xf32>
      %1919 = arith.mulf %1914, %1918 : vector<8x128xf32>
      %1920 = arith.addf %1, %1919 : vector<8x128xf32>
      %1921 = arith.mulf %1914, %13 : vector<8x128xf32>
      %1922 = arith.addf %11, %1921 : vector<8x128xf32>
      %1923 = arith.mulf %1914, %1922 : vector<8x128xf32>
      %1924 = arith.addf %3, %1923 : vector<8x128xf32>
      %1925 = arith.mulf %15, %1914 : vector<8x128xf32>
      %1926 = arith.addf %11, %1925 : vector<8x128xf32>
      %1927 = math.log %1908 : vector<8x128xf32>
      %1928 = math.log %1910 : vector<8x128xf32>
      %1929 = arith.mulf %1908, %1910 : vector<8x128xf32>
      %1930 = tpu.reciprocal %1929 {approx = true} : vector<8x128xf32> -> vector<8x128xf32>
      %1931 = arith.mulf %1908, %9 : vector<8x128xf32>
      %1932 = arith.mulf %1908, %1927 : vector<8x128xf32>
      %1933 = arith.mulf %1910, %1928 : vector<8x128xf32>
      %1934 = arith.addf %1932, %1933 : vector<8x128xf32>
      %cst_426 = arith.constant 2.494200e+03 : f32
      %1935 = vector.broadcast %cst_426 : f32 to vector<8x128xf32>
      %1936 = arith.mulf %1935, %1934 : vector<8x128xf32>
      %1937 = arith.addf %1931, %1936 : vector<8x128xf32>
      %1938 = arith.mulf %1929, %1920 : vector<8x128xf32>
      %1939 = arith.addf %1937, %1938 : vector<8x128xf32>
      %1940 = arith.subf %1927, %1928 : vector<8x128xf32>
      %cst_427 = arith.constant 2.494200e+03 : f32
      %1941 = vector.broadcast %cst_427 : f32 to vector<8x128xf32>
      %1942 = arith.mulf %1941, %1940 : vector<8x128xf32>
      %1943 = arith.addf %9, %1942 : vector<8x128xf32>
      %1944 = arith.mulf %1914, %1920 : vector<8x128xf32>
      %1945 = arith.addf %1943, %1944 : vector<8x128xf32>
      %cst_428 = arith.constant 2.000000e+00 : f32
      %1946 = vector.broadcast %cst_428 : f32 to vector<8x128xf32>
      %1947 = arith.mulf %1946, %1929 : vector<8x128xf32>
      %1948 = arith.mulf %1947, %1924 : vector<8x128xf32>
      %1949 = arith.subf %1945, %1948 : vector<8x128xf32>
      %cst_429 = arith.constant 2.494200e+03 : f32
      %1950 = vector.broadcast %cst_429 : f32 to vector<8x128xf32>
      %1951 = arith.mulf %1950, %1930 : vector<8x128xf32>
      %cst_430 = arith.constant 2.000000e+00 : f32
      %1952 = vector.broadcast %cst_430 : f32 to vector<8x128xf32>
      %1953 = arith.mulf %1952, %1920 : vector<8x128xf32>
      %1954 = arith.subf %1951, %1953 : vector<8x128xf32>
      %cst_431 = arith.constant 4.000000e+00 : f32
      %1955 = vector.broadcast %cst_431 : f32 to vector<8x128xf32>
      %1956 = arith.mulf %1955, %1914 : vector<8x128xf32>
      %1957 = arith.mulf %1956, %1924 : vector<8x128xf32>
      %1958 = arith.subf %1954, %1957 : vector<8x128xf32>
      %cst_432 = arith.constant 4.000000e+00 : f32
      %1959 = vector.broadcast %cst_432 : f32 to vector<8x128xf32>
      %1960 = arith.mulf %1959, %1929 : vector<8x128xf32>
      %1961 = arith.mulf %1960, %1926 : vector<8x128xf32>
      %1962 = arith.addf %1958, %1961 : vector<8x128xf32>
      %1963 = arith.subf %1908, %1850 : vector<8x128xf32>
      %1964 = arith.subf %1939, %1881 : vector<8x128xf32>
      %1965 = arith.subf %1949, %1891 : vector<8x128xf32>
      %1966 = arith.mulf %1891, %1963 : vector<8x128xf32>
      %1967 = arith.subf %1964, %1966 : vector<8x128xf32>
      %1968 = arith.mulf %1949, %1963 : vector<8x128xf32>
      %1969 = arith.subf %1968, %1964 : vector<8x128xf32>
      %1970 = arith.mulf %1965, %1965 : vector<8x128xf32>
      %1971 = arith.mulf %1904, %1962 : vector<8x128xf32>
      %1972 = arith.mulf %1971, %1963 : vector<8x128xf32>
      %1973 = arith.mulf %1972, %1963 : vector<8x128xf32>
      %1974 = arith.subf %1970, %1973 : vector<8x128xf32>
      %1975 = math.absf %1974 : vector<8x128xf32>
      %cst_433 = arith.constant 9.99999996E-13 : f32
      %1976 = vector.broadcast %cst_433 : f32 to vector<8x128xf32>
      %1977 = arith.cmpf olt, %1975, %1976 : vector<8x128xf32>
      %cst_434 = arith.constant 0.000000e+00 : f32
      %1978 = vector.broadcast %cst_434 : f32 to vector<8x128xf32>
      %1979 = arith.cmpf oge, %1974, %1978 : vector<8x128xf32>
      %cst_435 = arith.constant 9.99999996E-13 : f32
      %cst_436 = arith.constant -9.99999996E-13 : f32
      %1980 = vector.broadcast %cst_435 : f32 to vector<8x128xf32>
      %1981 = vector.broadcast %cst_436 : f32 to vector<8x128xf32>
      %1982 = arith.select %1979, %1980, %1981 : vector<8x128xi1>, vector<8x128xf32>
      %1983 = arith.select %1977, %1982, %1974 : vector<8x128xi1>, vector<8x128xf32>
      %1984 = tpu.reciprocal %1983 {approx = true} : vector<8x128xf32> -> vector<8x128xf32>
      %1985 = arith.mulf %1965, %1969 : vector<8x128xf32>
      %1986 = arith.mulf %1962, %1963 : vector<8x128xf32>
      %1987 = arith.mulf %1986, %1967 : vector<8x128xf32>
      %1988 = arith.subf %1985, %1987 : vector<8x128xf32>
      %1989 = arith.mulf %1988, %1984 : vector<8x128xf32>
      %cst_437 = arith.constant -5.000000e-02 : f32
      %cst_438 = arith.constant 5.000000e-02 : f32
      %1990 = vector.broadcast %cst_437 : f32 to vector<8x128xf32>
      %1991 = arith.maximumf %1990, %1989 : vector<8x128xf32>
      %1992 = vector.broadcast %cst_438 : f32 to vector<8x128xf32>
      %1993 = arith.minimumf %1992, %1991 : vector<8x128xf32>
      %1994 = arith.mulf %1904, %1963 : vector<8x128xf32>
      %1995 = arith.mulf %1994, %1969 : vector<8x128xf32>
      %1996 = arith.mulf %1965, %1967 : vector<8x128xf32>
      %1997 = arith.subf %1995, %1996 : vector<8x128xf32>
      %1998 = arith.mulf %1997, %1984 : vector<8x128xf32>
      %cst_439 = arith.constant -5.000000e-02 : f32
      %cst_440 = arith.constant 5.000000e-02 : f32
      %1999 = vector.broadcast %cst_439 : f32 to vector<8x128xf32>
      %2000 = arith.maximumf %1999, %1998 : vector<8x128xf32>
      %2001 = vector.broadcast %cst_440 : f32 to vector<8x128xf32>
      %2002 = arith.minimumf %2001, %2000 : vector<8x128xf32>
      %2003 = arith.addf %1850, %1993 : vector<8x128xf32>
      %cst_441 = arith.constant 1.000000e-07 : f32
      %cst_442 = arith.constant 0.99999988 : f32
      %2004 = vector.broadcast %cst_441 : f32 to vector<8x128xf32>
      %2005 = arith.maximumf %2004, %2003 : vector<8x128xf32>
      %2006 = vector.broadcast %cst_442 : f32 to vector<8x128xf32>
      %2007 = arith.minimumf %2006, %2005 : vector<8x128xf32>
      %2008 = arith.addf %1908, %2002 : vector<8x128xf32>
      %cst_443 = arith.constant 1.000000e-07 : f32
      %cst_444 = arith.constant 0.99999988 : f32
      %2009 = vector.broadcast %cst_443 : f32 to vector<8x128xf32>
      %2010 = arith.maximumf %2009, %2008 : vector<8x128xf32>
      %2011 = vector.broadcast %cst_444 : f32 to vector<8x128xf32>
      %2012 = arith.minimumf %2011, %2010 : vector<8x128xf32>
      %2013 = arith.subf %2007, %1850 : vector<8x128xf32>
      %2014 = math.absf %2013 : vector<8x128xf32>
      %2015 = arith.subf %2012, %1908 : vector<8x128xf32>
      %2016 = math.absf %2015 : vector<8x128xf32>
      %2017 = arith.maximumf %2014, %2016 : vector<8x128xf32>
      %2018 = arith.subf %2007, %1839 : vector<8x128xf32>
      %2019 = arith.mulf %1846, %2018 : vector<8x128xf32>
      %2020 = arith.addf %1839, %2019 : vector<8x128xf32>
      %2021 = arith.subf %2012, %1842 : vector<8x128xf32>
      %2022 = arith.mulf %1846, %2021 : vector<8x128xf32>
      %2023 = arith.addf %1842, %2022 : vector<8x128xf32>
      %cst_445 = arith.constant 9.99999997E-7 : f32
      %2024 = vector.broadcast %cst_445 : f32 to vector<8x128xf32>
      %2025 = arith.cmpf olt, %2017, %2024 : vector<8x128xf32>
      %cst_446 = arith.constant 0.000000e+00 : f32
      %2026 = vector.broadcast %cst_446 : f32 to vector<8x128xf32>
      %2027 = arith.select %2025, %2026, %1846 : vector<8x128xi1>, vector<8x128xf32>
      %cst_447 = arith.constant 1.000000e-07 : f32
      %cst_448 = arith.constant 0.99999988 : f32
      %2028 = vector.broadcast %cst_447 : f32 to vector<8x128xf32>
      %2029 = arith.maximumf %2028, %2020 : vector<8x128xf32>
      %2030 = vector.broadcast %cst_448 : f32 to vector<8x128xf32>
      %2031 = arith.minimumf %2030, %2029 : vector<8x128xf32>
      %cst_449 = arith.constant 1.000000e+00 : f32
      %2032 = vector.broadcast %cst_449 : f32 to vector<8x128xf32>
      %2033 = arith.subf %2032, %2031 : vector<8x128xf32>
      %cst_450 = arith.constant 2.000000e+00 : f32
      %2034 = vector.broadcast %cst_450 : f32 to vector<8x128xf32>
      %2035 = arith.mulf %2034, %2031 : vector<8x128xf32>
      %cst_451 = arith.constant 1.000000e+00 : f32
      %2036 = vector.broadcast %cst_451 : f32 to vector<8x128xf32>
      %2037 = arith.subf %2036, %2035 : vector<8x128xf32>
      %2038 = arith.mulf %2037, %7 : vector<8x128xf32>
      %2039 = arith.addf %5, %2038 : vector<8x128xf32>
      %2040 = arith.mulf %2037, %2039 : vector<8x128xf32>
      %2041 = arith.addf %3, %2040 : vector<8x128xf32>
      %2042 = arith.mulf %2037, %2041 : vector<8x128xf32>
      %2043 = arith.addf %1, %2042 : vector<8x128xf32>
      %2044 = arith.mulf %2037, %13 : vector<8x128xf32>
      %2045 = arith.addf %11, %2044 : vector<8x128xf32>
      %2046 = arith.mulf %2037, %2045 : vector<8x128xf32>
      %2047 = arith.addf %3, %2046 : vector<8x128xf32>
      %2048 = arith.mulf %15, %2037 : vector<8x128xf32>
      %2049 = arith.addf %11, %2048 : vector<8x128xf32>
      %2050 = math.log %2031 : vector<8x128xf32>
      %2051 = math.log %2033 : vector<8x128xf32>
      %2052 = arith.mulf %2031, %2033 : vector<8x128xf32>
      %2053 = tpu.reciprocal %2052 {approx = true} : vector<8x128xf32> -> vector<8x128xf32>
      %2054 = arith.mulf %2031, %9 : vector<8x128xf32>
      %2055 = arith.mulf %2031, %2050 : vector<8x128xf32>
      %2056 = arith.mulf %2033, %2051 : vector<8x128xf32>
      %2057 = arith.addf %2055, %2056 : vector<8x128xf32>
      %cst_452 = arith.constant 2.494200e+03 : f32
      %2058 = vector.broadcast %cst_452 : f32 to vector<8x128xf32>
      %2059 = arith.mulf %2058, %2057 : vector<8x128xf32>
      %2060 = arith.addf %2054, %2059 : vector<8x128xf32>
      %2061 = arith.mulf %2052, %2043 : vector<8x128xf32>
      %2062 = arith.addf %2060, %2061 : vector<8x128xf32>
      %2063 = arith.subf %2050, %2051 : vector<8x128xf32>
      %cst_453 = arith.constant 2.494200e+03 : f32
      %2064 = vector.broadcast %cst_453 : f32 to vector<8x128xf32>
      %2065 = arith.mulf %2064, %2063 : vector<8x128xf32>
      %2066 = arith.addf %9, %2065 : vector<8x128xf32>
      %2067 = arith.mulf %2037, %2043 : vector<8x128xf32>
      %2068 = arith.addf %2066, %2067 : vector<8x128xf32>
      %cst_454 = arith.constant 2.000000e+00 : f32
      %2069 = vector.broadcast %cst_454 : f32 to vector<8x128xf32>
      %2070 = arith.mulf %2069, %2052 : vector<8x128xf32>
      %2071 = arith.mulf %2070, %2047 : vector<8x128xf32>
      %2072 = arith.subf %2068, %2071 : vector<8x128xf32>
      %cst_455 = arith.constant 2.494200e+03 : f32
      %2073 = vector.broadcast %cst_455 : f32 to vector<8x128xf32>
      %2074 = arith.mulf %2073, %2053 : vector<8x128xf32>
      %cst_456 = arith.constant 2.000000e+00 : f32
      %2075 = vector.broadcast %cst_456 : f32 to vector<8x128xf32>
      %2076 = arith.mulf %2075, %2043 : vector<8x128xf32>
      %2077 = arith.subf %2074, %2076 : vector<8x128xf32>
      %cst_457 = arith.constant 4.000000e+00 : f32
      %2078 = vector.broadcast %cst_457 : f32 to vector<8x128xf32>
      %2079 = arith.mulf %2078, %2037 : vector<8x128xf32>
      %2080 = arith.mulf %2079, %2047 : vector<8x128xf32>
      %2081 = arith.subf %2077, %2080 : vector<8x128xf32>
      %cst_458 = arith.constant 4.000000e+00 : f32
      %2082 = vector.broadcast %cst_458 : f32 to vector<8x128xf32>
      %2083 = arith.mulf %2082, %2052 : vector<8x128xf32>
      %2084 = arith.mulf %2083, %2049 : vector<8x128xf32>
      %2085 = arith.addf %2081, %2084 : vector<8x128xf32>
      %cst_459 = arith.constant 1.000000e-07 : f32
      %cst_460 = arith.constant 0.99999988 : f32
      %2086 = vector.broadcast %cst_459 : f32 to vector<8x128xf32>
      %2087 = arith.maximumf %2086, %2023 : vector<8x128xf32>
      %2088 = vector.broadcast %cst_460 : f32 to vector<8x128xf32>
      %2089 = arith.minimumf %2088, %2087 : vector<8x128xf32>
      %cst_461 = arith.constant 1.000000e+00 : f32
      %2090 = vector.broadcast %cst_461 : f32 to vector<8x128xf32>
      %2091 = arith.subf %2090, %2089 : vector<8x128xf32>
      %cst_462 = arith.constant 2.000000e+00 : f32
      %2092 = vector.broadcast %cst_462 : f32 to vector<8x128xf32>
      %2093 = arith.mulf %2092, %2089 : vector<8x128xf32>
      %cst_463 = arith.constant 1.000000e+00 : f32
      %2094 = vector.broadcast %cst_463 : f32 to vector<8x128xf32>
      %2095 = arith.subf %2094, %2093 : vector<8x128xf32>
      %2096 = arith.mulf %2095, %7 : vector<8x128xf32>
      %2097 = arith.addf %5, %2096 : vector<8x128xf32>
      %2098 = arith.mulf %2095, %2097 : vector<8x128xf32>
      %2099 = arith.addf %3, %2098 : vector<8x128xf32>
      %2100 = arith.mulf %2095, %2099 : vector<8x128xf32>
      %2101 = arith.addf %1, %2100 : vector<8x128xf32>
      %2102 = arith.mulf %2095, %13 : vector<8x128xf32>
      %2103 = arith.addf %11, %2102 : vector<8x128xf32>
      %2104 = arith.mulf %2095, %2103 : vector<8x128xf32>
      %2105 = arith.addf %3, %2104 : vector<8x128xf32>
      %2106 = arith.mulf %15, %2095 : vector<8x128xf32>
      %2107 = arith.addf %11, %2106 : vector<8x128xf32>
      %2108 = math.log %2089 : vector<8x128xf32>
      %2109 = math.log %2091 : vector<8x128xf32>
      %2110 = arith.mulf %2089, %2091 : vector<8x128xf32>
      %2111 = tpu.reciprocal %2110 {approx = true} : vector<8x128xf32> -> vector<8x128xf32>
      %2112 = arith.mulf %2089, %9 : vector<8x128xf32>
      %2113 = arith.mulf %2089, %2108 : vector<8x128xf32>
      %2114 = arith.mulf %2091, %2109 : vector<8x128xf32>
      %2115 = arith.addf %2113, %2114 : vector<8x128xf32>
      %cst_464 = arith.constant 2.494200e+03 : f32
      %2116 = vector.broadcast %cst_464 : f32 to vector<8x128xf32>
      %2117 = arith.mulf %2116, %2115 : vector<8x128xf32>
      %2118 = arith.addf %2112, %2117 : vector<8x128xf32>
      %2119 = arith.mulf %2110, %2101 : vector<8x128xf32>
      %2120 = arith.addf %2118, %2119 : vector<8x128xf32>
      %2121 = arith.subf %2108, %2109 : vector<8x128xf32>
      %cst_465 = arith.constant 2.494200e+03 : f32
      %2122 = vector.broadcast %cst_465 : f32 to vector<8x128xf32>
      %2123 = arith.mulf %2122, %2121 : vector<8x128xf32>
      %2124 = arith.addf %9, %2123 : vector<8x128xf32>
      %2125 = arith.mulf %2095, %2101 : vector<8x128xf32>
      %2126 = arith.addf %2124, %2125 : vector<8x128xf32>
      %cst_466 = arith.constant 2.000000e+00 : f32
      %2127 = vector.broadcast %cst_466 : f32 to vector<8x128xf32>
      %2128 = arith.mulf %2127, %2110 : vector<8x128xf32>
      %2129 = arith.mulf %2128, %2105 : vector<8x128xf32>
      %2130 = arith.subf %2126, %2129 : vector<8x128xf32>
      %cst_467 = arith.constant 2.494200e+03 : f32
      %2131 = vector.broadcast %cst_467 : f32 to vector<8x128xf32>
      %2132 = arith.mulf %2131, %2111 : vector<8x128xf32>
      %cst_468 = arith.constant 2.000000e+00 : f32
      %2133 = vector.broadcast %cst_468 : f32 to vector<8x128xf32>
      %2134 = arith.mulf %2133, %2101 : vector<8x128xf32>
      %2135 = arith.subf %2132, %2134 : vector<8x128xf32>
      %cst_469 = arith.constant 4.000000e+00 : f32
      %2136 = vector.broadcast %cst_469 : f32 to vector<8x128xf32>
      %2137 = arith.mulf %2136, %2095 : vector<8x128xf32>
      %2138 = arith.mulf %2137, %2105 : vector<8x128xf32>
      %2139 = arith.subf %2135, %2138 : vector<8x128xf32>
      %cst_470 = arith.constant 4.000000e+00 : f32
      %2140 = vector.broadcast %cst_470 : f32 to vector<8x128xf32>
      %2141 = arith.mulf %2140, %2110 : vector<8x128xf32>
      %2142 = arith.mulf %2141, %2107 : vector<8x128xf32>
      %2143 = arith.addf %2139, %2142 : vector<8x128xf32>
      %2144 = arith.subf %2089, %2031 : vector<8x128xf32>
      %2145 = arith.subf %2120, %2062 : vector<8x128xf32>
      %2146 = arith.subf %2130, %2072 : vector<8x128xf32>
      %2147 = arith.mulf %2072, %2144 : vector<8x128xf32>
      %2148 = arith.subf %2145, %2147 : vector<8x128xf32>
      %2149 = arith.mulf %2130, %2144 : vector<8x128xf32>
      %2150 = arith.subf %2149, %2145 : vector<8x128xf32>
      %2151 = arith.mulf %2146, %2146 : vector<8x128xf32>
      %2152 = arith.mulf %2085, %2143 : vector<8x128xf32>
      %2153 = arith.mulf %2152, %2144 : vector<8x128xf32>
      %2154 = arith.mulf %2153, %2144 : vector<8x128xf32>
      %2155 = arith.subf %2151, %2154 : vector<8x128xf32>
      %2156 = math.absf %2155 : vector<8x128xf32>
      %cst_471 = arith.constant 9.99999996E-13 : f32
      %2157 = vector.broadcast %cst_471 : f32 to vector<8x128xf32>
      %2158 = arith.cmpf olt, %2156, %2157 : vector<8x128xf32>
      %cst_472 = arith.constant 0.000000e+00 : f32
      %2159 = vector.broadcast %cst_472 : f32 to vector<8x128xf32>
      %2160 = arith.cmpf oge, %2155, %2159 : vector<8x128xf32>
      %cst_473 = arith.constant 9.99999996E-13 : f32
      %cst_474 = arith.constant -9.99999996E-13 : f32
      %2161 = vector.broadcast %cst_473 : f32 to vector<8x128xf32>
      %2162 = vector.broadcast %cst_474 : f32 to vector<8x128xf32>
      %2163 = arith.select %2160, %2161, %2162 : vector<8x128xi1>, vector<8x128xf32>
      %2164 = arith.select %2158, %2163, %2155 : vector<8x128xi1>, vector<8x128xf32>
      %2165 = tpu.reciprocal %2164 {approx = true} : vector<8x128xf32> -> vector<8x128xf32>
      %2166 = arith.mulf %2146, %2150 : vector<8x128xf32>
      %2167 = arith.mulf %2143, %2144 : vector<8x128xf32>
      %2168 = arith.mulf %2167, %2148 : vector<8x128xf32>
      %2169 = arith.subf %2166, %2168 : vector<8x128xf32>
      %2170 = arith.mulf %2169, %2165 : vector<8x128xf32>
      %cst_475 = arith.constant -5.000000e-02 : f32
      %cst_476 = arith.constant 5.000000e-02 : f32
      %2171 = vector.broadcast %cst_475 : f32 to vector<8x128xf32>
      %2172 = arith.maximumf %2171, %2170 : vector<8x128xf32>
      %2173 = vector.broadcast %cst_476 : f32 to vector<8x128xf32>
      %2174 = arith.minimumf %2173, %2172 : vector<8x128xf32>
      %2175 = arith.mulf %2085, %2144 : vector<8x128xf32>
      %2176 = arith.mulf %2175, %2150 : vector<8x128xf32>
      %2177 = arith.mulf %2146, %2148 : vector<8x128xf32>
      %2178 = arith.subf %2176, %2177 : vector<8x128xf32>
      %2179 = arith.mulf %2178, %2165 : vector<8x128xf32>
      %cst_477 = arith.constant -5.000000e-02 : f32
      %cst_478 = arith.constant 5.000000e-02 : f32
      %2180 = vector.broadcast %cst_477 : f32 to vector<8x128xf32>
      %2181 = arith.maximumf %2180, %2179 : vector<8x128xf32>
      %2182 = vector.broadcast %cst_478 : f32 to vector<8x128xf32>
      %2183 = arith.minimumf %2182, %2181 : vector<8x128xf32>
      %2184 = arith.addf %2031, %2174 : vector<8x128xf32>
      %cst_479 = arith.constant 1.000000e-07 : f32
      %cst_480 = arith.constant 0.99999988 : f32
      %2185 = vector.broadcast %cst_479 : f32 to vector<8x128xf32>
      %2186 = arith.maximumf %2185, %2184 : vector<8x128xf32>
      %2187 = vector.broadcast %cst_480 : f32 to vector<8x128xf32>
      %2188 = arith.minimumf %2187, %2186 : vector<8x128xf32>
      %2189 = arith.addf %2089, %2183 : vector<8x128xf32>
      %cst_481 = arith.constant 1.000000e-07 : f32
      %cst_482 = arith.constant 0.99999988 : f32
      %2190 = vector.broadcast %cst_481 : f32 to vector<8x128xf32>
      %2191 = arith.maximumf %2190, %2189 : vector<8x128xf32>
      %2192 = vector.broadcast %cst_482 : f32 to vector<8x128xf32>
      %2193 = arith.minimumf %2192, %2191 : vector<8x128xf32>
      %2194 = arith.subf %2188, %2031 : vector<8x128xf32>
      %2195 = math.absf %2194 : vector<8x128xf32>
      %2196 = arith.subf %2193, %2089 : vector<8x128xf32>
      %2197 = math.absf %2196 : vector<8x128xf32>
      %2198 = arith.maximumf %2195, %2197 : vector<8x128xf32>
      %2199 = arith.subf %2188, %2020 : vector<8x128xf32>
      %2200 = arith.mulf %2027, %2199 : vector<8x128xf32>
      %2201 = arith.addf %2020, %2200 : vector<8x128xf32>
      %2202 = arith.subf %2193, %2023 : vector<8x128xf32>
      %2203 = arith.mulf %2027, %2202 : vector<8x128xf32>
      %2204 = arith.addf %2023, %2203 : vector<8x128xf32>
      %cst_483 = arith.constant 9.99999997E-7 : f32
      %2205 = vector.broadcast %cst_483 : f32 to vector<8x128xf32>
      %2206 = arith.cmpf olt, %2198, %2205 : vector<8x128xf32>
      %cst_484 = arith.constant 0.000000e+00 : f32
      %2207 = vector.broadcast %cst_484 : f32 to vector<8x128xf32>
      %2208 = arith.select %2206, %2207, %2027 : vector<8x128xi1>, vector<8x128xf32>
      %cst_485 = arith.constant 1.000000e-07 : f32
      %cst_486 = arith.constant 0.99999988 : f32
      %2209 = vector.broadcast %cst_485 : f32 to vector<8x128xf32>
      %2210 = arith.maximumf %2209, %2201 : vector<8x128xf32>
      %2211 = vector.broadcast %cst_486 : f32 to vector<8x128xf32>
      %2212 = arith.minimumf %2211, %2210 : vector<8x128xf32>
      %cst_487 = arith.constant 1.000000e+00 : f32
      %2213 = vector.broadcast %cst_487 : f32 to vector<8x128xf32>
      %2214 = arith.subf %2213, %2212 : vector<8x128xf32>
      %cst_488 = arith.constant 2.000000e+00 : f32
      %2215 = vector.broadcast %cst_488 : f32 to vector<8x128xf32>
      %2216 = arith.mulf %2215, %2212 : vector<8x128xf32>
      %cst_489 = arith.constant 1.000000e+00 : f32
      %2217 = vector.broadcast %cst_489 : f32 to vector<8x128xf32>
      %2218 = arith.subf %2217, %2216 : vector<8x128xf32>
      %2219 = arith.mulf %2218, %7 : vector<8x128xf32>
      %2220 = arith.addf %5, %2219 : vector<8x128xf32>
      %2221 = arith.mulf %2218, %2220 : vector<8x128xf32>
      %2222 = arith.addf %3, %2221 : vector<8x128xf32>
      %2223 = arith.mulf %2218, %2222 : vector<8x128xf32>
      %2224 = arith.addf %1, %2223 : vector<8x128xf32>
      %2225 = arith.mulf %2218, %13 : vector<8x128xf32>
      %2226 = arith.addf %11, %2225 : vector<8x128xf32>
      %2227 = arith.mulf %2218, %2226 : vector<8x128xf32>
      %2228 = arith.addf %3, %2227 : vector<8x128xf32>
      %2229 = arith.mulf %15, %2218 : vector<8x128xf32>
      %2230 = arith.addf %11, %2229 : vector<8x128xf32>
      %2231 = math.log %2212 : vector<8x128xf32>
      %2232 = math.log %2214 : vector<8x128xf32>
      %2233 = arith.mulf %2212, %2214 : vector<8x128xf32>
      %2234 = tpu.reciprocal %2233 {approx = true} : vector<8x128xf32> -> vector<8x128xf32>
      %2235 = arith.mulf %2212, %9 : vector<8x128xf32>
      %2236 = arith.mulf %2212, %2231 : vector<8x128xf32>
      %2237 = arith.mulf %2214, %2232 : vector<8x128xf32>
      %2238 = arith.addf %2236, %2237 : vector<8x128xf32>
      %cst_490 = arith.constant 2.494200e+03 : f32
      %2239 = vector.broadcast %cst_490 : f32 to vector<8x128xf32>
      %2240 = arith.mulf %2239, %2238 : vector<8x128xf32>
      %2241 = arith.addf %2235, %2240 : vector<8x128xf32>
      %2242 = arith.mulf %2233, %2224 : vector<8x128xf32>
      %2243 = arith.addf %2241, %2242 : vector<8x128xf32>
      %2244 = arith.subf %2231, %2232 : vector<8x128xf32>
      %cst_491 = arith.constant 2.494200e+03 : f32
      %2245 = vector.broadcast %cst_491 : f32 to vector<8x128xf32>
      %2246 = arith.mulf %2245, %2244 : vector<8x128xf32>
      %2247 = arith.addf %9, %2246 : vector<8x128xf32>
      %2248 = arith.mulf %2218, %2224 : vector<8x128xf32>
      %2249 = arith.addf %2247, %2248 : vector<8x128xf32>
      %cst_492 = arith.constant 2.000000e+00 : f32
      %2250 = vector.broadcast %cst_492 : f32 to vector<8x128xf32>
      %2251 = arith.mulf %2250, %2233 : vector<8x128xf32>
      %2252 = arith.mulf %2251, %2228 : vector<8x128xf32>
      %2253 = arith.subf %2249, %2252 : vector<8x128xf32>
      %cst_493 = arith.constant 2.494200e+03 : f32
      %2254 = vector.broadcast %cst_493 : f32 to vector<8x128xf32>
      %2255 = arith.mulf %2254, %2234 : vector<8x128xf32>
      %cst_494 = arith.constant 2.000000e+00 : f32
      %2256 = vector.broadcast %cst_494 : f32 to vector<8x128xf32>
      %2257 = arith.mulf %2256, %2224 : vector<8x128xf32>
      %2258 = arith.subf %2255, %2257 : vector<8x128xf32>
      %cst_495 = arith.constant 4.000000e+00 : f32
      %2259 = vector.broadcast %cst_495 : f32 to vector<8x128xf32>
      %2260 = arith.mulf %2259, %2218 : vector<8x128xf32>
      %2261 = arith.mulf %2260, %2228 : vector<8x128xf32>
      %2262 = arith.subf %2258, %2261 : vector<8x128xf32>
      %cst_496 = arith.constant 4.000000e+00 : f32
      %2263 = vector.broadcast %cst_496 : f32 to vector<8x128xf32>
      %2264 = arith.mulf %2263, %2233 : vector<8x128xf32>
      %2265 = arith.mulf %2264, %2230 : vector<8x128xf32>
      %2266 = arith.addf %2262, %2265 : vector<8x128xf32>
      %cst_497 = arith.constant 1.000000e-07 : f32
      %cst_498 = arith.constant 0.99999988 : f32
      %2267 = vector.broadcast %cst_497 : f32 to vector<8x128xf32>
      %2268 = arith.maximumf %2267, %2204 : vector<8x128xf32>
      %2269 = vector.broadcast %cst_498 : f32 to vector<8x128xf32>
      %2270 = arith.minimumf %2269, %2268 : vector<8x128xf32>
      %cst_499 = arith.constant 1.000000e+00 : f32
      %2271 = vector.broadcast %cst_499 : f32 to vector<8x128xf32>
      %2272 = arith.subf %2271, %2270 : vector<8x128xf32>
      %cst_500 = arith.constant 2.000000e+00 : f32
      %2273 = vector.broadcast %cst_500 : f32 to vector<8x128xf32>
      %2274 = arith.mulf %2273, %2270 : vector<8x128xf32>
      %cst_501 = arith.constant 1.000000e+00 : f32
      %2275 = vector.broadcast %cst_501 : f32 to vector<8x128xf32>
      %2276 = arith.subf %2275, %2274 : vector<8x128xf32>
      %2277 = arith.mulf %2276, %7 : vector<8x128xf32>
      %2278 = arith.addf %5, %2277 : vector<8x128xf32>
      %2279 = arith.mulf %2276, %2278 : vector<8x128xf32>
      %2280 = arith.addf %3, %2279 : vector<8x128xf32>
      %2281 = arith.mulf %2276, %2280 : vector<8x128xf32>
      %2282 = arith.addf %1, %2281 : vector<8x128xf32>
      %2283 = arith.mulf %2276, %13 : vector<8x128xf32>
      %2284 = arith.addf %11, %2283 : vector<8x128xf32>
      %2285 = arith.mulf %2276, %2284 : vector<8x128xf32>
      %2286 = arith.addf %3, %2285 : vector<8x128xf32>
      %2287 = arith.mulf %15, %2276 : vector<8x128xf32>
      %2288 = arith.addf %11, %2287 : vector<8x128xf32>
      %2289 = math.log %2270 : vector<8x128xf32>
      %2290 = math.log %2272 : vector<8x128xf32>
      %2291 = arith.mulf %2270, %2272 : vector<8x128xf32>
      %2292 = tpu.reciprocal %2291 {approx = true} : vector<8x128xf32> -> vector<8x128xf32>
      %2293 = arith.mulf %2270, %9 : vector<8x128xf32>
      %2294 = arith.mulf %2270, %2289 : vector<8x128xf32>
      %2295 = arith.mulf %2272, %2290 : vector<8x128xf32>
      %2296 = arith.addf %2294, %2295 : vector<8x128xf32>
      %cst_502 = arith.constant 2.494200e+03 : f32
      %2297 = vector.broadcast %cst_502 : f32 to vector<8x128xf32>
      %2298 = arith.mulf %2297, %2296 : vector<8x128xf32>
      %2299 = arith.addf %2293, %2298 : vector<8x128xf32>
      %2300 = arith.mulf %2291, %2282 : vector<8x128xf32>
      %2301 = arith.addf %2299, %2300 : vector<8x128xf32>
      %2302 = arith.subf %2289, %2290 : vector<8x128xf32>
      %cst_503 = arith.constant 2.494200e+03 : f32
      %2303 = vector.broadcast %cst_503 : f32 to vector<8x128xf32>
      %2304 = arith.mulf %2303, %2302 : vector<8x128xf32>
      %2305 = arith.addf %9, %2304 : vector<8x128xf32>
      %2306 = arith.mulf %2276, %2282 : vector<8x128xf32>
      %2307 = arith.addf %2305, %2306 : vector<8x128xf32>
      %cst_504 = arith.constant 2.000000e+00 : f32
      %2308 = vector.broadcast %cst_504 : f32 to vector<8x128xf32>
      %2309 = arith.mulf %2308, %2291 : vector<8x128xf32>
      %2310 = arith.mulf %2309, %2286 : vector<8x128xf32>
      %2311 = arith.subf %2307, %2310 : vector<8x128xf32>
      %cst_505 = arith.constant 2.494200e+03 : f32
      %2312 = vector.broadcast %cst_505 : f32 to vector<8x128xf32>
      %2313 = arith.mulf %2312, %2292 : vector<8x128xf32>
      %cst_506 = arith.constant 2.000000e+00 : f32
      %2314 = vector.broadcast %cst_506 : f32 to vector<8x128xf32>
      %2315 = arith.mulf %2314, %2282 : vector<8x128xf32>
      %2316 = arith.subf %2313, %2315 : vector<8x128xf32>
      %cst_507 = arith.constant 4.000000e+00 : f32
      %2317 = vector.broadcast %cst_507 : f32 to vector<8x128xf32>
      %2318 = arith.mulf %2317, %2276 : vector<8x128xf32>
      %2319 = arith.mulf %2318, %2286 : vector<8x128xf32>
      %2320 = arith.subf %2316, %2319 : vector<8x128xf32>
      %cst_508 = arith.constant 4.000000e+00 : f32
      %2321 = vector.broadcast %cst_508 : f32 to vector<8x128xf32>
      %2322 = arith.mulf %2321, %2291 : vector<8x128xf32>
      %2323 = arith.mulf %2322, %2288 : vector<8x128xf32>
      %2324 = arith.addf %2320, %2323 : vector<8x128xf32>
      %2325 = arith.subf %2270, %2212 : vector<8x128xf32>
      %2326 = arith.subf %2301, %2243 : vector<8x128xf32>
      %2327 = arith.subf %2311, %2253 : vector<8x128xf32>
      %2328 = arith.mulf %2253, %2325 : vector<8x128xf32>
      %2329 = arith.subf %2326, %2328 : vector<8x128xf32>
      %2330 = arith.mulf %2311, %2325 : vector<8x128xf32>
      %2331 = arith.subf %2330, %2326 : vector<8x128xf32>
      %2332 = arith.mulf %2327, %2327 : vector<8x128xf32>
      %2333 = arith.mulf %2266, %2324 : vector<8x128xf32>
      %2334 = arith.mulf %2333, %2325 : vector<8x128xf32>
      %2335 = arith.mulf %2334, %2325 : vector<8x128xf32>
      %2336 = arith.subf %2332, %2335 : vector<8x128xf32>
      %2337 = math.absf %2336 : vector<8x128xf32>
      %cst_509 = arith.constant 9.99999996E-13 : f32
      %2338 = vector.broadcast %cst_509 : f32 to vector<8x128xf32>
      %2339 = arith.cmpf olt, %2337, %2338 : vector<8x128xf32>
      %cst_510 = arith.constant 0.000000e+00 : f32
      %2340 = vector.broadcast %cst_510 : f32 to vector<8x128xf32>
      %2341 = arith.cmpf oge, %2336, %2340 : vector<8x128xf32>
      %cst_511 = arith.constant 9.99999996E-13 : f32
      %cst_512 = arith.constant -9.99999996E-13 : f32
      %2342 = vector.broadcast %cst_511 : f32 to vector<8x128xf32>
      %2343 = vector.broadcast %cst_512 : f32 to vector<8x128xf32>
      %2344 = arith.select %2341, %2342, %2343 : vector<8x128xi1>, vector<8x128xf32>
      %2345 = arith.select %2339, %2344, %2336 : vector<8x128xi1>, vector<8x128xf32>
      %2346 = tpu.reciprocal %2345 {approx = true} : vector<8x128xf32> -> vector<8x128xf32>
      %2347 = arith.mulf %2327, %2331 : vector<8x128xf32>
      %2348 = arith.mulf %2324, %2325 : vector<8x128xf32>
      %2349 = arith.mulf %2348, %2329 : vector<8x128xf32>
      %2350 = arith.subf %2347, %2349 : vector<8x128xf32>
      %2351 = arith.mulf %2350, %2346 : vector<8x128xf32>
      %cst_513 = arith.constant -5.000000e-02 : f32
      %cst_514 = arith.constant 5.000000e-02 : f32
      %2352 = vector.broadcast %cst_513 : f32 to vector<8x128xf32>
      %2353 = arith.maximumf %2352, %2351 : vector<8x128xf32>
      %2354 = vector.broadcast %cst_514 : f32 to vector<8x128xf32>
      %2355 = arith.minimumf %2354, %2353 : vector<8x128xf32>
      %2356 = arith.mulf %2266, %2325 : vector<8x128xf32>
      %2357 = arith.mulf %2356, %2331 : vector<8x128xf32>
      %2358 = arith.mulf %2327, %2329 : vector<8x128xf32>
      %2359 = arith.subf %2357, %2358 : vector<8x128xf32>
      %2360 = arith.mulf %2359, %2346 : vector<8x128xf32>
      %cst_515 = arith.constant -5.000000e-02 : f32
      %cst_516 = arith.constant 5.000000e-02 : f32
      %2361 = vector.broadcast %cst_515 : f32 to vector<8x128xf32>
      %2362 = arith.maximumf %2361, %2360 : vector<8x128xf32>
      %2363 = vector.broadcast %cst_516 : f32 to vector<8x128xf32>
      %2364 = arith.minimumf %2363, %2362 : vector<8x128xf32>
      %2365 = arith.addf %2212, %2355 : vector<8x128xf32>
      %cst_517 = arith.constant 1.000000e-07 : f32
      %cst_518 = arith.constant 0.99999988 : f32
      %2366 = vector.broadcast %cst_517 : f32 to vector<8x128xf32>
      %2367 = arith.maximumf %2366, %2365 : vector<8x128xf32>
      %2368 = vector.broadcast %cst_518 : f32 to vector<8x128xf32>
      %2369 = arith.minimumf %2368, %2367 : vector<8x128xf32>
      %2370 = arith.addf %2270, %2364 : vector<8x128xf32>
      %cst_519 = arith.constant 1.000000e-07 : f32
      %cst_520 = arith.constant 0.99999988 : f32
      %2371 = vector.broadcast %cst_519 : f32 to vector<8x128xf32>
      %2372 = arith.maximumf %2371, %2370 : vector<8x128xf32>
      %2373 = vector.broadcast %cst_520 : f32 to vector<8x128xf32>
      %2374 = arith.minimumf %2373, %2372 : vector<8x128xf32>
      %2375 = arith.subf %2369, %2212 : vector<8x128xf32>
      %2376 = math.absf %2375 : vector<8x128xf32>
      %2377 = arith.subf %2374, %2270 : vector<8x128xf32>
      %2378 = math.absf %2377 : vector<8x128xf32>
      %2379 = arith.maximumf %2376, %2378 : vector<8x128xf32>
      %2380 = arith.subf %2369, %2201 : vector<8x128xf32>
      %2381 = arith.mulf %2208, %2380 : vector<8x128xf32>
      %2382 = arith.addf %2201, %2381 : vector<8x128xf32>
      %2383 = arith.subf %2374, %2204 : vector<8x128xf32>
      %2384 = arith.mulf %2208, %2383 : vector<8x128xf32>
      %2385 = arith.addf %2204, %2384 : vector<8x128xf32>
      %cst_521 = arith.constant 9.99999997E-7 : f32
      %2386 = vector.broadcast %cst_521 : f32 to vector<8x128xf32>
      %2387 = arith.cmpf olt, %2379, %2386 : vector<8x128xf32>
      %cst_522 = arith.constant 0.000000e+00 : f32
      %2388 = vector.broadcast %cst_522 : f32 to vector<8x128xf32>
      %2389 = arith.select %2387, %2388, %2208 : vector<8x128xi1>, vector<8x128xf32>
      %cst_523 = arith.constant 1.000000e-07 : f32
      %cst_524 = arith.constant 0.99999988 : f32
      %2390 = vector.broadcast %cst_523 : f32 to vector<8x128xf32>
      %2391 = arith.maximumf %2390, %2382 : vector<8x128xf32>
      %2392 = vector.broadcast %cst_524 : f32 to vector<8x128xf32>
      %2393 = arith.minimumf %2392, %2391 : vector<8x128xf32>
      %cst_525 = arith.constant 1.000000e+00 : f32
      %2394 = vector.broadcast %cst_525 : f32 to vector<8x128xf32>
      %2395 = arith.subf %2394, %2393 : vector<8x128xf32>
      %cst_526 = arith.constant 2.000000e+00 : f32
      %2396 = vector.broadcast %cst_526 : f32 to vector<8x128xf32>
      %2397 = arith.mulf %2396, %2393 : vector<8x128xf32>
      %cst_527 = arith.constant 1.000000e+00 : f32
      %2398 = vector.broadcast %cst_527 : f32 to vector<8x128xf32>
      %2399 = arith.subf %2398, %2397 : vector<8x128xf32>
      %2400 = arith.mulf %2399, %7 : vector<8x128xf32>
      %2401 = arith.addf %5, %2400 : vector<8x128xf32>
      %2402 = arith.mulf %2399, %2401 : vector<8x128xf32>
      %2403 = arith.addf %3, %2402 : vector<8x128xf32>
      %2404 = arith.mulf %2399, %2403 : vector<8x128xf32>
      %2405 = arith.addf %1, %2404 : vector<8x128xf32>
      %2406 = arith.mulf %2399, %13 : vector<8x128xf32>
      %2407 = arith.addf %11, %2406 : vector<8x128xf32>
      %2408 = arith.mulf %2399, %2407 : vector<8x128xf32>
      %2409 = arith.addf %3, %2408 : vector<8x128xf32>
      %2410 = arith.mulf %15, %2399 : vector<8x128xf32>
      %2411 = arith.addf %11, %2410 : vector<8x128xf32>
      %2412 = math.log %2393 : vector<8x128xf32>
      %2413 = math.log %2395 : vector<8x128xf32>
      %2414 = arith.mulf %2393, %2395 : vector<8x128xf32>
      %2415 = tpu.reciprocal %2414 {approx = true} : vector<8x128xf32> -> vector<8x128xf32>
      %2416 = arith.mulf %2393, %9 : vector<8x128xf32>
      %2417 = arith.mulf %2393, %2412 : vector<8x128xf32>
      %2418 = arith.mulf %2395, %2413 : vector<8x128xf32>
      %2419 = arith.addf %2417, %2418 : vector<8x128xf32>
      %cst_528 = arith.constant 2.494200e+03 : f32
      %2420 = vector.broadcast %cst_528 : f32 to vector<8x128xf32>
      %2421 = arith.mulf %2420, %2419 : vector<8x128xf32>
      %2422 = arith.addf %2416, %2421 : vector<8x128xf32>
      %2423 = arith.mulf %2414, %2405 : vector<8x128xf32>
      %2424 = arith.addf %2422, %2423 : vector<8x128xf32>
      %2425 = arith.subf %2412, %2413 : vector<8x128xf32>
      %cst_529 = arith.constant 2.494200e+03 : f32
      %2426 = vector.broadcast %cst_529 : f32 to vector<8x128xf32>
      %2427 = arith.mulf %2426, %2425 : vector<8x128xf32>
      %2428 = arith.addf %9, %2427 : vector<8x128xf32>
      %2429 = arith.mulf %2399, %2405 : vector<8x128xf32>
      %2430 = arith.addf %2428, %2429 : vector<8x128xf32>
      %cst_530 = arith.constant 2.000000e+00 : f32
      %2431 = vector.broadcast %cst_530 : f32 to vector<8x128xf32>
      %2432 = arith.mulf %2431, %2414 : vector<8x128xf32>
      %2433 = arith.mulf %2432, %2409 : vector<8x128xf32>
      %2434 = arith.subf %2430, %2433 : vector<8x128xf32>
      %cst_531 = arith.constant 2.494200e+03 : f32
      %2435 = vector.broadcast %cst_531 : f32 to vector<8x128xf32>
      %2436 = arith.mulf %2435, %2415 : vector<8x128xf32>
      %cst_532 = arith.constant 2.000000e+00 : f32
      %2437 = vector.broadcast %cst_532 : f32 to vector<8x128xf32>
      %2438 = arith.mulf %2437, %2405 : vector<8x128xf32>
      %2439 = arith.subf %2436, %2438 : vector<8x128xf32>
      %cst_533 = arith.constant 4.000000e+00 : f32
      %2440 = vector.broadcast %cst_533 : f32 to vector<8x128xf32>
      %2441 = arith.mulf %2440, %2399 : vector<8x128xf32>
      %2442 = arith.mulf %2441, %2409 : vector<8x128xf32>
      %2443 = arith.subf %2439, %2442 : vector<8x128xf32>
      %cst_534 = arith.constant 4.000000e+00 : f32
      %2444 = vector.broadcast %cst_534 : f32 to vector<8x128xf32>
      %2445 = arith.mulf %2444, %2414 : vector<8x128xf32>
      %2446 = arith.mulf %2445, %2411 : vector<8x128xf32>
      %2447 = arith.addf %2443, %2446 : vector<8x128xf32>
      %cst_535 = arith.constant 1.000000e-07 : f32
      %cst_536 = arith.constant 0.99999988 : f32
      %2448 = vector.broadcast %cst_535 : f32 to vector<8x128xf32>
      %2449 = arith.maximumf %2448, %2385 : vector<8x128xf32>
      %2450 = vector.broadcast %cst_536 : f32 to vector<8x128xf32>
      %2451 = arith.minimumf %2450, %2449 : vector<8x128xf32>
      %cst_537 = arith.constant 1.000000e+00 : f32
      %2452 = vector.broadcast %cst_537 : f32 to vector<8x128xf32>
      %2453 = arith.subf %2452, %2451 : vector<8x128xf32>
      %cst_538 = arith.constant 2.000000e+00 : f32
      %2454 = vector.broadcast %cst_538 : f32 to vector<8x128xf32>
      %2455 = arith.mulf %2454, %2451 : vector<8x128xf32>
      %cst_539 = arith.constant 1.000000e+00 : f32
      %2456 = vector.broadcast %cst_539 : f32 to vector<8x128xf32>
      %2457 = arith.subf %2456, %2455 : vector<8x128xf32>
      %2458 = arith.mulf %2457, %7 : vector<8x128xf32>
      %2459 = arith.addf %5, %2458 : vector<8x128xf32>
      %2460 = arith.mulf %2457, %2459 : vector<8x128xf32>
      %2461 = arith.addf %3, %2460 : vector<8x128xf32>
      %2462 = arith.mulf %2457, %2461 : vector<8x128xf32>
      %2463 = arith.addf %1, %2462 : vector<8x128xf32>
      %2464 = arith.mulf %2457, %13 : vector<8x128xf32>
      %2465 = arith.addf %11, %2464 : vector<8x128xf32>
      %2466 = arith.mulf %2457, %2465 : vector<8x128xf32>
      %2467 = arith.addf %3, %2466 : vector<8x128xf32>
      %2468 = arith.mulf %15, %2457 : vector<8x128xf32>
      %2469 = arith.addf %11, %2468 : vector<8x128xf32>
      %2470 = math.log %2451 : vector<8x128xf32>
      %2471 = math.log %2453 : vector<8x128xf32>
      %2472 = arith.mulf %2451, %2453 : vector<8x128xf32>
      %2473 = tpu.reciprocal %2472 {approx = true} : vector<8x128xf32> -> vector<8x128xf32>
      %2474 = arith.mulf %2451, %9 : vector<8x128xf32>
      %2475 = arith.mulf %2451, %2470 : vector<8x128xf32>
      %2476 = arith.mulf %2453, %2471 : vector<8x128xf32>
      %2477 = arith.addf %2475, %2476 : vector<8x128xf32>
      %cst_540 = arith.constant 2.494200e+03 : f32
      %2478 = vector.broadcast %cst_540 : f32 to vector<8x128xf32>
      %2479 = arith.mulf %2478, %2477 : vector<8x128xf32>
      %2480 = arith.addf %2474, %2479 : vector<8x128xf32>
      %2481 = arith.mulf %2472, %2463 : vector<8x128xf32>
      %2482 = arith.addf %2480, %2481 : vector<8x128xf32>
      %2483 = arith.subf %2470, %2471 : vector<8x128xf32>
      %cst_541 = arith.constant 2.494200e+03 : f32
      %2484 = vector.broadcast %cst_541 : f32 to vector<8x128xf32>
      %2485 = arith.mulf %2484, %2483 : vector<8x128xf32>
      %2486 = arith.addf %9, %2485 : vector<8x128xf32>
      %2487 = arith.mulf %2457, %2463 : vector<8x128xf32>
      %2488 = arith.addf %2486, %2487 : vector<8x128xf32>
      %cst_542 = arith.constant 2.000000e+00 : f32
      %2489 = vector.broadcast %cst_542 : f32 to vector<8x128xf32>
      %2490 = arith.mulf %2489, %2472 : vector<8x128xf32>
      %2491 = arith.mulf %2490, %2467 : vector<8x128xf32>
      %2492 = arith.subf %2488, %2491 : vector<8x128xf32>
      %cst_543 = arith.constant 2.494200e+03 : f32
      %2493 = vector.broadcast %cst_543 : f32 to vector<8x128xf32>
      %2494 = arith.mulf %2493, %2473 : vector<8x128xf32>
      %cst_544 = arith.constant 2.000000e+00 : f32
      %2495 = vector.broadcast %cst_544 : f32 to vector<8x128xf32>
      %2496 = arith.mulf %2495, %2463 : vector<8x128xf32>
      %2497 = arith.subf %2494, %2496 : vector<8x128xf32>
      %cst_545 = arith.constant 4.000000e+00 : f32
      %2498 = vector.broadcast %cst_545 : f32 to vector<8x128xf32>
      %2499 = arith.mulf %2498, %2457 : vector<8x128xf32>
      %2500 = arith.mulf %2499, %2467 : vector<8x128xf32>
      %2501 = arith.subf %2497, %2500 : vector<8x128xf32>
      %cst_546 = arith.constant 4.000000e+00 : f32
      %2502 = vector.broadcast %cst_546 : f32 to vector<8x128xf32>
      %2503 = arith.mulf %2502, %2472 : vector<8x128xf32>
      %2504 = arith.mulf %2503, %2469 : vector<8x128xf32>
      %2505 = arith.addf %2501, %2504 : vector<8x128xf32>
      %2506 = arith.subf %2451, %2393 : vector<8x128xf32>
      %2507 = arith.subf %2482, %2424 : vector<8x128xf32>
      %2508 = arith.subf %2492, %2434 : vector<8x128xf32>
      %2509 = arith.mulf %2434, %2506 : vector<8x128xf32>
      %2510 = arith.subf %2507, %2509 : vector<8x128xf32>
      %2511 = arith.mulf %2492, %2506 : vector<8x128xf32>
      %2512 = arith.subf %2511, %2507 : vector<8x128xf32>
      %2513 = arith.mulf %2508, %2508 : vector<8x128xf32>
      %2514 = arith.mulf %2447, %2505 : vector<8x128xf32>
      %2515 = arith.mulf %2514, %2506 : vector<8x128xf32>
      %2516 = arith.mulf %2515, %2506 : vector<8x128xf32>
      %2517 = arith.subf %2513, %2516 : vector<8x128xf32>
      %2518 = math.absf %2517 : vector<8x128xf32>
      %cst_547 = arith.constant 9.99999996E-13 : f32
      %2519 = vector.broadcast %cst_547 : f32 to vector<8x128xf32>
      %2520 = arith.cmpf olt, %2518, %2519 : vector<8x128xf32>
      %cst_548 = arith.constant 0.000000e+00 : f32
      %2521 = vector.broadcast %cst_548 : f32 to vector<8x128xf32>
      %2522 = arith.cmpf oge, %2517, %2521 : vector<8x128xf32>
      %cst_549 = arith.constant 9.99999996E-13 : f32
      %cst_550 = arith.constant -9.99999996E-13 : f32
      %2523 = vector.broadcast %cst_549 : f32 to vector<8x128xf32>
      %2524 = vector.broadcast %cst_550 : f32 to vector<8x128xf32>
      %2525 = arith.select %2522, %2523, %2524 : vector<8x128xi1>, vector<8x128xf32>
      %2526 = arith.select %2520, %2525, %2517 : vector<8x128xi1>, vector<8x128xf32>
      %2527 = tpu.reciprocal %2526 {approx = true} : vector<8x128xf32> -> vector<8x128xf32>
      %2528 = arith.mulf %2508, %2512 : vector<8x128xf32>
      %2529 = arith.mulf %2505, %2506 : vector<8x128xf32>
      %2530 = arith.mulf %2529, %2510 : vector<8x128xf32>
      %2531 = arith.subf %2528, %2530 : vector<8x128xf32>
      %2532 = arith.mulf %2531, %2527 : vector<8x128xf32>
      %cst_551 = arith.constant -5.000000e-02 : f32
      %cst_552 = arith.constant 5.000000e-02 : f32
      %2533 = vector.broadcast %cst_551 : f32 to vector<8x128xf32>
      %2534 = arith.maximumf %2533, %2532 : vector<8x128xf32>
      %2535 = vector.broadcast %cst_552 : f32 to vector<8x128xf32>
      %2536 = arith.minimumf %2535, %2534 : vector<8x128xf32>
      %2537 = arith.mulf %2447, %2506 : vector<8x128xf32>
      %2538 = arith.mulf %2537, %2512 : vector<8x128xf32>
      %2539 = arith.mulf %2508, %2510 : vector<8x128xf32>
      %2540 = arith.subf %2538, %2539 : vector<8x128xf32>
      %2541 = arith.mulf %2540, %2527 : vector<8x128xf32>
      %cst_553 = arith.constant -5.000000e-02 : f32
      %cst_554 = arith.constant 5.000000e-02 : f32
      %2542 = vector.broadcast %cst_553 : f32 to vector<8x128xf32>
      %2543 = arith.maximumf %2542, %2541 : vector<8x128xf32>
      %2544 = vector.broadcast %cst_554 : f32 to vector<8x128xf32>
      %2545 = arith.minimumf %2544, %2543 : vector<8x128xf32>
      %2546 = arith.addf %2393, %2536 : vector<8x128xf32>
      %cst_555 = arith.constant 1.000000e-07 : f32
      %cst_556 = arith.constant 0.99999988 : f32
      %2547 = vector.broadcast %cst_555 : f32 to vector<8x128xf32>
      %2548 = arith.maximumf %2547, %2546 : vector<8x128xf32>
      %2549 = vector.broadcast %cst_556 : f32 to vector<8x128xf32>
      %2550 = arith.minimumf %2549, %2548 : vector<8x128xf32>
      %2551 = arith.addf %2451, %2545 : vector<8x128xf32>
      %cst_557 = arith.constant 1.000000e-07 : f32
      %cst_558 = arith.constant 0.99999988 : f32
      %2552 = vector.broadcast %cst_557 : f32 to vector<8x128xf32>
      %2553 = arith.maximumf %2552, %2551 : vector<8x128xf32>
      %2554 = vector.broadcast %cst_558 : f32 to vector<8x128xf32>
      %2555 = arith.minimumf %2554, %2553 : vector<8x128xf32>
      %2556 = arith.subf %2550, %2393 : vector<8x128xf32>
      %2557 = math.absf %2556 : vector<8x128xf32>
      %2558 = arith.subf %2555, %2451 : vector<8x128xf32>
      %2559 = math.absf %2558 : vector<8x128xf32>
      %2560 = arith.maximumf %2557, %2559 : vector<8x128xf32>
      %2561 = arith.subf %2550, %2382 : vector<8x128xf32>
      %2562 = arith.mulf %2389, %2561 : vector<8x128xf32>
      %2563 = arith.addf %2382, %2562 : vector<8x128xf32>
      %2564 = arith.subf %2555, %2385 : vector<8x128xf32>
      %2565 = arith.mulf %2389, %2564 : vector<8x128xf32>
      %2566 = arith.addf %2385, %2565 : vector<8x128xf32>
      %cst_559 = arith.constant 9.99999997E-7 : f32
      %2567 = vector.broadcast %cst_559 : f32 to vector<8x128xf32>
      %2568 = arith.cmpf olt, %2560, %2567 : vector<8x128xf32>
      %cst_560 = arith.constant 0.000000e+00 : f32
      %2569 = vector.broadcast %cst_560 : f32 to vector<8x128xf32>
      %2570 = arith.select %2568, %2569, %2389 : vector<8x128xi1>, vector<8x128xf32>
      %cst_561 = arith.constant 1.000000e-07 : f32
      %cst_562 = arith.constant 0.99999988 : f32
      %2571 = vector.broadcast %cst_561 : f32 to vector<8x128xf32>
      %2572 = arith.maximumf %2571, %2563 : vector<8x128xf32>
      %2573 = vector.broadcast %cst_562 : f32 to vector<8x128xf32>
      %2574 = arith.minimumf %2573, %2572 : vector<8x128xf32>
      %cst_563 = arith.constant 1.000000e+00 : f32
      %2575 = vector.broadcast %cst_563 : f32 to vector<8x128xf32>
      %2576 = arith.subf %2575, %2574 : vector<8x128xf32>
      %cst_564 = arith.constant 2.000000e+00 : f32
      %2577 = vector.broadcast %cst_564 : f32 to vector<8x128xf32>
      %2578 = arith.mulf %2577, %2574 : vector<8x128xf32>
      %cst_565 = arith.constant 1.000000e+00 : f32
      %2579 = vector.broadcast %cst_565 : f32 to vector<8x128xf32>
      %2580 = arith.subf %2579, %2578 : vector<8x128xf32>
      %2581 = arith.mulf %2580, %7 : vector<8x128xf32>
      %2582 = arith.addf %5, %2581 : vector<8x128xf32>
      %2583 = arith.mulf %2580, %2582 : vector<8x128xf32>
      %2584 = arith.addf %3, %2583 : vector<8x128xf32>
      %2585 = arith.mulf %2580, %2584 : vector<8x128xf32>
      %2586 = arith.addf %1, %2585 : vector<8x128xf32>
      %2587 = arith.mulf %2580, %13 : vector<8x128xf32>
      %2588 = arith.addf %11, %2587 : vector<8x128xf32>
      %2589 = arith.mulf %2580, %2588 : vector<8x128xf32>
      %2590 = arith.addf %3, %2589 : vector<8x128xf32>
      %2591 = arith.mulf %15, %2580 : vector<8x128xf32>
      %2592 = arith.addf %11, %2591 : vector<8x128xf32>
      %2593 = math.log %2574 : vector<8x128xf32>
      %2594 = math.log %2576 : vector<8x128xf32>
      %2595 = arith.mulf %2574, %2576 : vector<8x128xf32>
      %2596 = tpu.reciprocal %2595 {approx = true} : vector<8x128xf32> -> vector<8x128xf32>
      %2597 = arith.mulf %2574, %9 : vector<8x128xf32>
      %2598 = arith.mulf %2574, %2593 : vector<8x128xf32>
      %2599 = arith.mulf %2576, %2594 : vector<8x128xf32>
      %2600 = arith.addf %2598, %2599 : vector<8x128xf32>
      %cst_566 = arith.constant 2.494200e+03 : f32
      %2601 = vector.broadcast %cst_566 : f32 to vector<8x128xf32>
      %2602 = arith.mulf %2601, %2600 : vector<8x128xf32>
      %2603 = arith.addf %2597, %2602 : vector<8x128xf32>
      %2604 = arith.mulf %2595, %2586 : vector<8x128xf32>
      %2605 = arith.addf %2603, %2604 : vector<8x128xf32>
      %2606 = arith.subf %2593, %2594 : vector<8x128xf32>
      %cst_567 = arith.constant 2.494200e+03 : f32
      %2607 = vector.broadcast %cst_567 : f32 to vector<8x128xf32>
      %2608 = arith.mulf %2607, %2606 : vector<8x128xf32>
      %2609 = arith.addf %9, %2608 : vector<8x128xf32>
      %2610 = arith.mulf %2580, %2586 : vector<8x128xf32>
      %2611 = arith.addf %2609, %2610 : vector<8x128xf32>
      %cst_568 = arith.constant 2.000000e+00 : f32
      %2612 = vector.broadcast %cst_568 : f32 to vector<8x128xf32>
      %2613 = arith.mulf %2612, %2595 : vector<8x128xf32>
      %2614 = arith.mulf %2613, %2590 : vector<8x128xf32>
      %2615 = arith.subf %2611, %2614 : vector<8x128xf32>
      %cst_569 = arith.constant 2.494200e+03 : f32
      %2616 = vector.broadcast %cst_569 : f32 to vector<8x128xf32>
      %2617 = arith.mulf %2616, %2596 : vector<8x128xf32>
      %cst_570 = arith.constant 2.000000e+00 : f32
      %2618 = vector.broadcast %cst_570 : f32 to vector<8x128xf32>
      %2619 = arith.mulf %2618, %2586 : vector<8x128xf32>
      %2620 = arith.subf %2617, %2619 : vector<8x128xf32>
      %cst_571 = arith.constant 4.000000e+00 : f32
      %2621 = vector.broadcast %cst_571 : f32 to vector<8x128xf32>
      %2622 = arith.mulf %2621, %2580 : vector<8x128xf32>
      %2623 = arith.mulf %2622, %2590 : vector<8x128xf32>
      %2624 = arith.subf %2620, %2623 : vector<8x128xf32>
      %cst_572 = arith.constant 4.000000e+00 : f32
      %2625 = vector.broadcast %cst_572 : f32 to vector<8x128xf32>
      %2626 = arith.mulf %2625, %2595 : vector<8x128xf32>
      %2627 = arith.mulf %2626, %2592 : vector<8x128xf32>
      %2628 = arith.addf %2624, %2627 : vector<8x128xf32>
      %cst_573 = arith.constant 1.000000e-07 : f32
      %cst_574 = arith.constant 0.99999988 : f32
      %2629 = vector.broadcast %cst_573 : f32 to vector<8x128xf32>
      %2630 = arith.maximumf %2629, %2566 : vector<8x128xf32>
      %2631 = vector.broadcast %cst_574 : f32 to vector<8x128xf32>
      %2632 = arith.minimumf %2631, %2630 : vector<8x128xf32>
      %cst_575 = arith.constant 1.000000e+00 : f32
      %2633 = vector.broadcast %cst_575 : f32 to vector<8x128xf32>
      %2634 = arith.subf %2633, %2632 : vector<8x128xf32>
      %cst_576 = arith.constant 2.000000e+00 : f32
      %2635 = vector.broadcast %cst_576 : f32 to vector<8x128xf32>
      %2636 = arith.mulf %2635, %2632 : vector<8x128xf32>
      %cst_577 = arith.constant 1.000000e+00 : f32
      %2637 = vector.broadcast %cst_577 : f32 to vector<8x128xf32>
      %2638 = arith.subf %2637, %2636 : vector<8x128xf32>
      %2639 = arith.mulf %2638, %7 : vector<8x128xf32>
      %2640 = arith.addf %5, %2639 : vector<8x128xf32>
      %2641 = arith.mulf %2638, %2640 : vector<8x128xf32>
      %2642 = arith.addf %3, %2641 : vector<8x128xf32>
      %2643 = arith.mulf %2638, %2642 : vector<8x128xf32>
      %2644 = arith.addf %1, %2643 : vector<8x128xf32>
      %2645 = arith.mulf %2638, %13 : vector<8x128xf32>
      %2646 = arith.addf %11, %2645 : vector<8x128xf32>
      %2647 = arith.mulf %2638, %2646 : vector<8x128xf32>
      %2648 = arith.addf %3, %2647 : vector<8x128xf32>
      %2649 = arith.mulf %15, %2638 : vector<8x128xf32>
      %2650 = arith.addf %11, %2649 : vector<8x128xf32>
      %2651 = math.log %2632 : vector<8x128xf32>
      %2652 = math.log %2634 : vector<8x128xf32>
      %2653 = arith.mulf %2632, %2634 : vector<8x128xf32>
      %2654 = tpu.reciprocal %2653 {approx = true} : vector<8x128xf32> -> vector<8x128xf32>
      %2655 = arith.mulf %2632, %9 : vector<8x128xf32>
      %2656 = arith.mulf %2632, %2651 : vector<8x128xf32>
      %2657 = arith.mulf %2634, %2652 : vector<8x128xf32>
      %2658 = arith.addf %2656, %2657 : vector<8x128xf32>
      %cst_578 = arith.constant 2.494200e+03 : f32
      %2659 = vector.broadcast %cst_578 : f32 to vector<8x128xf32>
      %2660 = arith.mulf %2659, %2658 : vector<8x128xf32>
      %2661 = arith.addf %2655, %2660 : vector<8x128xf32>
      %2662 = arith.mulf %2653, %2644 : vector<8x128xf32>
      %2663 = arith.addf %2661, %2662 : vector<8x128xf32>
      %2664 = arith.subf %2651, %2652 : vector<8x128xf32>
      %cst_579 = arith.constant 2.494200e+03 : f32
      %2665 = vector.broadcast %cst_579 : f32 to vector<8x128xf32>
      %2666 = arith.mulf %2665, %2664 : vector<8x128xf32>
      %2667 = arith.addf %9, %2666 : vector<8x128xf32>
      %2668 = arith.mulf %2638, %2644 : vector<8x128xf32>
      %2669 = arith.addf %2667, %2668 : vector<8x128xf32>
      %cst_580 = arith.constant 2.000000e+00 : f32
      %2670 = vector.broadcast %cst_580 : f32 to vector<8x128xf32>
      %2671 = arith.mulf %2670, %2653 : vector<8x128xf32>
      %2672 = arith.mulf %2671, %2648 : vector<8x128xf32>
      %2673 = arith.subf %2669, %2672 : vector<8x128xf32>
      %cst_581 = arith.constant 2.494200e+03 : f32
      %2674 = vector.broadcast %cst_581 : f32 to vector<8x128xf32>
      %2675 = arith.mulf %2674, %2654 : vector<8x128xf32>
      %cst_582 = arith.constant 2.000000e+00 : f32
      %2676 = vector.broadcast %cst_582 : f32 to vector<8x128xf32>
      %2677 = arith.mulf %2676, %2644 : vector<8x128xf32>
      %2678 = arith.subf %2675, %2677 : vector<8x128xf32>
      %cst_583 = arith.constant 4.000000e+00 : f32
      %2679 = vector.broadcast %cst_583 : f32 to vector<8x128xf32>
      %2680 = arith.mulf %2679, %2638 : vector<8x128xf32>
      %2681 = arith.mulf %2680, %2648 : vector<8x128xf32>
      %2682 = arith.subf %2678, %2681 : vector<8x128xf32>
      %cst_584 = arith.constant 4.000000e+00 : f32
      %2683 = vector.broadcast %cst_584 : f32 to vector<8x128xf32>
      %2684 = arith.mulf %2683, %2653 : vector<8x128xf32>
      %2685 = arith.mulf %2684, %2650 : vector<8x128xf32>
      %2686 = arith.addf %2682, %2685 : vector<8x128xf32>
      %2687 = arith.subf %2632, %2574 : vector<8x128xf32>
      %2688 = arith.subf %2663, %2605 : vector<8x128xf32>
      %2689 = arith.subf %2673, %2615 : vector<8x128xf32>
      %2690 = arith.mulf %2615, %2687 : vector<8x128xf32>
      %2691 = arith.subf %2688, %2690 : vector<8x128xf32>
      %2692 = arith.mulf %2673, %2687 : vector<8x128xf32>
      %2693 = arith.subf %2692, %2688 : vector<8x128xf32>
      %2694 = arith.mulf %2689, %2689 : vector<8x128xf32>
      %2695 = arith.mulf %2628, %2686 : vector<8x128xf32>
      %2696 = arith.mulf %2695, %2687 : vector<8x128xf32>
      %2697 = arith.mulf %2696, %2687 : vector<8x128xf32>
      %2698 = arith.subf %2694, %2697 : vector<8x128xf32>
      %2699 = math.absf %2698 : vector<8x128xf32>
      %cst_585 = arith.constant 9.99999996E-13 : f32
      %2700 = vector.broadcast %cst_585 : f32 to vector<8x128xf32>
      %2701 = arith.cmpf olt, %2699, %2700 : vector<8x128xf32>
      %cst_586 = arith.constant 0.000000e+00 : f32
      %2702 = vector.broadcast %cst_586 : f32 to vector<8x128xf32>
      %2703 = arith.cmpf oge, %2698, %2702 : vector<8x128xf32>
      %cst_587 = arith.constant 9.99999996E-13 : f32
      %cst_588 = arith.constant -9.99999996E-13 : f32
      %2704 = vector.broadcast %cst_587 : f32 to vector<8x128xf32>
      %2705 = vector.broadcast %cst_588 : f32 to vector<8x128xf32>
      %2706 = arith.select %2703, %2704, %2705 : vector<8x128xi1>, vector<8x128xf32>
      %2707 = arith.select %2701, %2706, %2698 : vector<8x128xi1>, vector<8x128xf32>
      %2708 = tpu.reciprocal %2707 {approx = true} : vector<8x128xf32> -> vector<8x128xf32>
      %2709 = arith.mulf %2689, %2693 : vector<8x128xf32>
      %2710 = arith.mulf %2686, %2687 : vector<8x128xf32>
      %2711 = arith.mulf %2710, %2691 : vector<8x128xf32>
      %2712 = arith.subf %2709, %2711 : vector<8x128xf32>
      %2713 = arith.mulf %2712, %2708 : vector<8x128xf32>
      %cst_589 = arith.constant -5.000000e-02 : f32
      %cst_590 = arith.constant 5.000000e-02 : f32
      %2714 = vector.broadcast %cst_589 : f32 to vector<8x128xf32>
      %2715 = arith.maximumf %2714, %2713 : vector<8x128xf32>
      %2716 = vector.broadcast %cst_590 : f32 to vector<8x128xf32>
      %2717 = arith.minimumf %2716, %2715 : vector<8x128xf32>
      %2718 = arith.mulf %2628, %2687 : vector<8x128xf32>
      %2719 = arith.mulf %2718, %2693 : vector<8x128xf32>
      %2720 = arith.mulf %2689, %2691 : vector<8x128xf32>
      %2721 = arith.subf %2719, %2720 : vector<8x128xf32>
      %2722 = arith.mulf %2721, %2708 : vector<8x128xf32>
      %cst_591 = arith.constant -5.000000e-02 : f32
      %cst_592 = arith.constant 5.000000e-02 : f32
      %2723 = vector.broadcast %cst_591 : f32 to vector<8x128xf32>
      %2724 = arith.maximumf %2723, %2722 : vector<8x128xf32>
      %2725 = vector.broadcast %cst_592 : f32 to vector<8x128xf32>
      %2726 = arith.minimumf %2725, %2724 : vector<8x128xf32>
      %2727 = arith.addf %2574, %2717 : vector<8x128xf32>
      %cst_593 = arith.constant 1.000000e-07 : f32
      %cst_594 = arith.constant 0.99999988 : f32
      %2728 = vector.broadcast %cst_593 : f32 to vector<8x128xf32>
      %2729 = arith.maximumf %2728, %2727 : vector<8x128xf32>
      %2730 = vector.broadcast %cst_594 : f32 to vector<8x128xf32>
      %2731 = arith.minimumf %2730, %2729 : vector<8x128xf32>
      %2732 = arith.addf %2632, %2726 : vector<8x128xf32>
      %cst_595 = arith.constant 1.000000e-07 : f32
      %cst_596 = arith.constant 0.99999988 : f32
      %2733 = vector.broadcast %cst_595 : f32 to vector<8x128xf32>
      %2734 = arith.maximumf %2733, %2732 : vector<8x128xf32>
      %2735 = vector.broadcast %cst_596 : f32 to vector<8x128xf32>
      %2736 = arith.minimumf %2735, %2734 : vector<8x128xf32>
      %2737 = arith.subf %2731, %2574 : vector<8x128xf32>
      %2738 = math.absf %2737 : vector<8x128xf32>
      %2739 = arith.subf %2736, %2632 : vector<8x128xf32>
      %2740 = math.absf %2739 : vector<8x128xf32>
      %2741 = arith.maximumf %2738, %2740 : vector<8x128xf32>
      %2742 = arith.subf %2731, %2563 : vector<8x128xf32>
      %2743 = arith.mulf %2570, %2742 : vector<8x128xf32>
      %2744 = arith.addf %2563, %2743 : vector<8x128xf32>
      %2745 = arith.subf %2736, %2566 : vector<8x128xf32>
      %2746 = arith.mulf %2570, %2745 : vector<8x128xf32>
      %2747 = arith.addf %2566, %2746 : vector<8x128xf32>
      %cst_597 = arith.constant 9.99999997E-7 : f32
      %2748 = vector.broadcast %cst_597 : f32 to vector<8x128xf32>
      %2749 = arith.cmpf olt, %2741, %2748 : vector<8x128xf32>
      %cst_598 = arith.constant 0.000000e+00 : f32
      %2750 = vector.broadcast %cst_598 : f32 to vector<8x128xf32>
      %2751 = arith.select %2749, %2750, %2570 : vector<8x128xi1>, vector<8x128xf32>
      %cst_599 = arith.constant 1.000000e-07 : f32
      %cst_600 = arith.constant 0.99999988 : f32
      %2752 = vector.broadcast %cst_599 : f32 to vector<8x128xf32>
      %2753 = arith.maximumf %2752, %2744 : vector<8x128xf32>
      %2754 = vector.broadcast %cst_600 : f32 to vector<8x128xf32>
      %2755 = arith.minimumf %2754, %2753 : vector<8x128xf32>
      %cst_601 = arith.constant 1.000000e+00 : f32
      %2756 = vector.broadcast %cst_601 : f32 to vector<8x128xf32>
      %2757 = arith.subf %2756, %2755 : vector<8x128xf32>
      %cst_602 = arith.constant 2.000000e+00 : f32
      %2758 = vector.broadcast %cst_602 : f32 to vector<8x128xf32>
      %2759 = arith.mulf %2758, %2755 : vector<8x128xf32>
      %cst_603 = arith.constant 1.000000e+00 : f32
      %2760 = vector.broadcast %cst_603 : f32 to vector<8x128xf32>
      %2761 = arith.subf %2760, %2759 : vector<8x128xf32>
      %2762 = arith.mulf %2761, %7 : vector<8x128xf32>
      %2763 = arith.addf %5, %2762 : vector<8x128xf32>
      %2764 = arith.mulf %2761, %2763 : vector<8x128xf32>
      %2765 = arith.addf %3, %2764 : vector<8x128xf32>
      %2766 = arith.mulf %2761, %2765 : vector<8x128xf32>
      %2767 = arith.addf %1, %2766 : vector<8x128xf32>
      %2768 = arith.mulf %2761, %13 : vector<8x128xf32>
      %2769 = arith.addf %11, %2768 : vector<8x128xf32>
      %2770 = arith.mulf %2761, %2769 : vector<8x128xf32>
      %2771 = arith.addf %3, %2770 : vector<8x128xf32>
      %2772 = arith.mulf %15, %2761 : vector<8x128xf32>
      %2773 = arith.addf %11, %2772 : vector<8x128xf32>
      %2774 = math.log %2755 : vector<8x128xf32>
      %2775 = math.log %2757 : vector<8x128xf32>
      %2776 = arith.mulf %2755, %2757 : vector<8x128xf32>
      %2777 = tpu.reciprocal %2776 {approx = true} : vector<8x128xf32> -> vector<8x128xf32>
      %2778 = arith.mulf %2755, %9 : vector<8x128xf32>
      %2779 = arith.mulf %2755, %2774 : vector<8x128xf32>
      %2780 = arith.mulf %2757, %2775 : vector<8x128xf32>
      %2781 = arith.addf %2779, %2780 : vector<8x128xf32>
      %cst_604 = arith.constant 2.494200e+03 : f32
      %2782 = vector.broadcast %cst_604 : f32 to vector<8x128xf32>
      %2783 = arith.mulf %2782, %2781 : vector<8x128xf32>
      %2784 = arith.addf %2778, %2783 : vector<8x128xf32>
      %2785 = arith.mulf %2776, %2767 : vector<8x128xf32>
      %2786 = arith.addf %2784, %2785 : vector<8x128xf32>
      %2787 = arith.subf %2774, %2775 : vector<8x128xf32>
      %cst_605 = arith.constant 2.494200e+03 : f32
      %2788 = vector.broadcast %cst_605 : f32 to vector<8x128xf32>
      %2789 = arith.mulf %2788, %2787 : vector<8x128xf32>
      %2790 = arith.addf %9, %2789 : vector<8x128xf32>
      %2791 = arith.mulf %2761, %2767 : vector<8x128xf32>
      %2792 = arith.addf %2790, %2791 : vector<8x128xf32>
      %cst_606 = arith.constant 2.000000e+00 : f32
      %2793 = vector.broadcast %cst_606 : f32 to vector<8x128xf32>
      %2794 = arith.mulf %2793, %2776 : vector<8x128xf32>
      %2795 = arith.mulf %2794, %2771 : vector<8x128xf32>
      %2796 = arith.subf %2792, %2795 : vector<8x128xf32>
      %cst_607 = arith.constant 2.494200e+03 : f32
      %2797 = vector.broadcast %cst_607 : f32 to vector<8x128xf32>
      %2798 = arith.mulf %2797, %2777 : vector<8x128xf32>
      %cst_608 = arith.constant 2.000000e+00 : f32
      %2799 = vector.broadcast %cst_608 : f32 to vector<8x128xf32>
      %2800 = arith.mulf %2799, %2767 : vector<8x128xf32>
      %2801 = arith.subf %2798, %2800 : vector<8x128xf32>
      %cst_609 = arith.constant 4.000000e+00 : f32
      %2802 = vector.broadcast %cst_609 : f32 to vector<8x128xf32>
      %2803 = arith.mulf %2802, %2761 : vector<8x128xf32>
      %2804 = arith.mulf %2803, %2771 : vector<8x128xf32>
      %2805 = arith.subf %2801, %2804 : vector<8x128xf32>
      %cst_610 = arith.constant 4.000000e+00 : f32
      %2806 = vector.broadcast %cst_610 : f32 to vector<8x128xf32>
      %2807 = arith.mulf %2806, %2776 : vector<8x128xf32>
      %2808 = arith.mulf %2807, %2773 : vector<8x128xf32>
      %2809 = arith.addf %2805, %2808 : vector<8x128xf32>
      %cst_611 = arith.constant 1.000000e-07 : f32
      %cst_612 = arith.constant 0.99999988 : f32
      %2810 = vector.broadcast %cst_611 : f32 to vector<8x128xf32>
      %2811 = arith.maximumf %2810, %2747 : vector<8x128xf32>
      %2812 = vector.broadcast %cst_612 : f32 to vector<8x128xf32>
      %2813 = arith.minimumf %2812, %2811 : vector<8x128xf32>
      %cst_613 = arith.constant 1.000000e+00 : f32
      %2814 = vector.broadcast %cst_613 : f32 to vector<8x128xf32>
      %2815 = arith.subf %2814, %2813 : vector<8x128xf32>
      %cst_614 = arith.constant 2.000000e+00 : f32
      %2816 = vector.broadcast %cst_614 : f32 to vector<8x128xf32>
      %2817 = arith.mulf %2816, %2813 : vector<8x128xf32>
      %cst_615 = arith.constant 1.000000e+00 : f32
      %2818 = vector.broadcast %cst_615 : f32 to vector<8x128xf32>
      %2819 = arith.subf %2818, %2817 : vector<8x128xf32>
      %2820 = arith.mulf %2819, %7 : vector<8x128xf32>
      %2821 = arith.addf %5, %2820 : vector<8x128xf32>
      %2822 = arith.mulf %2819, %2821 : vector<8x128xf32>
      %2823 = arith.addf %3, %2822 : vector<8x128xf32>
      %2824 = arith.mulf %2819, %2823 : vector<8x128xf32>
      %2825 = arith.addf %1, %2824 : vector<8x128xf32>
      %2826 = arith.mulf %2819, %13 : vector<8x128xf32>
      %2827 = arith.addf %11, %2826 : vector<8x128xf32>
      %2828 = arith.mulf %2819, %2827 : vector<8x128xf32>
      %2829 = arith.addf %3, %2828 : vector<8x128xf32>
      %2830 = arith.mulf %15, %2819 : vector<8x128xf32>
      %2831 = arith.addf %11, %2830 : vector<8x128xf32>
      %2832 = math.log %2813 : vector<8x128xf32>
      %2833 = math.log %2815 : vector<8x128xf32>
      %2834 = arith.mulf %2813, %2815 : vector<8x128xf32>
      %2835 = tpu.reciprocal %2834 {approx = true} : vector<8x128xf32> -> vector<8x128xf32>
      %2836 = arith.mulf %2813, %9 : vector<8x128xf32>
      %2837 = arith.mulf %2813, %2832 : vector<8x128xf32>
      %2838 = arith.mulf %2815, %2833 : vector<8x128xf32>
      %2839 = arith.addf %2837, %2838 : vector<8x128xf32>
      %cst_616 = arith.constant 2.494200e+03 : f32
      %2840 = vector.broadcast %cst_616 : f32 to vector<8x128xf32>
      %2841 = arith.mulf %2840, %2839 : vector<8x128xf32>
      %2842 = arith.addf %2836, %2841 : vector<8x128xf32>
      %2843 = arith.mulf %2834, %2825 : vector<8x128xf32>
      %2844 = arith.addf %2842, %2843 : vector<8x128xf32>
      %2845 = arith.subf %2832, %2833 : vector<8x128xf32>
      %cst_617 = arith.constant 2.494200e+03 : f32
      %2846 = vector.broadcast %cst_617 : f32 to vector<8x128xf32>
      %2847 = arith.mulf %2846, %2845 : vector<8x128xf32>
      %2848 = arith.addf %9, %2847 : vector<8x128xf32>
      %2849 = arith.mulf %2819, %2825 : vector<8x128xf32>
      %2850 = arith.addf %2848, %2849 : vector<8x128xf32>
      %cst_618 = arith.constant 2.000000e+00 : f32
      %2851 = vector.broadcast %cst_618 : f32 to vector<8x128xf32>
      %2852 = arith.mulf %2851, %2834 : vector<8x128xf32>
      %2853 = arith.mulf %2852, %2829 : vector<8x128xf32>
      %2854 = arith.subf %2850, %2853 : vector<8x128xf32>
      %cst_619 = arith.constant 2.494200e+03 : f32
      %2855 = vector.broadcast %cst_619 : f32 to vector<8x128xf32>
      %2856 = arith.mulf %2855, %2835 : vector<8x128xf32>
      %cst_620 = arith.constant 2.000000e+00 : f32
      %2857 = vector.broadcast %cst_620 : f32 to vector<8x128xf32>
      %2858 = arith.mulf %2857, %2825 : vector<8x128xf32>
      %2859 = arith.subf %2856, %2858 : vector<8x128xf32>
      %cst_621 = arith.constant 4.000000e+00 : f32
      %2860 = vector.broadcast %cst_621 : f32 to vector<8x128xf32>
      %2861 = arith.mulf %2860, %2819 : vector<8x128xf32>
      %2862 = arith.mulf %2861, %2829 : vector<8x128xf32>
      %2863 = arith.subf %2859, %2862 : vector<8x128xf32>
      %cst_622 = arith.constant 4.000000e+00 : f32
      %2864 = vector.broadcast %cst_622 : f32 to vector<8x128xf32>
      %2865 = arith.mulf %2864, %2834 : vector<8x128xf32>
      %2866 = arith.mulf %2865, %2831 : vector<8x128xf32>
      %2867 = arith.addf %2863, %2866 : vector<8x128xf32>
      %2868 = arith.subf %2813, %2755 : vector<8x128xf32>
      %2869 = arith.subf %2844, %2786 : vector<8x128xf32>
      %2870 = arith.subf %2854, %2796 : vector<8x128xf32>
      %2871 = arith.mulf %2796, %2868 : vector<8x128xf32>
      %2872 = arith.subf %2869, %2871 : vector<8x128xf32>
      %2873 = arith.mulf %2854, %2868 : vector<8x128xf32>
      %2874 = arith.subf %2873, %2869 : vector<8x128xf32>
      %2875 = arith.mulf %2870, %2870 : vector<8x128xf32>
      %2876 = arith.mulf %2809, %2867 : vector<8x128xf32>
      %2877 = arith.mulf %2876, %2868 : vector<8x128xf32>
      %2878 = arith.mulf %2877, %2868 : vector<8x128xf32>
      %2879 = arith.subf %2875, %2878 : vector<8x128xf32>
      %2880 = math.absf %2879 : vector<8x128xf32>
      %cst_623 = arith.constant 9.99999996E-13 : f32
      %2881 = vector.broadcast %cst_623 : f32 to vector<8x128xf32>
      %2882 = arith.cmpf olt, %2880, %2881 : vector<8x128xf32>
      %cst_624 = arith.constant 0.000000e+00 : f32
      %2883 = vector.broadcast %cst_624 : f32 to vector<8x128xf32>
      %2884 = arith.cmpf oge, %2879, %2883 : vector<8x128xf32>
      %cst_625 = arith.constant 9.99999996E-13 : f32
      %cst_626 = arith.constant -9.99999996E-13 : f32
      %2885 = vector.broadcast %cst_625 : f32 to vector<8x128xf32>
      %2886 = vector.broadcast %cst_626 : f32 to vector<8x128xf32>
      %2887 = arith.select %2884, %2885, %2886 : vector<8x128xi1>, vector<8x128xf32>
      %2888 = arith.select %2882, %2887, %2879 : vector<8x128xi1>, vector<8x128xf32>
      %2889 = tpu.reciprocal %2888 {approx = true} : vector<8x128xf32> -> vector<8x128xf32>
      %2890 = arith.mulf %2870, %2874 : vector<8x128xf32>
      %2891 = arith.mulf %2867, %2868 : vector<8x128xf32>
      %2892 = arith.mulf %2891, %2872 : vector<8x128xf32>
      %2893 = arith.subf %2890, %2892 : vector<8x128xf32>
      %2894 = arith.mulf %2893, %2889 : vector<8x128xf32>
      %cst_627 = arith.constant -5.000000e-02 : f32
      %cst_628 = arith.constant 5.000000e-02 : f32
      %2895 = vector.broadcast %cst_627 : f32 to vector<8x128xf32>
      %2896 = arith.maximumf %2895, %2894 : vector<8x128xf32>
      %2897 = vector.broadcast %cst_628 : f32 to vector<8x128xf32>
      %2898 = arith.minimumf %2897, %2896 : vector<8x128xf32>
      %2899 = arith.mulf %2809, %2868 : vector<8x128xf32>
      %2900 = arith.mulf %2899, %2874 : vector<8x128xf32>
      %2901 = arith.mulf %2870, %2872 : vector<8x128xf32>
      %2902 = arith.subf %2900, %2901 : vector<8x128xf32>
      %2903 = arith.mulf %2902, %2889 : vector<8x128xf32>
      %cst_629 = arith.constant -5.000000e-02 : f32
      %cst_630 = arith.constant 5.000000e-02 : f32
      %2904 = vector.broadcast %cst_629 : f32 to vector<8x128xf32>
      %2905 = arith.maximumf %2904, %2903 : vector<8x128xf32>
      %2906 = vector.broadcast %cst_630 : f32 to vector<8x128xf32>
      %2907 = arith.minimumf %2906, %2905 : vector<8x128xf32>
      %2908 = arith.addf %2755, %2898 : vector<8x128xf32>
      %cst_631 = arith.constant 1.000000e-07 : f32
      %cst_632 = arith.constant 0.99999988 : f32
      %2909 = vector.broadcast %cst_631 : f32 to vector<8x128xf32>
      %2910 = arith.maximumf %2909, %2908 : vector<8x128xf32>
      %2911 = vector.broadcast %cst_632 : f32 to vector<8x128xf32>
      %2912 = arith.minimumf %2911, %2910 : vector<8x128xf32>
      %2913 = arith.addf %2813, %2907 : vector<8x128xf32>
      %cst_633 = arith.constant 1.000000e-07 : f32
      %cst_634 = arith.constant 0.99999988 : f32
      %2914 = vector.broadcast %cst_633 : f32 to vector<8x128xf32>
      %2915 = arith.maximumf %2914, %2913 : vector<8x128xf32>
      %2916 = vector.broadcast %cst_634 : f32 to vector<8x128xf32>
      %2917 = arith.minimumf %2916, %2915 : vector<8x128xf32>
      %2918 = arith.subf %2912, %2755 : vector<8x128xf32>
      %2919 = math.absf %2918 : vector<8x128xf32>
      %2920 = arith.subf %2917, %2813 : vector<8x128xf32>
      %2921 = math.absf %2920 : vector<8x128xf32>
      %2922 = arith.maximumf %2919, %2921 : vector<8x128xf32>
      %2923 = arith.subf %2912, %2744 : vector<8x128xf32>
      %2924 = arith.mulf %2751, %2923 : vector<8x128xf32>
      %2925 = arith.addf %2744, %2924 : vector<8x128xf32>
      %2926 = arith.subf %2917, %2747 : vector<8x128xf32>
      %2927 = arith.mulf %2751, %2926 : vector<8x128xf32>
      %2928 = arith.addf %2747, %2927 : vector<8x128xf32>
      %cst_635 = arith.constant 9.99999997E-7 : f32
      %2929 = vector.broadcast %cst_635 : f32 to vector<8x128xf32>
      %2930 = arith.cmpf olt, %2922, %2929 : vector<8x128xf32>
      %cst_636 = arith.constant 0.000000e+00 : f32
      %2931 = vector.broadcast %cst_636 : f32 to vector<8x128xf32>
      %2932 = arith.select %2930, %2931, %2751 : vector<8x128xi1>, vector<8x128xf32>
      scf.yield %2925, %2928, %2932 : vector<8x128xf32>, vector<8x128xf32>, vector<8x128xf32>
    }
    %c0_23 = arith.constant 0 : index
    %c0_24 = arith.constant 0 : index
    %c0_25 = arith.constant 0 : index
    %31 = vector.load %arg3[%c0_23, %c0_24, %c0_25] : memref<2x8x128xf32, #tpu.memory_space<vmem>>, vector<1x8x128xf32>
    %32 = vector.shape_cast %31 : vector<1x8x128xf32> to vector<8x128xf32>
    %33 = vector.shape_cast %30#0 : vector<8x128xf32> to vector<1x8x128xf32>
    tpu.vector_store %arg3[%c0_23, %c0_24, %c0_25], %33 {strides = array<i32>} : memref<2x8x128xf32, #tpu.memory_space<vmem>>, vector<1x8x128xf32>,
    %c1_26 = arith.constant 1 : index
    %c0_27 = arith.constant 0 : index
    %c0_28 = arith.constant 0 : index
    %34 = vector.load %arg3[%c1_26, %c0_27, %c0_28] : memref<2x8x128xf32, #tpu.memory_space<vmem>>, vector<1x8x128xf32>
    %35 = vector.shape_cast %34 : vector<1x8x128xf32> to vector<8x128xf32>
    %36 = vector.shape_cast %30#1 : vector<8x128xf32> to vector<1x8x128xf32>
    tpu.vector_store %arg3[%c1_26, %c0_27, %c0_28], %36 {strides = array<i32>} : memref<2x8x128xf32, #tpu.memory_space<vmem>>, vector<1x8x128xf32>,
    return
  }
  func.func @transform_0(%arg0: i32) -> (i32, i32, i32) {
    %c0_i32 = arith.constant 0 : i32
    %c0_i32_0 = arith.constant 0 : i32
    %c0_i32_1 = arith.constant 0 : i32
    return %c0_i32, %arg0, %c0_i32_0 : i32, i32, i32
  }
  func.func @transform_1(%arg0: i32) -> (i32, i32, i32) {
    %c0_i32 = arith.constant 0 : i32
    %c0_i32_0 = arith.constant 0 : i32
    %c0_i32_1 = arith.constant 0 : i32
    return %c0_i32, %arg0, %c0_i32_0 : i32, i32, i32
  }
  func.func @transform_2(%arg0: i32) -> (i32, i32, i32) {
    %c0_i32 = arith.constant 0 : i32
    %c0_i32_0 = arith.constant 0 : i32
    %c0_i32_1 = arith.constant 0 : i32
    return %c0_i32, %arg0, %c0_i32_0 : i32, i32, i32
  }
}

</mosaic_0001>

<bundles_post_ra>
// kernel: _lambda_.1
= control target key start
LH: loop header
LB: loop body
LE: loop exit
PB: predicated region body
PF: predicated region fallthrough
CT: control target
= control target key end

     0   :  { %v2795_v14 = vmov 1.0   ;;  %s4184_s0 = inlined_call_operand.vmem [shape: f32[2,8,128], index: 0, kind: input, shape index: {}]   ;;  %s4185_s1 = inlined_call_operand.vmem [shape: f32[5,8,128], index: 1, kind: input, shape index: {}]   ;;  %s4186_s2 = inlined_call_operand.vmem [shape: f32[2,8,128], index: 2, kind: output, shape index: {}]  }
   0x1   :  { %v2758_v0 = vld [vmem:[%s4185_s1] sm:$0xff]  ;;  %v2763_v1 = vld [vmem:[%s4185_s1 + $0x8] sm:$0xff]  ;;  %v2768_v2 = vld [vmem:[%s4185_s1 + $0x10] sm:$0xff] }
   0x2   :  { %v2773_v3 = vld [vmem:[%s4185_s1 + $0x18] sm:$0xff]  ;;  %v2778_v4 = vld [vmem:[%s4185_s1 + $0x20] sm:$0xff]  ;;  %v2781_v5 = vmul.f32 2.0, %v2768_v2  ;;  %v2416_v10 = vld [vmem:[%s4184_s0 + $0x8] sm:$0xff]  ;;  %s2801_s1 = smov 0  }
   0x3   :  { %v23_v6 = vld [vmem:[%s4184_s0] sm:$0xff]  ;;  %v2787_v7 = vmul.f32 3.0, %v2773_v3  ;;  %v2790_v8 = vmul.f32 6.0, %v2773_v3  ;;  %v28_v11 = vmax.f32 %v2416_v10, 1e-07 }
   0x4   :  { %v24_v9 = vmax.f32 %v23_v6, 1e-07 }
   0x5   :  { %v29_v13 = vmin.f32 %v28_v11, 0.9999999  }
   0x6   :  { %v25_v12 = vmin.f32 %v24_v9, 0.9999999  }
   0x7 LB: > { %v39_v15 = vmax.f32 %v2733_v12, 1e-07  ;;  %v87_v16 = vmax.f32 %v2729_v13, 1e-07  ;;  %s35_s1 = sadd.s32 1, %s2737_s1   ;;  %s2737_s1 = sphi %s2801_s1, %s35_s1   ;;  %v2733_v12 = vphi %v25_v12, %v4188_v12   ;;  %v2729_v13 = vphi %v29_v13, %v4187_v13   ;;  %v2725_v14 = vphi %v2795_v14, %v2390_v14  }
   0x8   : > { %p32_p0 = scmp.ge.s32.totalorder %s35_s1, 4  }
   0x9   : > { %v2817_v17 = vmin.f32 %v39_v15, 0.9999999  ;;  %v2819_v18 = vmin.f32 %v87_v16, 0.9999999 }
   0xb   : > { %v41_v19 = vsub.f32 1.0, %v2817_v17  ;;  %v42_v20 = vmul.f32 2.0, %v2817_v17  ;;  %2483 = vlog2.f32 %v2817_v17  ;;  %v89_v21 = vsub.f32 1.0, %v2819_v18 }
   0xc   : > { %v90_v22 = vmul.f32 2.0, %v2819_v18  ;;  %2485 = vlog2.f32 %v2819_v18  ;;  %v2854_v43 = vmul.f32 %v2778_v4, %v2817_v17 }
   0xd   : > { %v43_v23 = vsub.f32 1.0, %v42_v20  ;;  %2487 = vlog2.f32 %v41_v19  ;;  %v2828_v24 = vmul.f32 %v41_v19, %v2817_v17  ;;  %v2833_v26 = vmul.f32 %v89_v21, %v2819_v18 }
   0xe   : > { %v2830_v25 = vsub.f32 1.0, %v90_v22  ;;  %2489 = vlog2.f32 %v89_v21 }
   0xf   : > { %v44_v27 = vmul.f32 %v2773_v3, %v43_v23  ;;  %v50_v28 = vmul.f32 %v43_v23, %v2787_v7  ;;  %v54_v29 = vmul.f32 %v43_v23, %v2790_v8  ;;  %2491 = vrcp.f32 %v2828_v24 }
  0x10   : > { %v92_v30 = vmul.f32 %v2773_v3, %v2830_v25  ;;  %v98_v33 = vmul.f32 %v2830_v25, %v2787_v7  ;;  %v84_v34 = vmul.f32 4.0, %v2828_v24  ;;  %2493 = vrcp.f32 %v2833_v26 }
  0x11   : > { %v45_v31 = vadd.f32 %v2768_v2, %v44_v27  ;;  %v51_v32 = vadd.f32 %v50_v28, %v2781_v5  ;;  %v55_v38 = vadd.f32 %v54_v29, %v2781_v5  ;;  %v75_v44 = vmul.f32 2.0, %v2828_v24 }
  0x12   : > { %v93_v35 = vadd.f32 %v2768_v2, %v92_v30  ;;  %v99_v39 = vadd.f32 %v98_v33, %v2781_v5  ;;  %v81_v48 = vmul.f32 4.0, %v43_v23  ;;  %v102_v50 = vmul.f32 %v2830_v25, %v2790_v8 }
  0x13   : > { %v46_v36 = vmul.f32 %v45_v31, %v43_v23  ;;  %v52_v37 = vmul.f32 %v51_v32, %v43_v23  ;;  %v85_v54 = vmul.f32 %v84_v34, %v55_v38  ;;  %v123_v55 = vmul.f32 2.0, %v2833_v26 }
  0x14   : > { %v94_v40 = vmul.f32 %v93_v35, %v2830_v25  ;;  %v100_v45 = vmul.f32 %v99_v39, %v2830_v25  ;;  %v129_v60 = vmul.f32 4.0, %v2830_v25  ;;  %v103_v27 = vadd.f32 %v102_v50, %v2781_v5 }
  0x15   : > { %v2484_v41 = vpop.eup %2483  ;;  %v47_v42 = vadd.f32 %v2763_v1, %v46_v36  ;;  %v53_v53 = vadd.f32 %v2763_v1, %v52_v37  ;;  %v132_v33 = vmul.f32 4.0, %v2833_v26 }
  0x16   : > { %v2486_v46 = vpop.eup %2485  ;;  %v57_v47 = vmul.f32 0.6931472, %v2484_v41  ;;  %v95_v49 = vadd.f32 %v2763_v1, %v94_v40  ;;  %v101_v59 = vadd.f32 %v2763_v1, %v100_v45 }
  0x17   : > { %v2488_v51 = vpop.eup %2487  ;;  %v48_v52 = vmul.f32 %v47_v42, %v43_v23  ;;  %v105_v6 = vmul.f32 0.6931472, %v2486_v46  ;;  %v82_v22 = vmul.f32 %v81_v48, %v53_v53  ;;  %v76_v41 = vmul.f32 %v75_v44, %v53_v53 }
  0x18   : > { %v2490_v56 = vpop.eup %2489  ;;  %v59_v57 = vmul.f32 0.6931472, %v2488_v51  ;;  %v96_v58 = vmul.f32 %v95_v49, %v2830_v25  ;;  %v63_v63 = vmul.f32 %v57_v47, %v2817_v17  ;;  %v130_v40 = vmul.f32 %v129_v60, %v101_v59 }
  0x19   : > { %v2492_v61 = vpop.eup %2491  ;;  %v49_v62 = vadd.f32 %v48_v52, %v2758_v0  ;;  %v107_v9 = vmul.f32 0.6931472, %v2490_v56  ;;  %v111_v28 = vmul.f32 %v105_v6, %v2819_v18  ;;  %v133_v48 = vmul.f32 %v132_v33, %v103_v27 }
  0x1a   : > { %v64_v10 = vmul.f32 %v59_v57, %v41_v19  ;;  %v70_v11 = vsub.f32 %v57_v47, %v59_v57  ;;  %v78_v15 = vmul.f32 2494.2, %v2492_v61  ;;  %v97_v16 = vadd.f32 %v96_v58, %v2758_v0  ;;  %v2494_v29 = vpop.eup %2493 }
  0x1b   : > { %v79_v20 = vmul.f32 2.0, %v49_v62  ;;  %v73_v31 = vmul.f32 %v49_v62, %v43_v23  ;;  %v112_v32 = vmul.f32 %v107_v9, %v89_v21  ;;  %v118_v36 = vsub.f32 %v105_v6, %v107_v9 }
  0x1c   : > { %v71_v30 = vmul.f32 2494.2, %v70_v11  ;;  %v65_v34 = vadd.f32 %v64_v10, %v63_v63  ;;  %v126_v19 = vmul.f32 2494.2, %v2494_v29  ;;  %v127_v39 = vmul.f32 2.0, %v97_v16 }
  0x1d   : > { %v80_v35 = vsub.f32 %v78_v15, %v79_v20  ;;  %v113_v38 = vadd.f32 %v112_v32, %v111_v28  ;;  %v119_v45 = vmul.f32 2494.2, %v118_v36  ;;  %v121_v46 = vmul.f32 %v97_v16, %v2830_v25 }
  0x1e   : > { %v72_v37 = vadd.f32 %v2778_v4, %v71_v30  ;;  %v110_v21 = vmul.f32 %v2778_v4, %v2819_v18  ;;  %v128_v23 = vsub.f32 %v126_v19, %v127_v39  ;;  %v66_v49 = vmul.f32 2494.2, %v65_v34 }
  0x1f   : > { %v83_v42 = vsub.f32 %v80_v35, %v82_v22  ;;  %v114_v50 = vmul.f32 2494.2, %v113_v38  ;;  %v120_v51 = vadd.f32 %v2778_v4, %v119_v45  ;;  %v124_v52 = vmul.f32 %v123_v55, %v101_v59 }
  0x20   : > { %v74_v47 = vadd.f32 %v73_v31, %v72_v37  ;;  %v131_v57 = vsub.f32 %v128_v23, %v130_v40  ;;  %v68_v44 = vmul.f32 %v2828_v24, %v49_v62  ;;  %v135_v25 = vsub.f32 %v2819_v18, %v2817_v17 }
  0x21   : > { %v86_v56 = vadd.f32 %v85_v54, %v83_v42  ;;  %v122_v60 = vadd.f32 %v121_v46, %v120_v51  ;;  %v67_v61 = vadd.f32 %v66_v49, %v2854_v43  ;;  %v115_v63 = vadd.f32 %v114_v50, %v110_v21 }
  0x22   : > { %v77_v58 = vsub.f32 %v74_v47, %v76_v41  ;;  %v134_v53 = vadd.f32 %v133_v48, %v131_v57  ;;  %v116_v6 = vmul.f32 %v2833_v26, %v97_v16  ;;  %v2739_v29 = vmov -1e-12  }
  0x23   : > { %v125_v9 = vsub.f32 %v122_v60, %v124_v52  ;;  %v69_v55 = vadd.f32 %v68_v44, %v67_v61  ;;  %v160_v30 = vmul.f32 %v135_v25, %v86_v56 }
  0x24   : > { %v143_v10 = vmul.f32 %v134_v53, %v86_v56  ;;  %v117_v54 = vadd.f32 %v116_v6, %v115_v63  ;;  %v138_v24 = vmul.f32 %v135_v25, %v77_v58  ;;  %v154_v32 = vmul.f32 %v135_v25, %v134_v53 }
  0x25   : > { %v137_v11 = vsub.f32 %v125_v9, %v77_v58  ;;  %v140_v62 = vmul.f32 %v135_v25, %v125_v9 }
  0x26   : > { %v144_v15 = vmul.f32 %v143_v10, %v135_v25  ;;  %v136_v27 = vsub.f32 %v117_v54, %v69_v55 }
  0x27   : > { %v142_v59 = vmul.f32 %v137_v11, %v137_v11 }
  0x28   : > { %v145_v20 = vmul.f32 %v144_v15, %v135_v25  ;;  %v139_v26 = vsub.f32 %v136_v27, %v138_v24  ;;  %v141_v16 = vsub.f32 %v140_v62, %v136_v27 }
  0x2a   : > { %v146_v22 = vsub.f32 %v142_v59, %v145_v20  ;;  %v153_v33 = vmul.f32 %v141_v16, %v137_v11  ;;  %v155_v34 = vmul.f32 %v154_v32, %v139_v26  ;;  %v161_v35 = vmul.f32 %v160_v30, %v141_v16 }
  0x2b   : > { %v162_v36 = vmul.f32 %v139_v26, %v137_v11 }
  0x2c   : > { %v147_v28 = vand.u32 2147483647, %v146_v22  ;;  %vm149_vm0 = vcmp.ge.f32.partialorder %v146_v22, 0.0  ;;  %v156_v19 = vsub.f32 %v153_v33, %v155_v34 }
  0x2d   : > { %v150_v43 = vsel %vm149_vm0, 1e-12, %v2739_v29  ;;  %v163_v37 = vsub.f32 %v161_v35, %v162_v36 }
  0x2e   : > { %vm148_vm1 = vcmp.lt.f32.partialorder %v147_v28, 1e-12 }
  0x2f   : > { %v151_v31 = vsel %vm148_vm1, %v150_v43, %v146_v22 }
  0x30   : > { %2495 = vrcp.f32 %v151_v31 }
  0x3a   : > { %v2496_v38 = vpop.eup %2495 }
  0x3b   : > { %v157_v39 = vmul.f32 %v2496_v38, %v156_v19  ;;  %v164_v40 = vmul.f32 %v2496_v38, %v163_v37 }
  0x3d   : > { %v2417_v41 = vclamps-f32 %v157_v39, 0.05  ;;  %v2418_v42 = vclamps-f32 %v164_v40, 0.05 }
  0x3f   : > { %v167_v45 = vadd.f32 %v2417_v41, %v2817_v17  ;;  %v170_v46 = vadd.f32 %v2418_v42, %v2819_v18 }
  0x41   : > { %v168_v47 = vmax.f32 %v167_v45, 1e-07  ;;  %v171_v21 = vmax.f32 %v170_v46, 1e-07 }
  0x43   : > { %v169_v23 = vmin.f32 %v168_v47, 0.9999999  ;;  %v172_v48 = vmin.f32 %v171_v21, 0.9999999 }
  0x45   : > { %v173_v49 = vsub.f32 %v169_v23, %v2817_v17  ;;  %v175_v50 = vsub.f32 %v172_v48, %v2819_v18  ;;  %v178_v51 = vsub.f32 %v169_v23, %v2733_v12  ;;  %v181_v52 = vsub.f32 %v172_v48, %v2729_v13 }
  0x47   : > { %v174_v56 = vand.u32 2147483647, %v173_v49  ;;  %v176_v57 = vand.u32 2147483647, %v175_v50  ;;  %v179_v58 = vmul.f32 %v2725_v14, %v178_v51  ;;  %v182_v60 = vmul.f32 %v2725_v14, %v181_v52 }
  0x49   : > { %v177_v44 = vmax.f32.f32 %v174_v56, %v176_v57  ;;  %v2892_v53 = vadd.f32 %v2733_v12, %v179_v58  ;;  %v2895_v25 = vadd.f32 %v2729_v13, %v182_v60 }
  0x4b   : > { %vm184_vm2 = vcmp.lt.f32.partialorder %v177_v44, 1e-06  ;;  %v186_v17 = vmax.f32 %v2892_v53, 1e-07  ;;  %v234_v18 = vmax.f32 %v2895_v25, 1e-07 }
  0x4c   : > { %v2900_v61 = vsel %vm184_vm2, 0.0, %v2725_v14 }
  0x4d   : > { %v2902_v63 = vmin.f32 %v186_v17, 0.9999999  ;;  %v2904_v6 = vmin.f32 %v234_v18, 0.9999999 }
  0x4f   : > { %v188_v9 = vsub.f32 1.0, %v2902_v63  ;;  %v189_v12 = vmul.f32 2.0, %v2902_v63  ;;  %2497 = vlog2.f32 %v2902_v63  ;;  %v236_v13 = vsub.f32 1.0, %v2904_v6 }
  0x50   : > { %v237_v10 = vmul.f32 2.0, %v2904_v6  ;;  %2499 = vlog2.f32 %v2904_v6  ;;  %v2939_v35 = vmul.f32 %v2778_v4, %v2902_v63 }
  0x51   : > { %v190_v11 = vsub.f32 1.0, %v189_v12  ;;  %2501 = vlog2.f32 %v188_v9  ;;  %v2913_v14 = vmul.f32 %v188_v9, %v2902_v63  ;;  %v2918_v55 = vmul.f32 %v236_v13, %v2904_v6 }
  0x52   : > { %v2915_v15 = vsub.f32 1.0, %v237_v10  ;;  %2503 = vlog2.f32 %v236_v13 }
  0x53   : > { %v191_v54 = vmul.f32 %v2773_v3, %v190_v11  ;;  %v197_v59 = vmul.f32 %v190_v11, %v2787_v7  ;;  %v201_v20 = vmul.f32 %v190_v11, %v2790_v8  ;;  %2505 = vrcp.f32 %v2913_v14 }
  0x54   : > { %v239_v22 = vmul.f32 %v2773_v3, %v2915_v15  ;;  %v245_v62 = vmul.f32 %v2915_v15, %v2787_v7  ;;  %v231_v28 = vmul.f32 4.0, %v2913_v14  ;;  %2507 = vrcp.f32 %v2918_v55 }
  0x55   : > { %v192_v27 = vadd.f32 %v2768_v2, %v191_v54  ;;  %v198_v24 = vadd.f32 %v197_v59, %v2781_v5  ;;  %v202_v16 = vadd.f32 %v201_v20, %v2781_v5  ;;  %v222_v36 = vmul.f32 2.0, %v2913_v14 }
  0x56   : > { %v240_v43 = vadd.f32 %v2768_v2, %v239_v22  ;;  %v246_v31 = vadd.f32 %v245_v62, %v2781_v5  ;;  %v228_v39 = vmul.f32 4.0, %v190_v11  ;;  %v249_v41 = vmul.f32 %v2915_v15, %v2790_v8 }
  0x57   : > { %v193_v30 = vmul.f32 %v192_v27, %v190_v11  ;;  %v199_v26 = vmul.f32 %v198_v24, %v190_v11  ;;  %v232_v47 = vmul.f32 %v231_v28, %v202_v16  ;;  %v270_v21 = vmul.f32 2.0, %v2918_v55 }
  0x58   : > { %v241_v32 = vmul.f32 %v240_v43, %v2915_v15  ;;  %v247_v19 = vmul.f32 %v246_v31, %v2915_v15  ;;  %v276_v51 = vmul.f32 4.0, %v2915_v15  ;;  %v250_v59 = vadd.f32 %v249_v41, %v2781_v5 }
  0x59   : > { %v2498_v33 = vpop.eup %2497  ;;  %v194_v34 = vadd.f32 %v2763_v1, %v193_v30  ;;  %v200_v46 = vadd.f32 %v2763_v1, %v199_v26  ;;  %v279_v28 = vmul.f32 4.0, %v2918_v55 }
  0x5a   : > { %v2500_v37 = vpop.eup %2499  ;;  %v204_v38 = vmul.f32 0.6931472, %v2498_v33  ;;  %v242_v40 = vadd.f32 %v2763_v1, %v241_v32  ;;  %v248_v50 = vadd.f32 %v2763_v1, %v247_v19 }
  0x5b   : > { %v2502_v42 = vpop.eup %2501  ;;  %v195_v45 = vmul.f32 %v194_v34, %v190_v11  ;;  %v252_v58 = vmul.f32 0.6931472, %v2500_v37  ;;  %v229_v54 = vmul.f32 %v228_v39, %v200_v46  ;;  %v223_v34 = vmul.f32 %v222_v36, %v200_v46 }
  0x5c   : > { %v2504_v23 = vpop.eup %2503  ;;  %v206_v48 = vmul.f32 0.6931472, %v2502_v42  ;;  %v243_v49 = vmul.f32 %v242_v40, %v2915_v15  ;;  %v210_v57 = vmul.f32 %v204_v38, %v2902_v63  ;;  %v277_v33 = vmul.f32 %v276_v51, %v248_v50 }
  0x5d   : > { %v2506_v52 = vpop.eup %2505  ;;  %v196_v56 = vadd.f32 %v195_v45, %v2758_v0  ;;  %v254_v60 = vmul.f32 0.6931472, %v2504_v23  ;;  %v258_v20 = vmul.f32 %v252_v58, %v2904_v6  ;;  %v280_v40 = vmul.f32 %v279_v28, %v250_v59 }
  0x5e   : > { %v211_v44 = vmul.f32 %v206_v48, %v188_v9  ;;  %v217_v17 = vsub.f32 %v204_v38, %v206_v48  ;;  %v225_v18 = vmul.f32 2494.2, %v2506_v52  ;;  %v244_v12 = vadd.f32 %v243_v49, %v2758_v0  ;;  %v2508_v22 = vpop.eup %2507 }
  0x5f   : > { %v226_v10 = vmul.f32 2.0, %v196_v56  ;;  %v220_v24 = vmul.f32 %v196_v56, %v190_v11  ;;  %v259_v62 = vmul.f32 %v254_v60, %v236_v13  ;;  %v265_v26 = vsub.f32 %v252_v58, %v254_v60 }
  0x60   : > { %v218_v27 = vmul.f32 2494.2, %v217_v17  ;;  %v212_v43 = vadd.f32 %v211_v44, %v210_v57  ;;  %v273_v9 = vmul.f32 2494.2, %v2508_v22  ;;  %v274_v32 = vmul.f32 2.0, %v244_v12 }
  0x61   : > { %v227_v30 = vsub.f32 %v225_v18, %v226_v10  ;;  %v260_v31 = vadd.f32 %v259_v62, %v258_v20  ;;  %v266_v37 = vmul.f32 2494.2, %v265_v26  ;;  %v268_v38 = vmul.f32 %v244_v12, %v2915_v15 }
  0x62   : > { %v219_v16 = vadd.f32 %v2778_v4, %v218_v27  ;;  %v257_v13 = vmul.f32 %v2778_v4, %v2904_v6  ;;  %v275_v11 = vsub.f32 %v273_v9, %v274_v32  ;;  %v213_v41 = vmul.f32 2494.2, %v212_v43 }
  0x63   : > { %v230_v19 = vsub.f32 %v227_v30, %v229_v54  ;;  %v261_v42 = vmul.f32 2494.2, %v260_v31  ;;  %v267_v45 = vadd.f32 %v2778_v4, %v266_v37  ;;  %v271_v23 = vmul.f32 %v270_v21, %v248_v50 }
  0x64   : > { %v221_v39 = vadd.f32 %v220_v24, %v219_v16  ;;  %v278_v49 = vsub.f32 %v275_v11, %v277_v33  ;;  %v215_v36 = vmul.f32 %v2913_v14, %v196_v56  ;;  %v282_v15 = vsub.f32 %v2904_v6, %v2902_v63 }
  0x65   : > { %v233_v48 = vadd.f32 %v232_v47, %v230_v19  ;;  %v269_v51 = vadd.f32 %v268_v38, %v267_v45  ;;  %v214_v57 = vadd.f32 %v213_v41, %v2939_v35  ;;  %v262_v58 = vadd.f32 %v261_v42, %v257_v13 }
  0x66   : > { %v224_v52 = vsub.f32 %v221_v39, %v223_v34  ;;  %v281_v46 = vadd.f32 %v280_v40, %v278_v49  ;;  %v263_v60 = vmul.f32 %v2918_v55, %v244_v12 }
  0x67   : > { %v272_v44 = vsub.f32 %v269_v51, %v271_v23  ;;  %v216_v21 = vadd.f32 %v215_v36, %v214_v57  ;;  %v307_v35 = vmul.f32 %v282_v15, %v233_v48 }
  0x68   : > { %v290_v17 = vmul.f32 %v281_v46, %v233_v48  ;;  %v264_v47 = vadd.f32 %v263_v60, %v262_v58  ;;  %v285_v14 = vmul.f32 %v282_v15, %v224_v52  ;;  %v301_v62 = vmul.f32 %v282_v15, %v281_v46 }
  0x69   : > { %v284_v18 = vsub.f32 %v272_v44, %v224_v52  ;;  %v287_v56 = vmul.f32 %v282_v15, %v272_v44 }
  0x6a   : > { %v291_v10 = vmul.f32 %v290_v17, %v282_v15  ;;  %v283_v20 = vsub.f32 %v264_v47, %v216_v21 }
  0x6b   : > { %v289_v50 = vmul.f32 %v284_v18, %v284_v18 }
  0x6c   : > { %v292_v54 = vmul.f32 %v291_v10, %v282_v15  ;;  %v286_v24 = vsub.f32 %v283_v20, %v285_v14  ;;  %v288_v55 = vsub.f32 %v287_v56, %v283_v20 }
  0x6e   : > { %v293_v59 = vsub.f32 %v289_v50, %v292_v54  ;;  %v300_v28 = vmul.f32 %v288_v55, %v284_v18  ;;  %v302_v43 = vmul.f32 %v301_v62, %v286_v24  ;;  %v308_v30 = vmul.f32 %v307_v35, %v288_v55 }
  0x6f   : > { %v309_v26 = vmul.f32 %v286_v24, %v284_v18 }
  0x70   : > { %v294_v22 = vand.u32 2147483647, %v293_v59  ;;  %vm296_vm3 = vcmp.ge.f32.partialorder %v293_v59, 0.0  ;;  %v303_v9 = vsub.f32 %v300_v28, %v302_v43 }
  0x71   : > { %v297_v27 = vsel %vm296_vm3, 1e-12, %v2739_v29  ;;  %v310_v16 = vsub.f32 %v308_v30, %v309_v26 }
  0x72   : > { %vm295_vm4 = vcmp.lt.f32.partialorder %v294_v22, 1e-12 }
  0x73   : > { %v298_v12 = vsel %vm295_vm4, %v297_v27, %v293_v59 }
  0x74   : > { %2509 = vrcp.f32 %v298_v12 }
  0x7e   : > { %v2510_v31 = vpop.eup %2509 }
  0x7f   : > { %v304_v32 = vmul.f32 %v2510_v31, %v303_v9  ;;  %v311_v33 = vmul.f32 %v2510_v31, %v310_v16 }
  0x81   : > { %v2419_v34 = vclamps-f32 %v304_v32, 0.05  ;;  %v2420_v19 = vclamps-f32 %v311_v33, 0.05 }
  0x83   : > { %v314_v37 = vadd.f32 %v2419_v34, %v2902_v63  ;;  %v317_v38 = vadd.f32 %v2420_v19, %v2904_v6 }
  0x85   : > { %v315_v39 = vmax.f32 %v314_v37, 1e-07  ;;  %v318_v13 = vmax.f32 %v317_v38, 1e-07 }
  0x87   : > { %v316_v11 = vmin.f32 %v315_v39, 0.9999999  ;;  %v319_v40 = vmin.f32 %v318_v13, 0.9999999 }
  0x89   : > { %v320_v41 = vsub.f32 %v316_v11, %v2902_v63  ;;  %v322_v42 = vsub.f32 %v319_v40, %v2904_v6  ;;  %v325_v45 = vsub.f32 %v316_v11, %v2892_v53  ;;  %v328_v23 = vsub.f32 %v319_v40, %v2895_v25 }
  0x8b   : > { %v321_v48 = vand.u32 2147483647, %v320_v41  ;;  %v323_v49 = vand.u32 2147483647, %v322_v42  ;;  %v326_v52 = vmul.f32 %v325_v45, %v2900_v61  ;;  %v329_v51 = vmul.f32 %v328_v23, %v2900_v61 }
  0x8d   : > { %v324_v36 = vmax.f32.f32 %v321_v48, %v323_v49  ;;  %v2977_v46 = vadd.f32 %v326_v52, %v2892_v53  ;;  %v2980_v15 = vadd.f32 %v329_v51, %v2895_v25 }
  0x8f   : > { %vm331_vm5 = vcmp.lt.f32.partialorder %v324_v36, 1e-06  ;;  %v333_v63 = vmax.f32 %v2977_v46, 1e-07  ;;  %v381_v6 = vmax.f32 %v2980_v15, 1e-07 }
  0x90   : > { %v2985_v57 = vsel %vm331_vm5, 0.0, %v2900_v61 }
  0x91   : > { %v2987_v58 = vmin.f32 %v333_v63, 0.9999999  ;;  %v2989_v60 = vmin.f32 %v381_v6, 0.9999999 }
  0x93   : > { %v335_v44 = vsub.f32 1.0, %v2987_v58  ;;  %v336_v53 = vmul.f32 2.0, %v2987_v58  ;;  %2511 = vlog2.f32 %v2987_v58  ;;  %v383_v25 = vsub.f32 1.0, %v2989_v60 }
  0x94   : > { %v384_v17 = vmul.f32 2.0, %v2989_v60  ;;  %2513 = vlog2.f32 %v2989_v60  ;;  %v3024_v30 = vmul.f32 %v2778_v4, %v2987_v58 }
  0x95   : > { %v337_v18 = vsub.f32 1.0, %v336_v53  ;;  %2515 = vlog2.f32 %v335_v44  ;;  %v2998_v61 = vmul.f32 %v335_v44, %v2987_v58  ;;  %v3003_v21 = vmul.f32 %v383_v25, %v2989_v60 }
  0x96   : > { %v3000_v10 = vsub.f32 1.0, %v384_v17  ;;  %2517 = vlog2.f32 %v383_v25 }
  0x97   : > { %v338_v47 = vmul.f32 %v2773_v3, %v337_v18  ;;  %v344_v50 = vmul.f32 %v337_v18, %v2787_v7  ;;  %v348_v54 = vmul.f32 %v337_v18, %v2790_v8  ;;  %2519 = vrcp.f32 %v2998_v61 }
  0x98   : > { %v386_v59 = vmul.f32 %v2773_v3, %v3000_v10  ;;  %v392_v56 = vmul.f32 %v3000_v10, %v2787_v7  ;;  %v378_v22 = vmul.f32 4.0, %v2998_v61  ;;  %2521 = vrcp.f32 %v3003_v21 }
  0x99   : > { %v339_v20 = vadd.f32 %v2768_v2, %v338_v47  ;;  %v345_v14 = vadd.f32 %v344_v50, %v2781_v5  ;;  %v349_v55 = vadd.f32 %v348_v54, %v2781_v5  ;;  %v369_v26 = vmul.f32 2.0, %v2998_v61 }
  0x9a   : > { %v387_v27 = vadd.f32 %v2768_v2, %v386_v59  ;;  %v393_v12 = vadd.f32 %v392_v56, %v2781_v5  ;;  %v375_v32 = vmul.f32 4.0, %v337_v18  ;;  %v396_v34 = vmul.f32 %v3000_v10, %v2790_v8 }
  0x9b   : > { %v340_v35 = vmul.f32 %v339_v20, %v337_v18  ;;  %v346_v24 = vmul.f32 %v345_v14, %v337_v18  ;;  %v379_v39 = vmul.f32 %v378_v22, %v349_v55  ;;  %v417_v13 = vmul.f32 2.0, %v3003_v21 }
  0x9c   : > { %v388_v62 = vmul.f32 %v387_v27, %v3000_v10  ;;  %v394_v9 = vmul.f32 %v393_v12, %v3000_v10  ;;  %v423_v45 = vmul.f32 4.0, %v3000_v10  ;;  %v397_v50 = vadd.f32 %v396_v34, %v2781_v5 }
  0x9d   : > { %v2512_v28 = vpop.eup %2511  ;;  %v341_v43 = vadd.f32 %v2763_v1, %v340_v35  ;;  %v347_v38 = vadd.f32 %v2763_v1, %v346_v24  ;;  %v426_v22 = vmul.f32 4.0, %v3003_v21 }
  0x9e   : > { %v2514_v16 = vpop.eup %2513  ;;  %v351_v31 = vmul.f32 0.6931472, %v2512_v28  ;;  %v389_v33 = vadd.f32 %v2763_v1, %v388_v62  ;;  %v395_v42 = vadd.f32 %v2763_v1, %v394_v9 }
  0x9f   : > { %v2516_v19 = vpop.eup %2515  ;;  %v342_v37 = vmul.f32 %v341_v43, %v337_v18  ;;  %v399_v52 = vmul.f32 0.6931472, %v2514_v16  ;;  %v376_v47 = vmul.f32 %v375_v32, %v347_v38  ;;  %v370_v43 = vmul.f32 %v369_v26, %v347_v38 }
  0xa0   : > { %v2518_v11 = vpop.eup %2517  ;;  %v353_v40 = vmul.f32 0.6931472, %v2516_v19  ;;  %v390_v41 = vmul.f32 %v389_v33, %v3000_v10  ;;  %v357_v49 = vmul.f32 %v351_v31, %v2987_v58  ;;  %v424_v28 = vmul.f32 %v423_v45, %v395_v42 }
  0xa1   : > { %v2520_v23 = vpop.eup %2519  ;;  %v343_v48 = vadd.f32 %v342_v37, %v2758_v0  ;;  %v401_v51 = vmul.f32 0.6931472, %v2518_v11  ;;  %v405_v54 = vmul.f32 %v399_v52, %v2989_v60  ;;  %v427_v33 = vmul.f32 %v426_v22, %v397_v50 }
  0xa2   : > { %v358_v36 = vmul.f32 %v353_v40, %v335_v44  ;;  %v364_v63 = vsub.f32 %v351_v31, %v353_v40  ;;  %v372_v6 = vmul.f32 2494.2, %v2520_v23  ;;  %v391_v53 = vadd.f32 %v390_v41, %v2758_v0  ;;  %v2522_v59 = vpop.eup %2521 }
  0xa3   : > { %v373_v17 = vmul.f32 2.0, %v343_v48  ;;  %v367_v14 = vmul.f32 %v343_v48, %v337_v18  ;;  %v406_v56 = vmul.f32 %v401_v51, %v383_v25  ;;  %v412_v24 = vsub.f32 %v399_v52, %v401_v51 }
  0xa4   : > { %v365_v20 = vmul.f32 2494.2, %v364_v63  ;;  %v359_v27 = vadd.f32 %v358_v36, %v357_v49  ;;  %v420_v44 = vmul.f32 2494.2, %v2522_v59  ;;  %v421_v62 = vmul.f32 2.0, %v391_v53 }
  0xa5   : > { %v374_v35 = vsub.f32 %v372_v6, %v373_v17  ;;  %v407_v12 = vadd.f32 %v406_v56, %v405_v54  ;;  %v413_v16 = vmul.f32 2494.2, %v412_v24  ;;  %v415_v31 = vmul.f32 %v391_v53, %v3000_v10 }
  0xa6   : > { %v366_v55 = vadd.f32 %v2778_v4, %v365_v20  ;;  %v404_v25 = vmul.f32 %v2778_v4, %v2989_v60  ;;  %v422_v18 = vsub.f32 %v420_v44, %v421_v62  ;;  %v360_v34 = vmul.f32 2494.2, %v359_v27 }
  0xa7   : > { %v377_v9 = vsub.f32 %v374_v35, %v376_v47  ;;  %v408_v19 = vmul.f32 2494.2, %v407_v12  ;;  %v414_v37 = vadd.f32 %v2778_v4, %v413_v16  ;;  %v418_v11 = vmul.f32 %v417_v13, %v395_v42 }
  0xa8   : > { %v368_v32 = vadd.f32 %v367_v14, %v366_v55  ;;  %v425_v41 = vsub.f32 %v422_v18, %v424_v28  ;;  %v362_v26 = vmul.f32 %v2998_v61, %v343_v48  ;;  %v429_v10 = vsub.f32 %v2989_v60, %v2987_v58 }
  0xa9   : > { %v380_v40 = vadd.f32 %v379_v39, %v377_v9  ;;  %v416_v45 = vadd.f32 %v415_v31, %v414_v37  ;;  %v361_v49 = vadd.f32 %v360_v34, %v3024_v30  ;;  %v409_v52 = vadd.f32 %v408_v19, %v404_v25 }
  0xaa   : > { %v371_v23 = vsub.f32 %v368_v32, %v370_v43  ;;  %v428_v38 = vadd.f32 %v427_v33, %v425_v41  ;;  %v410_v51 = vmul.f32 %v3003_v21, %v391_v53 }
  0xab   : > { %v419_v36 = vsub.f32 %v416_v45, %v418_v11  ;;  %v363_v13 = vadd.f32 %v362_v26, %v361_v49  ;;  %v454_v30 = vmul.f32 %v429_v10, %v380_v40 }
  0xac   : > { %v437_v63 = vmul.f32 %v428_v38, %v380_v40  ;;  %v411_v39 = vadd.f32 %v410_v51, %v409_v52  ;;  %v432_v61 = vmul.f32 %v429_v10, %v371_v23  ;;  %v448_v56 = vmul.f32 %v429_v10, %v428_v38 }
  0xad   : > { %v431_v6 = vsub.f32 %v419_v36, %v371_v23  ;;  %v434_v48 = vmul.f32 %v429_v10, %v419_v36 }
  0xae   : > { %v438_v17 = vmul.f32 %v437_v63, %v429_v10  ;;  %v430_v54 = vsub.f32 %v411_v39, %v363_v13 }
  0xaf   : > { %v436_v42 = vmul.f32 %v431_v6, %v431_v6 }
  0xb0   : > { %v439_v47 = vmul.f32 %v438_v17, %v429_v10  ;;  %v433_v14 = vsub.f32 %v430_v54, %v432_v61  ;;  %v435_v21 = vsub.f32 %v434_v48, %v430_v54 }
  0xb2   : > { %v440_v50 = vsub.f32 %v436_v42, %v439_v47  ;;  %v447_v22 = vmul.f32 %v435_v21, %v431_v6  ;;  %v449_v27 = vmul.f32 %v448_v56, %v433_v14  ;;  %v455_v35 = vmul.f32 %v454_v30, %v435_v21 }
  0xb3   : > { %v456_v24 = vmul.f32 %v433_v14, %v431_v6 }
  0xb4   : > { %v441_v59 = vand.u32 2147483647, %v440_v50  ;;  %vm443_vm6 = vcmp.ge.f32.partialorder %v440_v50, 0.0  ;;  %v450_v44 = vsub.f32 %v447_v22, %v449_v27 }
  0xb5   : > { %v444_v20 = vsel %vm443_vm6, 1e-12, %v2739_v29  ;;  %v457_v55 = vsub.f32 %v455_v35, %v456_v24 }
  0xb6   : > { %vm442_vm7 = vcmp.lt.f32.partialorder %v441_v59, 1e-12 }
  0xb7   : > { %v445_v53 = vsel %vm442_vm7, %v444_v20, %v440_v50 }
  0xb8   : > { %2523 = vrcp.f32 %v445_v53 }
  0xc2   : > { %v2524_v12 = vpop.eup %2523 }
  0xc3   : > { %v451_v62 = vmul.f32 %v2524_v12, %v450_v44  ;;  %v458_v28 = vmul.f32 %v2524_v12, %v457_v55 }
  0xc5   : > { %v2421_v43 = vclamps-f32 %v451_v62, 0.05  ;;  %v2422_v9 = vclamps-f32 %v458_v28, 0.05 }
  0xc7   : > { %v461_v16 = vadd.f32 %v2421_v43, %v2987_v58  ;;  %v464_v31 = vadd.f32 %v2422_v9, %v2989_v60 }
  0xc9   : > { %v462_v32 = vmax.f32 %v461_v16, 1e-07  ;;  %v465_v25 = vmax.f32 %v464_v31, 1e-07 }
  0xcb   : > { %v463_v18 = vmin.f32 %v462_v32, 0.9999999  ;;  %v466_v33 = vmin.f32 %v465_v25, 0.9999999 }
  0xcd   : > { %v467_v34 = vsub.f32 %v463_v18, %v2987_v58  ;;  %v469_v19 = vsub.f32 %v466_v33, %v2989_v60  ;;  %v472_v37 = vsub.f32 %v463_v18, %v2977_v46  ;;  %v475_v11 = vsub.f32 %v466_v33, %v2980_v15 }
  0xcf   : > { %v468_v40 = vand.u32 2147483647, %v467_v34  ;;  %v470_v41 = vand.u32 2147483647, %v469_v19  ;;  %v473_v23 = vmul.f32 %v472_v37, %v2985_v57  ;;  %v476_v45 = vmul.f32 %v475_v11, %v2985_v57 }
  0xd1   : > { %v471_v26 = vmax.f32.f32 %v468_v40, %v470_v41  ;;  %v3062_v38 = vadd.f32 %v473_v23, %v2977_v46  ;;  %v3065_v10 = vadd.f32 %v476_v45, %v2980_v15 }
  0xd3   : > { %vm478_vm8 = vcmp.lt.f32.partialorder %v471_v26, 1e-06  ;;  %v480_v58 = vmax.f32 %v3062_v38, 1e-07  ;;  %v528_v60 = vmax.f32 %v3065_v10, 1e-07 }
  0xd4   : > { %v3070_v49 = vsel %vm478_vm8, 0.0, %v2985_v57 }
  0xd5   : > { %v3072_v52 = vmin.f32 %v480_v58, 0.9999999  ;;  %v3074_v51 = vmin.f32 %v528_v60, 0.9999999 }
  0xd7   : > { %v482_v36 = vsub.f32 1.0, %v3072_v52  ;;  %v483_v46 = vmul.f32 2.0, %v3072_v52  ;;  %2525 = vlog2.f32 %v3072_v52  ;;  %v530_v15 = vsub.f32 1.0, %v3074_v51 }
  0xd8   : > { %v531_v63 = vmul.f32 2.0, %v3074_v51  ;;  %2527 = vlog2.f32 %v3074_v51  ;;  %v3109_v35 = vmul.f32 %v2778_v4, %v3072_v52 }
  0xd9   : > { %v484_v6 = vsub.f32 1.0, %v483_v46  ;;  %2529 = vlog2.f32 %v482_v36  ;;  %v3083_v57 = vmul.f32 %v482_v36, %v3072_v52  ;;  %v3088_v13 = vmul.f32 %v530_v15, %v3074_v51 }
  0xda   : > { %v3085_v17 = vsub.f32 1.0, %v531_v63  ;;  %2531 = vlog2.f32 %v530_v15 }
  0xdb   : > { %v485_v39 = vmul.f32 %v2773_v3, %v484_v6  ;;  %v491_v42 = vmul.f32 %v484_v6, %v2787_v7  ;;  %v495_v47 = vmul.f32 %v484_v6, %v2790_v8  ;;  %2533 = vrcp.f32 %v3083_v57 }
  0xdc   : > { %v533_v50 = vmul.f32 %v2773_v3, %v3085_v17  ;;  %v539_v48 = vmul.f32 %v3085_v17, %v2787_v7  ;;  %v525_v59 = vmul.f32 4.0, %v3083_v57  ;;  %2535 = vrcp.f32 %v3088_v13 }
  0xdd   : > { %v486_v54 = vadd.f32 %v2768_v2, %v485_v39  ;;  %v492_v61 = vadd.f32 %v491_v42, %v2781_v5  ;;  %v496_v21 = vadd.f32 %v495_v47, %v2781_v5  ;;  %v516_v24 = vmul.f32 2.0, %v3083_v57 }
  0xde   : > { %v534_v20 = vadd.f32 %v2768_v2, %v533_v50  ;;  %v540_v53 = vadd.f32 %v539_v48, %v2781_v5  ;;  %v522_v62 = vmul.f32 4.0, %v484_v6  ;;  %v543_v43 = vmul.f32 %v3085_v17, %v2790_v8 }
  0xdf   : > { %v487_v30 = vmul.f32 %v486_v54, %v484_v6  ;;  %v493_v14 = vmul.f32 %v492_v61, %v484_v6  ;;  %v526_v32 = vmul.f32 %v525_v59, %v496_v21  ;;  %v564_v25 = vmul.f32 2.0, %v3088_v13 }
  0xe0   : > { %v535_v56 = vmul.f32 %v534_v20, %v3085_v17  ;;  %v541_v44 = vmul.f32 %v540_v53, %v3085_v17  ;;  %v570_v37 = vmul.f32 4.0, %v3085_v17  ;;  %v544_v42 = vadd.f32 %v543_v43, %v2781_v5 }
  0xe1   : > { %v2526_v22 = vpop.eup %2525  ;;  %v488_v27 = vadd.f32 %v2763_v1, %v487_v30  ;;  %v494_v31 = vadd.f32 %v2763_v1, %v493_v14  ;;  %v573_v59 = vmul.f32 4.0, %v3088_v13 }
  0xe2   : > { %v2528_v55 = vpop.eup %2527  ;;  %v498_v12 = vmul.f32 0.6931472, %v2526_v22  ;;  %v536_v28 = vadd.f32 %v2763_v1, %v535_v56  ;;  %v542_v19 = vadd.f32 %v2763_v1, %v541_v44 }
  0xe3   : > { %v2530_v9 = vpop.eup %2529  ;;  %v489_v16 = vmul.f32 %v488_v27, %v484_v6  ;;  %v546_v23 = vmul.f32 0.6931472, %v2528_v55  ;;  %v523_v39 = vmul.f32 %v522_v62, %v494_v31  ;;  %v517_v27 = vmul.f32 %v516_v24, %v494_v31 }
  0xe4   : > { %v2532_v18 = vpop.eup %2531  ;;  %v500_v33 = vmul.f32 0.6931472, %v2530_v9  ;;  %v537_v34 = vmul.f32 %v536_v28, %v3085_v17  ;;  %v504_v41 = vmul.f32 %v498_v12, %v3072_v52  ;;  %v571_v22 = vmul.f32 %v570_v37, %v542_v19 }
  0xe5   : > { %v2534_v11 = vpop.eup %2533  ;;  %v490_v40 = vadd.f32 %v489_v16, %v2758_v0  ;;  %v548_v45 = vmul.f32 0.6931472, %v2532_v18  ;;  %v552_v47 = vmul.f32 %v546_v23, %v3074_v51  ;;  %v574_v28 = vmul.f32 %v573_v59, %v544_v42 }
  0xe6   : > { %v505_v26 = vmul.f32 %v500_v33, %v482_v36  ;;  %v511_v58 = vsub.f32 %v498_v12, %v500_v33  ;;  %v519_v60 = vmul.f32 2494.2, %v2534_v11  ;;  %v538_v46 = vadd.f32 %v537_v34, %v2758_v0  ;;  %v2536_v50 = vpop.eup %2535 }
  0xe7   : > { %v520_v63 = vmul.f32 2.0, %v490_v40  ;;  %v514_v61 = vmul.f32 %v490_v40, %v484_v6  ;;  %v553_v48 = vmul.f32 %v548_v45, %v530_v15  ;;  %v559_v14 = vsub.f32 %v546_v23, %v548_v45 }
  0xe8   : > { %v512_v54 = vmul.f32 2494.2, %v511_v58  ;;  %v506_v20 = vadd.f32 %v505_v26, %v504_v41  ;;  %v567_v36 = vmul.f32 2494.2, %v2536_v50  ;;  %v568_v56 = vmul.f32 2.0, %v538_v46 }
  0xe9   : > { %v521_v30 = vsub.f32 %v519_v60, %v520_v63  ;;  %v554_v53 = vadd.f32 %v553_v48, %v552_v47  ;;  %v560_v55 = vmul.f32 2494.2, %v559_v14  ;;  %v562_v12 = vmul.f32 %v538_v46, %v3085_v17 }
  0xea   : > { %v513_v21 = vadd.f32 %v2778_v4, %v512_v54  ;;  %v551_v15 = vmul.f32 %v2778_v4, %v3074_v51  ;;  %v569_v6 = vsub.f32 %v567_v36, %v568_v56  ;;  %v507_v43 = vmul.f32 2494.2, %v506_v20 }
  0xeb   : > { %v524_v44 = vsub.f32 %v521_v30, %v523_v39  ;;  %v555_v9 = vmul.f32 2494.2, %v554_v53  ;;  %v561_v16 = vadd.f32 %v2778_v4, %v560_v55  ;;  %v565_v18 = vmul.f32 %v564_v25, %v542_v19 }
  0xec   : > { %v515_v62 = vadd.f32 %v514_v61, %v513_v21  ;;  %v572_v34 = vsub.f32 %v569_v6, %v571_v22  ;;  %v509_v24 = vmul.f32 %v3083_v57, %v490_v40  ;;  %v576_v17 = vsub.f32 %v3074_v51, %v3072_v52 }
  0xed   : > { %v527_v33 = vadd.f32 %v526_v32, %v524_v44  ;;  %v563_v37 = vadd.f32 %v562_v12, %v561_v16  ;;  %v508_v41 = vadd.f32 %v507_v43, %v3109_v35  ;;  %v556_v23 = vadd.f32 %v555_v9, %v551_v15 }
  0xee   : > { %v518_v11 = vsub.f32 %v515_v62, %v517_v27  ;;  %v575_v31 = vadd.f32 %v574_v28, %v572_v34  ;;  %v557_v45 = vmul.f32 %v3088_v13, %v538_v46 }
  0xef   : > { %v566_v26 = vsub.f32 %v563_v37, %v565_v18  ;;  %v510_v25 = vadd.f32 %v509_v24, %v508_v41  ;;  %v601_v35 = vmul.f32 %v576_v17, %v527_v33 }
  0xf0   : > { %v584_v58 = vmul.f32 %v575_v31, %v527_v33  ;;  %v558_v32 = vadd.f32 %v557_v45, %v556_v23  ;;  %v579_v57 = vmul.f32 %v576_v17, %v518_v11  ;;  %v595_v48 = vmul.f32 %v576_v17, %v575_v31 }
  0xf1   : > { %v578_v60 = vsub.f32 %v566_v26, %v518_v11  ;;  %v581_v40 = vmul.f32 %v576_v17, %v566_v26 }
  0xf2   : > { %v585_v63 = vmul.f32 %v584_v58, %v576_v17  ;;  %v577_v47 = vsub.f32 %v558_v32, %v510_v25 }
  0xf3   : > { %v583_v19 = vmul.f32 %v578_v60, %v578_v60 }
  0xf4   : > { %v586_v39 = vmul.f32 %v585_v63, %v576_v17  ;;  %v580_v61 = vsub.f32 %v577_v47, %v579_v57  ;;  %v582_v13 = vsub.f32 %v581_v40, %v577_v47 }
  0xf6   : > { %v587_v42 = vsub.f32 %v583_v19, %v586_v39  ;;  %v594_v59 = vmul.f32 %v582_v13, %v578_v60  ;;  %v596_v20 = vmul.f32 %v595_v48, %v580_v61  ;;  %v602_v30 = vmul.f32 %v601_v35, %v582_v13 }
  0xf7   : > { %v603_v14 = vmul.f32 %v580_v61, %v578_v60 }
  0xf8   : > { %v588_v50 = vand.u32 2147483647, %v587_v42  ;;  %vm590_vm9 = vcmp.ge.f32.partialorder %v587_v42, 0.0  ;;  %v597_v36 = vsub.f32 %v594_v59, %v596_v20 }
  0xf9   : > { %v591_v54 = vsel %vm590_vm9, 1e-12, %v2739_v29  ;;  %v604_v21 = vsub.f32 %v602_v30, %v603_v14 }
  0xfa   : > { %vm589_vm10 = vcmp.lt.f32.partialorder %v588_v50, 1e-12 }
  0xfb   : > { %v592_v46 = vsel %vm589_vm10, %v591_v54, %v587_v42 }
  0xfc   : > { %2537 = vrcp.f32 %v592_v46 }
 0x106   : > { %v2538_v53 = vpop.eup %2537 }
 0x107   : > { %v598_v56 = vmul.f32 %v2538_v53, %v597_v36  ;;  %v605_v22 = vmul.f32 %v2538_v53, %v604_v21 }
 0x109   : > { %v2423_v27 = vclamps-f32 %v598_v56, 0.05  ;;  %v2424_v44 = vclamps-f32 %v605_v22, 0.05 }
 0x10b   : > { %v608_v55 = vadd.f32 %v2423_v27, %v3072_v52  ;;  %v611_v12 = vadd.f32 %v2424_v44, %v3074_v51 }
 0x10d   : > { %v609_v62 = vmax.f32 %v608_v55, 1e-07  ;;  %v612_v15 = vmax.f32 %v611_v12, 1e-07 }
 0x10f   : > { %v610_v6 = vmin.f32 %v609_v62, 0.9999999  ;;  %v613_v28 = vmin.f32 %v612_v15, 0.9999999 }
 0x111   : > { %v614_v43 = vsub.f32 %v610_v6, %v3072_v52  ;;  %v616_v9 = vsub.f32 %v613_v28, %v3074_v51  ;;  %v619_v16 = vsub.f32 %v610_v6, %v3062_v38  ;;  %v622_v18 = vsub.f32 %v613_v28, %v3065_v10 }
 0x113   : > { %v615_v33 = vand.u32 2147483647, %v614_v43  ;;  %v617_v34 = vand.u32 2147483647, %v616_v9  ;;  %v620_v11 = vmul.f32 %v619_v16, %v3070_v49  ;;  %v623_v37 = vmul.f32 %v622_v18, %v3070_v49 }
 0x115   : > { %v618_v24 = vmax.f32.f32 %v615_v33, %v617_v34  ;;  %v3147_v31 = vadd.f32 %v620_v11, %v3062_v38  ;;  %v3150_v17 = vadd.f32 %v623_v37, %v3065_v10 }
 0x117   : > { %vm625_vm11 = vcmp.lt.f32.partialorder %v618_v24, 1e-06  ;;  %v627_v52 = vmax.f32 %v3147_v31, 1e-07  ;;  %v675_v51 = vmax.f32 %v3150_v17, 1e-07 }
 0x118   : > { %v3155_v41 = vsel %vm625_vm11, 0.0, %v3070_v49 }
 0x119   : > { %v3157_v23 = vmin.f32 %v627_v52, 0.9999999  ;;  %v3159_v45 = vmin.f32 %v675_v51, 0.9999999 }
 0x11b   : > { %v629_v26 = vsub.f32 1.0, %v3157_v23  ;;  %v630_v38 = vmul.f32 2.0, %v3157_v23  ;;  %2539 = vlog2.f32 %v3157_v23  ;;  %v677_v10 = vsub.f32 1.0, %v3159_v45 }
 0x11c   : > { %v678_v58 = vmul.f32 2.0, %v3159_v45  ;;  %2541 = vlog2.f32 %v3159_v45  ;;  %v3194_v30 = vmul.f32 %v2778_v4, %v3157_v23 }
 0x11d   : > { %v631_v60 = vsub.f32 1.0, %v630_v38  ;;  %2543 = vlog2.f32 %v629_v26  ;;  %v3168_v49 = vmul.f32 %v629_v26, %v3157_v23  ;;  %v3173_v25 = vmul.f32 %v677_v10, %v3159_v45 }
 0x11e   : > { %v3170_v63 = vsub.f32 1.0, %v678_v58  ;;  %2545 = vlog2.f32 %v677_v10 }
 0x11f   : > { %v632_v32 = vmul.f32 %v2773_v3, %v631_v60  ;;  %v638_v19 = vmul.f32 %v631_v60, %v2787_v7  ;;  %v642_v39 = vmul.f32 %v631_v60, %v2790_v8  ;;  %2547 = vrcp.f32 %v3168_v49 }
 0x120   : > { %v680_v42 = vmul.f32 %v2773_v3, %v3170_v63  ;;  %v686_v40 = vmul.f32 %v3170_v63, %v2787_v7  ;;  %v672_v50 = vmul.f32 4.0, %v3168_v49  ;;  %2549 = vrcp.f32 %v3173_v25 }
 0x121   : > { %v633_v47 = vadd.f32 %v2768_v2, %v632_v32  ;;  %v639_v57 = vadd.f32 %v638_v19, %v2781_v5  ;;  %v643_v13 = vadd.f32 %v642_v39, %v2781_v5  ;;  %v663_v14 = vmul.f32 2.0, %v3168_v49 }
 0x122   : > { %v681_v54 = vadd.f32 %v2768_v2, %v680_v42  ;;  %v687_v46 = vadd.f32 %v686_v40, %v2781_v5  ;;  %v669_v56 = vmul.f32 4.0, %v631_v60  ;;  %v690_v27 = vmul.f32 %v3170_v63, %v2790_v8 }
 0x123   : > { %v634_v35 = vmul.f32 %v633_v47, %v631_v60  ;;  %v640_v61 = vmul.f32 %v639_v57, %v631_v60  ;;  %v673_v62 = vmul.f32 %v672_v50, %v643_v13  ;;  %v711_v15 = vmul.f32 2.0, %v3173_v25 }
 0x124   : > { %v682_v48 = vmul.f32 %v681_v54, %v3170_v63  ;;  %v688_v36 = vmul.f32 %v687_v46, %v3170_v63  ;;  %v717_v16 = vmul.f32 4.0, %v3170_v63  ;;  %v691_v19 = vadd.f32 %v690_v27, %v2781_v5 }
 0x125   : > { %v2540_v59 = vpop.eup %2539  ;;  %v635_v20 = vadd.f32 %v2763_v1, %v634_v35  ;;  %v641_v12 = vadd.f32 %v2763_v1, %v640_v61  ;;  %v720_v50 = vmul.f32 4.0, %v3173_v25 }
 0x126   : > { %v2542_v21 = vpop.eup %2541  ;;  %v645_v53 = vmul.f32 0.6931472, %v2540_v59  ;;  %v683_v22 = vadd.f32 %v2763_v1, %v682_v48  ;;  %v689_v9 = vadd.f32 %v2763_v1, %v688_v36 }
 0x127   : > { %v2544_v44 = vpop.eup %2543  ;;  %v636_v55 = vmul.f32 %v635_v20, %v631_v60  ;;  %v693_v11 = vmul.f32 0.6931472, %v2542_v21  ;;  %v670_v32 = vmul.f32 %v669_v56, %v641_v12  ;;  %v664_v20 = vmul.f32 %v663_v14, %v641_v12 }
 0x128   : > { %v2546_v6 = vpop.eup %2545  ;;  %v647_v28 = vmul.f32 0.6931472, %v2544_v44  ;;  %v684_v43 = vmul.f32 %v683_v22, %v3170_v63  ;;  %v651_v34 = vmul.f32 %v645_v53, %v3157_v23  ;;  %v718_v59 = vmul.f32 %v717_v16, %v689_v9 }
 0x129   : > { %v2548_v18 = vpop.eup %2547  ;;  %v637_v33 = vadd.f32 %v636_v55, %v2758_v0  ;;  %v695_v37 = vmul.f32 0.6931472, %v2546_v6  ;;  %v699_v39 = vmul.f32 %v693_v11, %v3159_v45  ;;  %v721_v22 = vmul.f32 %v720_v50, %v691_v19 }
 0x12a   : > { %v652_v24 = vmul.f32 %v647_v28, %v629_v26  ;;  %v658_v52 = vsub.f32 %v645_v53, %v647_v28  ;;  %v666_v51 = vmul.f32 2494.2, %v2548_v18  ;;  %v685_v38 = vadd.f32 %v684_v43, %v2758_v0  ;;  %v2550_v42 = vpop.eup %2549 }
 0x12b   : > { %v667_v58 = vmul.f32 2.0, %v637_v33  ;;  %v661_v57 = vmul.f32 %v637_v33, %v631_v60  ;;  %v700_v40 = vmul.f32 %v695_v37, %v677_v10  ;;  %v706_v61 = vsub.f32 %v693_v11, %v695_v37 }
 0x12c   : > { %v659_v47 = vmul.f32 2494.2, %v658_v52  ;;  %v653_v54 = vadd.f32 %v652_v24, %v651_v34  ;;  %v714_v26 = vmul.f32 2494.2, %v2550_v42  ;;  %v715_v48 = vmul.f32 2.0, %v685_v38 }
 0x12d   : > { %v668_v35 = vsub.f32 %v666_v51, %v667_v58  ;;  %v701_v46 = vadd.f32 %v700_v40, %v699_v39  ;;  %v707_v21 = vmul.f32 2494.2, %v706_v61  ;;  %v709_v53 = vmul.f32 %v685_v38, %v3170_v63 }
 0x12e   : > { %v660_v13 = vadd.f32 %v2778_v4, %v659_v47  ;;  %v698_v10 = vmul.f32 %v2778_v4, %v3159_v45  ;;  %v716_v60 = vsub.f32 %v714_v26, %v715_v48  ;;  %v654_v27 = vmul.f32 2494.2, %v653_v54 }
 0x12f   : > { %v671_v36 = vsub.f32 %v668_v35, %v670_v32  ;;  %v702_v44 = vmul.f32 2494.2, %v701_v46  ;;  %v708_v55 = vadd.f32 %v2778_v4, %v707_v21  ;;  %v712_v6 = vmul.f32 %v711_v15, %v689_v9 }
 0x130   : > { %v662_v56 = vadd.f32 %v661_v57, %v660_v13  ;;  %v719_v43 = vsub.f32 %v716_v60, %v718_v59  ;;  %v656_v14 = vmul.f32 %v3168_v49, %v637_v33  ;;  %v723_v63 = vsub.f32 %v3159_v45, %v3157_v23 }
 0x131   : > { %v674_v28 = vadd.f32 %v673_v62, %v671_v36  ;;  %v710_v16 = vadd.f32 %v709_v53, %v708_v55  ;;  %v655_v34 = vadd.f32 %v654_v27, %v3194_v30  ;;  %v703_v11 = vadd.f32 %v702_v44, %v698_v10 }
 0x132   : > { %v665_v18 = vsub.f32 %v662_v56, %v664_v20  ;;  %v722_v12 = vadd.f32 %v721_v22, %v719_v43  ;;  %v704_v37 = vmul.f32 %v3173_v25, %v685_v38 }
 0x133   : > { %v713_v24 = vsub.f32 %v710_v16, %v712_v6  ;;  %v657_v15 = vadd.f32 %v656_v14, %v655_v34  ;;  %v748_v30 = vmul.f32 %v723_v63, %v674_v28 }
 0x134   : > { %v731_v52 = vmul.f32 %v722_v12, %v674_v28  ;;  %v705_v62 = vadd.f32 %v704_v37, %v703_v11  ;;  %v726_v49 = vmul.f32 %v723_v63, %v665_v18  ;;  %v742_v40 = vmul.f32 %v723_v63, %v722_v12 }
 0x135   : > { %v725_v51 = vsub.f32 %v713_v24, %v665_v18  ;;  %v728_v33 = vmul.f32 %v723_v63, %v713_v24 }
 0x136   : > { %v732_v58 = vmul.f32 %v731_v52, %v723_v63  ;;  %v724_v39 = vsub.f32 %v705_v62, %v657_v15 }
 0x137   : > { %v730_v9 = vmul.f32 %v725_v51, %v725_v51 }
 0x138   : > { %v733_v32 = vmul.f32 %v732_v58, %v723_v63  ;;  %v727_v57 = vsub.f32 %v724_v39, %v726_v49  ;;  %v729_v25 = vsub.f32 %v728_v33, %v724_v39 }
 0x13a   : > { %v734_v19 = vsub.f32 %v730_v9, %v733_v32  ;;  %v741_v50 = vmul.f32 %v729_v25, %v725_v51  ;;  %v743_v54 = vmul.f32 %v742_v40, %v727_v57  ;;  %v749_v35 = vmul.f32 %v748_v30, %v729_v25 }
 0x13b   : > { %v750_v61 = vmul.f32 %v727_v57, %v725_v51 }
 0x13c   : > { %v735_v42 = vand.u32 2147483647, %v734_v19  ;;  %vm737_vm12 = vcmp.ge.f32.partialorder %v734_v19, 0.0  ;;  %v744_v26 = vsub.f32 %v741_v50, %v743_v54 }
 0x13d   : > { %v738_v47 = vsel %vm737_vm12, 1e-12, %v2739_v29  ;;  %v751_v13 = vsub.f32 %v749_v35, %v750_v61 }
 0x13e   : > { %vm736_vm13 = vcmp.lt.f32.partialorder %v735_v42, 1e-12 }
 0x13f   : > { %v739_v38 = vsel %vm736_vm13, %v738_v47, %v734_v19 }
 0x140   : > { %2551 = vrcp.f32 %v739_v38 }
 0x14a   : > { %v2552_v46 = vpop.eup %2551 }
 0x14b   : > { %v745_v48 = vmul.f32 %v2552_v46, %v744_v26  ;;  %v752_v59 = vmul.f32 %v2552_v46, %v751_v13 }
 0x14d   : > { %v2425_v20 = vclamps-f32 %v745_v48, 0.05  ;;  %v2426_v36 = vclamps-f32 %v752_v59, 0.05 }
 0x14f   : > { %v755_v21 = vadd.f32 %v2425_v20, %v3157_v23  ;;  %v758_v53 = vadd.f32 %v2426_v36, %v3159_v45 }
 0x151   : > { %v756_v56 = vmax.f32 %v755_v21, 1e-07  ;;  %v759_v10 = vmax.f32 %v758_v53, 1e-07 }
 0x153   : > { %v757_v60 = vmin.f32 %v756_v56, 0.9999999  ;;  %v760_v22 = vmin.f32 %v759_v10, 0.9999999 }
 0x155   : > { %v761_v27 = vsub.f32 %v757_v60, %v3157_v23  ;;  %v763_v44 = vsub.f32 %v760_v22, %v3159_v45  ;;  %v766_v55 = vsub.f32 %v757_v60, %v3147_v31  ;;  %v769_v6 = vsub.f32 %v760_v22, %v3150_v17 }
 0x157   : > { %v762_v28 = vand.u32 2147483647, %v761_v27  ;;  %v764_v43 = vand.u32 2147483647, %v763_v44  ;;  %v767_v18 = vmul.f32 %v766_v55, %v3155_v41  ;;  %v770_v16 = vmul.f32 %v769_v6, %v3155_v41 }
 0x159   : > { %v765_v14 = vmax.f32.f32 %v762_v28, %v764_v43  ;;  %v3232_v12 = vadd.f32 %v767_v18, %v3147_v31  ;;  %v3235_v63 = vadd.f32 %v770_v16, %v3150_v17 }
 0x15b   : > { %vm772_vm14 = vcmp.lt.f32.partialorder %v765_v14, 1e-06  ;;  %v774_v23 = vmax.f32 %v3232_v12, 1e-07  ;;  %v822_v45 = vmax.f32 %v3235_v63, 1e-07 }
 0x15c   : > { %v3240_v34 = vsel %vm772_vm14, 0.0, %v3155_v41 }
 0x15d   : > { %v3242_v11 = vmin.f32 %v774_v23, 0.9999999  ;;  %v3244_v37 = vmin.f32 %v822_v45, 0.9999999 }
 0x15f   : > { %v776_v24 = vsub.f32 1.0, %v3242_v11  ;;  %v777_v31 = vmul.f32 2.0, %v3242_v11  ;;  %2553 = vlog2.f32 %v3242_v11  ;;  %v824_v17 = vsub.f32 1.0, %v3244_v37 }
 0x160   : > { %v825_v52 = vmul.f32 2.0, %v3244_v37  ;;  %2555 = vlog2.f32 %v3244_v37  ;;  %v3279_v35 = vmul.f32 %v2778_v4, %v3242_v11 }
 0x161   : > { %v778_v51 = vsub.f32 1.0, %v777_v31  ;;  %2557 = vlog2.f32 %v776_v24  ;;  %v3253_v41 = vmul.f32 %v776_v24, %v3242_v11  ;;  %v3258_v15 = vmul.f32 %v824_v17, %v3244_v37 }
 0x162   : > { %v3255_v58 = vsub.f32 1.0, %v825_v52  ;;  %2559 = vlog2.f32 %v824_v17 }
 0x163   : > { %v779_v62 = vmul.f32 %v2773_v3, %v778_v51  ;;  %v785_v9 = vmul.f32 %v778_v51, %v2787_v7  ;;  %v789_v32 = vmul.f32 %v778_v51, %v2790_v8  ;;  %2561 = vrcp.f32 %v3253_v41 }
 0x164   : > { %v827_v19 = vmul.f32 %v2773_v3, %v3255_v58  ;;  %v833_v33 = vmul.f32 %v3255_v58, %v2787_v7  ;;  %v819_v42 = vmul.f32 4.0, %v3253_v41  ;;  %2563 = vrcp.f32 %v3258_v15 }
 0x165   : > { %v780_v39 = vadd.f32 %v2768_v2, %v779_v62  ;;  %v786_v49 = vadd.f32 %v785_v9, %v2781_v5  ;;  %v790_v25 = vadd.f32 %v789_v32, %v2781_v5  ;;  %v810_v61 = vmul.f32 2.0, %v3253_v41 }
 0x166   : > { %v828_v47 = vadd.f32 %v2768_v2, %v827_v19  ;;  %v834_v38 = vadd.f32 %v833_v33, %v2781_v5  ;;  %v816_v48 = vmul.f32 4.0, %v778_v51  ;;  %v837_v20 = vmul.f32 %v3255_v58, %v2790_v8 }
 0x167   : > { %v781_v30 = vmul.f32 %v780_v39, %v778_v51  ;;  %v787_v57 = vmul.f32 %v786_v49, %v778_v51  ;;  %v820_v56 = vmul.f32 %v819_v42, %v790_v25  ;;  %v858_v10 = vmul.f32 2.0, %v3258_v15 }
 0x168   : > { %v829_v40 = vmul.f32 %v828_v47, %v3255_v58  ;;  %v835_v26 = vmul.f32 %v834_v38, %v3255_v58  ;;  %v864_v55 = vmul.f32 4.0, %v3255_v58  ;;  %v838_v9 = vadd.f32 %v837_v20, %v2781_v5 }
 0x169   : > { %v2554_v50 = vpop.eup %2553  ;;  %v782_v54 = vadd.f32 %v2763_v1, %v781_v30  ;;  %v788_v53 = vadd.f32 %v2763_v1, %v787_v57  ;;  %v867_v42 = vmul.f32 4.0, %v3258_v15 }
 0x16a   : > { %v2556_v13 = vpop.eup %2555  ;;  %v792_v46 = vmul.f32 0.6931472, %v2554_v50  ;;  %v830_v59 = vadd.f32 %v2763_v1, %v829_v40  ;;  %v836_v44 = vadd.f32 %v2763_v1, %v835_v26 }
 0x16b   : > { %v2558_v36 = vpop.eup %2557  ;;  %v783_v21 = vmul.f32 %v782_v54, %v778_v51  ;;  %v840_v18 = vmul.f32 0.6931472, %v2556_v13  ;;  %v817_v62 = vmul.f32 %v816_v48, %v788_v53  ;;  %v811_v54 = vmul.f32 %v810_v61, %v788_v53 }
 0x16c   : > { %v2560_v60 = vpop.eup %2559  ;;  %v794_v22 = vmul.f32 0.6931472, %v2558_v36  ;;  %v831_v27 = vmul.f32 %v830_v59, %v3255_v58  ;;  %v798_v43 = vmul.f32 %v792_v46, %v3242_v11  ;;  %v865_v50 = vmul.f32 %v864_v55, %v836_v44 }
 0x16d   : > { %v2562_v6 = vpop.eup %2561  ;;  %v784_v28 = vadd.f32 %v783_v21, %v2758_v0  ;;  %v842_v16 = vmul.f32 0.6931472, %v2560_v60  ;;  %v846_v32 = vmul.f32 %v840_v18, %v3244_v37  ;;  %v868_v59 = vmul.f32 %v867_v42, %v838_v9 }
 0x16e   : > { %v799_v14 = vmul.f32 %v794_v22, %v776_v24  ;;  %v805_v23 = vsub.f32 %v792_v46, %v794_v22  ;;  %v813_v45 = vmul.f32 2494.2, %v2562_v6  ;;  %v832_v31 = vadd.f32 %v831_v27, %v2758_v0  ;;  %v2564_v19 = vpop.eup %2563 }
 0x16f   : > { %v814_v52 = vmul.f32 2.0, %v784_v28  ;;  %v808_v49 = vmul.f32 %v784_v28, %v778_v51  ;;  %v847_v33 = vmul.f32 %v842_v16, %v824_v17  ;;  %v853_v57 = vsub.f32 %v840_v18, %v842_v16 }
 0x170   : > { %v806_v39 = vmul.f32 2494.2, %v805_v23  ;;  %v800_v47 = vadd.f32 %v799_v14, %v798_v43  ;;  %v861_v24 = vmul.f32 2494.2, %v2564_v19  ;;  %v862_v40 = vmul.f32 2.0, %v832_v31 }
 0x171   : > { %v815_v30 = vsub.f32 %v813_v45, %v814_v52  ;;  %v848_v38 = vadd.f32 %v847_v33, %v846_v32  ;;  %v854_v13 = vmul.f32 2494.2, %v853_v57  ;;  %v856_v46 = vmul.f32 %v832_v31, %v3255_v58 }
 0x172   : > { %v807_v25 = vadd.f32 %v2778_v4, %v806_v39  ;;  %v845_v17 = vmul.f32 %v2778_v4, %v3244_v37  ;;  %v863_v51 = vsub.f32 %v861_v24, %v862_v40  ;;  %v801_v20 = vmul.f32 2494.2, %v800_v47 }
 0x173   : > { %v818_v26 = vsub.f32 %v815_v30, %v817_v62  ;;  %v849_v36 = vmul.f32 2494.2, %v848_v38  ;;  %v855_v21 = vadd.f32 %v2778_v4, %v854_v13  ;;  %v859_v60 = vmul.f32 %v858_v10, %v836_v44 }
 0x174   : > { %v809_v48 = vadd.f32 %v808_v49, %v807_v25  ;;  %v866_v27 = vsub.f32 %v863_v51, %v865_v50  ;;  %v803_v61 = vmul.f32 %v3253_v41, %v784_v28  ;;  %v870_v58 = vsub.f32 %v3244_v37, %v3242_v11 }
 0x175   : > { %v821_v22 = vadd.f32 %v820_v56, %v818_v26  ;;  %v857_v55 = vadd.f32 %v856_v46, %v855_v21  ;;  %v802_v43 = vadd.f32 %v801_v20, %v3279_v35  ;;  %v850_v18 = vadd.f32 %v849_v36, %v845_v17 }
 0x176   : > { %v812_v6 = vsub.f32 %v809_v48, %v811_v54  ;;  %v869_v53 = vadd.f32 %v868_v59, %v866_v27  ;;  %v851_v16 = vmul.f32 %v3258_v15, %v832_v31 }
 0x177   : > { %v860_v14 = vsub.f32 %v857_v55, %v859_v60  ;;  %v804_v10 = vadd.f32 %v803_v61, %v802_v43  ;;  %v895_v35 = vmul.f32 %v870_v58, %v821_v22 }
 0x178   : > { %v878_v23 = vmul.f32 %v869_v53, %v821_v22  ;;  %v852_v56 = vadd.f32 %v851_v16, %v850_v18  ;;  %v873_v41 = vmul.f32 %v870_v58, %v812_v6  ;;  %v889_v33 = vmul.f32 %v870_v58, %v869_v53 }
 0x179   : > { %v872_v45 = vsub.f32 %v860_v14, %v812_v6  ;;  %v875_v28 = vmul.f32 %v870_v58, %v860_v14 }
 0x17a   : > { %v879_v52 = vmul.f32 %v878_v23, %v870_v58  ;;  %v871_v32 = vsub.f32 %v852_v56, %v804_v10 }
 0x17b   : > { %v877_v44 = vmul.f32 %v872_v45, %v872_v45 }
 0x17c   : > { %v880_v62 = vmul.f32 %v879_v52, %v870_v58  ;;  %v874_v49 = vsub.f32 %v871_v32, %v873_v41  ;;  %v876_v15 = vsub.f32 %v875_v28, %v871_v32 }
 0x17e   : > { %v881_v9 = vsub.f32 %v877_v44, %v880_v62  ;;  %v888_v42 = vmul.f32 %v876_v15, %v872_v45  ;;  %v890_v47 = vmul.f32 %v889_v33, %v874_v49  ;;  %v896_v30 = vmul.f32 %v895_v35, %v876_v15 }
 0x17f   : > { %v897_v57 = vmul.f32 %v874_v49, %v872_v45 }
 0x180   : > { %v882_v19 = vand.u32 2147483647, %v881_v9  ;;  %vm884_vm15 = vcmp.ge.f32.partialorder %v881_v9, 0.0  ;;  %v891_v24 = vsub.f32 %v888_v42, %v890_v47 }
 0x181   : > { %v885_v39 = vsel %vm884_vm15, 1e-12, %v2739_v29  ;;  %v898_v25 = vsub.f32 %v896_v30, %v897_v57 }
 0x182   : > { %vm883_vm0 = vcmp.lt.f32.partialorder %v882_v19, 1e-12 }
 0x183   : > { %v886_v31 = vsel %vm883_vm0, %v885_v39, %v881_v9 }
 0x184   : > { %2565 = vrcp.f32 %v886_v31 }
 0x18e   : > { %v2566_v38 = vpop.eup %2565 }
 0x18f   : > { %v892_v40 = vmul.f32 %v2566_v38, %v891_v24  ;;  %v899_v50 = vmul.f32 %v2566_v38, %v898_v25 }
 0x191   : > { %v2427_v54 = vclamps-f32 %v892_v40, 0.05  ;;  %v2428_v26 = vclamps-f32 %v899_v50, 0.05 }
 0x193   : > { %v902_v13 = vadd.f32 %v2427_v54, %v3242_v11  ;;  %v905_v46 = vadd.f32 %v2428_v26, %v3244_v37 }
 0x195   : > { %v903_v48 = vmax.f32 %v902_v13, 1e-07  ;;  %v906_v17 = vmax.f32 %v905_v46, 1e-07 }
 0x197   : > { %v904_v51 = vmin.f32 %v903_v48, 0.9999999  ;;  %v907_v59 = vmin.f32 %v906_v17, 0.9999999 }
 0x199   : > { %v908_v20 = vsub.f32 %v904_v51, %v3242_v11  ;;  %v910_v36 = vsub.f32 %v907_v59, %v3244_v37  ;;  %v913_v21 = vsub.f32 %v904_v51, %v3232_v12  ;;  %v916_v60 = vsub.f32 %v907_v59, %v3235_v63 }
 0x19b   : > { %v909_v22 = vand.u32 2147483647, %v908_v20  ;;  %v911_v27 = vand.u32 2147483647, %v910_v36  ;;  %v914_v6 = vmul.f32 %v913_v21, %v3240_v34  ;;  %v917_v55 = vmul.f32 %v916_v60, %v3240_v34 }
 0x19d   : > { %v912_v61 = vmax.f32.f32 %v909_v22, %v911_v27  ;;  %v3317_v53 = vadd.f32 %v914_v6, %v3232_v12  ;;  %v3320_v58 = vadd.f32 %v917_v55, %v3235_v63 }
 0x19f   : > { %vm919_vm1 = vcmp.lt.f32.partialorder %v912_v61, 1e-06  ;;  %v921_v11 = vmax.f32 %v3317_v53, 1e-07  ;;  %v969_v37 = vmax.f32 %v3320_v58, 1e-07 }
 0x1a0   : > { %v3325_v43 = vsel %vm919_vm1, 0.0, %v3240_v34 }
 0x1a1   : > { %v3327_v18 = vmin.f32 %v921_v11, 0.9999999  ;;  %v3329_v16 = vmin.f32 %v969_v37, 0.9999999 }
 0x1a3   : > { %v923_v14 = vsub.f32 1.0, %v3327_v18  ;;  %v924_v12 = vmul.f32 2.0, %v3327_v18  ;;  %2567 = vlog2.f32 %v3327_v18  ;;  %v971_v63 = vsub.f32 1.0, %v3329_v16 }
 0x1a4   : > { %v972_v23 = vmul.f32 2.0, %v3329_v16  ;;  %2569 = vlog2.f32 %v3329_v16  ;;  %v3364_v30 = vmul.f32 %v2778_v4, %v3327_v18 }
 0x1a5   : > { %v925_v45 = vsub.f32 1.0, %v924_v12  ;;  %2571 = vlog2.f32 %v923_v14  ;;  %v3338_v34 = vmul.f32 %v923_v14, %v3327_v18  ;;  %v3343_v10 = vmul.f32 %v971_v63, %v3329_v16 }
 0x1a6   : > { %v3340_v52 = vsub.f32 1.0, %v972_v23  ;;  %2573 = vlog2.f32 %v971_v63 }
 0x1a7   : > { %v926_v56 = vmul.f32 %v2773_v3, %v925_v45  ;;  %v932_v44 = vmul.f32 %v925_v45, %v2787_v7  ;;  %v936_v62 = vmul.f32 %v925_v45, %v2790_v8  ;;  %2575 = vrcp.f32 %v3338_v34 }
 0x1a8   : > { %v974_v9 = vmul.f32 %v2773_v3, %v3340_v52  ;;  %v980_v28 = vmul.f32 %v3340_v52, %v2787_v7  ;;  %v966_v19 = vmul.f32 4.0, %v3338_v34  ;;  %2577 = vrcp.f32 %v3343_v10 }
 0x1a9   : > { %v927_v32 = vadd.f32 %v2768_v2, %v926_v56  ;;  %v933_v41 = vadd.f32 %v932_v44, %v2781_v5  ;;  %v937_v15 = vadd.f32 %v936_v62, %v2781_v5  ;;  %v957_v57 = vmul.f32 2.0, %v3338_v34 }
 0x1aa   : > { %v975_v39 = vadd.f32 %v2768_v2, %v974_v9  ;;  %v981_v31 = vadd.f32 %v980_v28, %v2781_v5  ;;  %v963_v40 = vmul.f32 4.0, %v925_v45  ;;  %v984_v54 = vmul.f32 %v3340_v52, %v2790_v8 }
 0x1ab   : > { %v928_v35 = vmul.f32 %v927_v32, %v925_v45  ;;  %v934_v49 = vmul.f32 %v933_v41, %v925_v45  ;;  %v967_v48 = vmul.f32 %v966_v19, %v937_v15  ;;  %v1005_v17 = vmul.f32 2.0, %v3343_v10 }
 0x1ac   : > { %v976_v33 = vmul.f32 %v975_v39, %v3340_v52  ;;  %v982_v24 = vmul.f32 %v981_v31, %v3340_v52  ;;  %v1011_v21 = vmul.f32 4.0, %v3340_v52  ;;  %v985_v44 = vadd.f32 %v984_v54, %v2781_v5 }
 0x1ad   : > { %v2568_v42 = vpop.eup %2567  ;;  %v929_v47 = vadd.f32 %v2763_v1, %v928_v35  ;;  %v935_v46 = vadd.f32 %v2763_v1, %v934_v49  ;;  %v1014_v19 = vmul.f32 4.0, %v3343_v10 }
 0x1ae   : > { %v2570_v25 = vpop.eup %2569  ;;  %v939_v38 = vmul.f32 0.6931472, %v2568_v42  ;;  %v977_v50 = vadd.f32 %v2763_v1, %v976_v33  ;;  %v983_v36 = vadd.f32 %v2763_v1, %v982_v24 }
 0x1af   : > { %v2572_v26 = vpop.eup %2571  ;;  %v930_v13 = vmul.f32 %v929_v47, %v925_v45  ;;  %v987_v6 = vmul.f32 0.6931472, %v2570_v25  ;;  %v964_v56 = vmul.f32 %v963_v40, %v935_v46  ;;  %v958_v47 = vmul.f32 %v957_v57, %v935_v46 }
 0x1b0   : > { %v2574_v51 = vpop.eup %2573  ;;  %v941_v59 = vmul.f32 0.6931472, %v2572_v26  ;;  %v978_v20 = vmul.f32 %v977_v50, %v3340_v52  ;;  %v945_v27 = vmul.f32 %v939_v38, %v3327_v18  ;;  %v1012_v42 = vmul.f32 %v1011_v21, %v983_v36 }
 0x1b1   : > { %v2576_v60 = vpop.eup %2575  ;;  %v931_v22 = vadd.f32 %v930_v13, %v2758_v0  ;;  %v989_v55 = vmul.f32 0.6931472, %v2574_v51  ;;  %v993_v62 = vmul.f32 %v987_v6, %v3329_v16  ;;  %v1015_v50 = vmul.f32 %v1014_v19, %v985_v44 }
 0x1b2   : > { %v946_v61 = vmul.f32 %v941_v59, %v923_v14  ;;  %v952_v11 = vsub.f32 %v939_v38, %v941_v59  ;;  %v960_v37 = vmul.f32 2494.2, %v2576_v60  ;;  %v979_v12 = vadd.f32 %v978_v20, %v2758_v0  ;;  %v2578_v9 = vpop.eup %2577 }
 0x1b3   : > { %v961_v23 = vmul.f32 2.0, %v931_v22  ;;  %v955_v41 = vmul.f32 %v931_v22, %v925_v45  ;;  %v994_v28 = vmul.f32 %v989_v55, %v971_v63  ;;  %v1000_v49 = vsub.f32 %v987_v6, %v989_v55 }
 0x1b4   : > { %v953_v32 = vmul.f32 2494.2, %v952_v11  ;;  %v947_v39 = vadd.f32 %v946_v61, %v945_v27  ;;  %v1008_v14 = vmul.f32 2494.2, %v2578_v9  ;;  %v1009_v33 = vmul.f32 2.0, %v979_v12 }
 0x1b5   : > { %v962_v35 = vsub.f32 %v960_v37, %v961_v23  ;;  %v995_v31 = vadd.f32 %v994_v28, %v993_v62  ;;  %v1001_v25 = vmul.f32 2494.2, %v1000_v49  ;;  %v1003_v38 = vmul.f32 %v979_v12, %v3340_v52 }
 0x1b6   : > { %v954_v15 = vadd.f32 %v2778_v4, %v953_v32  ;;  %v992_v63 = vmul.f32 %v2778_v4, %v3329_v16  ;;  %v1010_v45 = vsub.f32 %v1008_v14, %v1009_v33  ;;  %v948_v54 = vmul.f32 2494.2, %v947_v39 }
 0x1b7   : > { %v965_v24 = vsub.f32 %v962_v35, %v964_v56  ;;  %v996_v26 = vmul.f32 2494.2, %v995_v31  ;;  %v1002_v13 = vadd.f32 %v2778_v4, %v1001_v25  ;;  %v1006_v51 = vmul.f32 %v1005_v17, %v983_v36 }
 0x1b8   : > { %v956_v40 = vadd.f32 %v955_v41, %v954_v15  ;;  %v1013_v20 = vsub.f32 %v1010_v45, %v1012_v42  ;;  %v950_v57 = vmul.f32 %v3338_v34, %v931_v22  ;;  %v1017_v52 = vsub.f32 %v3329_v16, %v3327_v18 }
 0x1b9   : > { %v968_v59 = vadd.f32 %v967_v48, %v965_v24  ;;  %v1004_v21 = vadd.f32 %v1003_v38, %v1002_v13  ;;  %v949_v27 = vadd.f32 %v948_v54, %v3364_v30  ;;  %v997_v6 = vadd.f32 %v996_v26, %v992_v63 }
 0x1ba   : > { %v959_v60 = vsub.f32 %v956_v40, %v958_v47  ;;  %v1016_v46 = vadd.f32 %v1015_v50, %v1013_v20  ;;  %v998_v55 = vmul.f32 %v3343_v10, %v979_v12 }
 0x1bb   : > { %v1007_v61 = vsub.f32 %v1004_v21, %v1006_v51  ;;  %v951_v17 = vadd.f32 %v950_v57, %v949_v27  ;;  %v1042_v30 = vmul.f32 %v1017_v52, %v968_v59 }
 0x1bc   : > { %v1025_v11 = vmul.f32 %v1016_v46, %v968_v59  ;;  %v999_v48 = vadd.f32 %v998_v55, %v997_v6  ;;  %v1020_v34 = vmul.f32 %v1017_v52, %v959_v60  ;;  %v1036_v28 = vmul.f32 %v1017_v52, %v1016_v46 }
 0x1bd   : > { %v1019_v37 = vsub.f32 %v1007_v61, %v959_v60  ;;  %v1022_v22 = vmul.f32 %v1017_v52, %v1007_v61 }
 0x1be   : > { %v1026_v23 = vmul.f32 %v1025_v11, %v1017_v52  ;;  %v1018_v62 = vsub.f32 %v999_v48, %v951_v17 }
 0x1bf   : > { %v1024_v36 = vmul.f32 %v1019_v37, %v1019_v37 }
 0x1c0   : > { %v1027_v56 = vmul.f32 %v1026_v23, %v1017_v52  ;;  %v1021_v41 = vsub.f32 %v1018_v62, %v1020_v34  ;;  %v1023_v10 = vsub.f32 %v1022_v22, %v1018_v62 }
 0x1c2   : > { %v1028_v44 = vsub.f32 %v1024_v36, %v1027_v56  ;;  %v1035_v19 = vmul.f32 %v1023_v10, %v1019_v37  ;;  %v1037_v39 = vmul.f32 %v1036_v28, %v1021_v41  ;;  %v1043_v35 = vmul.f32 %v1042_v30, %v1023_v10 }
 0x1c3   : > { %v1044_v49 = vmul.f32 %v1021_v41, %v1019_v37 }
 0x1c4   : > { %v1029_v9 = vand.u32 2147483647, %v1028_v44  ;;  %vm1031_vm2 = vcmp.ge.f32.partialorder %v1028_v44, 0.0  ;;  %v1038_v14 = vsub.f32 %v1035_v19, %v1037_v39 }
 0x1c5   : > { %v1032_v32 = vsel %vm1031_vm2, 1e-12, %v2739_v29  ;;  %v1045_v15 = vsub.f32 %v1043_v35, %v1044_v49 }
 0x1c6   : > { %vm1030_vm3 = vcmp.lt.f32.partialorder %v1029_v9, 1e-12 }
 0x1c7   : > { %v1033_v12 = vsel %vm1030_vm3, %v1032_v32, %v1028_v44 }
 0x1c8   : > { %2579 = vrcp.f32 %v1033_v12 }
 0x1d2   : > { %v2580_v31 = vpop.eup %2579 }
 0x1d3   : > { %v1039_v33 = vmul.f32 %v2580_v31, %v1038_v14  ;;  %v1046_v42 = vmul.f32 %v2580_v31, %v1045_v15 }
 0x1d5   : > { %v2429_v47 = vclamps-f32 %v1039_v33, 0.05  ;;  %v2430_v24 = vclamps-f32 %v1046_v42, 0.05 }
 0x1d7   : > { %v1049_v25 = vadd.f32 %v2429_v47, %v3327_v18  ;;  %v1052_v38 = vadd.f32 %v2430_v24, %v3329_v16 }
 0x1d9   : > { %v1050_v40 = vmax.f32 %v1049_v25, 1e-07  ;;  %v1053_v63 = vmax.f32 %v1052_v38, 1e-07 }
 0x1db   : > { %v1051_v45 = vmin.f32 %v1050_v40, 0.9999999  ;;  %v1054_v50 = vmin.f32 %v1053_v63, 0.9999999 }
 0x1dd   : > { %v1055_v54 = vsub.f32 %v1051_v45, %v3327_v18  ;;  %v1057_v26 = vsub.f32 %v1054_v50, %v3329_v16  ;;  %v1060_v13 = vsub.f32 %v1051_v45, %v3317_v53  ;;  %v1063_v51 = vsub.f32 %v1054_v50, %v3320_v58 }
 0x1df   : > { %v1056_v59 = vand.u32 2147483647, %v1055_v54  ;;  %v1058_v20 = vand.u32 2147483647, %v1057_v26  ;;  %v1061_v60 = vmul.f32 %v1060_v13, %v3325_v43  ;;  %v1064_v21 = vmul.f32 %v1063_v51, %v3325_v43 }
 0x1e1   : > { %v1059_v57 = vmax.f32.f32 %v1056_v59, %v1058_v20  ;;  %v3402_v46 = vadd.f32 %v1061_v60, %v3317_v53  ;;  %v3405_v52 = vadd.f32 %v1064_v21, %v3320_v58 }
 0x1e3   : > { %vm1066_vm4 = vcmp.lt.f32.partialorder %v1059_v57, 1e-06  ;;  %v1068_v18 = vmax.f32 %v3402_v46, 1e-07  ;;  %v1116_v16 = vmax.f32 %v3405_v52, 1e-07 }
 0x1e4   : > { %v3410_v27 = vsel %vm1066_vm4, 0.0, %v3325_v43 }
 0x1e5   : > { %v3412_v6 = vmin.f32 %v1068_v18, 0.9999999  ;;  %v3414_v55 = vmin.f32 %v1116_v16, 0.9999999 }
 0x1e7   : > { %v1070_v61 = vsub.f32 1.0, %v3412_v6  ;;  %v1071_v53 = vmul.f32 2.0, %v3412_v6  ;;  %2581 = vlog2.f32 %v3412_v6  ;;  %v1118_v58 = vsub.f32 1.0, %v3414_v55 }
 0x1e8   : > { %v1119_v11 = vmul.f32 2.0, %v3414_v55  ;;  %2583 = vlog2.f32 %v3414_v55  ;;  %v3449_v35 = vmul.f32 %v2778_v4, %v3412_v6 }
 0x1e9   : > { %v1072_v37 = vsub.f32 1.0, %v1071_v53  ;;  %2585 = vlog2.f32 %v1070_v61  ;;  %v3423_v43 = vmul.f32 %v1070_v61, %v3412_v6  ;;  %v3428_v17 = vmul.f32 %v1118_v58, %v3414_v55 }
 0x1ea   : > { %v3425_v23 = vsub.f32 1.0, %v1119_v11  ;;  %2587 = vlog2.f32 %v1118_v58 }
 0x1eb   : > { %v1073_v48 = vmul.f32 %v2773_v3, %v1072_v37  ;;  %v1079_v36 = vmul.f32 %v1072_v37, %v2787_v7  ;;  %v1083_v56 = vmul.f32 %v1072_v37, %v2790_v8  ;;  %2589 = vrcp.f32 %v3423_v43 }
 0x1ec   : > { %v1121_v44 = vmul.f32 %v2773_v3, %v3425_v23  ;;  %v1127_v22 = vmul.f32 %v3425_v23, %v2787_v7  ;;  %v1113_v9 = vmul.f32 4.0, %v3423_v43  ;;  %2591 = vrcp.f32 %v3428_v17 }
 0x1ed   : > { %v1074_v62 = vadd.f32 %v2768_v2, %v1073_v48  ;;  %v1080_v34 = vadd.f32 %v1079_v36, %v2781_v5  ;;  %v1084_v10 = vadd.f32 %v1083_v56, %v2781_v5  ;;  %v1104_v49 = vmul.f32 2.0, %v3423_v43 }
 0x1ee   : > { %v1122_v32 = vadd.f32 %v2768_v2, %v1121_v44  ;;  %v1128_v12 = vadd.f32 %v1127_v22, %v2781_v5  ;;  %v1110_v33 = vmul.f32 4.0, %v1072_v37  ;;  %v1131_v47 = vmul.f32 %v3425_v23, %v2790_v8 }
 0x1ef   : > { %v1075_v30 = vmul.f32 %v1074_v62, %v1072_v37  ;;  %v1081_v41 = vmul.f32 %v1080_v34, %v1072_v37  ;;  %v1114_v40 = vmul.f32 %v1113_v9, %v1084_v10  ;;  %v1152_v63 = vmul.f32 2.0, %v3428_v17 }
 0x1f0   : > { %v1123_v28 = vmul.f32 %v1122_v32, %v3425_v23  ;;  %v1129_v14 = vmul.f32 %v1128_v12, %v3425_v23  ;;  %v1158_v13 = vmul.f32 4.0, %v3425_v23  ;;  %v1132_v36 = vadd.f32 %v1131_v47, %v2781_v5 }
 0x1f1   : > { %v2582_v19 = vpop.eup %2581  ;;  %v1076_v39 = vadd.f32 %v2763_v1, %v1075_v30  ;;  %v1082_v38 = vadd.f32 %v2763_v1, %v1081_v41  ;;  %v1161_v9 = vmul.f32 4.0, %v3428_v17 }
 0x1f2   : > { %v2584_v15 = vpop.eup %2583  ;;  %v1086_v31 = vmul.f32 0.6931472, %v2582_v19  ;;  %v1124_v42 = vadd.f32 %v2763_v1, %v1123_v28  ;;  %v1130_v26 = vadd.f32 %v2763_v1, %v1129_v14 }
 0x1f3   : > { %v2586_v24 = vpop.eup %2585  ;;  %v1077_v25 = vmul.f32 %v1076_v39, %v1072_v37  ;;  %v1134_v60 = vmul.f32 0.6931472, %v2584_v15  ;;  %v1111_v48 = vmul.f32 %v1110_v33, %v1082_v38  ;;  %v1105_v39 = vmul.f32 %v1104_v49, %v1082_v38 }
 0x1f4   : > { %v2588_v45 = vpop.eup %2587  ;;  %v1088_v50 = vmul.f32 0.6931472, %v2586_v24  ;;  %v1125_v54 = vmul.f32 %v1124_v42, %v3425_v23  ;;  %v1092_v20 = vmul.f32 %v1086_v31, %v3412_v6  ;;  %v1159_v19 = vmul.f32 %v1158_v13, %v1130_v26 }
 0x1f5   : > { %v2590_v51 = vpop.eup %2589  ;;  %v1078_v59 = vadd.f32 %v1077_v25, %v2758_v0  ;;  %v1136_v21 = vmul.f32 0.6931472, %v2588_v45  ;;  %v1140_v56 = vmul.f32 %v1134_v60, %v3414_v55  ;;  %v1162_v42 = vmul.f32 %v1161_v9, %v1132_v36 }
 0x1f6   : > { %v1093_v57 = vmul.f32 %v1088_v50, %v1070_v61  ;;  %v1099_v18 = vsub.f32 %v1086_v31, %v1088_v50  ;;  %v1107_v16 = vmul.f32 2494.2, %v2590_v51  ;;  %v1126_v53 = vadd.f32 %v1125_v54, %v2758_v0  ;;  %v2592_v44 = vpop.eup %2591 }
 0x1f7   : > { %v1108_v11 = vmul.f32 2.0, %v1078_v59  ;;  %v1102_v34 = vmul.f32 %v1078_v59, %v1072_v37  ;;  %v1141_v22 = vmul.f32 %v1136_v21, %v1118_v58  ;;  %v1147_v41 = vsub.f32 %v1134_v60, %v1136_v21 }
 0x1f8   : > { %v1100_v62 = vmul.f32 2494.2, %v1099_v18  ;;  %v1094_v32 = vadd.f32 %v1093_v57, %v1092_v20  ;;  %v1155_v61 = vmul.f32 2494.2, %v2592_v44  ;;  %v1156_v28 = vmul.f32 2.0, %v1126_v53 }
 0x1f9   : > { %v1109_v30 = vsub.f32 %v1107_v16, %v1108_v11  ;;  %v1142_v12 = vadd.f32 %v1141_v22, %v1140_v56  ;;  %v1148_v15 = vmul.f32 2494.2, %v1147_v41  ;;  %v1150_v31 = vmul.f32 %v1126_v53, %v3425_v23 }
 0x1fa   : > { %v1101_v10 = vadd.f32 %v2778_v4, %v1100_v62  ;;  %v1139_v58 = vmul.f32 %v2778_v4, %v3414_v55  ;;  %v1157_v37 = vsub.f32 %v1155_v61, %v1156_v28  ;;  %v1095_v47 = vmul.f32 2494.2, %v1094_v32 }
 0x1fb   : > { %v1112_v14 = vsub.f32 %v1109_v30, %v1111_v48  ;;  %v1143_v24 = vmul.f32 2494.2, %v1142_v12  ;;  %v1149_v25 = vadd.f32 %v2778_v4, %v1148_v15  ;;  %v1153_v45 = vmul.f32 %v1152_v63, %v1130_v26 }
 0x1fc   : > { %v1103_v33 = vadd.f32 %v1102_v34, %v1101_v10  ;;  %v1160_v54 = vsub.f32 %v1157_v37, %v1159_v19  ;;  %v1097_v49 = vmul.f32 %v3423_v43, %v1078_v59  ;;  %v1164_v23 = vsub.f32 %v3414_v55, %v3412_v6 }
 0x1fd   : > { %v1115_v50 = vadd.f32 %v1114_v40, %v1112_v14  ;;  %v1151_v13 = vadd.f32 %v1150_v31, %v1149_v25  ;;  %v1096_v20 = vadd.f32 %v1095_v47, %v3449_v35  ;;  %v1144_v60 = vadd.f32 %v1143_v24, %v1139_v58 }
 0x1fe   : > { %v1106_v51 = vsub.f32 %v1103_v33, %v1105_v39  ;;  %v1163_v38 = vadd.f32 %v1162_v42, %v1160_v54  ;;  %v1145_v21 = vmul.f32 %v3428_v17, %v1126_v53 }
 0x1ff   : > { %v1154_v57 = vsub.f32 %v1151_v13, %v1153_v45  ;;  %v1098_v63 = vadd.f32 %v1097_v49, %v1096_v20  ;;  %v1189_v35 = vmul.f32 %v1164_v23, %v1115_v50 }
 0x200   : > { %v1172_v18 = vmul.f32 %v1163_v38, %v1115_v50  ;;  %v1146_v40 = vadd.f32 %v1145_v21, %v1144_v60  ;;  %v1167_v43 = vmul.f32 %v1164_v23, %v1106_v51  ;;  %v1183_v22 = vmul.f32 %v1164_v23, %v1163_v38 }
 0x201   : > { %v1166_v16 = vsub.f32 %v1154_v57, %v1106_v51  ;;  %v1169_v59 = vmul.f32 %v1164_v23, %v1154_v57 }
 0x202   : > { %v1173_v11 = vmul.f32 %v1172_v18, %v1164_v23  ;;  %v1165_v56 = vsub.f32 %v1146_v40, %v1098_v63 }
 0x203   : > { %v1171_v26 = vmul.f32 %v1166_v16, %v1166_v16 }
 0x204   : > { %v1174_v48 = vmul.f32 %v1173_v11, %v1164_v23  ;;  %v1168_v34 = vsub.f32 %v1165_v56, %v1167_v43  ;;  %v1170_v17 = vsub.f32 %v1169_v59, %v1165_v56 }
 0x206   : > { %v1175_v36 = vsub.f32 %v1171_v26, %v1174_v48  ;;  %v1182_v9 = vmul.f32 %v1170_v17, %v1166_v16  ;;  %v1184_v32 = vmul.f32 %v1183_v22, %v1168_v34  ;;  %v1190_v30 = vmul.f32 %v1189_v35, %v1170_v17 }
 0x207   : > { %v1191_v41 = vmul.f32 %v1168_v34, %v1166_v16 }
 0x208   : > { %v1176_v44 = vand.u32 2147483647, %v1175_v36  ;;  %vm1178_vm5 = vcmp.ge.f32.partialorder %v1175_v36, 0.0  ;;  %v1185_v61 = vsub.f32 %v1182_v9, %v1184_v32 }
 0x209   : > { %v1179_v62 = vsel %vm1178_vm5, 1e-12, %v2739_v29  ;;  %v1192_v10 = vsub.f32 %v1190_v30, %v1191_v41 }
 0x20a   : > { %vm1177_vm6 = vcmp.lt.f32.partialorder %v1176_v44, 1e-12 }
 0x20b   : > { %v1180_v53 = vsel %vm1177_vm6, %v1179_v62, %v1175_v36 }
 0x20c   : > { %2593 = vrcp.f32 %v1180_v53 }
 0x216   : > { %v2594_v12 = vpop.eup %2593 }
 0x217   : > { %v1186_v28 = vmul.f32 %v2594_v12, %v1185_v61  ;;  %v1193_v19 = vmul.f32 %v2594_v12, %v1192_v10 }
 0x219   : > { %v2431_v39 = vclamps-f32 %v1186_v28, 0.05  ;;  %v2432_v14 = vclamps-f32 %v1193_v19, 0.05 }
 0x21b   : > { %v1196_v15 = vadd.f32 %v2431_v39, %v3412_v6  ;;  %v1199_v31 = vadd.f32 %v2432_v14, %v3414_v55 }
 0x21d   : > { %v1197_v33 = vmax.f32 %v1196_v15, 1e-07  ;;  %v1200_v58 = vmax.f32 %v1199_v31, 1e-07 }
 0x21f   : > { %v1198_v37 = vmin.f32 %v1197_v33, 0.9999999  ;;  %v1201_v42 = vmin.f32 %v1200_v58, 0.9999999 }
 0x221   : > { %v1202_v47 = vsub.f32 %v1198_v37, %v3412_v6  ;;  %v1204_v24 = vsub.f32 %v1201_v42, %v3414_v55  ;;  %v1207_v25 = vsub.f32 %v1198_v37, %v3402_v46  ;;  %v1210_v45 = vsub.f32 %v1201_v42, %v3405_v52 }
 0x223   : > { %v1203_v50 = vand.u32 2147483647, %v1202_v47  ;;  %v1205_v54 = vand.u32 2147483647, %v1204_v24  ;;  %v1208_v51 = vmul.f32 %v1207_v25, %v3410_v27  ;;  %v1211_v13 = vmul.f32 %v1210_v45, %v3410_v27 }
 0x225   : > { %v1206_v49 = vmax.f32.f32 %v1203_v50, %v1205_v54  ;;  %v3487_v38 = vadd.f32 %v1208_v51, %v3402_v46  ;;  %v3490_v23 = vadd.f32 %v1211_v13, %v3405_v52 }
 0x227   : > { %vm1213_vm7 = vcmp.lt.f32.partialorder %v1206_v49, 1e-06  ;;  %v1215_v6 = vmax.f32 %v3487_v38, 1e-07  ;;  %v1263_v55 = vmax.f32 %v3490_v23, 1e-07 }
 0x228   : > { %v3495_v20 = vsel %vm1213_vm7, 0.0, %v3410_v27 }
 0x229   : > { %v3497_v60 = vmin.f32 %v1215_v6, 0.9999999  ;;  %v3499_v21 = vmin.f32 %v1263_v55, 0.9999999 }
 0x22b   : > { %v1217_v57 = vsub.f32 1.0, %v3497_v60  ;;  %v1218_v46 = vmul.f32 2.0, %v3497_v60  ;;  %2595 = vlog2.f32 %v3497_v60  ;;  %v1265_v52 = vsub.f32 1.0, %v3499_v21 }
 0x22c   : > { %v1266_v18 = vmul.f32 2.0, %v3499_v21  ;;  %2597 = vlog2.f32 %v3499_v21  ;;  %v3534_v30 = vmul.f32 %v2778_v4, %v3497_v60 }
 0x22d   : > { %v1219_v16 = vsub.f32 1.0, %v1218_v46  ;;  %2599 = vlog2.f32 %v1217_v57  ;;  %v3508_v27 = vmul.f32 %v1217_v57, %v3497_v60  ;;  %v3513_v63 = vmul.f32 %v1265_v52, %v3499_v21 }
 0x22e   : > { %v3510_v11 = vsub.f32 1.0, %v1266_v18  ;;  %2601 = vlog2.f32 %v1265_v52 }
 0x22f   : > { %v1220_v40 = vmul.f32 %v2773_v3, %v1219_v16  ;;  %v1226_v26 = vmul.f32 %v1219_v16, %v2787_v7  ;;  %v1230_v48 = vmul.f32 %v1219_v16, %v2790_v8  ;;  %2603 = vrcp.f32 %v3508_v27 }
 0x230   : > { %v1268_v36 = vmul.f32 %v2773_v3, %v3510_v11  ;;  %v1274_v59 = vmul.f32 %v3510_v11, %v2787_v7  ;;  %v1260_v44 = vmul.f32 4.0, %v3508_v27  ;;  %2605 = vrcp.f32 %v3513_v63 }
 0x231   : > { %v1221_v56 = vadd.f32 %v2768_v2, %v1220_v40  ;;  %v1227_v43 = vadd.f32 %v1226_v26, %v2781_v5  ;;  %v1231_v17 = vadd.f32 %v1230_v48, %v2781_v5  ;;  %v1251_v41 = vmul.f32 2.0, %v3508_v27 }
 0x232   : > { %v1269_v62 = vadd.f32 %v2768_v2, %v1268_v36  ;;  %v1275_v53 = vadd.f32 %v1274_v59, %v2781_v5  ;;  %v1257_v28 = vmul.f32 4.0, %v1219_v16  ;;  %v1278_v39 = vmul.f32 %v3510_v11, %v2790_v8 }
 0x233   : > { %v1222_v35 = vmul.f32 %v1221_v56, %v1219_v16  ;;  %v1228_v34 = vmul.f32 %v1227_v43, %v1219_v16  ;;  %v1261_v33 = vmul.f32 %v1260_v44, %v1231_v17  ;;  %v1299_v58 = vmul.f32 2.0, %v3513_v63 }
 0x234   : > { %v1270_v22 = vmul.f32 %v1269_v62, %v3510_v11  ;;  %v1276_v61 = vmul.f32 %v1275_v53, %v3510_v11  ;;  %v1305_v25 = vmul.f32 4.0, %v3510_v11  ;;  %v1279_v26 = vadd.f32 %v1278_v39, %v2781_v5 }
 0x235   : > { %v2596_v9 = vpop.eup %2595  ;;  %v1223_v32 = vadd.f32 %v2763_v1, %v1222_v35  ;;  %v1229_v31 = vadd.f32 %v2763_v1, %v1228_v34  ;;  %v1308_v44 = vmul.f32 4.0, %v3513_v63 }
 0x236   : > { %v2598_v10 = vpop.eup %2597  ;;  %v1233_v12 = vmul.f32 0.6931472, %v2596_v9  ;;  %v1271_v19 = vadd.f32 %v2763_v1, %v1270_v22  ;;  %v1277_v24 = vadd.f32 %v2763_v1, %v1276_v61 }
 0x237   : > { %v2600_v14 = vpop.eup %2599  ;;  %v1224_v15 = vmul.f32 %v1223_v32, %v1219_v16  ;;  %v1281_v51 = vmul.f32 0.6931472, %v2598_v10  ;;  %v1258_v40 = vmul.f32 %v1257_v28, %v1229_v31  ;;  %v1252_v32 = vmul.f32 %v1251_v41, %v1229_v31 }
 0x238   : > { %v2602_v37 = vpop.eup %2601  ;;  %v1235_v42 = vmul.f32 0.6931472, %v2600_v14  ;;  %v1272_v47 = vmul.f32 %v1271_v19, %v3510_v11  ;;  %v1239_v54 = vmul.f32 %v1233_v12, %v3497_v60  ;;  %v1306_v9 = vmul.f32 %v1305_v25, %v1277_v24 }
 0x239   : > { %v2604_v45 = vpop.eup %2603  ;;  %v1225_v50 = vadd.f32 %v1224_v15, %v2758_v0  ;;  %v1283_v13 = vmul.f32 0.6931472, %v2602_v37  ;;  %v1287_v48 = vmul.f32 %v1281_v51, %v3499_v21  ;;  %v1309_v19 = vmul.f32 %v1308_v44, %v1279_v26 }
 0x23a   : > { %v1240_v49 = vmul.f32 %v1235_v42, %v1217_v57  ;;  %v1246_v6 = vsub.f32 %v1233_v12, %v1235_v42  ;;  %v1254_v55 = vmul.f32 2494.2, %v2604_v45  ;;  %v1273_v46 = vadd.f32 %v1272_v47, %v2758_v0  ;;  %v2606_v36 = vpop.eup %2605 }
 0x23b   : > { %v1255_v18 = vmul.f32 2.0, %v1225_v50  ;;  %v1249_v43 = vmul.f32 %v1225_v50, %v1219_v16  ;;  %v1288_v59 = vmul.f32 %v1283_v13, %v1265_v52  ;;  %v1294_v34 = vsub.f32 %v1281_v51, %v1283_v13 }
 0x23c   : > { %v1247_v56 = vmul.f32 2494.2, %v1246_v6  ;;  %v1241_v62 = vadd.f32 %v1240_v49, %v1239_v54  ;;  %v1302_v57 = vmul.f32 2494.2, %v2606_v36  ;;  %v1303_v22 = vmul.f32 2.0, %v1273_v46 }
 0x23d   : > { %v1256_v35 = vsub.f32 %v1254_v55, %v1255_v18  ;;  %v1289_v53 = vadd.f32 %v1288_v59, %v1287_v48  ;;  %v1295_v10 = vmul.f32 2494.2, %v1294_v34  ;;  %v1297_v12 = vmul.f32 %v1273_v46, %v3510_v11 }
 0x23e   : > { %v1248_v17 = vadd.f32 %v2778_v4, %v1247_v56  ;;  %v1286_v52 = vmul.f32 %v2778_v4, %v3499_v21  ;;  %v1304_v16 = vsub.f32 %v1302_v57, %v1303_v22  ;;  %v1242_v39 = vmul.f32 2494.2, %v1241_v62 }
 0x23f   : > { %v1259_v61 = vsub.f32 %v1256_v35, %v1258_v40  ;;  %v1290_v14 = vmul.f32 2494.2, %v1289_v53  ;;  %v1296_v15 = vadd.f32 %v2778_v4, %v1295_v10  ;;  %v1300_v37 = vmul.f32 %v1299_v58, %v1277_v24 }
 0x240   : > { %v1250_v28 = vadd.f32 %v1249_v43, %v1248_v17  ;;  %v1307_v47 = vsub.f32 %v1304_v16, %v1306_v9  ;;  %v1244_v41 = vmul.f32 %v3508_v27, %v1225_v50  ;;  %v1311_v11 = vsub.f32 %v3499_v21, %v3497_v60 }
 0x241   : > { %v1262_v42 = vadd.f32 %v1261_v33, %v1259_v61  ;;  %v1298_v25 = vadd.f32 %v1297_v12, %v1296_v15  ;;  %v1243_v54 = vadd.f32 %v1242_v39, %v3534_v30  ;;  %v1291_v51 = vadd.f32 %v1290_v14, %v1286_v52 }
 0x242   : > { %v1253_v45 = vsub.f32 %v1250_v28, %v1252_v32  ;;  %v1310_v31 = vadd.f32 %v1309_v19, %v1307_v47  ;;  %v1292_v13 = vmul.f32 %v3513_v63, %v1273_v46 }
 0x243   : > { %v1301_v49 = vsub.f32 %v1298_v25, %v1300_v37  ;;  %v1245_v58 = vadd.f32 %v1244_v41, %v1243_v54  ;;  %v1336_v30 = vmul.f32 %v1311_v11, %v1262_v42 }
 0x244   : > { %v1319_v6 = vmul.f32 %v1310_v31, %v1262_v42  ;;  %v1293_v33 = vadd.f32 %v1292_v13, %v1291_v51  ;;  %v1314_v27 = vmul.f32 %v1311_v11, %v1253_v45  ;;  %v1330_v59 = vmul.f32 %v1311_v11, %v1310_v31 }
 0x245   : > { %v1313_v55 = vsub.f32 %v1301_v49, %v1253_v45  ;;  %v1316_v50 = vmul.f32 %v1311_v11, %v1301_v49 }
 0x246   : > { %v1320_v18 = vmul.f32 %v1319_v6, %v1311_v11  ;;  %v1312_v48 = vsub.f32 %v1293_v33, %v1245_v58 }
 0x247   : > { %v1318_v24 = vmul.f32 %v1313_v55, %v1313_v55 }
 0x248   : > { %v1321_v40 = vmul.f32 %v1320_v18, %v1311_v11  ;;  %v1315_v43 = vsub.f32 %v1312_v48, %v1314_v27  ;;  %v1317_v63 = vsub.f32 %v1316_v50, %v1312_v48 }
 0x24a   : > { %v1322_v26 = vsub.f32 %v1318_v24, %v1321_v40  ;;  %v1329_v44 = vmul.f32 %v1317_v63, %v1313_v55  ;;  %v1331_v62 = vmul.f32 %v1330_v59, %v1315_v43  ;;  %v1337_v35 = vmul.f32 %v1336_v30, %v1317_v63 }
 0x24b   : > { %v1338_v34 = vmul.f32 %v1315_v43, %v1313_v55 }
 0x24c   : > { %v1323_v36 = vand.u32 2147483647, %v1322_v26  ;;  %vm1325_vm8 = vcmp.ge.f32.partialorder %v1322_v26, 0.0  ;;  %v1332_v57 = vsub.f32 %v1329_v44, %v1331_v62 }
 0x24d   : > { %v1326_v56 = vsel %vm1325_vm8, 1e-12, %v2739_v29  ;;  %v1339_v17 = vsub.f32 %v1337_v35, %v1338_v34 }
 0x24e   : > { %vm1324_vm9 = vcmp.lt.f32.partialorder %v1323_v36, 1e-12 }
 0x24f   : > { %v1327_v46 = vsel %vm1324_vm9, %v1326_v56, %v1322_v26 }
 0x250   : > { %2607 = vrcp.f32 %v1327_v46 }
 0x25a   : > { %v2608_v53 = vpop.eup %2607 }
 0x25b   : > { %v1333_v22 = vmul.f32 %v2608_v53, %v1332_v57  ;;  %v1340_v9 = vmul.f32 %v2608_v53, %v1339_v17 }
 0x25d   : > { %v2433_v32 = vclamps-f32 %v1333_v22, 0.05  ;;  %v2434_v61 = vclamps-f32 %v1340_v9, 0.05 }
 0x25f   : > { %v1343_v10 = vadd.f32 %v2433_v32, %v3497_v60  ;;  %v1346_v12 = vadd.f32 %v2434_v61, %v3499_v21 }
 0x261   : > { %v1344_v28 = vmax.f32 %v1343_v10, 1e-07  ;;  %v1347_v52 = vmax.f32 %v1346_v12, 1e-07 }
 0x263   : > { %v1345_v16 = vmin.f32 %v1344_v28, 0.9999999  ;;  %v1348_v19 = vmin.f32 %v1347_v52, 0.9999999 }
 0x265   : > { %v1349_v39 = vsub.f32 %v1345_v16, %v3497_v60  ;;  %v1351_v14 = vsub.f32 %v1348_v19, %v3499_v21  ;;  %v1354_v15 = vsub.f32 %v1345_v16, %v3487_v38  ;;  %v1357_v37 = vsub.f32 %v1348_v19, %v3490_v23 }
 0x267   : > { %v1350_v42 = vand.u32 2147483647, %v1349_v39  ;;  %v1352_v47 = vand.u32 2147483647, %v1351_v14  ;;  %v1355_v45 = vmul.f32 %v1354_v15, %v3495_v20  ;;  %v1358_v25 = vmul.f32 %v1357_v37, %v3495_v20 }
 0x269   : > { %v1353_v41 = vmax.f32.f32 %v1350_v42, %v1352_v47  ;;  %v3572_v31 = vadd.f32 %v1355_v45, %v3487_v38  ;;  %v3575_v11 = vadd.f32 %v1358_v25, %v3490_v23 }
 0x26b   : > { %vm1360_vm10 = vcmp.lt.f32.partialorder %v1353_v41, 1e-06  ;;  %v1362_v60 = vmax.f32 %v3572_v31, 1e-07  ;;  %v1410_v21 = vmax.f32 %v3575_v11, 1e-07 }
 0x26c   : > { %v3580_v54 = vsel %vm1360_vm10, 0.0, %v3495_v20 }
 0x26d   : > { %v3582_v51 = vmin.f32 %v1362_v60, 0.9999999  ;;  %v3584_v13 = vmin.f32 %v1410_v21, 0.9999999 }
 0x26f   : > { %v1364_v49 = vsub.f32 1.0, %v3582_v51  ;;  %v1365_v38 = vmul.f32 2.0, %v3582_v51  ;;  %2609 = vlog2.f32 %v3582_v51  ;;  %v1412_v23 = vsub.f32 1.0, %v3584_v13 }
 0x270   : > { %v1413_v6 = vmul.f32 2.0, %v3584_v13  ;;  %2611 = vlog2.f32 %v3584_v13  ;;  %v3619_v35 = vmul.f32 %v2778_v4, %v3582_v51 }
 0x271   : > { %v1366_v55 = vsub.f32 1.0, %v1365_v38  ;;  %2613 = vlog2.f32 %v1364_v49  ;;  %v3593_v20 = vmul.f32 %v1364_v49, %v3582_v51  ;;  %v3598_v58 = vmul.f32 %v1412_v23, %v3584_v13 }
 0x272   : > { %v3595_v18 = vsub.f32 1.0, %v1413_v6  ;;  %2615 = vlog2.f32 %v1412_v23 }
 0x273   : > { %v1367_v33 = vmul.f32 %v2773_v3, %v1366_v55  ;;  %v1373_v24 = vmul.f32 %v1366_v55, %v2787_v7  ;;  %v1377_v40 = vmul.f32 %v1366_v55, %v2790_v8  ;;  %2617 = vrcp.f32 %v3593_v20 }
 0x274   : > { %v1415_v26 = vmul.f32 %v2773_v3, %v3595_v18  ;;  %v1421_v50 = vmul.f32 %v3595_v18, %v2787_v7  ;;  %v1407_v36 = vmul.f32 4.0, %v3593_v20  ;;  %2619 = vrcp.f32 %v3598_v58 }
 0x275   : > { %v1368_v48 = vadd.f32 %v2768_v2, %v1367_v33  ;;  %v1374_v27 = vadd.f32 %v1373_v24, %v2781_v5  ;;  %v1378_v63 = vadd.f32 %v1377_v40, %v2781_v5  ;;  %v1398_v34 = vmul.f32 2.0, %v3593_v20 }
 0x276   : > { %v1416_v56 = vadd.f32 %v2768_v2, %v1415_v26  ;;  %v1422_v46 = vadd.f32 %v1421_v50, %v2781_v5  ;;  %v1404_v22 = vmul.f32 4.0, %v1366_v55  ;;  %v1425_v32 = vmul.f32 %v3595_v18, %v2790_v8 }
 0x277   : > { %v1369_v30 = vmul.f32 %v1368_v48, %v1366_v55  ;;  %v1375_v43 = vmul.f32 %v1374_v27, %v1366_v55  ;;  %v1408_v28 = vmul.f32 %v1407_v36, %v1378_v63  ;;  %v1446_v52 = vmul.f32 2.0, %v3598_v58 }
 0x278   : > { %v1417_v59 = vmul.f32 %v1416_v56, %v3595_v18  ;;  %v1423_v57 = vmul.f32 %v1422_v46, %v3595_v18  ;;  %v1452_v15 = vmul.f32 4.0, %v3595_v18  ;;  %v1426_v24 = vadd.f32 %v1425_v32, %v2781_v5 }
 0x279   : > { %v2610_v44 = vpop.eup %2609  ;;  %v1370_v62 = vadd.f32 %v2763_v1, %v1369_v30  ;;  %v1376_v12 = vadd.f32 %v2763_v1, %v1375_v43  ;;  %v1455_v36 = vmul.f32 4.0, %v3598_v58 }
 0x27a   : > { %v2612_v17 = vpop.eup %2611  ;;  %v1380_v53 = vmul.f32 0.6931472, %v2610_v44  ;;  %v1418_v9 = vadd.f32 %v2763_v1, %v1417_v59  ;;  %v1424_v14 = vadd.f32 %v2763_v1, %v1423_v57 }
 0x27b   : > { %v2614_v61 = vpop.eup %2613  ;;  %v1371_v10 = vmul.f32 %v1370_v62, %v1366_v55  ;;  %v1428_v45 = vmul.f32 0.6931472, %v2612_v17  ;;  %v1405_v33 = vmul.f32 %v1404_v22, %v1376_v12  ;;  %v1399_v62 = vmul.f32 %v1398_v34, %v1376_v12 }
 0x27c   : > { %v2616_v16 = vpop.eup %2615  ;;  %v1382_v19 = vmul.f32 0.6931472, %v2614_v61  ;;  %v1419_v39 = vmul.f32 %v1418_v9, %v3595_v18  ;;  %v1386_v47 = vmul.f32 %v1380_v53, %v3582_v51  ;;  %v1453_v44 = vmul.f32 %v1452_v15, %v1424_v14 }
 0x27d   : > { %v2618_v37 = vpop.eup %2617  ;;  %v1372_v42 = vadd.f32 %v1371_v10, %v2758_v0  ;;  %v1430_v25 = vmul.f32 0.6931472, %v2616_v16  ;;  %v1434_v40 = vmul.f32 %v1428_v45, %v3584_v13  ;;  %v1456_v9 = vmul.f32 %v1455_v36, %v1426_v24 }
 0x27e   : > { %v1387_v41 = vmul.f32 %v1382_v19, %v1364_v49  ;;  %v1393_v60 = vsub.f32 %v1380_v53, %v1382_v19  ;;  %v1401_v21 = vmul.f32 2494.2, %v2618_v37  ;;  %v1420_v38 = vadd.f32 %v1419_v39, %v2758_v0  ;;  %v2620_v26 = vpop.eup %2619 }
 0x27f   : > { %v1402_v6 = vmul.f32 2.0, %v1372_v42  ;;  %v1396_v27 = vmul.f32 %v1372_v42, %v1366_v55  ;;  %v1435_v50 = vmul.f32 %v1430_v25, %v1412_v23  ;;  %v1441_v43 = vsub.f32 %v1428_v45, %v1430_v25 }
 0x280   : > { %v1394_v48 = vmul.f32 2494.2, %v1393_v60  ;;  %v1388_v56 = vadd.f32 %v1387_v41, %v1386_v47  ;;  %v1449_v49 = vmul.f32 2494.2, %v2620_v26  ;;  %v1450_v59 = vmul.f32 2.0, %v1420_v38 }
 0x281   : > { %v1403_v30 = vsub.f32 %v1401_v21, %v1402_v6  ;;  %v1436_v46 = vadd.f32 %v1435_v50, %v1434_v40  ;;  %v1442_v17 = vmul.f32 2494.2, %v1441_v43  ;;  %v1444_v53 = vmul.f32 %v1420_v38, %v3595_v18 }
 0x282   : > { %v1395_v63 = vadd.f32 %v2778_v4, %v1394_v48  ;;  %v1433_v23 = vmul.f32 %v2778_v4, %v3584_v13  ;;  %v1451_v55 = vsub.f32 %v1449_v49, %v1450_v59  ;;  %v1389_v32 = vmul.f32 2494.2, %v1388_v56 }
 0x283   : > { %v1406_v57 = vsub.f32 %v1403_v30, %v1405_v33  ;;  %v1437_v61 = vmul.f32 2494.2, %v1436_v46  ;;  %v1443_v10 = vadd.f32 %v2778_v4, %v1442_v17  ;;  %v1447_v16 = vmul.f32 %v1446_v52, %v1424_v14 }
 0x284   : > { %v1397_v22 = vadd.f32 %v1396_v27, %v1395_v63  ;;  %v1454_v39 = vsub.f32 %v1451_v55, %v1453_v44  ;;  %v1391_v34 = vmul.f32 %v3593_v20, %v1372_v42  ;;  %v1458_v18 = vsub.f32 %v3584_v13, %v3582_v51 }
 0x285   : > { %v1409_v19 = vadd.f32 %v1408_v28, %v1406_v57  ;;  %v1445_v15 = vadd.f32 %v1444_v53, %v1443_v10  ;;  %v1390_v47 = vadd.f32 %v1389_v32, %v3619_v35  ;;  %v1438_v45 = vadd.f32 %v1437_v61, %v1433_v23 }
 0x286   : > { %v1400_v37 = vsub.f32 %v1397_v22, %v1399_v62  ;;  %v1457_v12 = vadd.f32 %v1456_v9, %v1454_v39  ;;  %v1439_v25 = vmul.f32 %v3598_v58, %v1420_v38 }
 0x287   : > { %v1448_v41 = vsub.f32 %v1445_v15, %v1447_v16  ;;  %v1392_v52 = vadd.f32 %v1391_v34, %v1390_v47  ;;  %v1483_v35 = vmul.f32 %v1458_v18, %v1409_v19 }
 0x288   : > { %v1466_v60 = vmul.f32 %v1457_v12, %v1409_v19  ;;  %v1440_v28 = vadd.f32 %v1439_v25, %v1438_v45  ;;  %v1461_v20 = vmul.f32 %v1458_v18, %v1400_v37  ;;  %v1477_v50 = vmul.f32 %v1458_v18, %v1457_v12 }
 0x289   : > { %v1460_v21 = vsub.f32 %v1448_v41, %v1400_v37  ;;  %v1463_v42 = vmul.f32 %v1458_v18, %v1448_v41 }
 0x28a   : > { %v1467_v6 = vmul.f32 %v1466_v60, %v1458_v18  ;;  %v1459_v40 = vsub.f32 %v1440_v28, %v1392_v52 }
 0x28b   : > { %v1465_v14 = vmul.f32 %v1460_v21, %v1460_v21 }
 0x28c   : > { %v1468_v33 = vmul.f32 %v1467_v6, %v1458_v18  ;;  %v1462_v27 = vsub.f32 %v1459_v40, %v1461_v20  ;;  %v1464_v58 = vsub.f32 %v1463_v42, %v1459_v40 }
 0x28e   : > { %v1469_v24 = vsub.f32 %v1465_v14, %v1468_v33  ;;  %v1476_v36 = vmul.f32 %v1464_v58, %v1460_v21  ;;  %v1478_v56 = vmul.f32 %v1477_v50, %v1462_v27  ;;  %v1484_v30 = vmul.f32 %v1483_v35, %v1464_v58 }
 0x28f   : > { %v1485_v43 = vmul.f32 %v1462_v27, %v1460_v21 }
 0x290   : > { %v1470_v26 = vand.u32 2147483647, %v1469_v24  ;;  %vm1472_vm11 = vcmp.ge.f32.partialorder %v1469_v24, 0.0  ;;  %v1479_v49 = vsub.f32 %v1476_v36, %v1478_v56 }
 0x291   : > { %v1473_v48 = vsel %vm1472_vm11, 1e-12, %v2739_v29  ;;  %v1486_v63 = vsub.f32 %v1484_v30, %v1485_v43 }
 0x292   : > { %vm1471_vm12 = vcmp.lt.f32.partialorder %v1470_v26, 1e-12 }
 0x293   : > { %v1474_v38 = vsel %vm1471_vm12, %v1473_v48, %v1469_v24 }
 0x294   : > { %2621 = vrcp.f32 %v1474_v38 }
 0x29e   : > { %v2622_v46 = vpop.eup %2621 }
 0x29f   : > { %v1480_v59 = vmul.f32 %v2622_v46, %v1479_v49  ;;  %v1487_v44 = vmul.f32 %v2622_v46, %v1486_v63 }
 0x2a1   : > { %v2435_v62 = vclamps-f32 %v1480_v59, 0.05  ;;  %v2436_v57 = vclamps-f32 %v1487_v44, 0.05 }
 0x2a3   : > { %v1490_v17 = vadd.f32 %v2435_v62, %v3582_v51  ;;  %v1493_v53 = vadd.f32 %v2436_v57, %v3584_v13 }
 0x2a5   : > { %v1491_v22 = vmax.f32 %v1490_v17, 1e-07  ;;  %v1494_v23 = vmax.f32 %v1493_v53, 1e-07 }
 0x2a7   : > { %v1492_v55 = vmin.f32 %v1491_v22, 0.9999999  ;;  %v1495_v9 = vmin.f32 %v1494_v23, 0.9999999 }
 0x2a9   : > { %v1496_v32 = vsub.f32 %v1492_v55, %v3582_v51  ;;  %v1498_v61 = vsub.f32 %v1495_v9, %v3584_v13  ;;  %v1501_v10 = vsub.f32 %v1492_v55, %v3572_v31  ;;  %v1504_v16 = vsub.f32 %v1495_v9, %v3575_v11 }
 0x2ab   : > { %v1497_v19 = vand.u32 2147483647, %v1496_v32  ;;  %v1499_v39 = vand.u32 2147483647, %v1498_v61  ;;  %v1502_v37 = vmul.f32 %v1501_v10, %v3580_v54  ;;  %v1505_v15 = vmul.f32 %v1504_v16, %v3580_v54 }
 0x2ad   : > { %v1500_v34 = vmax.f32.f32 %v1497_v19, %v1499_v39  ;;  %v3657_v12 = vadd.f32 %v1502_v37, %v3572_v31  ;;  %v3660_v18 = vadd.f32 %v1505_v15, %v3575_v11 }
 0x2af   : > { %vm1507_vm13 = vcmp.lt.f32.partialorder %v1500_v34, 1e-06  ;;  %v1509_v51 = vmax.f32 %v3657_v12, 1e-07  ;;  %v1557_v13 = vmax.f32 %v3660_v18, 1e-07 }
 0x2b0   : > { %v3665_v47 = vsel %vm1507_vm13, 0.0, %v3580_v54 }
 0x2b1   : > { %v3667_v45 = vmin.f32 %v1509_v51, 0.9999999  ;;  %v3669_v25 = vmin.f32 %v1557_v13, 0.9999999 }
 0x2b3   : > { %v1511_v41 = vsub.f32 1.0, %v3667_v45  ;;  %v1512_v31 = vmul.f32 2.0, %v3667_v45  ;;  %2623 = vlog2.f32 %v3667_v45  ;;  %v1559_v11 = vsub.f32 1.0, %v3669_v25 }
 0x2b4   : > { %v1560_v60 = vmul.f32 2.0, %v3669_v25  ;;  %2625 = vlog2.f32 %v3669_v25  ;;  %v3704_v30 = vmul.f32 %v2778_v4, %v3667_v45 }
 0x2b5   : > { %v1513_v21 = vsub.f32 1.0, %v1512_v31  ;;  %2627 = vlog2.f32 %v1511_v41  ;;  %v3678_v54 = vmul.f32 %v1511_v41, %v3667_v45  ;;  %v3683_v52 = vmul.f32 %v1559_v11, %v3669_v25 }
 0x2b6   : > { %v3680_v6 = vsub.f32 1.0, %v1560_v60  ;;  %2629 = vlog2.f32 %v1559_v11 }
 0x2b7   : > { %v1514_v28 = vmul.f32 %v2773_v3, %v1513_v21  ;;  %v1520_v14 = vmul.f32 %v1513_v21, %v2787_v7  ;;  %v1524_v33 = vmul.f32 %v1513_v21, %v2790_v8  ;;  %2631 = vrcp.f32 %v3678_v54 }
 0x2b8   : > { %v1562_v24 = vmul.f32 %v2773_v3, %v3680_v6  ;;  %v1568_v42 = vmul.f32 %v3680_v6, %v2787_v7  ;;  %v1554_v26 = vmul.f32 4.0, %v3678_v54  ;;  %2633 = vrcp.f32 %v3683_v52 }
 0x2b9   : > { %v1515_v40 = vadd.f32 %v2768_v2, %v1514_v28  ;;  %v1521_v20 = vadd.f32 %v1520_v14, %v2781_v5  ;;  %v1525_v58 = vadd.f32 %v1524_v33, %v2781_v5  ;;  %v1545_v43 = vmul.f32 2.0, %v3678_v54 }
 0x2ba   : > { %v1563_v48 = vadd.f32 %v2768_v2, %v1562_v24  ;;  %v1569_v38 = vadd.f32 %v1568_v42, %v2781_v5  ;;  %v1551_v59 = vmul.f32 4.0, %v1513_v21  ;;  %v1572_v62 = vmul.f32 %v3680_v6, %v2790_v8 }
 0x2bb   : > { %v1516_v35 = vmul.f32 %v1515_v40, %v1513_v21  ;;  %v1522_v27 = vmul.f32 %v1521_v20, %v1513_v21  ;;  %v1555_v22 = vmul.f32 %v1554_v26, %v1525_v58  ;;  %v1593_v23 = vmul.f32 2.0, %v3683_v52 }
 0x2bc   : > { %v1564_v50 = vmul.f32 %v1563_v48, %v3680_v6  ;;  %v1570_v49 = vmul.f32 %v1569_v38, %v3680_v6  ;;  %v1599_v10 = vmul.f32 4.0, %v3680_v6  ;;  %v1573_v14 = vadd.f32 %v1572_v62, %v2781_v5 }
 0x2bd   : > { %v2624_v36 = vpop.eup %2623  ;;  %v1517_v56 = vadd.f32 %v2763_v1, %v1516_v35  ;;  %v1523_v53 = vadd.f32 %v2763_v1, %v1522_v27  ;;  %v1602_v26 = vmul.f32 4.0, %v3683_v52 }
 0x2be   : > { %v2626_v63 = vpop.eup %2625  ;;  %v1527_v46 = vmul.f32 0.6931472, %v2624_v36  ;;  %v1565_v44 = vadd.f32 %v2763_v1, %v1564_v50  ;;  %v1571_v61 = vadd.f32 %v2763_v1, %v1570_v49 }
 0x2bf   : > { %v2628_v57 = vpop.eup %2627  ;;  %v1518_v17 = vmul.f32 %v1517_v56, %v1513_v21  ;;  %v1575_v37 = vmul.f32 0.6931472, %v2626_v63  ;;  %v1552_v28 = vmul.f32 %v1551_v59, %v1523_v53  ;;  %v1546_v56 = vmul.f32 %v1545_v43, %v1523_v53 }
 0x2c0   : > { %v2630_v55 = vpop.eup %2629  ;;  %v1529_v9 = vmul.f32 0.6931472, %v2628_v57  ;;  %v1566_v32 = vmul.f32 %v1565_v44, %v3680_v6  ;;  %v1533_v39 = vmul.f32 %v1527_v46, %v3667_v45  ;;  %v1600_v36 = vmul.f32 %v1599_v10, %v1571_v61 }
 0x2c1   : > { %v2632_v16 = vpop.eup %2631  ;;  %v1519_v19 = vadd.f32 %v1518_v17, %v2758_v0  ;;  %v1577_v15 = vmul.f32 0.6931472, %v2630_v55  ;;  %v1581_v33 = vmul.f32 %v1575_v37, %v3669_v25  ;;  %v1603_v44 = vmul.f32 %v1602_v26, %v1573_v14 }
 0x2c2   : > { %v1534_v34 = vmul.f32 %v1529_v9, %v1511_v41  ;;  %v1540_v51 = vsub.f32 %v1527_v46, %v1529_v9  ;;  %v1548_v13 = vmul.f32 2494.2, %v2632_v16  ;;  %v1567_v31 = vadd.f32 %v1566_v32, %v2758_v0  ;;  %v2634_v24 = vpop.eup %2633 }
 0x2c3   : > { %v1549_v60 = vmul.f32 2.0, %v1519_v19  ;;  %v1543_v20 = vmul.f32 %v1519_v19, %v1513_v21  ;;  %v1582_v42 = vmul.f32 %v1577_v15, %v1559_v11  ;;  %v1588_v27 = vsub.f32 %v1575_v37, %v1577_v15 }
 0x2c4   : > { %v1541_v40 = vmul.f32 2494.2, %v1540_v51  ;;  %v1535_v48 = vadd.f32 %v1534_v34, %v1533_v39  ;;  %v1596_v41 = vmul.f32 2494.2, %v2634_v24  ;;  %v1597_v50 = vmul.f32 2.0, %v1567_v31 }
 0x2c5   : > { %v1550_v35 = vsub.f32 %v1548_v13, %v1549_v60  ;;  %v1583_v38 = vadd.f32 %v1582_v42, %v1581_v33  ;;  %v1589_v63 = vmul.f32 2494.2, %v1588_v27  ;;  %v1591_v46 = vmul.f32 %v1567_v31, %v3680_v6 }
 0x2c6   : > { %v1542_v58 = vadd.f32 %v2778_v4, %v1541_v40  ;;  %v1580_v11 = vmul.f32 %v2778_v4, %v3669_v25  ;;  %v1598_v21 = vsub.f32 %v1596_v41, %v1597_v50  ;;  %v1536_v62 = vmul.f32 2494.2, %v1535_v48 }
 0x2c7   : > { %v1553_v49 = vsub.f32 %v1550_v35, %v1552_v28  ;;  %v1584_v57 = vmul.f32 2494.2, %v1583_v38  ;;  %v1590_v17 = vadd.f32 %v2778_v4, %v1589_v63  ;;  %v1594_v55 = vmul.f32 %v1593_v23, %v1571_v61 }
 0x2c8   : > { %v1544_v59 = vadd.f32 %v1543_v20, %v1542_v58  ;;  %v1601_v32 = vsub.f32 %v1598_v21, %v1600_v36  ;;  %v1538_v43 = vmul.f32 %v3678_v54, %v1519_v19  ;;  %v1605_v6 = vsub.f32 %v3669_v25, %v3667_v45 }
 0x2c9   : > { %v1556_v9 = vadd.f32 %v1555_v22, %v1553_v49  ;;  %v1592_v10 = vadd.f32 %v1591_v46, %v1590_v17  ;;  %v1537_v39 = vadd.f32 %v1536_v62, %v3704_v30  ;;  %v1585_v37 = vadd.f32 %v1584_v57, %v1580_v11 }
 0x2ca   : > { %v1547_v16 = vsub.f32 %v1544_v59, %v1546_v56  ;;  %v1604_v53 = vadd.f32 %v1603_v44, %v1601_v32  ;;  %v1586_v15 = vmul.f32 %v3683_v52, %v1567_v31 }
 0x2cb   : > { %v1595_v34 = vsub.f32 %v1592_v10, %v1594_v55  ;;  %v1539_v23 = vadd.f32 %v1538_v43, %v1537_v39  ;;  %v1630_v30 = vmul.f32 %v1605_v6, %v1556_v9 }
 0x2cc   : > { %v1613_v51 = vmul.f32 %v1604_v53, %v1556_v9  ;;  %v1587_v22 = vadd.f32 %v1586_v15, %v1585_v37  ;;  %v1608_v54 = vmul.f32 %v1605_v6, %v1547_v16  ;;  %v1624_v42 = vmul.f32 %v1605_v6, %v1604_v53 }
 0x2cd   : > { %v1607_v13 = vsub.f32 %v1595_v34, %v1547_v16  ;;  %v1610_v19 = vmul.f32 %v1605_v6, %v1595_v34 }
 0x2ce   : > { %v1614_v60 = vmul.f32 %v1613_v51, %v1605_v6  ;;  %v1606_v33 = vsub.f32 %v1587_v22, %v1539_v23 }
 0x2cf   : > { %v1612_v61 = vmul.f32 %v1607_v13, %v1607_v13 }
 0x2d0   : > { %v1615_v28 = vmul.f32 %v1614_v60, %v1605_v6  ;;  %v1609_v20 = vsub.f32 %v1606_v33, %v1608_v54  ;;  %v1611_v52 = vsub.f32 %v1610_v19, %v1606_v33 }
 0x2d2   : > { %v1616_v14 = vsub.f32 %v1612_v61, %v1615_v28  ;;  %v1623_v26 = vmul.f32 %v1611_v52, %v1607_v13  ;;  %v1625_v48 = vmul.f32 %v1624_v42, %v1609_v20  ;;  %v1631_v35 = vmul.f32 %v1630_v30, %v1611_v52 }
 0x2d3   : > { %v1632_v27 = vmul.f32 %v1609_v20, %v1607_v13 }
 0x2d4   : > { %v1617_v24 = vand.u32 2147483647, %v1616_v14  ;;  %vm1619_vm14 = vcmp.ge.f32.partialorder %v1616_v14, 0.0  ;;  %v1626_v41 = vsub.f32 %v1623_v26, %v1625_v48 }
 0x2d5   : > { %v1620_v40 = vsel %vm1619_vm14, 1e-12, %v2739_v29  ;;  %v1633_v58 = vsub.f32 %v1631_v35, %v1632_v27 }
 0x2d6   : > { %vm1618_vm15 = vcmp.lt.f32.partialorder %v1617_v24, 1e-12 }
 0x2d7   : > { %v1621_v31 = vsel %vm1618_vm15, %v1620_v40, %v1616_v14 }
 0x2d8   : > { %2635 = vrcp.f32 %v1621_v31 }
 0x2e2   : > { %v2636_v38 = vpop.eup %2635 }
 0x2e3   : > { %v1627_v50 = vmul.f32 %v2636_v38, %v1626_v41  ;;  %v1634_v36 = vmul.f32 %v2636_v38, %v1633_v58 }
 0x2e5   : > { %v2437_v56 = vclamps-f32 %v1627_v50, 0.05  ;;  %v2438_v49 = vclamps-f32 %v1634_v36, 0.05 }
 0x2e7   : > { %v1637_v63 = vadd.f32 %v2437_v56, %v3667_v45  ;;  %v1640_v46 = vadd.f32 %v2438_v49, %v3669_v25 }
 0x2e9   : > { %v1638_v59 = vmax.f32 %v1637_v63, 1e-07  ;;  %v1641_v11 = vmax.f32 %v1640_v46, 1e-07 }
 0x2eb   : > { %v1639_v21 = vmin.f32 %v1638_v59, 0.9999999  ;;  %v1642_v44 = vmin.f32 %v1641_v11, 0.9999999 }
 0x2ed   : > { %v1643_v62 = vsub.f32 %v1639_v21, %v3667_v45  ;;  %v1645_v57 = vsub.f32 %v1642_v44, %v3669_v25  ;;  %v1648_v17 = vsub.f32 %v1639_v21, %v3657_v12  ;;  %v1651_v55 = vsub.f32 %v1642_v44, %v3660_v18 }
 0x2ef   : > { %v1644_v9 = vand.u32 2147483647, %v1643_v62  ;;  %v1646_v32 = vand.u32 2147483647, %v1645_v57  ;;  %v1649_v16 = vmul.f32 %v1648_v17, %v3665_v47  ;;  %v1652_v10 = vmul.f32 %v1651_v55, %v3665_v47 }
 0x2f1   : > { %v1647_v43 = vmax.f32.f32 %v1644_v9, %v1646_v32  ;;  %v3742_v53 = vadd.f32 %v1649_v16, %v3657_v12  ;;  %v3745_v6 = vadd.f32 %v1652_v10, %v3660_v18 }
 0x2f3   : > { %vm1654_vm0 = vcmp.lt.f32.partialorder %v1647_v43, 1e-06  ;;  %v1656_v45 = vmax.f32 %v3742_v53, 1e-07  ;;  %v1704_v25 = vmax.f32 %v3745_v6, 1e-07 }
 0x2f4   : > { %v3750_v39 = vsel %vm1654_vm0, 0.0, %v3665_v47 }
 0x2f5   : > { %v3752_v37 = vmin.f32 %v1656_v45, 0.9999999  ;;  %v3754_v15 = vmin.f32 %v1704_v25, 0.9999999 }
 0x2f7   : > { %v1658_v34 = vsub.f32 1.0, %v3752_v37  ;;  %v1659_v12 = vmul.f32 2.0, %v3752_v37  ;;  %2637 = vlog2.f32 %v3752_v37  ;;  %v1706_v18 = vsub.f32 1.0, %v3754_v15 }
 0x2f8   : > { %v1707_v51 = vmul.f32 2.0, %v3754_v15  ;;  %2639 = vlog2.f32 %v3754_v15  ;;  %v3789_v35 = vmul.f32 %v2778_v4, %v3752_v37 }
 0x2f9   : > { %v1660_v13 = vsub.f32 1.0, %v1659_v12  ;;  %2641 = vlog2.f32 %v1658_v34  ;;  %v3763_v47 = vmul.f32 %v1658_v34, %v3752_v37  ;;  %v3768_v23 = vmul.f32 %v1706_v18, %v3754_v15 }
 0x2fa   : > { %v3765_v60 = vsub.f32 1.0, %v1707_v51  ;;  %2643 = vlog2.f32 %v1706_v18 }
 0x2fb   : > { %v1661_v22 = vmul.f32 %v2773_v3, %v1660_v13  ;;  %v1667_v61 = vmul.f32 %v1660_v13, %v2787_v7  ;;  %v1671_v28 = vmul.f32 %v1660_v13, %v2790_v8  ;;  %2645 = vrcp.f32 %v3763_v47 }
 0x2fc   : > { %v1709_v14 = vmul.f32 %v2773_v3, %v3765_v60  ;;  %v1715_v19 = vmul.f32 %v3765_v60, %v2787_v7  ;;  %v1701_v24 = vmul.f32 4.0, %v3763_v47  ;;  %2647 = vrcp.f32 %v3768_v23 }
 0x2fd   : > { %v1662_v33 = vadd.f32 %v2768_v2, %v1661_v22  ;;  %v1668_v54 = vadd.f32 %v1667_v61, %v2781_v5  ;;  %v1672_v52 = vadd.f32 %v1671_v28, %v2781_v5  ;;  %v1692_v27 = vmul.f32 2.0, %v3763_v47 }
 0x2fe   : > { %v1710_v40 = vadd.f32 %v2768_v2, %v1709_v14  ;;  %v1716_v31 = vadd.f32 %v1715_v19, %v2781_v5  ;;  %v1698_v50 = vmul.f32 4.0, %v1660_v13  ;;  %v1719_v56 = vmul.f32 %v3765_v60, %v2790_v8 }
 0x2ff   : > { %v1663_v30 = vmul.f32 %v1662_v33, %v1660_v13  ;;  %v1669_v20 = vmul.f32 %v1668_v54, %v1660_v13  ;;  %v1702_v59 = vmul.f32 %v1701_v24, %v1672_v52  ;;  %v1740_v11 = vmul.f32 2.0, %v3768_v23 }
 0x300   : > { %v1711_v42 = vmul.f32 %v1710_v40, %v3765_v60  ;;  %v1717_v41 = vmul.f32 %v1716_v31, %v3765_v60  ;;  %v1746_v17 = vmul.f32 4.0, %v3765_v60  ;;  %v1720_v61 = vadd.f32 %v1719_v56, %v2781_v5 }
 0x301   : > { %v2638_v26 = vpop.eup %2637  ;;  %v1664_v48 = vadd.f32 %v2763_v1, %v1663_v30  ;;  %v1670_v46 = vadd.f32 %v2763_v1, %v1669_v20  ;;  %v1749_v24 = vmul.f32 4.0, %v3768_v23 }
 0x302   : > { %v2640_v58 = vpop.eup %2639  ;;  %v1674_v38 = vmul.f32 0.6931472, %v2638_v26  ;;  %v1712_v36 = vadd.f32 %v2763_v1, %v1711_v42  ;;  %v1718_v57 = vadd.f32 %v2763_v1, %v1717_v41 }
 0x303   : > { %v2642_v49 = vpop.eup %2641  ;;  %v1665_v63 = vmul.f32 %v1664_v48, %v1660_v13  ;;  %v1722_v16 = vmul.f32 0.6931472, %v2640_v58  ;;  %v1699_v22 = vmul.f32 %v1698_v50, %v1670_v46  ;;  %v1693_v48 = vmul.f32 %v1692_v27, %v1670_v46 }
 0x304   : > { %v2644_v21 = vpop.eup %2643  ;;  %v1676_v44 = vmul.f32 0.6931472, %v2642_v49  ;;  %v1713_v62 = vmul.f32 %v1712_v36, %v3765_v60  ;;  %v1680_v32 = vmul.f32 %v1674_v38, %v3752_v37  ;;  %v1747_v26 = vmul.f32 %v1746_v17, %v1718_v57 }
 0x305   : > { %v2646_v55 = vpop.eup %2645  ;;  %v1666_v9 = vadd.f32 %v1665_v63, %v2758_v0  ;;  %v1724_v10 = vmul.f32 0.6931472, %v2644_v21  ;;  %v1728_v28 = vmul.f32 %v1722_v16, %v3754_v15  ;;  %v1750_v36 = vmul.f32 %v1749_v24, %v1720_v61 }
 0x306   : > { %v1681_v43 = vmul.f32 %v1676_v44, %v1658_v34  ;;  %v1687_v45 = vsub.f32 %v1674_v38, %v1676_v44  ;;  %v1695_v25 = vmul.f32 2494.2, %v2646_v55  ;;  %v1714_v12 = vadd.f32 %v1713_v62, %v2758_v0  ;;  %v2648_v14 = vpop.eup %2647 }
 0x307   : > { %v1696_v51 = vmul.f32 2.0, %v1666_v9  ;;  %v1690_v54 = vmul.f32 %v1666_v9, %v1660_v13  ;;  %v1729_v19 = vmul.f32 %v1724_v10, %v1706_v18  ;;  %v1735_v20 = vsub.f32 %v1722_v16, %v1724_v10 }
 0x308   : > { %v1688_v33 = vmul.f32 2494.2, %v1687_v45  ;;  %v1682_v40 = vadd.f32 %v1681_v43, %v1680_v32  ;;  %v1743_v34 = vmul.f32 2494.2, %v2648_v14  ;;  %v1744_v42 = vmul.f32 2.0, %v1714_v12 }
 0x309   : > { %v1697_v30 = vsub.f32 %v1695_v25, %v1696_v51  ;;  %v1730_v31 = vadd.f32 %v1729_v19, %v1728_v28  ;;  %v1736_v58 = vmul.f32 2494.2, %v1735_v20  ;;  %v1738_v38 = vmul.f32 %v1714_v12, %v3765_v60 }
 0x30a   : > { %v1689_v52 = vadd.f32 %v2778_v4, %v1688_v33  ;;  %v1727_v18 = vmul.f32 %v2778_v4, %v3754_v15  ;;  %v1745_v13 = vsub.f32 %v1743_v34, %v1744_v42  ;;  %v1683_v56 = vmul.f32 2494.2, %v1682_v40 }
 0x30b   : > { %v1700_v41 = vsub.f32 %v1697_v30, %v1699_v22  ;;  %v1731_v49 = vmul.f32 2494.2, %v1730_v31  ;;  %v1737_v63 = vadd.f32 %v2778_v4, %v1736_v58  ;;  %v1741_v21 = vmul.f32 %v1740_v11, %v1718_v57 }
 0x30c   : > { %v1691_v50 = vadd.f32 %v1690_v54, %v1689_v52  ;;  %v1748_v62 = vsub.f32 %v1745_v13, %v1747_v26  ;;  %v1685_v27 = vmul.f32 %v3763_v47, %v1666_v9  ;;  %v1752_v60 = vsub.f32 %v3754_v15, %v3752_v37 }
 0x30d   : > { %v1703_v44 = vadd.f32 %v1702_v59, %v1700_v41  ;;  %v1739_v17 = vadd.f32 %v1738_v38, %v1737_v63  ;;  %v1684_v32 = vadd.f32 %v1683_v56, %v3789_v35  ;;  %v1732_v16 = vadd.f32 %v1731_v49, %v1727_v18 }
 0x30e   : > { %v1694_v55 = vsub.f32 %v1691_v50, %v1693_v48  ;;  %v1751_v46 = vadd.f32 %v1750_v36, %v1748_v62  ;;  %v1733_v10 = vmul.f32 %v3768_v23, %v1714_v12 }
 0x30f   : > { %v1742_v43 = vsub.f32 %v1739_v17, %v1741_v21  ;;  %v1686_v11 = vadd.f32 %v1685_v27, %v1684_v32  ;;  %v1777_v35 = vmul.f32 %v1752_v60, %v1703_v44 }
 0x310   : > { %v1760_v45 = vmul.f32 %v1751_v46, %v1703_v44  ;;  %v1734_v59 = vadd.f32 %v1733_v10, %v1732_v16  ;;  %v1755_v47 = vmul.f32 %v1752_v60, %v1694_v55  ;;  %v1771_v19 = vmul.f32 %v1752_v60, %v1751_v46 }
 0x311   : > { %v1754_v25 = vsub.f32 %v1742_v43, %v1694_v55  ;;  %v1757_v9 = vmul.f32 %v1752_v60, %v1742_v43 }
 0x312   : > { %v1761_v51 = vmul.f32 %v1760_v45, %v1752_v60  ;;  %v1753_v28 = vsub.f32 %v1734_v59, %v1686_v11 }
 0x313   : > { %v1759_v57 = vmul.f32 %v1754_v25, %v1754_v25 }
 0x314   : > { %v1762_v22 = vmul.f32 %v1761_v51, %v1752_v60  ;;  %v1756_v54 = vsub.f32 %v1753_v28, %v1755_v47  ;;  %v1758_v23 = vsub.f32 %v1757_v9, %v1753_v28 }
 0x316   : > { %v1763_v61 = vsub.f32 %v1759_v57, %v1762_v22  ;;  %v1770_v24 = vmul.f32 %v1758_v23, %v1754_v25  ;;  %v1772_v40 = vmul.f32 %v1771_v19, %v1756_v54  ;;  %v1778_v30 = vmul.f32 %v1777_v35, %v1758_v23 }
 0x317   : > { %v1779_v20 = vmul.f32 %v1756_v54, %v1754_v25 }
 0x318   : > { %v1764_v14 = vand.u32 2147483647, %v1763_v61  ;;  %vm1766_vm1 = vcmp.ge.f32.partialorder %v1763_v61, 0.0  ;;  %v1773_v34 = vsub.f32 %v1770_v24, %v1772_v40 }
 0x319   : > { %v1767_v33 = vsel %vm1766_vm1, 1e-12, %v2739_v29  ;;  %v1780_v52 = vsub.f32 %v1778_v30, %v1779_v20 }
 0x31a   : > { %vm1765_vm2 = vcmp.lt.f32.partialorder %v1764_v14, 1e-12 }
 0x31b   : > { %v1768_v12 = vsel %vm1765_vm2, %v1767_v33, %v1763_v61 }
 0x31c   : > { %2649 = vrcp.f32 %v1768_v12 }
 0x326   : > { %v2650_v31 = vpop.eup %2649 }
 0x327   : > { %v1774_v42 = vmul.f32 %v2650_v31, %v1773_v34  ;;  %v1781_v26 = vmul.f32 %v2650_v31, %v1780_v52 }
 0x329   : > { %v2439_v48 = vclamps-f32 %v1774_v42, 0.05  ;;  %v2440_v41 = vclamps-f32 %v1781_v26, 0.05 }
 0x32b   : > { %v1784_v58 = vadd.f32 %v2439_v48, %v3752_v37  ;;  %v1787_v38 = vadd.f32 %v2440_v41, %v3754_v15 }
 0x32d   : > { %v1785_v50 = vmax.f32 %v1784_v58, 1e-07  ;;  %v1788_v18 = vmax.f32 %v1787_v38, 1e-07 }
 0x32f   : > { %v1786_v13 = vmin.f32 %v1785_v50, 0.9999999  ;;  %v1789_v36 = vmin.f32 %v1788_v18, 0.9999999 }
 0x331   : > { %v1790_v56 = vsub.f32 %v1786_v13, %v3752_v37  ;;  %v1792_v49 = vsub.f32 %v1789_v36, %v3754_v15  ;;  %v1795_v63 = vsub.f32 %v1786_v13, %v3742_v53  ;;  %v1798_v21 = vsub.f32 %v1789_v36, %v3745_v6 }
 0x333   : > { %v1791_v44 = vand.u32 2147483647, %v1790_v56  ;;  %v1793_v62 = vand.u32 2147483647, %v1792_v49  ;;  %v1796_v55 = vmul.f32 %v1795_v63, %v3750_v39  ;;  %v1799_v17 = vmul.f32 %v1798_v21, %v3750_v39 }
 0x335   : > { %v1794_v27 = vmax.f32.f32 %v1791_v44, %v1793_v62  ;;  %v3827_v46 = vadd.f32 %v1796_v55, %v3742_v53  ;;  %v3830_v60 = vadd.f32 %v1799_v17, %v3745_v6 }
 0x337   : > { %vm1801_vm3 = vcmp.lt.f32.partialorder %v1794_v27, 1e-06  ;;  %v1803_v37 = vmax.f32 %v3827_v46, 1e-07  ;;  %v1851_v15 = vmax.f32 %v3830_v60, 1e-07 }
 0x338   : > { %v3835_v32 = vsel %vm1801_vm3, 0.0, %v3750_v39 }
 0x339   : > { %v3837_v16 = vmin.f32 %v1803_v37, 0.9999999  ;;  %v3839_v10 = vmin.f32 %v1851_v15, 0.9999999 }
 0x33b   : > { %v1805_v43 = vsub.f32 1.0, %v3837_v16  ;;  %v1806_v53 = vmul.f32 2.0, %v3837_v16  ;;  %2651 = vlog2.f32 %v3837_v16  ;;  %v1853_v6 = vsub.f32 1.0, %v3839_v10 }
 0x33c   : > { %v1854_v45 = vmul.f32 2.0, %v3839_v10  ;;  %2653 = vlog2.f32 %v3839_v10  ;;  %v3874_v30 = vmul.f32 %v2778_v4, %v3837_v16 }
 0x33d   : > { %v1807_v25 = vsub.f32 1.0, %v1806_v53  ;;  %2655 = vlog2.f32 %v1805_v43  ;;  %v3848_v39 = vmul.f32 %v1805_v43, %v3837_v16  ;;  %v3853_v11 = vmul.f32 %v1853_v6, %v3839_v10 }
 0x33e   : > { %v3850_v51 = vsub.f32 1.0, %v1854_v45  ;;  %2657 = vlog2.f32 %v1853_v6 }
 0x33f   : > { %v1808_v59 = vmul.f32 %v2773_v3, %v1807_v25  ;;  %v1814_v57 = vmul.f32 %v1807_v25, %v2787_v7  ;;  %v1818_v22 = vmul.f32 %v1807_v25, %v2790_v8  ;;  %2659 = vrcp.f32 %v3848_v39 }
 0x340   : > { %v1856_v61 = vmul.f32 %v2773_v3, %v3850_v51  ;;  %v1862_v9 = vmul.f32 %v3850_v51, %v2787_v7  ;;  %v1848_v14 = vmul.f32 4.0, %v3848_v39  ;;  %2661 = vrcp.f32 %v3853_v11 }
 0x341   : > { %v1809_v28 = vadd.f32 %v2768_v2, %v1808_v59  ;;  %v1815_v47 = vadd.f32 %v1814_v57, %v2781_v5  ;;  %v1819_v23 = vadd.f32 %v1818_v22, %v2781_v5  ;;  %v1839_v20 = vmul.f32 2.0, %v3848_v39 }
 0x342   : > { %v1857_v33 = vadd.f32 %v2768_v2, %v1856_v61  ;;  %v1863_v12 = vadd.f32 %v1862_v9, %v2781_v5  ;;  %v1845_v42 = vmul.f32 4.0, %v1807_v25  ;;  %v1866_v48 = vmul.f32 %v3850_v51, %v2790_v8 }
 0x343   : > { %v1810_v35 = vmul.f32 %v1809_v28, %v1807_v25  ;;  %v1816_v54 = vmul.f32 %v1815_v47, %v1807_v25  ;;  %v1849_v50 = vmul.f32 %v1848_v14, %v1819_v23  ;;  %v1887_v18 = vmul.f32 2.0, %v3853_v11 }
 0x344   : > { %v1858_v19 = vmul.f32 %v1857_v33, %v3850_v51  ;;  %v1864_v34 = vmul.f32 %v1863_v12, %v3850_v51  ;;  %v1893_v63 = vmul.f32 4.0, %v3850_v51  ;;  %v1867_v57 = vadd.f32 %v1866_v48, %v2781_v5 }
 0x345   : > { %v2652_v24 = vpop.eup %2651  ;;  %v1811_v40 = vadd.f32 %v2763_v1, %v1810_v35  ;;  %v1817_v38 = vadd.f32 %v2763_v1, %v1816_v54  ;;  %v1896_v14 = vmul.f32 4.0, %v3853_v11 }
 0x346   : > { %v2654_v52 = vpop.eup %2653  ;;  %v1821_v31 = vmul.f32 0.6931472, %v2652_v24  ;;  %v1859_v26 = vadd.f32 %v2763_v1, %v1858_v19  ;;  %v1865_v49 = vadd.f32 %v2763_v1, %v1864_v34 }
 0x347   : > { %v2656_v41 = vpop.eup %2655  ;;  %v1812_v58 = vmul.f32 %v1811_v40, %v1807_v25  ;;  %v1869_v55 = vmul.f32 0.6931472, %v2654_v52  ;;  %v1846_v59 = vmul.f32 %v1845_v42, %v1817_v38  ;;  %v1840_v40 = vmul.f32 %v1839_v20, %v1817_v38 }
 0x348   : > { %v2658_v13 = vpop.eup %2657  ;;  %v1823_v36 = vmul.f32 0.6931472, %v2656_v41  ;;  %v1860_v56 = vmul.f32 %v1859_v26, %v3850_v51  ;;  %v1827_v62 = vmul.f32 %v1821_v31, %v3837_v16  ;;  %v1894_v24 = vmul.f32 %v1893_v63, %v1865_v49 }
 0x349   : > { %v2660_v21 = vpop.eup %2659  ;;  %v1813_v44 = vadd.f32 %v1812_v58, %v2758_v0  ;;  %v1871_v17 = vmul.f32 0.6931472, %v2658_v13  ;;  %v1875_v22 = vmul.f32 %v1869_v55, %v3839_v10  ;;  %v1897_v26 = vmul.f32 %v1896_v14, %v1867_v57 }
 0x34a   : > { %v1828_v27 = vmul.f32 %v1823_v36, %v1805_v43  ;;  %v1834_v37 = vsub.f32 %v1821_v31, %v1823_v36  ;;  %v1842_v15 = vmul.f32 2494.2, %v2660_v21  ;;  %v1861_v53 = vadd.f32 %v1860_v56, %v2758_v0  ;;  %v2662_v61 = vpop.eup %2661 }
 0x34b   : > { %v1843_v45 = vmul.f32 2.0, %v1813_v44  ;;  %v1837_v47 = vmul.f32 %v1813_v44, %v1807_v25  ;;  %v1876_v9 = vmul.f32 %v1871_v17, %v1853_v6  ;;  %v1882_v54 = vsub.f32 %v1869_v55, %v1871_v17 }
 0x34c   : > { %v1835_v28 = vmul.f32 2494.2, %v1834_v37  ;;  %v1829_v33 = vadd.f32 %v1828_v27, %v1827_v62  ;;  %v1890_v43 = vmul.f32 2494.2, %v2662_v61  ;;  %v1891_v19 = vmul.f32 2.0, %v1861_v53 }
 0x34d   : > { %v1844_v35 = vsub.f32 %v1842_v15, %v1843_v45  ;;  %v1877_v12 = vadd.f32 %v1876_v9, %v1875_v22  ;;  %v1883_v52 = vmul.f32 2494.2, %v1882_v54  ;;  %v1885_v31 = vmul.f32 %v1861_v53, %v3850_v51 }
 0x34e   : > { %v1836_v23 = vadd.f32 %v2778_v4, %v1835_v28  ;;  %v1874_v6 = vmul.f32 %v2778_v4, %v3839_v10  ;;  %v1892_v25 = vsub.f32 %v1890_v43, %v1891_v19  ;;  %v1830_v48 = vmul.f32 2494.2, %v1829_v33 }
 0x34f   : > { %v1847_v34 = vsub.f32 %v1844_v35, %v1846_v59  ;;  %v1878_v41 = vmul.f32 2494.2, %v1877_v12  ;;  %v1884_v58 = vadd.f32 %v2778_v4, %v1883_v52  ;;  %v1888_v13 = vmul.f32 %v1887_v18, %v1865_v49 }
 0x350   : > { %v1838_v42 = vadd.f32 %v1837_v47, %v1836_v23  ;;  %v1895_v56 = vsub.f32 %v1892_v25, %v1894_v24  ;;  %v1832_v20 = vmul.f32 %v3848_v39, %v1813_v44  ;;  %v1899_v51 = vsub.f32 %v3839_v10, %v3837_v16 }
 0x351   : > { %v1850_v36 = vadd.f32 %v1849_v50, %v1847_v34  ;;  %v1886_v63 = vadd.f32 %v1885_v31, %v1884_v58  ;;  %v1831_v62 = vadd.f32 %v1830_v48, %v3874_v30  ;;  %v1879_v55 = vadd.f32 %v1878_v41, %v1874_v6 }
 0x352   : > { %v1841_v21 = vsub.f32 %v1838_v42, %v1840_v40  ;;  %v1898_v38 = vadd.f32 %v1897_v26, %v1895_v56  ;;  %v1880_v17 = vmul.f32 %v3853_v11, %v1861_v53 }
 0x353   : > { %v1889_v27 = vsub.f32 %v1886_v63, %v1888_v13  ;;  %v1833_v18 = vadd.f32 %v1832_v20, %v1831_v62  ;;  %v1924_v30 = vmul.f32 %v1899_v51, %v1850_v36 }
 0x354   : > { %v1907_v37 = vmul.f32 %v1898_v38, %v1850_v36  ;;  %v1881_v50 = vadd.f32 %v1880_v17, %v1879_v55  ;;  %v1902_v39 = vmul.f32 %v1899_v51, %v1841_v21  ;;  %v1918_v9 = vmul.f32 %v1899_v51, %v1898_v38 }
 0x355   : > { %v1901_v15 = vsub.f32 %v1889_v27, %v1841_v21  ;;  %v1904_v44 = vmul.f32 %v1899_v51, %v1889_v27 }
 0x356   : > { %v1908_v45 = vmul.f32 %v1907_v37, %v1899_v51  ;;  %v1900_v22 = vsub.f32 %v1881_v50, %v1833_v18 }
 0x357   : > { %v1906_v49 = vmul.f32 %v1901_v15, %v1901_v15 }
 0x358   : > { %v1909_v59 = vmul.f32 %v1908_v45, %v1899_v51  ;;  %v1903_v47 = vsub.f32 %v1900_v22, %v1902_v39  ;;  %v1905_v11 = vsub.f32 %v1904_v44, %v1900_v22 }
 0x35a   : > { %v1910_v57 = vsub.f32 %v1906_v49, %v1909_v59  ;;  %v1917_v14 = vmul.f32 %v1905_v11, %v1901_v15  ;;  %v1919_v33 = vmul.f32 %v1918_v9, %v1903_v47  ;;  %v1925_v35 = vmul.f32 %v1924_v30, %v1905_v11 }
 0x35b   : > { %v1926_v54 = vmul.f32 %v1903_v47, %v1901_v15 }
 0x35c   : > { %v1911_v61 = vand.u32 2147483647, %v1910_v57  ;;  %vm1913_vm4 = vcmp.ge.f32.partialorder %v1910_v57, 0.0  ;;  %v1920_v43 = vsub.f32 %v1917_v14, %v1919_v33 }
 0x35d   : > { %v1914_v28 = vsel %vm1913_vm4, 1e-12, %v2739_v29  ;;  %v1927_v23 = vsub.f32 %v1925_v35, %v1926_v54 }
 0x35e   : > { %vm1912_vm5 = vcmp.lt.f32.partialorder %v1911_v61, 1e-12 }
 0x35f   : > { %v1915_v53 = vsel %vm1912_vm5, %v1914_v28, %v1910_v57 }
 0x360   : > { %2663 = vrcp.f32 %v1915_v53 }
 0x36a   : > { %v2664_v12 = vpop.eup %2663 }
 0x36b   : > { %v1921_v19 = vmul.f32 %v2664_v12, %v1920_v43  ;;  %v1928_v24 = vmul.f32 %v2664_v12, %v1927_v23 }
 0x36d   : > { %v2441_v40 = vclamps-f32 %v1921_v19, 0.05  ;;  %v2442_v34 = vclamps-f32 %v1928_v24, 0.05 }
 0x36f   : > { %v1931_v52 = vadd.f32 %v2441_v40, %v3837_v16  ;;  %v1934_v31 = vadd.f32 %v2442_v34, %v3839_v10 }
 0x371   : > { %v1932_v42 = vmax.f32 %v1931_v52, 1e-07  ;;  %v1935_v6 = vmax.f32 %v1934_v31, 1e-07 }
 0x373   : > { %v1933_v25 = vmin.f32 %v1932_v42, 0.9999999  ;;  %v1936_v26 = vmin.f32 %v1935_v6, 0.9999999 }
 0x375   : > { %v1937_v48 = vsub.f32 %v1933_v25, %v3837_v16  ;;  %v1939_v41 = vsub.f32 %v1936_v26, %v3839_v10  ;;  %v1942_v58 = vsub.f32 %v1933_v25, %v3827_v46  ;;  %v1945_v13 = vsub.f32 %v1936_v26, %v3830_v60 }
 0x377   : > { %v1938_v36 = vand.u32 2147483647, %v1937_v48  ;;  %v1940_v56 = vand.u32 2147483647, %v1939_v41  ;;  %v1943_v21 = vmul.f32 %v1942_v58, %v3835_v32  ;;  %v1946_v63 = vmul.f32 %v1945_v13, %v3835_v32 }
 0x379   : > { %v1941_v20 = vmax.f32.f32 %v1938_v36, %v1940_v56  ;;  %v3912_v38 = vadd.f32 %v1943_v21, %v3827_v46  ;;  %v3915_v51 = vadd.f32 %v1946_v63, %v3830_v60 }
 0x37b   : > { %vm1948_vm6 = vcmp.lt.f32.partialorder %v1941_v20, 1e-06  ;;  %v1950_v16 = vmax.f32 %v3912_v38, 1e-07  ;;  %v1998_v10 = vmax.f32 %v3915_v51, 1e-07 }
 0x37c   : > { %v3920_v62 = vsel %vm1948_vm6, 0.0, %v3835_v32 }
 0x37d   : > { %v3922_v55 = vmin.f32 %v1950_v16, 0.9999999  ;;  %v3924_v17 = vmin.f32 %v1998_v10, 0.9999999 }
 0x37f   : > { %v1952_v27 = vsub.f32 1.0, %v3922_v55  ;;  %v1953_v46 = vmul.f32 2.0, %v3922_v55  ;;  %2665 = vlog2.f32 %v3922_v55  ;;  %v2000_v60 = vsub.f32 1.0, %v3924_v17 }
 0x380   : > { %v2001_v37 = vmul.f32 2.0, %v3924_v17  ;;  %2667 = vlog2.f32 %v3924_v17  ;;  %v3959_v35 = vmul.f32 %v2778_v4, %v3922_v55 }
 0x381   : > { %v1954_v15 = vsub.f32 1.0, %v1953_v46  ;;  %2669 = vlog2.f32 %v1952_v27  ;;  %v3933_v32 = vmul.f32 %v1952_v27, %v3922_v55  ;;  %v3938_v18 = vmul.f32 %v2000_v60, %v3924_v17 }
 0x382   : > { %v3935_v45 = vsub.f32 1.0, %v2001_v37  ;;  %2671 = vlog2.f32 %v2000_v60 }
 0x383   : > { %v1955_v50 = vmul.f32 %v2773_v3, %v1954_v15  ;;  %v1961_v49 = vmul.f32 %v1954_v15, %v2787_v7  ;;  %v1965_v59 = vmul.f32 %v1954_v15, %v2790_v8  ;;  %2673 = vrcp.f32 %v3933_v32 }
 0x384   : > { %v2003_v57 = vmul.f32 %v2773_v3, %v3935_v45  ;;  %v2009_v44 = vmul.f32 %v3935_v45, %v2787_v7  ;;  %v1995_v61 = vmul.f32 4.0, %v3933_v32  ;;  %2675 = vrcp.f32 %v3938_v18 }
 0x385   : > { %v1956_v22 = vadd.f32 %v2768_v2, %v1955_v50  ;;  %v1962_v39 = vadd.f32 %v1961_v49, %v2781_v5  ;;  %v1966_v11 = vadd.f32 %v1965_v59, %v2781_v5  ;;  %v1986_v54 = vmul.f32 2.0, %v3933_v32 }
 0x386   : > { %v2004_v28 = vadd.f32 %v2768_v2, %v2003_v57  ;;  %v2010_v53 = vadd.f32 %v2009_v44, %v2781_v5  ;;  %v1992_v19 = vmul.f32 4.0, %v1954_v15  ;;  %v2013_v40 = vmul.f32 %v3935_v45, %v2790_v8 }
 0x387   : > { %v1957_v30 = vmul.f32 %v1956_v22, %v1954_v15  ;;  %v1963_v47 = vmul.f32 %v1962_v39, %v1954_v15  ;;  %v1996_v42 = vmul.f32 %v1995_v61, %v1966_v11  ;;  %v2034_v6 = vmul.f32 2.0, %v3938_v18 }
 0x388   : > { %v2005_v9 = vmul.f32 %v2004_v28, %v3935_v45  ;;  %v2011_v43 = vmul.f32 %v2010_v53, %v3935_v45  ;;  %v2040_v58 = vmul.f32 4.0, %v3935_v45  ;;  %v2014_v49 = vadd.f32 %v2013_v40, %v2781_v5 }
 0x389   : > { %v2666_v14 = vpop.eup %2665  ;;  %v1958_v33 = vadd.f32 %v2763_v1, %v1957_v30  ;;  %v1964_v31 = vadd.f32 %v2763_v1, %v1963_v47  ;;  %v2043_v61 = vmul.f32 4.0, %v3938_v18 }
 0x38a   : > { %v2668_v23 = vpop.eup %2667  ;;  %v1968_v12 = vmul.f32 0.6931472, %v2666_v14  ;;  %v2006_v24 = vadd.f32 %v2763_v1, %v2005_v9  ;;  %v2012_v41 = vadd.f32 %v2763_v1, %v2011_v43 }
 0x38b   : > { %v2670_v34 = vpop.eup %2669  ;;  %v1959_v52 = vmul.f32 %v1958_v33, %v1954_v15  ;;  %v2016_v21 = vmul.f32 0.6931472, %v2668_v23  ;;  %v1993_v50 = vmul.f32 %v1992_v19, %v1964_v31  ;;  %v1987_v33 = vmul.f32 %v1986_v54, %v1964_v31 }
 0x38c   : > { %v2672_v25 = vpop.eup %2671  ;;  %v1970_v26 = vmul.f32 0.6931472, %v2670_v34  ;;  %v2007_v48 = vmul.f32 %v2006_v24, %v3935_v45  ;;  %v1974_v56 = vmul.f32 %v1968_v12, %v3922_v55  ;;  %v2041_v14 = vmul.f32 %v2040_v58, %v2012_v41 }
 0x38d   : > { %v2674_v13 = vpop.eup %2673  ;;  %v1960_v36 = vadd.f32 %v1959_v52, %v2758_v0  ;;  %v2018_v63 = vmul.f32 0.6931472, %v2672_v25  ;;  %v2022_v59 = vmul.f32 %v2016_v21, %v3924_v17  ;;  %v2044_v24 = vmul.f32 %v2043_v61, %v2014_v49 }
 0x38e   : > { %v1975_v20 = vmul.f32 %v1970_v26, %v1952_v27  ;;  %v1981_v16 = vsub.f32 %v1968_v12, %v1970_v26  ;;  %v1989_v10 = vmul.f32 2494.2, %v2674_v13  ;;  %v2008_v46 = vadd.f32 %v2007_v48, %v2758_v0  ;;  %v2676_v57 = vpop.eup %2675 }
 0x38f   : > { %v1990_v37 = vmul.f32 2.0, %v1960_v36  ;;  %v1984_v39 = vmul.f32 %v1960_v36, %v1954_v15  ;;  %v2023_v44 = vmul.f32 %v2018_v63, %v2000_v60  ;;  %v2029_v47 = vsub.f32 %v2016_v21, %v2018_v63 }
 0x390   : > { %v1982_v22 = vmul.f32 2494.2, %v1981_v16  ;;  %v1976_v28 = vadd.f32 %v1975_v20, %v1974_v56  ;;  %v2037_v27 = vmul.f32 2494.2, %v2676_v57  ;;  %v2038_v9 = vmul.f32 2.0, %v2008_v46 }
 0x391   : > { %v1991_v30 = vsub.f32 %v1989_v10, %v1990_v37  ;;  %v2024_v53 = vadd.f32 %v2023_v44, %v2022_v59  ;;  %v2030_v23 = vmul.f32 2494.2, %v2029_v47  ;;  %v2032_v12 = vmul.f32 %v2008_v46, %v3935_v45 }
 0x392   : > { %v1983_v11 = vadd.f32 %v2778_v4, %v1982_v22  ;;  %v2021_v60 = vmul.f32 %v2778_v4, %v3924_v17  ;;  %v2039_v15 = vsub.f32 %v2037_v27, %v2038_v9  ;;  %v1977_v40 = vmul.f32 2494.2, %v1976_v28 }
 0x393   : > { %v1994_v43 = vsub.f32 %v1991_v30, %v1993_v50  ;;  %v2025_v34 = vmul.f32 2494.2, %v2024_v53  ;;  %v2031_v52 = vadd.f32 %v2778_v4, %v2030_v23  ;;  %v2035_v25 = vmul.f32 %v2034_v6, %v2012_v41 }
 0x394   : > { %v1985_v19 = vadd.f32 %v1984_v39, %v1983_v11  ;;  %v2042_v48 = vsub.f32 %v2039_v15, %v2041_v14  ;;  %v1979_v54 = vmul.f32 %v3933_v32, %v1960_v36  ;;  %v2046_v45 = vsub.f32 %v3924_v17, %v3922_v55 }
 0x395   : > { %v1997_v26 = vadd.f32 %v1996_v42, %v1994_v43  ;;  %v2033_v58 = vadd.f32 %v2032_v12, %v2031_v52  ;;  %v1978_v56 = vadd.f32 %v1977_v40, %v3959_v35  ;;  %v2026_v21 = vadd.f32 %v2025_v34, %v2021_v60 }
 0x396   : > { %v1988_v13 = vsub.f32 %v1985_v19, %v1987_v33  ;;  %v2045_v31 = vadd.f32 %v2044_v24, %v2042_v48  ;;  %v2027_v63 = vmul.f32 %v3938_v18, %v2008_v46 }
 0x397   : > { %v2036_v20 = vsub.f32 %v2033_v58, %v2035_v25  ;;  %v1980_v6 = vadd.f32 %v1979_v54, %v1978_v56  ;;  %v2071_v35 = vmul.f32 %v2046_v45, %v1997_v26 }
 0x398   : > { %v2054_v16 = vmul.f32 %v2045_v31, %v1997_v26  ;;  %v2028_v42 = vadd.f32 %v2027_v63, %v2026_v21  ;;  %v2049_v32 = vmul.f32 %v2046_v45, %v1988_v13  ;;  %v2065_v44 = vmul.f32 %v2046_v45, %v2045_v31 }
 0x399   : > { %v2048_v10 = vsub.f32 %v2036_v20, %v1988_v13  ;;  %v2051_v36 = vmul.f32 %v2046_v45, %v2036_v20 }
 0x39a   : > { %v2055_v37 = vmul.f32 %v2054_v16, %v2046_v45  ;;  %v2047_v59 = vsub.f32 %v2028_v42, %v1980_v6 }
 0x39b   : > { %v2053_v41 = vmul.f32 %v2048_v10, %v2048_v10 }
 0x39c   : > { %v2056_v50 = vmul.f32 %v2055_v37, %v2046_v45  ;;  %v2050_v39 = vsub.f32 %v2047_v59, %v2049_v32  ;;  %v2052_v18 = vsub.f32 %v2051_v36, %v2047_v59 }
 0x39e   : > { %v2057_v49 = vsub.f32 %v2053_v41, %v2056_v50  ;;  %v2064_v61 = vmul.f32 %v2052_v18, %v2048_v10  ;;  %v2066_v28 = vmul.f32 %v2065_v44, %v2050_v39  ;;  %v2072_v30 = vmul.f32 %v2071_v35, %v2052_v18 }
 0x39f   : > { %v2073_v47 = vmul.f32 %v2050_v39, %v2048_v10 }
 0x3a0   : > { %v2058_v57 = vand.u32 2147483647, %v2057_v49  ;;  %vm2060_vm7 = vcmp.ge.f32.partialorder %v2057_v49, 0.0  ;;  %v2067_v27 = vsub.f32 %v2064_v61, %v2066_v28 }
 0x3a1   : > { %v2061_v22 = vsel %vm2060_vm7, 1e-12, %v2739_v29  ;;  %v2074_v11 = vsub.f32 %v2072_v30, %v2073_v47 }
 0x3a2   : > { %vm2059_vm8 = vcmp.lt.f32.partialorder %v2058_v57, 1e-12 }
 0x3a3   : > { %v2062_v46 = vsel %vm2059_vm8, %v2061_v22, %v2057_v49 }
 0x3a4   : > { %2677 = vrcp.f32 %v2062_v46 }
 0x3ae   : > { %v2678_v53 = vpop.eup %2677 }
 0x3af   : > { %v2068_v9 = vmul.f32 %v2678_v53, %v2067_v27  ;;  %v2075_v14 = vmul.f32 %v2678_v53, %v2074_v11 }
 0x3b1   : > { %v2443_v33 = vclamps-f32 %v2068_v9, 0.05  ;;  %v2444_v43 = vclamps-f32 %v2075_v14, 0.05 }
 0x3b3   : > { %v2078_v23 = vadd.f32 %v2443_v33, %v3922_v55  ;;  %v2081_v12 = vadd.f32 %v2444_v43, %v3924_v17 }
 0x3b5   : > { %v2079_v19 = vmax.f32 %v2078_v23, 1e-07  ;;  %v2082_v60 = vmax.f32 %v2081_v12, 1e-07 }
 0x3b7   : > { %v2080_v15 = vmin.f32 %v2079_v19, 0.9999999  ;;  %v2083_v24 = vmin.f32 %v2082_v60, 0.9999999 }
 0x3b9   : > { %v2084_v40 = vsub.f32 %v2080_v15, %v3922_v55  ;;  %v2086_v34 = vsub.f32 %v2083_v24, %v3924_v17  ;;  %v2089_v52 = vsub.f32 %v2080_v15, %v3912_v38  ;;  %v2092_v25 = vsub.f32 %v2083_v24, %v3915_v51 }
 0x3bb   : > { %v2085_v26 = vand.u32 2147483647, %v2084_v40  ;;  %v2087_v48 = vand.u32 2147483647, %v2086_v34  ;;  %v2090_v13 = vmul.f32 %v2089_v52, %v3920_v62  ;;  %v2093_v58 = vmul.f32 %v2092_v25, %v3920_v62 }
 0x3bd   : > { %v2088_v54 = vmax.f32.f32 %v2085_v26, %v2087_v48  ;;  %v3997_v31 = vadd.f32 %v2090_v13, %v3912_v38  ;;  %v4000_v45 = vadd.f32 %v2093_v58, %v3915_v51 }
 0x3bf   : > { %vm2095_vm9 = vcmp.lt.f32.partialorder %v2088_v54, 1e-06  ;;  %v2097_v55 = vmax.f32 %v3997_v31, 1e-07  ;;  %v2145_v17 = vmax.f32 %v4000_v45, 1e-07 }
 0x3c0   : > { %v4005_v56 = vsel %vm2095_vm9, 0.0, %v3920_v62 }
 0x3c1   : > { %v4007_v21 = vmin.f32 %v2097_v55, 0.9999999  ;;  %v4009_v63 = vmin.f32 %v2145_v17, 0.9999999 }
 0x3c3   : > { %v2099_v20 = vsub.f32 1.0, %v4007_v21  ;;  %v2100_v38 = vmul.f32 2.0, %v4007_v21  ;;  %2679 = vlog2.f32 %v4007_v21  ;;  %v2147_v51 = vsub.f32 1.0, %v4009_v63 }
 0x3c4   : > { %v2148_v16 = vmul.f32 2.0, %v4009_v63  ;;  %2681 = vlog2.f32 %v4009_v63  ;;  %v4044_v30 = vmul.f32 %v2778_v4, %v4007_v21 }
 0x3c5   : > { %v2101_v10 = vsub.f32 1.0, %v2100_v38  ;;  %2683 = vlog2.f32 %v2099_v20  ;;  %v4018_v62 = vmul.f32 %v2099_v20, %v4007_v21  ;;  %v4023_v6 = vmul.f32 %v2147_v51, %v4009_v63 }
 0x3c6   : > { %v4020_v37 = vsub.f32 1.0, %v2148_v16  ;;  %2685 = vlog2.f32 %v2147_v51 }
 0x3c7   : > { %v2102_v42 = vmul.f32 %v2773_v3, %v2101_v10  ;;  %v2108_v41 = vmul.f32 %v2101_v10, %v2787_v7  ;;  %v2112_v50 = vmul.f32 %v2101_v10, %v2790_v8  ;;  %2687 = vrcp.f32 %v4018_v62 }
 0x3c8   : > { %v2150_v49 = vmul.f32 %v2773_v3, %v4020_v37  ;;  %v2156_v36 = vmul.f32 %v4020_v37, %v2787_v7  ;;  %v2142_v57 = vmul.f32 4.0, %v4018_v62  ;;  %2689 = vrcp.f32 %v4023_v6 }
 0x3c9   : > { %v2103_v59 = vadd.f32 %v2768_v2, %v2102_v42  ;;  %v2109_v32 = vadd.f32 %v2108_v41, %v2781_v5  ;;  %v2113_v18 = vadd.f32 %v2112_v50, %v2781_v5  ;;  %v2133_v47 = vmul.f32 2.0, %v4018_v62 }
 0x3ca   : > { %v2151_v22 = vadd.f32 %v2768_v2, %v2150_v49  ;;  %v2157_v46 = vadd.f32 %v2156_v36, %v2781_v5  ;;  %v2139_v9 = vmul.f32 4.0, %v2101_v10  ;;  %v2160_v33 = vmul.f32 %v4020_v37, %v2790_v8 }
 0x3cb   : > { %v2104_v35 = vmul.f32 %v2103_v59, %v2101_v10  ;;  %v2110_v39 = vmul.f32 %v2109_v32, %v2101_v10  ;;  %v2143_v19 = vmul.f32 %v2142_v57, %v2113_v18  ;;  %v2181_v60 = vmul.f32 2.0, %v4023_v6 }
 0x3cc   : > { %v2152_v44 = vmul.f32 %v2151_v22, %v4020_v37  ;;  %v2158_v27 = vmul.f32 %v2157_v46, %v4020_v37  ;;  %v2187_v52 = vmul.f32 4.0, %v4020_v37  ;;  %v2161_v41 = vadd.f32 %v2160_v33, %v2781_v5 }
 0x3cd   : > { %v2680_v61 = vpop.eup %2679  ;;  %v2105_v28 = vadd.f32 %v2763_v1, %v2104_v35  ;;  %v2111_v12 = vadd.f32 %v2763_v1, %v2110_v39  ;;  %v2190_v57 = vmul.f32 4.0, %v4023_v6 }
 0x3ce   : > { %v2682_v11 = vpop.eup %2681  ;;  %v2115_v53 = vmul.f32 0.6931472, %v2680_v61  ;;  %v2153_v14 = vadd.f32 %v2763_v1, %v2152_v44  ;;  %v2159_v34 = vadd.f32 %v2763_v1, %v2158_v27 }
 0x3cf   : > { %v2684_v43 = vpop.eup %2683  ;;  %v2106_v23 = vmul.f32 %v2105_v28, %v2101_v10  ;;  %v2163_v13 = vmul.f32 0.6931472, %v2682_v11  ;;  %v2140_v42 = vmul.f32 %v2139_v9, %v2111_v12  ;;  %v2134_v28 = vmul.f32 %v2133_v47, %v2111_v12 }
 0x3d0   : > { %v2686_v15 = vpop.eup %2685  ;;  %v2117_v24 = vmul.f32 0.6931472, %v2684_v43  ;;  %v2154_v40 = vmul.f32 %v2153_v14, %v4020_v37  ;;  %v2121_v48 = vmul.f32 %v2115_v53, %v4007_v21  ;;  %v2188_v61 = vmul.f32 %v2187_v52, %v2159_v34 }
 0x3d1   : > { %v2688_v25 = vpop.eup %2687  ;;  %v2107_v26 = vadd.f32 %v2106_v23, %v2758_v0  ;;  %v2165_v58 = vmul.f32 0.6931472, %v2686_v15  ;;  %v2169_v50 = vmul.f32 %v2163_v13, %v4009_v63  ;;  %v2191_v14 = vmul.f32 %v2190_v57, %v2161_v41 }
 0x3d2   : > { %v2122_v54 = vmul.f32 %v2117_v24, %v2099_v20  ;;  %v2128_v55 = vsub.f32 %v2115_v53, %v2117_v24  ;;  %v2136_v17 = vmul.f32 2494.2, %v2688_v25  ;;  %v2155_v38 = vadd.f32 %v2154_v40, %v2758_v0  ;;  %v2690_v49 = vpop.eup %2689 }
 0x3d3   : > { %v2137_v16 = vmul.f32 2.0, %v2107_v26  ;;  %v2131_v32 = vmul.f32 %v2107_v26, %v2101_v10  ;;  %v2170_v36 = vmul.f32 %v2165_v58, %v2147_v51  ;;  %v2176_v39 = vsub.f32 %v2163_v13, %v2165_v58 }
 0x3d4   : > { %v2129_v59 = vmul.f32 2494.2, %v2128_v55  ;;  %v2123_v22 = vadd.f32 %v2122_v54, %v2121_v48  ;;  %v2184_v20 = vmul.f32 2494.2, %v2690_v49  ;;  %v2185_v44 = vmul.f32 2.0, %v2155_v38 }
 0x3d5   : > { %v2138_v35 = vsub.f32 %v2136_v17, %v2137_v16  ;;  %v2171_v46 = vadd.f32 %v2170_v36, %v2169_v50  ;;  %v2177_v11 = vmul.f32 2494.2, %v2176_v39  ;;  %v2179_v53 = vmul.f32 %v2155_v38, %v4020_v37 }
 0x3d6   : > { %v2130_v18 = vadd.f32 %v2778_v4, %v2129_v59  ;;  %v2168_v51 = vmul.f32 %v2778_v4, %v4009_v63  ;;  %v2186_v10 = vsub.f32 %v2184_v20, %v2185_v44  ;;  %v2124_v33 = vmul.f32 2494.2, %v2123_v22 }
 0x3d7   : > { %v2141_v27 = vsub.f32 %v2138_v35, %v2140_v42  ;;  %v2172_v43 = vmul.f32 2494.2, %v2171_v46  ;;  %v2178_v23 = vadd.f32 %v2778_v4, %v2177_v11  ;;  %v2182_v15 = vmul.f32 %v2181_v60, %v2159_v34 }
 0x3d8   : > { %v2132_v9 = vadd.f32 %v2131_v32, %v2130_v18  ;;  %v2189_v40 = vsub.f32 %v2186_v10, %v2188_v61  ;;  %v2126_v47 = vmul.f32 %v4018_v62, %v2107_v26  ;;  %v2193_v37 = vsub.f32 %v4009_v63, %v4007_v21 }
 0x3d9   : > { %v2144_v24 = vadd.f32 %v2143_v19, %v2141_v27  ;;  %v2180_v52 = vadd.f32 %v2179_v53, %v2178_v23  ;;  %v2125_v48 = vadd.f32 %v2124_v33, %v4044_v30  ;;  %v2173_v13 = vadd.f32 %v2172_v43, %v2168_v51 }
 0x3da   : > { %v2135_v25 = vsub.f32 %v2132_v9, %v2134_v28  ;;  %v2192_v12 = vadd.f32 %v2191_v14, %v2189_v40  ;;  %v2174_v58 = vmul.f32 %v4023_v6, %v2155_v38 }
 0x3db   : > { %v2183_v54 = vsub.f32 %v2180_v52, %v2182_v15  ;;  %v2127_v60 = vadd.f32 %v2126_v47, %v2125_v48  ;;  %v2218_v30 = vmul.f32 %v2193_v37, %v2144_v24 }
 0x3dc   : > { %v2201_v55 = vmul.f32 %v2192_v12, %v2144_v24  ;;  %v2175_v19 = vadd.f32 %v2174_v58, %v2173_v13  ;;  %v2196_v62 = vmul.f32 %v2193_v37, %v2135_v25  ;;  %v2212_v36 = vmul.f32 %v2193_v37, %v2192_v12 }
 0x3dd   : > { %v2195_v17 = vsub.f32 %v2183_v54, %v2135_v25  ;;  %v2198_v26 = vmul.f32 %v2193_v37, %v2183_v54 }
 0x3de   : > { %v2202_v16 = vmul.f32 %v2201_v55, %v2193_v37  ;;  %v2194_v50 = vsub.f32 %v2175_v19, %v2127_v60 }
 0x3df   : > { %v2200_v34 = vmul.f32 %v2195_v17, %v2195_v17 }
 0x3e0   : > { %v2203_v42 = vmul.f32 %v2202_v16, %v2193_v37  ;;  %v2197_v32 = vsub.f32 %v2194_v50, %v2196_v62  ;;  %v2199_v6 = vsub.f32 %v2198_v26, %v2194_v50 }
 0x3e2   : > { %v2204_v41 = vsub.f32 %v2200_v34, %v2203_v42  ;;  %v2211_v57 = vmul.f32 %v2199_v6, %v2195_v17  ;;  %v2213_v22 = vmul.f32 %v2212_v36, %v2197_v32  ;;  %v2219_v35 = vmul.f32 %v2218_v30, %v2199_v6 }
 0x3e3   : > { %v2220_v39 = vmul.f32 %v2197_v32, %v2195_v17 }
 0x3e4   : > { %v2205_v49 = vand.u32 2147483647, %v2204_v41  ;;  %vm2207_vm10 = vcmp.ge.f32.partialorder %v2204_v41, 0.0  ;;  %v2214_v20 = vsub.f32 %v2211_v57, %v2213_v22 }
 0x3e5   : > { %v2208_v59 = vsel %vm2207_vm10, 1e-12, %v2739_v29  ;;  %v2221_v18 = vsub.f32 %v2219_v35, %v2220_v39 }
 0x3e6   : > { %vm2206_vm11 = vcmp.lt.f32.partialorder %v2205_v49, 1e-12 }
 0x3e7   : > { %v2209_v38 = vsel %vm2206_vm11, %v2208_v59, %v2204_v41 }
 0x3e8   : > { %2691 = vrcp.f32 %v2209_v38 }
 0x3f2   : > { %v2692_v46 = vpop.eup %2691 }
 0x3f3   : > { %v2215_v44 = vmul.f32 %v2692_v46, %v2214_v20  ;;  %v2222_v61 = vmul.f32 %v2692_v46, %v2221_v18 }
 0x3f5   : > { %v2445_v28 = vclamps-f32 %v2215_v44, 0.05  ;;  %v2446_v27 = vclamps-f32 %v2222_v61, 0.05 }
 0x3f7   : > { %v2225_v11 = vadd.f32 %v2445_v28, %v4007_v21  ;;  %v2228_v53 = vadd.f32 %v2446_v27, %v4009_v63 }
 0x3f9   : > { %v2226_v9 = vmax.f32 %v2225_v11, 1e-07  ;;  %v2229_v51 = vmax.f32 %v2228_v53, 1e-07 }
 0x3fb   : > { %v2227_v10 = vmin.f32 %v2226_v9, 0.9999999  ;;  %v2230_v14 = vmin.f32 %v2229_v51, 0.9999999 }
 0x3fd   : > { %v2231_v33 = vsub.f32 %v2227_v10, %v4007_v21  ;;  %v2233_v43 = vsub.f32 %v2230_v14, %v4009_v63  ;;  %v2236_v23 = vsub.f32 %v2227_v10, %v3997_v31  ;;  %v2239_v15 = vsub.f32 %v2230_v14, %v4000_v45 }
 0x3ff   : > { %v2232_v24 = vand.u32 2147483647, %v2231_v33  ;;  %v2234_v40 = vand.u32 2147483647, %v2233_v43  ;;  %v2237_v25 = vmul.f32 %v2236_v23, %v4005_v56  ;;  %v2240_v52 = vmul.f32 %v2239_v15, %v4005_v56 }
 0x401   : > { %v2235_v47 = vmax.f32.f32 %v2232_v24, %v2234_v40  ;;  %v4082_v12 = vadd.f32 %v2237_v25, %v3997_v31  ;;  %v4085_v37 = vadd.f32 %v2240_v52, %v4000_v45 }
 0x403   : > { %vm2242_vm12 = vcmp.lt.f32.partialorder %v2235_v47, 1e-06  ;;  %v2244_v21 = vmax.f32 %v4082_v12, 1e-07  ;;  %v2292_v63 = vmax.f32 %v4085_v37, 1e-07 }
 0x404   : > { %v4090_v48 = vsel %vm2242_vm12, 0.0, %v4005_v56 }
 0x405   : > { %v4092_v13 = vmin.f32 %v2244_v21, 0.9999999  ;;  %v4094_v58 = vmin.f32 %v2292_v63, 0.9999999 }
 0x407   : > { %v2246_v54 = vsub.f32 1.0, %v4092_v13  ;;  %v2247_v31 = vmul.f32 2.0, %v4092_v13  ;;  %2693 = vlog2.f32 %v4092_v13  ;;  %v2294_v45 = vsub.f32 1.0, %v4094_v58 }
 0x408   : > { %v2295_v55 = vmul.f32 2.0, %v4094_v58  ;;  %2695 = vlog2.f32 %v4094_v58  ;;  %v4129_v35 = vmul.f32 %v2778_v4, %v4092_v13 }
 0x409   : > { %v2248_v17 = vsub.f32 1.0, %v2247_v31  ;;  %2697 = vlog2.f32 %v2246_v54  ;;  %v4103_v56 = vmul.f32 %v2246_v54, %v4092_v13  ;;  %v4108_v60 = vmul.f32 %v2294_v45, %v4094_v58 }
 0x40a   : > { %v4105_v16 = vsub.f32 1.0, %v2295_v55  ;;  %2699 = vlog2.f32 %v2294_v45 }
 0x40b   : > { %v2249_v19 = vmul.f32 %v2773_v3, %v2248_v17  ;;  %v2255_v34 = vmul.f32 %v2248_v17, %v2787_v7  ;;  %v2259_v42 = vmul.f32 %v2248_v17, %v2790_v8  ;;  %2701 = vrcp.f32 %v4103_v56 }
 0x40c   : > { %v2297_v41 = vmul.f32 %v2773_v3, %v4105_v16  ;;  %v2303_v26 = vmul.f32 %v4105_v16, %v2787_v7  ;;  %v2289_v49 = vmul.f32 4.0, %v4103_v56  ;;  %2703 = vrcp.f32 %v4108_v60 }
 0x40d   : > { %v2250_v50 = vadd.f32 %v2768_v2, %v2249_v19  ;;  %v2256_v62 = vadd.f32 %v2255_v34, %v2781_v5  ;;  %v2260_v6 = vadd.f32 %v2259_v42, %v2781_v5  ;;  %v2280_v39 = vmul.f32 2.0, %v4103_v56 }
 0x40e   : > { %v2298_v59 = vadd.f32 %v2768_v2, %v2297_v41  ;;  %v2304_v38 = vadd.f32 %v2303_v26, %v2781_v5  ;;  %v2286_v44 = vmul.f32 4.0, %v2248_v17  ;;  %v2307_v28 = vmul.f32 %v4105_v16, %v2790_v8 }
 0x40f   : > { %v2251_v30 = vmul.f32 %v2250_v50, %v2248_v17  ;;  %v2257_v32 = vmul.f32 %v2256_v62, %v2248_v17  ;;  %v2290_v9 = vmul.f32 %v2289_v49, %v2260_v6  ;;  %v2328_v51 = vmul.f32 2.0, %v4108_v60 }
 0x410   : > { %v2299_v36 = vmul.f32 %v2298_v59, %v4105_v16  ;;  %v2305_v20 = vmul.f32 %v2304_v38, %v4105_v16  ;;  %v2334_v23 = vmul.f32 4.0, %v4105_v16  ;;  %v2308_v34 = vadd.f32 %v2307_v28, %v2781_v5 }
 0x411   : > { %v2694_v57 = vpop.eup %2693  ;;  %v2252_v22 = vadd.f32 %v2763_v1, %v2251_v30  ;;  %v2258_v53 = vadd.f32 %v2763_v1, %v2257_v32  ;;  %v2337_v49 = vmul.f32 4.0, %v4108_v60 }
 0x412   : > { %v2696_v18 = vpop.eup %2695  ;;  %v2262_v46 = vmul.f32 0.6931472, %v2694_v57  ;;  %v2300_v61 = vadd.f32 %v2763_v1, %v2299_v36  ;;  %v2306_v43 = vadd.f32 %v2763_v1, %v2305_v20 }
 0x413   : > { %v2698_v27 = vpop.eup %2697  ;;  %v2253_v11 = vmul.f32 %v2252_v22, %v2248_v17  ;;  %v2310_v25 = vmul.f32 0.6931472, %v2696_v18  ;;  %v2287_v19 = vmul.f32 %v2286_v44, %v2258_v53  ;;  %v2281_v22 = vmul.f32 %v2280_v39, %v2258_v53 }
 0x414   : > { %v2700_v10 = vpop.eup %2699  ;;  %v2264_v14 = vmul.f32 0.6931472, %v2698_v27  ;;  %v2301_v33 = vmul.f32 %v2300_v61, %v4105_v16  ;;  %v2268_v40 = vmul.f32 %v2262_v46, %v4092_v13  ;;  %v2335_v57 = vmul.f32 %v2334_v23, %v2306_v43 }
 0x415   : > { %v2702_v15 = vpop.eup %2701  ;;  %v2254_v24 = vadd.f32 %v2253_v11, %v2758_v0  ;;  %v2312_v52 = vmul.f32 0.6931472, %v2700_v10  ;;  %v2316_v42 = vmul.f32 %v2310_v25, %v4094_v58  ;;  %v2338_v61 = vmul.f32 %v2337_v49, %v2308_v34 }
 0x416   : > { %v2269_v47 = vmul.f32 %v2264_v14, %v2246_v54  ;;  %v2275_v21 = vsub.f32 %v2262_v46, %v2264_v14  ;;  %v2283_v63 = vmul.f32 2494.2, %v2702_v15  ;;  %v2302_v31 = vadd.f32 %v2301_v33, %v2758_v0  ;;  %v2704_v41 = vpop.eup %2703 }
 0x417   : > { %v2284_v55 = vmul.f32 2.0, %v2254_v24  ;;  %v2278_v62 = vmul.f32 %v2254_v24, %v2248_v17  ;;  %v2317_v26 = vmul.f32 %v2312_v52, %v2294_v45  ;;  %v2323_v32 = vsub.f32 %v2310_v25, %v2312_v52 }
 0x418   : > { %v2276_v50 = vmul.f32 2494.2, %v2275_v21  ;;  %v2270_v59 = vadd.f32 %v2269_v47, %v2268_v40  ;;  %v2331_v54 = vmul.f32 2494.2, %v2704_v41  ;;  %v2332_v36 = vmul.f32 2.0, %v2302_v31 }
 0x419   : > { %v2285_v30 = vsub.f32 %v2283_v63, %v2284_v55  ;;  %v2318_v38 = vadd.f32 %v2317_v26, %v2316_v42  ;;  %v2324_v18 = vmul.f32 2494.2, %v2323_v32  ;;  %v2326_v46 = vmul.f32 %v2302_v31, %v4105_v16 }
 0x41a   : > { %v2277_v6 = vadd.f32 %v2778_v4, %v2276_v50  ;;  %v2315_v45 = vmul.f32 %v2778_v4, %v4094_v58  ;;  %v2333_v17 = vsub.f32 %v2331_v54, %v2332_v36  ;;  %v2271_v28 = vmul.f32 2494.2, %v2270_v59 }
 0x41b   : > { %v2288_v20 = vsub.f32 %v2285_v30, %v2287_v19  ;;  %v2319_v27 = vmul.f32 2494.2, %v2318_v38  ;;  %v2325_v11 = vadd.f32 %v2778_v4, %v2324_v18  ;;  %v2329_v10 = vmul.f32 %v2328_v51, %v2306_v43 }
 0x41c   : > { %v2279_v44 = vadd.f32 %v2278_v62, %v2277_v6  ;;  %v2336_v33 = vsub.f32 %v2333_v17, %v2335_v57  ;;  %v2273_v39 = vmul.f32 %v4103_v56, %v2254_v24  ;;  %v2340_v16 = vsub.f32 %v4094_v58, %v4092_v13 }
 0x41d   : > { %v2291_v14 = vadd.f32 %v2290_v9, %v2288_v20  ;;  %v2327_v23 = vadd.f32 %v2326_v46, %v2325_v11  ;;  %v2272_v40 = vadd.f32 %v2271_v28, %v4129_v35  ;;  %v2320_v25 = vadd.f32 %v2319_v27, %v2315_v45 }
 0x41e   : > { %v2282_v15 = vsub.f32 %v2279_v44, %v2281_v22  ;;  %v2339_v53 = vadd.f32 %v2338_v61, %v2336_v33  ;;  %v2321_v52 = vmul.f32 %v4108_v60, %v2302_v31 }
 0x41f   : > { %v2330_v47 = vsub.f32 %v2327_v23, %v2329_v10  ;;  %v2274_v51 = vadd.f32 %v2273_v39, %v2272_v40  ;;  %v2365_v35 = vmul.f32 %v2340_v16, %v2291_v14 }
 0x420   : > { %v2348_v21 = vmul.f32 %v2339_v53, %v2291_v14  ;;  %v2322_v9 = vadd.f32 %v2321_v52, %v2320_v25  ;;  %v2343_v56 = vmul.f32 %v2340_v16, %v2282_v15  ;;  %v2359_v26 = vmul.f32 %v2340_v16, %v2339_v53 }
 0x421   : > { %v2342_v63 = vsub.f32 %v2330_v47, %v2282_v15  ;;  %v2345_v24 = vmul.f32 %v2340_v16, %v2330_v47 }
 0x422   : > { %v2349_v55 = vmul.f32 %v2348_v21, %v2340_v16  ;;  %v2341_v42 = vsub.f32 %v2322_v9, %v2274_v51 }
 0x423   : > { %v2347_v43 = vmul.f32 %v2342_v63, %v2342_v63 }
 0x424   : > { %v2350_v19 = vmul.f32 %v2349_v55, %v2340_v16  ;;  %v2344_v62 = vsub.f32 %v2341_v42, %v2343_v56  ;;  %v2346_v60 = vsub.f32 %v2345_v24, %v2341_v42 }
 0x426   : > { %v2351_v34 = vsub.f32 %v2347_v43, %v2350_v19  ;;  %v2358_v49 = vmul.f32 %v2346_v60, %v2342_v63  ;;  %v2360_v59 = vmul.f32 %v2359_v26, %v2344_v62  ;;  %v2366_v30 = vmul.f32 %v2365_v35, %v2346_v60 }
 0x427   : > { %v2367_v32 = vmul.f32 %v2344_v62, %v2342_v63 }
 0x428   : > { %v2352_v41 = vand.u32 2147483647, %v2351_v34  ;;  %vm2354_vm13 = vcmp.ge.f32.partialorder %v2351_v34, 0.0  ;;  %v2361_v54 = vsub.f32 %v2358_v49, %v2360_v59 }
 0x429   : > { %v2355_v50 = vsel %vm2354_vm13, 1e-12, %v2739_v29  ;;  %v2368_v6 = vsub.f32 %v2366_v30, %v2367_v32 }
 0x42a   : > { %vm2353_vm14 = vcmp.lt.f32.partialorder %v2352_v41, 1e-12 }
 0x42b   : > { %v2356_v31 = vsel %vm2353_vm14, %v2355_v50, %v2351_v34 }
 0x42c   : > { %2705 = vrcp.f32 %v2356_v31 }
 0x436   : > { %v2706_v38 = vpop.eup %2705 }
 0x437   : > { %v2362_v36 = vmul.f32 %v2706_v38, %v2361_v54  ;;  %v2369_v57 = vmul.f32 %v2706_v38, %v2368_v6 }
 0x439   : > { %v2447_v22 = vclamps-f32 %v2362_v36, 0.05  ;;  %v2448_v20 = vclamps-f32 %v2369_v57, 0.05 }
 0x43b   : > { %v2372_v29 = vadd.f32 %v2447_v22, %v4092_v13  ;;  %v2375_v18 = vadd.f32 %v2448_v20, %v4094_v58 }
 0x43d   : > { %v2373_v46 = vmax.f32 %v2372_v29, 1e-07  ;;  %v2376_v44 = vmax.f32 %v2375_v18, 1e-07 }
 0x43f   : > { %v2374_v45 = vmin.f32 %v2373_v46, 0.9999999  ;;  %v2377_v17 = vmin.f32 %v2376_v44, 0.9999999 }
 0x441   : > { %v2378_v61 = vsub.f32 %v2374_v45, %v4092_v13  ;;  %v2380_v28 = vsub.f32 %v2377_v17, %v4094_v58  ;;  %v2383_v27 = vsub.f32 %v2374_v45, %v4082_v12  ;;  %v2386_v11 = vsub.f32 %v2377_v17, %v4085_v37 }
 0x442   :  { %34 = sbr.rel (!%p32_p0) target bundleno = 7 (0x7), region = 41 }
 0x443   : > { %v2379_v10 = vand.u32 2147483647, %v2378_v61  ;;  %v2381_v14 = vand.u32 2147483647, %v2380_v28  ;;  %v2384_v33 = vmul.f32 %v2383_v27, %v4090_v48  ;;  %v2387_v15 = vmul.f32 %v2386_v11, %v4090_v48 }
 0x445   : > { %v2382_v23 = vmax.f32.f32 %v2379_v10, %v2381_v14  ;;  %v2385_v39 = vadd.f32 %v2384_v33, %v4082_v12   ;;  %v2388_v53 = vadd.f32 %v2387_v15, %v4085_v37  }
 0x447   : > { %vm2389_vm15 = vcmp.lt.f32.partialorder %v2382_v23, 1e-06  ;;  %v4187_v13 = vmov %v2388_v53  ;;  %v4188_v12 = vmov %v2385_v39  ;;  %2391 = vst [vmem:[%s4186_s2] sm:$0xff] (%p32_p0), %v2385_v39  ;;  %2449 = vst [vmem:[%s4186_s2 + $0x8] sm:$0xff] (%p32_p0), %v2388_v53 }
 0x448   : > { %v2390_v14 = vsel %vm2389_vm15, 0.0, %v4090_v48  }

</bundles_post_ra>
